<compile_context>
chip_gen: v6e
topology: v6e:2x2x1
jax: 0.10.0
libtpu: 0.0.40
codegen_flags: <defaults>
</compile_context>

<pallas_src>
import functools
import math

import numpy as np
import jax
import jax.numpy as jnp
from jax.experimental import pallas as pl
from jax.experimental.pallas import tpu as pltpu

# ------------------------- small, forward-consistent config -------------------------
IMG_SIZE = 16
PATCH_SIZE = 8
IN_CHANS = 3
EMBED_DIM = 32
DEPTH = 2
NUM_HEADS = 4
DEC_EMBED_DIM = 16
DEC_DEPTH = 1
DEC_NUM_HEADS = 4
MLP_RATIO = 4.0
PRED_DIM = 16
BATCH = 2
MASK_RATIO_MAE = 0.75
MASK_RATIO_JIGSAW = 0.0
W_MAE, W_JIGSAW, W_SIAM = 1.0, 0.05, 1.0
TEMPERATURE = 0.1
NUM_PATCHES = (IMG_SIZE // PATCH_SIZE) ** 2
SEQ = NUM_PATCHES + 1
LN_EPS = 1e-5
BN_EPS = 1e-5
NEG_INF = -1e9


def _vmem_spec():
    # whole array resident in VMEM, no grid machinery
    return pl.BlockSpec(memory_space=pltpu.MemorySpace.VMEM)


# =============================== in-kernel helpers ===============================
def _ln(v, g, b, eps):
    mu = jnp.mean(v, axis=-1, keepdims=True)
    vc = v - mu
    var = jnp.mean(vc * vc, axis=-1, keepdims=True)
    return vc * jax.lax.rsqrt(var + eps) * g + b


def _erf(x):
    # TODO(synk): erf via Abramowitz-Stegun 7.1.26 polynomial (|err| <= 1.5e-7 == f32 noise)
    # instead of lax.erf (no guaranteed Mosaic lowering); keeps exact-GELU semantics.
    p = 0.3275911
    a1, a2, a3, a4, a5 = 0.254829592, -0.284496736, 1.421413741, -1.453152027, 1.061405429
    ax = jnp.abs(x)
    t = 1.0 / (1.0 + p * ax)
    poly = ((((a5 * t + a4) * t + a3) * t + a2) * t + a1) * t
    y = 1.0 - poly * jnp.exp(-ax * ax)
    return jnp.where(x < 0.0, -y, y)


def _gelu_erf(x):
    return 0.5 * x * (1.0 + _erf(x * 0.7071067811865476))


# =============================== transformer tower kernel ===============================
def _tower_kernel(x_ref, bias_ref,
                  ln1w_ref, ln1b_ref,
                  qw_ref, qb_ref, kw_ref, kb_ref, vw_ref, vb_ref,
                  pw_ref, pb_ref,
                  ln2w_ref, ln2b_ref,
                  fc1w_ref, fc1b_ref, fc2w_ref, fc2b_ref,
                  fnw_ref, fnb_ref, hw_ref, hb_ref,
                  out_ref,
                  *, depth, num_heads, head_dim, eps, emit_x):
    """One chunk of sequences, batch folded onto the sublane axis.

    x_ref:    (M, D) rows of (batch * seq) tokens.
    bias_ref: (M, M) additive attention bias (block-diagonal batch separation + key padding),
              built once in the wrapper and loaded once here (no per-head broadcasts).
    Per-block weights are stacked over depth and pre-split per attention head so the kernel
    never slices activations on the lane axis nor concatenates head outputs.
    out_ref:  (M, D + Dout) packed [norm(x) | head(norm(x))] if emit_x else (M, Dout).
    """
    x = x_ref[...]
    bias = bias_ref[...]
    scale = float(head_dim) ** -0.5

    for d in range(depth):
        # ---------------- attention sub-block ----------------
        h = _ln(x, ln1w_ref[d], ln1b_ref[d], eps)
        acc = None
        for hh in range(num_heads):
            q = jnp.dot(h, qw_ref[d, hh], preferred_element_type=jnp.float32) + qb_ref[d, hh]
            k = jnp.dot(h, kw_ref[d, hh], preferred_element_type=jnp.float32) + kb_ref[d, hh]
            v = jnp.dot(h, vw_ref[d, hh], preferred_element_type=jnp.float32) + vb_ref[d, hh]
            s = jax.lax.dot_general(q, k, (((1,), (1,)), ((), ())),
                                    preferred_element_type=jnp.float32) * scale + bias
            s = s - jnp.max(s, axis=-1, keepdims=True)
            p = jnp.exp(s)
            p = p * pl.reciprocal(jnp.sum(p, axis=-1, keepdims=True), approx=True)
            o = jnp.dot(p, v, preferred_element_type=jnp.float32)
            # head-concat folded into the output projection: proj(cat(o_h)) == sum_h o_h @ P_h
            contrib = jnp.dot(o, pw_ref[d, hh], preferred_element_type=jnp.float32)
            acc = contrib if acc is None else acc + contrib
        x = x + acc + pb_ref[d]

        # ---------------- MLP sub-block (erf-GELU fused) ----------------
        h2 = _ln(x, ln2w_ref[d], ln2b_ref[d], eps)
        h2 = jnp.dot(h2, fc1w_ref[d], preferred_element_type=jnp.float32) + fc1b_ref[d]
        h2 = _gelu_erf(h2)
        h2 = jnp.dot(h2, fc2w_ref[d], preferred_element_type=jnp.float32) + fc2b_ref[d]
        x = x + h2

    x = _ln(x, fnw_ref[...], fnb_ref[...], eps)
    head = jnp.dot(x, hw_ref[...], preferred_element_type=jnp.float32) + hb_ref[...]
    if emit_x:
        dm = x.shape[-1]
        out_ref[:, :dm] = x
        out_ref[:, dm:] = head
    else:
        out_ref[...] = head


def pallas_tower(x_chunks, bias_chunks, blocks, fn_w, fn_b, head_w, head_b,
                 *, depth, num_heads, emit_x):
    """x_chunks: (G, M, D) row-slabs (G grid steps, M = batch*seq rows).
    bias_chunks: (G, M, M) additive attention bias per chunk.
    Returns (G, M, D + Dout) packed [x | head(x)] if emit_x, else (G, M, Dout)."""
    G, M, D = x_chunks.shape
    Dout = head_w.shape[1]
    W = D + Dout if emit_x else Dout

    def chunk_spec(width):
        return pl.BlockSpec((None, M, width), lambda g: (g, 0, 0))

    def rep_spec(a):
        return pl.BlockSpec(a.shape, lambda g, _nd=a.ndim: (0,) * _nd)

    operands = (
        x_chunks, bias_chunks,
        blocks["ln1_w"], blocks["ln1_b"],
        blocks["q_w"], blocks["q_b"], blocks["k_w"], blocks["k_b"],
        blocks["v_w"], blocks["v_b"],
        blocks["p_w"], blocks["p_b"],
        blocks["ln2_w"], blocks["ln2_b"],
        blocks["fc1_w"], blocks["fc1_b"], blocks["fc2_w"], blocks["fc2_b"],
        fn_w, fn_b, head_w, head_b,
    )
    in_specs = [chunk_spec(D), pl.BlockSpec((None, M, M), lambda g: (g, 0, 0))]
    in_specs += [rep_spec(a) for a in operands[2:]]

    kernel = functools.partial(_tower_kernel, depth=depth, num_heads=num_heads,
                               head_dim=D // num_heads, eps=LN_EPS, emit_x=emit_x)
    return pl.pallas_call(
        kernel,
        grid=(G,),
        in_specs=in_specs,
        out_specs=chunk_spec(W),
        out_shape=jax.ShapeDtypeStruct((G, M, W), jnp.float32),
        compiler_params=pltpu.CompilerParams(
            dimension_semantics=("parallel",)),   # v7x: one fat chunk per TensorCore
    )(*operands)


# =============================== patch-embed kernel ===============================
def _dense_kernel(x_ref, w_ref, b_ref, o_ref):
    o_ref[...] = (jnp.dot(x_ref[...], w_ref[...], preferred_element_type=jnp.float32)
                  + b_ref[...])


def pallas_dense(x2, w, b):
    M = x2.shape[0]
    N = w.shape[1]
    return pl.pallas_call(
        _dense_kernel,
        out_shape=jax.ShapeDtypeStruct((M, N), jnp.float32),
        in_specs=[_vmem_spec()] * 3,
        out_specs=_vmem_spec(),
    )(x2, w, b)


# =============================== fused epilogue kernel ===============================
def _epilogue_kernel(jx_ref, jlbl_ref, cls1_ref, cls2_ref, pred_ref, tgt_ref, msk_ref,
                     jw1_ref, jb1_ref, jw2_ref, jb2_ref, jw3_ref, jb3_ref,
                     sw1_ref, sw2_ref, sb2_ref,
                     loss_ref,
                     *, bn_eps, inv_temp, w_mae, w_jig, w_siam):
    """Jigsaw MLP + CE, siamese predictor + contrastive CE, masked-MSE recon loss.
    Output: (1, 4) = [total, w*recon, w*jigsaw, w*siam]."""
    # ---- jigsaw head (3-layer MLP) + cross-entropy (one-hot labels via iota) ----
    h = jnp.dot(jx_ref[...], jw1_ref[...], preferred_element_type=jnp.float32) + jb1_ref[...]
    h = jnp.maximum(h, 0.0)
    h = jnp.dot(h, jw2_ref[...], preferred_element_type=jnp.float32) + jb2_ref[...]
    h = jnp.maximum(h, 0.0)
    jl = jnp.dot(h, jw3_ref[...], preferred_element_type=jnp.float32) + jb3_ref[...]  # (Nj, L)
    nj = jl.shape[0]
    m = jnp.max(jl, axis=-1, keepdims=True)
    lse = m + jnp.log(jnp.sum(jnp.exp(jl - m), axis=-1, keepdims=True))
    onehot = (jax.lax.broadcasted_iota(jnp.int32, jl.shape, 1)
              == jlbl_ref[...]).astype(jnp.float32)
    picked = jnp.sum(jl * onehot, axis=-1, keepdims=True)
    ce_jig = jnp.sum(lse - picked, axis=0, keepdims=True) * (1.0 / nj)          # (1,1)

    # ---- siamese predictor + contrastive CE (labels = arange(B) -> diagonal) ----
    # TODO(synk): BatchNorm1d uses training-mode batch statistics (affine=1/0), per branch.
    def branch(c):
        t = jnp.dot(c, sw1_ref[...], preferred_element_type=jnp.float32)
        mu = jnp.mean(t, axis=0, keepdims=True)
        dc = t - mu
        var = jnp.mean(dc * dc, axis=0, keepdims=True)
        t = jnp.maximum(dc * jax.lax.rsqrt(var + bn_eps), 0.0)
        t = jnp.dot(t, sw2_ref[...], preferred_element_type=jnp.float32) + sb2_ref[...]
        n = jnp.sqrt(jnp.sum(t * t, axis=-1, keepdims=True))
        return t / jnp.maximum(n, 1e-12)

    z1 = branch(cls1_ref[...])
    z2 = branch(cls2_ref[...])
    logits = jax.lax.dot_general(z1, z2, (((1,), (1,)), ((), ())),
                                 preferred_element_type=jnp.float32) * inv_temp  # (B, B)
    nb = logits.shape[0]
    m2 = jnp.max(logits, axis=-1, keepdims=True)
    lse2 = m2 + jnp.log(jnp.sum(jnp.exp(logits - m2), axis=-1, keepdims=True))
    diag = (jax.lax.broadcasted_iota(jnp.int32, logits.shape, 0)
            == jax.lax.broadcasted_iota(jnp.int32, logits.shape, 1)).astype(jnp.float32)
    picked2 = jnp.sum(logits * diag, axis=-1, keepdims=True)
    ce_siam = jnp.sum(lse2 - picked2, axis=0, keepdims=True) * (1.0 / nb)        # (1,1)

    # ---- masked-MSE reconstruction loss (norm_pix_loss = False) ----
    d = pred_ref[...] - tgt_ref[...]
    mse = jnp.mean(d * d, axis=-1, keepdims=True)                                # (M,1)
    msk = msk_ref[...]
    num = jnp.sum(mse * msk, axis=0, keepdims=True)
    den = jnp.sum(msk, axis=0, keepdims=True)
    recon = num / den                                                            # (1,1)

    l_rec = w_mae * recon
    l_jig = w_jig * ce_jig
    l_siam = w_siam * ce_siam
    total = l_rec + l_jig + l_siam
    lane = jax.lax.broadcasted_iota(jnp.int32, (1, 4), 1)
    loss_ref[...] = jnp.where(lane == 0, total,
                    jnp.where(lane == 1, l_rec,
                    jnp.where(lane == 2, l_jig, l_siam)))


def pallas_epilogue(jig_x, jig_lbl, cls1, cls2, pred2, target2, mask2, params):
    kernel = functools.partial(_epilogue_kernel, bn_eps=BN_EPS, inv_temp=1.0 / TEMPERATURE,
                               w_mae=W_MAE, w_jig=W_JIGSAW, w_siam=W_SIAM)
    return pl.pallas_call(
        kernel,
        out_shape=jax.ShapeDtypeStruct((1, 4), jnp.float32),
        in_specs=[_vmem_spec()] * 16,
        out_specs=_vmem_spec(),
    )(jig_x, jig_lbl, cls1, cls2, pred2, target2, mask2,
      params["jig_w1"], params["jig_b1"], params["jig_w2"], params["jig_b2"],
      params["jig_w3"], params["jig_b3"],
      params["siam_w1"], params["siam_w2"], params["siam_b2"])


# =============================== model glue (plain JAX) ===============================
def img_to_patches_conv_order(imgs, p):
    """Conv2d-flattening order (c, ph, pw): equivalent to PatchEmbed conv+flatten."""
    N, C, H, W = imgs.shape
    h, w = H // p, W // p
    x = imgs.reshape(N, C, h, p, w, p)
    x = jnp.transpose(x, (0, 2, 4, 1, 3, 5))  # N,h,w,C,p,p
    return x.reshape(N, h * w, C * p * p)


def patchify(imgs, p):
    """MAE patchify: 'nchpwq->nhwpqc'."""
    N, C, H, W = imgs.shape
    h, w = H // p, W // p
    x = imgs.reshape(N, C, h, p, w, p)
    x = jnp.transpose(x, (0, 2, 4, 3, 5, 1))  # N,h,w,p,q,c
    return x.reshape(N, h * w, p * p * C)


def get_2d_sincos_pos_embed(embed_dim, grid_size, cls_token=False):
    def _1d(dim, pos):
        omega = np.arange(dim // 2, dtype=np.float64) / (dim / 2.0)
        omega = 1.0 / 10000.0 ** omega
        pos = pos.reshape(-1)
        out = np.einsum("m,d->md", pos, omega)
        return np.concatenate([np.sin(out), np.cos(out)], axis=1)

    grid_h = np.arange(grid_size, dtype=np.float64)
    grid_w = np.arange(grid_size, dtype=np.float64)
    grid = np.meshgrid(grid_w, grid_h)
    grid = np.stack(grid, axis=0).reshape(2, 1, grid_size, grid_size)
    emb = np.concatenate([_1d(embed_dim // 2, grid[0]),
                          _1d(embed_dim // 2, grid[1])], axis=1)
    if cls_token:
        emb = np.concatenate([np.zeros((1, embed_dim)), emb], axis=0)
    return emb.astype(np.float32)


def random_masking(x, mask_ratio, key):
    # TODO(synk): argsort/gather token shuffling has no clean Pallas equivalent; plain JAX.
    N, L, D = x.shape
    len_keep = int(round(L * (1.0 - mask_ratio)))
    noise = jax.random.uniform(key, (N, L))
    ids_shuffle = jnp.argsort(noise, axis=1)
    ids_restore = jnp.argsort(ids_shuffle, axis=1)
    ids_keep = ids_shuffle[:, :len_keep]
    x_masked = jnp.take_along_axis(x, ids_keep[:, :, None], axis=1)
    mask = jnp.ones((N, L), jnp.float32).at[:, :len_keep].set(0.0)
    mask = jnp.take_along_axis(mask, ids_restore, axis=1)
    return x_masked, mask, ids_restore, ids_keep


def make_block_bias(nseq, seqlen, s_valid):
    """Static (nseq*seqlen, nseq*seqlen) additive bias: 0 where query/key share a sequence
    AND the key position is a valid (non-padded) token, else -1e9."""
    n = nseq * seqlen
    idx = np.arange(n)
    blk = idx // seqlen
    pos = idx % seqlen
    ok = (blk[:, None] == blk[None, :]) & (pos[None, :] < s_valid)
    return jnp.asarray(np.where(ok, 0.0, NEG_INF).astype(np.float32))


def pad_seq(seq, s_full):
    B, s, D = seq.shape
    if s < s_full:
        seq = jnp.concatenate([seq, jnp.zeros((B, s_full - s, D), jnp.float32)], axis=1)
    return seq


# =============================== forward pass ===============================
def forward(params, img1, key_mask1, key_mask2):
    """img2 is None (single-view path): both branches consume img1."""
    B = img1.shape[0]
    L = NUM_PATCHES
    D = EMBED_DIM
    S = SEQ

    # Shared patch embedding (computed once for both branches).   [launch 1]
    patches = img_to_patches_conv_order(img1, PATCH_SIZE)
    tokens = pallas_dense(patches.reshape(B * L, -1),
                          params["patch_w"], params["patch_b"]).reshape(B, L, D)

    # --- MAE branch tokens (with pos embed, mask_ratio_mae), padded to S ---
    x_mae = tokens + params["pos_embed"][:, 1:, :]
    x_mae, mask, ids_restore, _ = random_masking(x_mae, MASK_RATIO_MAE, key_mask1)
    s_mae = 1 + x_mae.shape[1]
    cls_mae = jnp.broadcast_to(params["cls_token"] + params["pos_embed"][:, :1, :], (B, 1, D))
    seq_mae = pad_seq(jnp.concatenate([cls_mae, x_mae], axis=1), S)

    # --- Jigsaw branch tokens (no pos embed, mask_ratio_jigsaw == 0 -> full permutation) ---
    x_jig, _, _, ids_keep2 = random_masking(tokens, MASK_RATIO_JIGSAW, key_mask2)
    len_keep_jig = x_jig.shape[1]
    s_jig = 1 + len_keep_jig
    cls_jig = jnp.broadcast_to(params["cls_token"], (B, 1, D))
    seq_jig = pad_seq(jnp.concatenate([cls_jig, x_jig], axis=1), S)

    # --- Fused dual-branch encoder: grid=(2,) {MAE chunk, Jigsaw chunk}, rows = B*S ---
    # [launch 2]
    x_chunks = jnp.stack([seq_mae.reshape(B * S, D), seq_jig.reshape(B * S, D)], axis=0)
    bias_chunks = jnp.stack([make_block_bias(B, S, s_mae),
                             make_block_bias(B, S, s_jig)], axis=0)
    enc_out = pallas_tower(x_chunks, bias_chunks, params["enc_blocks"],
                           params["norm_w"], params["norm_b"],
                           params["dec_embed_w"], params["dec_embed_b"],
                           depth=DEPTH, num_heads=NUM_HEADS, emit_x=True)
    enc_out = enc_out.reshape(2, B, S, D + DEC_EMBED_DIM)
    latent_mae = enc_out[0, :, :, :D]            # (B, S, D); valid rows: :s_mae
    dec_x = enc_out[0, :, :s_mae, D:]            # decoder_embed(latent), (B, s_mae, 16)
    latent_jig = enc_out[1, :, :s_jig, :D]       # (B, s_jig, D)
    cls1 = latent_mae[:, 0, :]
    cls2 = latent_jig[:, 0, :]

    # --- Decoder: un-shuffle (JAX gather), then ONE fused tower call (head only) ---
    # [launch 3]
    mask_tokens = jnp.broadcast_to(params["mask_token"],
                                   (B,) + params["mask_token"].shape[1:])
    x_ = jnp.concatenate([dec_x[:, 1:, :], mask_tokens], axis=1)
    x_ = jnp.take_along_axis(x_, ids_restore[:, :, None], axis=1)
    dec_seq = jnp.concatenate([dec_x[:, :1, :], x_], axis=1) + params["dec_pos_embed"]
    dec_chunks = dec_seq.reshape(1, B * S, DEC_EMBED_DIM)
    dec_bias = make_block_bias(B, S, S)[None]
    pred_full = pallas_tower(dec_chunks, dec_bias, params["dec_blocks"],
                             params["dec_norm_w"], params["dec_norm_b"],
                             params["dec_pred_w"], params["dec_pred_b"],
                             depth=DEC_DEPTH, num_heads=DEC_NUM_HEADS, emit_x=False)
    pred_recon = pred_full.reshape(B, S, -1)[:, 1:, :]

    # --- Fused epilogue: jigsaw MLP+CE, siamese predictor+CE, masked-MSE recon loss ---
    # [launch 4]
    target = patchify(img1, PATCH_SIZE)
    jig_x = latent_jig[:, 1:, :].reshape(B * len_keep_jig, D)
    jig_lbl = ids_keep2.reshape(-1, 1).astype(jnp.int32)
    loss_vec = pallas_epilogue(
        jig_x, jig_lbl, cls1, cls2,
        pred_recon.reshape(B * L, -1), target.reshape(B * L, -1),
        mask.reshape(B * L, 1), params)

    loss = loss_vec[0, 0]
    losses = {"recon": loss_vec[0, 1], "jigsaw": loss_vec[0, 2], "siam": loss_vec[0, 3]}
    return loss, pred_recon, mask, losses


# =============================== parameter init ===============================
def xavier(key, shape):
    fan_in, fan_out = shape[0], shape[1]
    bound = math.sqrt(6.0 / (fan_in + fan_out))
    return jax.random.uniform(key, shape, jnp.float32, -bound, bound)


def init_block_params(key, dim, num_heads, mlp_ratio):
    """Block params with q/k/v/proj weights pre-split per attention head so the kernel
    never slices activations on the lane axis."""
    ks = jax.random.split(key, 4)
    hidden = int(dim * mlp_ratio)
    dh = dim // num_heads
    qkv_w = xavier(ks[0], (dim, 3 * dim))
    proj_w = xavier(ks[1], (dim, dim))
    fc1_w = xavier(ks[2], (dim, hidden))
    fc2_w = xavier(ks[3], (hidden, dim))

    def split_cols(wpart):  # (dim, dim) -> (H, dim, dh)
        return jnp.transpose(wpart.reshape(dim, num_heads, dh), (1, 0, 2))

    return dict(
        ln1_w=jnp.ones((1, dim), jnp.float32), ln1_b=jnp.zeros((1, dim), jnp.float32),
        q_w=split_cols(qkv_w[:, :dim]), q_b=jnp.zeros((num_heads, 1, dh), jnp.float32),
        k_w=split_cols(qkv_w[:, dim:2 * dim]), k_b=jnp.zeros((num_heads, 1, dh), jnp.float32),
        v_w=split_cols(qkv_w[:, 2 * dim:]), v_b=jnp.zeros((num_heads, 1, dh), jnp.float32),
        p_w=proj_w.reshape(num_heads, dh, dim), p_b=jnp.zeros((1, dim), jnp.float32),
        ln2_w=jnp.ones((1, dim), jnp.float32), ln2_b=jnp.zeros((1, dim), jnp.float32),
        fc1_w=fc1_w, fc1_b=jnp.zeros((1, hidden), jnp.float32),
        fc2_w=fc2_w, fc2_b=jnp.zeros((1, dim), jnp.float32),
    )


def stack_blocks(blocks):
    """Stack per-block params along a leading depth axis for the fused tower kernel."""
    return {k: jnp.stack([b[k] for b in blocks], axis=0) for k in blocks[0]}


def init_params(key):
    keys = iter(jax.random.split(key, 32))
    p = {}
    kpp = IN_CHANS * PATCH_SIZE * PATCH_SIZE
    p["patch_w"] = xavier(next(keys), (kpp, EMBED_DIM))
    p["patch_b"] = jnp.zeros((1, EMBED_DIM), jnp.float32)
    p["cls_token"] = 0.02 * jax.random.normal(next(keys), (1, 1, EMBED_DIM), jnp.float32)
    p["pos_embed"] = jnp.asarray(
        get_2d_sincos_pos_embed(EMBED_DIM, int(NUM_PATCHES ** 0.5), True))[None]
    p["enc_blocks"] = stack_blocks(
        [init_block_params(next(keys), EMBED_DIM, NUM_HEADS, MLP_RATIO)
         for _ in range(DEPTH)])
    p["norm_w"] = jnp.ones((1, EMBED_DIM), jnp.float32)
    p["norm_b"] = jnp.zeros((1, EMBED_DIM), jnp.float32)
    p["dec_embed_w"] = xavier(next(keys), (EMBED_DIM, DEC_EMBED_DIM))
    p["dec_embed_b"] = jnp.zeros((1, DEC_EMBED_DIM), jnp.float32)
    n_mask = int(round(MASK_RATIO_MAE * NUM_PATCHES))
    p["mask_token"] = 0.02 * jax.random.normal(next(keys), (1, n_mask, DEC_EMBED_DIM),
                                               jnp.float32)
    p["dec_pos_embed"] = jnp.asarray(
        get_2d_sincos_pos_embed(DEC_EMBED_DIM, int(NUM_PATCHES ** 0.5), True))[None]
    p["dec_blocks"] = stack_blocks(
        [init_block_params(next(keys), DEC_EMBED_DIM, DEC_NUM_HEADS, MLP_RATIO)
         for _ in range(DEC_DEPTH)])
    p["dec_norm_w"] = jnp.ones((1, DEC_EMBED_DIM), jnp.float32)
    p["dec_norm_b"] = jnp.zeros((1, DEC_EMBED_DIM), jnp.float32)
    p["dec_pred_w"] = xavier(next(keys), (DEC_EMBED_DIM, PATCH_SIZE ** 2 * IN_CHANS))
    p["dec_pred_b"] = jnp.zeros((1, PATCH_SIZE ** 2 * IN_CHANS), jnp.float32)
    p["jig_w1"] = xavier(next(keys), (EMBED_DIM, EMBED_DIM))
    p["jig_b1"] = jnp.zeros((1, EMBED_DIM), jnp.float32)
    p["jig_w2"] = xavier(next(keys), (EMBED_DIM, EMBED_DIM))
    p["jig_b2"] = jnp.zeros((1, EMBED_DIM), jnp.float32)
    p["jig_w3"] = xavier(next(keys), (EMBED_DIM, NUM_PATCHES))
    p["jig_b3"] = jnp.zeros((1, NUM_PATCHES), jnp.float32)
    p["siam_w1"] = xavier(next(keys), (EMBED_DIM, PRED_DIM))
    p["siam_w2"] = xavier(next(keys), (PRED_DIM, EMBED_DIM))
    p["siam_b2"] = jnp.zeros((1, EMBED_DIM), jnp.float32)
    return p


# ==================================== main ====================================
if __name__ == "__main__":
    root = jax.random.PRNGKey(0)
    k_params, k_img, k_mask1, k_mask2 = jax.random.split(root, 4)
    params = init_params(k_params)
    img1 = jax.random.normal(k_img, (BATCH, IN_CHANS, IMG_SIZE, IMG_SIZE), jnp.float32)

    fwd = jax.jit(forward)
    loss, pred_recon, mask, losses = fwd(params, img1, k_mask1, k_mask2)
    jax.block_until_ready((loss, pred_recon, mask, losses))

    assert pred_recon.shape == (BATCH, NUM_PATCHES, PATCH_SIZE ** 2 * IN_CHANS)
    assert mask.shape == (BATCH, NUM_PATCHES)
    assert bool(jnp.isfinite(loss))
    print("KERNEL_OK")
</pallas_src>

<mosaic_0001>
module attributes {stable_mosaic.version = 11 : i64} {
  func.func @_dense_kernel(%arg0: memref<8x192xf32, #tpu.memory_space<vmem>>, %arg1: memref<192x32xf32, #tpu.memory_space<vmem>>, %arg2: memref<1x32xf32, #tpu.memory_space<vmem>>, %arg3: memref<8x32xf32, #tpu.memory_space<vmem>>) attributes {dimension_semantics = [], scalar_prefetch = 0 : i64, scratch_operands = 0 : i64, tpu.core_type = #tpu.core_type<tc>} {
    %c0 = arith.constant 0 : index
    %c0_0 = arith.constant 0 : index
    %0 = vector.load %arg0[%c0, %c0_0] : memref<8x192xf32, #tpu.memory_space<vmem>>, vector<8x192xf32>
    %c0_1 = arith.constant 0 : index
    %c0_2 = arith.constant 0 : index
    %1 = vector.load %arg1[%c0_1, %c0_2] : memref<192x32xf32, #tpu.memory_space<vmem>>, vector<192x32xf32>
    %cst = arith.constant dense<0.000000e+00> : vector<8x32xf32>
    %2 = tpu.matmul %0, %1, %cst {dimension_numbers = #tpu.dot_dimension_numbers<[1], [0], [0], [1], [0, 0, 1, 1], [], []>} : vector<8x192xf32>, vector<192x32xf32>, vector<8x32xf32> -> vector<8x32xf32>
    %c0_3 = arith.constant 0 : index
    %c0_4 = arith.constant 0 : index
    %3 = vector.load %arg2[%c0_3, %c0_4] : memref<1x32xf32, #tpu.memory_space<vmem>>, vector<1x32xf32>
    %4 = vector.broadcast %3 : vector<1x32xf32> to vector<8x32xf32>
    %5 = arith.addf %2, %4 : vector<8x32xf32>
    %c0_5 = arith.constant 0 : index
    %c0_6 = arith.constant 0 : index
    %6 = vector.load %arg3[%c0_5, %c0_6] : memref<8x32xf32, #tpu.memory_space<vmem>>, vector<8x32xf32>
    tpu.vector_store %arg3[%c0_5, %c0_6], %5 {strides = array<i32>} : memref<8x32xf32, #tpu.memory_space<vmem>>, vector<8x32xf32>,
    return
  }
}

module attributes {stable_mosaic.version = 11 : i64} {
  func.func @_tower_kernel(%arg0: i32, %arg1: memref<1x10x32xf32, #tpu.memory_space<vmem>>, %arg2: memref<1x10x10xf32, #tpu.memory_space<vmem>>, %arg3: memref<2x1x32xf32, #tpu.memory_space<vmem>>, %arg4: memref<2x1x32xf32, #tpu.memory_space<vmem>>, %arg5: memref<2x4x32x8xf32, #tpu.memory_space<vmem>>, %arg6: memref<2x4x1x8xf32, #tpu.memory_space<vmem>>, %arg7: memref<2x4x32x8xf32, #tpu.memory_space<vmem>>, %arg8: memref<2x4x1x8xf32, #tpu.memory_space<vmem>>, %arg9: memref<2x4x32x8xf32, #tpu.memory_space<vmem>>, %arg10: memref<2x4x1x8xf32, #tpu.memory_space<vmem>>, %arg11: memref<2x4x8x32xf32, #tpu.memory_space<vmem>>, %arg12: memref<2x1x32xf32, #tpu.memory_space<vmem>>, %arg13: memref<2x1x32xf32, #tpu.memory_space<vmem>>, %arg14: memref<2x1x32xf32, #tpu.memory_space<vmem>>, %arg15: memref<2x32x128xf32, #tpu.memory_space<vmem>>, %arg16: memref<2x1x128xf32, #tpu.memory_space<vmem>>, %arg17: memref<2x128x32xf32, #tpu.memory_space<vmem>>, %arg18: memref<2x1x32xf32, #tpu.memory_space<vmem>>, %arg19: memref<1x32xf32, #tpu.memory_space<vmem>>, %arg20: memref<1x32xf32, #tpu.memory_space<vmem>>, %arg21: memref<32x16xf32, #tpu.memory_space<vmem>>, %arg22: memref<1x16xf32, #tpu.memory_space<vmem>>, %arg23: memref<1x10x48xf32, #tpu.memory_space<vmem>>) attributes {dimension_semantics = [#tpu.dimension_semantics<parallel>], iteration_bounds = array<i64: 2>, scalar_prefetch = 0 : i64, scratch_operands = 0 : i64, tpu.core_type = #tpu.core_type<tc>, window_params = [{transform_indices = @transform_0, window_bounds = array<i64: 1, 10, 32>}, {transform_indices = @transform_1, window_bounds = array<i64: 1, 10, 10>}, {pipeline_mode = #tpu.pipeline_mode<synchronous>, transform_indices = @transform_2, window_bounds = array<i64: 2, 1, 32>}, {pipeline_mode = #tpu.pipeline_mode<synchronous>, transform_indices = @transform_3, window_bounds = array<i64: 2, 1, 32>}, {pipeline_mode = #tpu.pipeline_mode<synchronous>, transform_indices = @transform_4, window_bounds = array<i64: 2, 4, 32, 8>}, {pipeline_mode = #tpu.pipeline_mode<synchronous>, transform_indices = @transform_5, window_bounds = array<i64: 2, 4, 1, 8>}, {pipeline_mode = #tpu.pipeline_mode<synchronous>, transform_indices = @transform_6, window_bounds = array<i64: 2, 4, 32, 8>}, {pipeline_mode = #tpu.pipeline_mode<synchronous>, transform_indices = @transform_7, window_bounds = array<i64: 2, 4, 1, 8>}, {pipeline_mode = #tpu.pipeline_mode<synchronous>, transform_indices = @transform_8, window_bounds = array<i64: 2, 4, 32, 8>}, {pipeline_mode = #tpu.pipeline_mode<synchronous>, transform_indices = @transform_9, window_bounds = array<i64: 2, 4, 1, 8>}, {pipeline_mode = #tpu.pipeline_mode<synchronous>, transform_indices = @transform_10, window_bounds = array<i64: 2, 4, 8, 32>}, {pipeline_mode = #tpu.pipeline_mode<synchronous>, transform_indices = @transform_11, window_bounds = array<i64: 2, 1, 32>}, {pipeline_mode = #tpu.pipeline_mode<synchronous>, transform_indices = @transform_12, window_bounds = array<i64: 2, 1, 32>}, {pipeline_mode = #tpu.pipeline_mode<synchronous>, transform_indices = @transform_13, window_bounds = array<i64: 2, 1, 32>}, {pipeline_mode = #tpu.pipeline_mode<synchronous>, transform_indices = @transform_14, window_bounds = array<i64: 2, 32, 128>}, {pipeline_mode = #tpu.pipeline_mode<synchronous>, transform_indices = @transform_15, window_bounds = array<i64: 2, 1, 128>}, {pipeline_mode = #tpu.pipeline_mode<synchronous>, transform_indices = @transform_16, window_bounds = array<i64: 2, 128, 32>}, {pipeline_mode = #tpu.pipeline_mode<synchronous>, transform_indices = @transform_17, window_bounds = array<i64: 2, 1, 32>}, {pipeline_mode = #tpu.pipeline_mode<synchronous>, transform_indices = @transform_18, window_bounds = array<i64: 1, 32>}, {pipeline_mode = #tpu.pipeline_mode<synchronous>, transform_indices = @transform_19, window_bounds = array<i64: 1, 32>}, {pipeline_mode = #tpu.pipeline_mode<synchronous>, transform_indices = @transform_20, window_bounds = array<i64: 32, 16>}, {pipeline_mode = #tpu.pipeline_mode<synchronous>, transform_indices = @transform_21, window_bounds = array<i64: 1, 16>}, {transform_indices = @transform_22, window_bounds = array<i64: 1, 10, 48>}]} {
    %c0 = arith.constant 0 : index
    %c0_0 = arith.constant 0 : index
    %c0_1 = arith.constant 0 : index
    %0 = vector.load %arg1[%c0, %c0_0, %c0_1] : memref<1x10x32xf32, #tpu.memory_space<vmem>>, vector<1x10x32xf32>
    %1 = vector.shape_cast %0 : vector<1x10x32xf32> to vector<10x32xf32>
    %c0_2 = arith.constant 0 : index
    %c0_3 = arith.constant 0 : index
    %c0_4 = arith.constant 0 : index
    %2 = vector.load %arg2[%c0_2, %c0_3, %c0_4] : memref<1x10x10xf32, #tpu.memory_space<vmem>>, vector<1x10x10xf32>
    %3 = vector.shape_cast %2 : vector<1x10x10xf32> to vector<10x10xf32>
    %c0_5 = arith.constant 0 : index
    %c0_6 = arith.constant 0 : index
    %c0_7 = arith.constant 0 : index
    %4 = vector.load %arg3[%c0_5, %c0_6, %c0_7] : memref<2x1x32xf32, #tpu.memory_space<vmem>>, vector<1x1x32xf32>
    %5 = vector.shape_cast %4 : vector<1x1x32xf32> to vector<1x32xf32>
    %c0_8 = arith.constant 0 : index
    %c0_9 = arith.constant 0 : index
    %c0_10 = arith.constant 0 : index
    %6 = vector.load %arg4[%c0_8, %c0_9, %c0_10] : memref<2x1x32xf32, #tpu.memory_space<vmem>>, vector<1x1x32xf32>
    %7 = vector.shape_cast %6 : vector<1x1x32xf32> to vector<1x32xf32>
    %cst = arith.constant dense<0.000000e+00> : vector<10xf32>
    %8 = vector.multi_reduction <add>, %1, %cst [1] : vector<10x32xf32> to vector<10xf32>
    %9 = vector.shape_cast %8 : vector<10xf32> to vector<10x1xf32>
    %cst_11 = arith.constant 3.200000e+01 : f32
    %10 = vector.broadcast %cst_11 : f32 to vector<10x1xf32>
    %11 = arith.divf %9, %10 : vector<10x1xf32>
    %12 = vector.broadcast %11 : vector<10x1xf32> to vector<10x32xf32>
    %13 = arith.subf %1, %12 : vector<10x32xf32>
    %14 = arith.mulf %13, %13 : vector<10x32xf32>
    %cst_12 = arith.constant dense<0.000000e+00> : vector<10xf32>
    %15 = vector.multi_reduction <add>, %14, %cst_12 [1] : vector<10x32xf32> to vector<10xf32>
    %16 = vector.shape_cast %15 : vector<10xf32> to vector<10x1xf32>
    %cst_13 = arith.constant 3.200000e+01 : f32
    %17 = vector.broadcast %cst_13 : f32 to vector<10x1xf32>
    %18 = arith.divf %16, %17 : vector<10x1xf32>
    %cst_14 = arith.constant 9.99999974E-6 : f32
    %19 = vector.broadcast %cst_14 : f32 to vector<10x1xf32>
    %20 = arith.addf %18, %19 : vector<10x1xf32>
    %21 = math.rsqrt %20 : vector<10x1xf32>
    %22 = vector.broadcast %21 : vector<10x1xf32> to vector<10x32xf32>
    %23 = arith.mulf %13, %22 : vector<10x32xf32>
    %24 = vector.broadcast %5 : vector<1x32xf32> to vector<10x32xf32>
    %25 = arith.mulf %23, %24 : vector<10x32xf32>
    %26 = vector.broadcast %7 : vector<1x32xf32> to vector<10x32xf32>
    %27 = arith.addf %25, %26 : vector<10x32xf32>
    %c0_15 = arith.constant 0 : index
    %c0_16 = arith.constant 0 : index
    %c0_17 = arith.constant 0 : index
    %c0_18 = arith.constant 0 : index
    %28 = vector.load %arg5[%c0_15, %c0_16, %c0_17, %c0_18] : memref<2x4x32x8xf32, #tpu.memory_space<vmem>>, vector<1x1x32x8xf32>
    %29 = vector.shape_cast %28 : vector<1x1x32x8xf32> to vector<32x8xf32>
    %cst_19 = arith.constant dense<0.000000e+00> : vector<10x8xf32>
    %30 = tpu.matmul %27, %29, %cst_19 {dimension_numbers = #tpu.dot_dimension_numbers<[1], [0], [0], [1], [0, 0, 1, 1], [], []>} : vector<10x32xf32>, vector<32x8xf32>, vector<10x8xf32> -> vector<10x8xf32>
    %c0_20 = arith.constant 0 : index
    %c0_21 = arith.constant 0 : index
    %c0_22 = arith.constant 0 : index
    %c0_23 = arith.constant 0 : index
    %31 = vector.load %arg6[%c0_20, %c0_21, %c0_22, %c0_23] : memref<2x4x1x8xf32, #tpu.memory_space<vmem>>, vector<1x1x1x8xf32>
    %32 = vector.shape_cast %31 : vector<1x1x1x8xf32> to vector<1x8xf32>
    %33 = vector.broadcast %32 : vector<1x8xf32> to vector<10x8xf32>
    %34 = arith.addf %30, %33 : vector<10x8xf32>
    %c0_24 = arith.constant 0 : index
    %c0_25 = arith.constant 0 : index
    %c0_26 = arith.constant 0 : index
    %c0_27 = arith.constant 0 : index
    %35 = vector.load %arg7[%c0_24, %c0_25, %c0_26, %c0_27] : memref<2x4x32x8xf32, #tpu.memory_space<vmem>>, vector<1x1x32x8xf32>
    %36 = vector.shape_cast %35 : vector<1x1x32x8xf32> to vector<32x8xf32>
    %cst_28 = arith.constant dense<0.000000e+00> : vector<10x8xf32>
    %37 = tpu.matmul %27, %36, %cst_28 {dimension_numbers = #tpu.dot_dimension_numbers<[1], [0], [0], [1], [0, 0, 1, 1], [], []>} : vector<10x32xf32>, vector<32x8xf32>, vector<10x8xf32> -> vector<10x8xf32>
    %c0_29 = arith.constant 0 : index
    %c0_30 = arith.constant 0 : index
    %c0_31 = arith.constant 0 : index
    %c0_32 = arith.constant 0 : index
    %38 = vector.load %arg8[%c0_29, %c0_30, %c0_31, %c0_32] : memref<2x4x1x8xf32, #tpu.memory_space<vmem>>, vector<1x1x1x8xf32>
    %39 = vector.shape_cast %38 : vector<1x1x1x8xf32> to vector<1x8xf32>
    %40 = vector.broadcast %39 : vector<1x8xf32> to vector<10x8xf32>
    %41 = arith.addf %37, %40 : vector<10x8xf32>
    %c0_33 = arith.constant 0 : index
    %c0_34 = arith.constant 0 : index
    %c0_35 = arith.constant 0 : index
    %c0_36 = arith.constant 0 : index
    %42 = vector.load %arg9[%c0_33, %c0_34, %c0_35, %c0_36] : memref<2x4x32x8xf32, #tpu.memory_space<vmem>>, vector<1x1x32x8xf32>
    %43 = vector.shape_cast %42 : vector<1x1x32x8xf32> to vector<32x8xf32>
    %cst_37 = arith.constant dense<0.000000e+00> : vector<10x8xf32>
    %44 = tpu.matmul %27, %43, %cst_37 {dimension_numbers = #tpu.dot_dimension_numbers<[1], [0], [0], [1], [0, 0, 1, 1], [], []>} : vector<10x32xf32>, vector<32x8xf32>, vector<10x8xf32> -> vector<10x8xf32>
    %c0_38 = arith.constant 0 : index
    %c0_39 = arith.constant 0 : index
    %c0_40 = arith.constant 0 : index
    %c0_41 = arith.constant 0 : index
    %45 = vector.load %arg10[%c0_38, %c0_39, %c0_40, %c0_41] : memref<2x4x1x8xf32, #tpu.memory_space<vmem>>, vector<1x1x1x8xf32>
    %46 = vector.shape_cast %45 : vector<1x1x1x8xf32> to vector<1x8xf32>
    %47 = vector.broadcast %46 : vector<1x8xf32> to vector<10x8xf32>
    %48 = arith.addf %44, %47 : vector<10x8xf32>
    %cst_42 = arith.constant dense<0.000000e+00> : vector<10x10xf32>
    %49 = tpu.matmul %34, %41, %cst_42 {dimension_numbers = #tpu.dot_dimension_numbers<[1], [1], [0], [0], [0, 0, 1, 0], [], []>} : vector<10x8xf32>, vector<10x8xf32>, vector<10x10xf32> -> vector<10x10xf32>
    %cst_43 = arith.constant 0.353553385 : f32
    %50 = vector.broadcast %cst_43 : f32 to vector<10x10xf32>
    %51 = arith.mulf %49, %50 : vector<10x10xf32>
    %52 = arith.addf %51, %3 : vector<10x10xf32>
    %cst_44 = arith.constant dense<0xFF800000> : vector<10xf32>
    %53 = vector.multi_reduction <maximumf>, %52, %cst_44 [1] : vector<10x10xf32> to vector<10xf32>
    %54 = vector.shape_cast %53 : vector<10xf32> to vector<10x1xf32>
    %55 = vector.broadcast %54 : vector<10x1xf32> to vector<10x10xf32>
    %56 = arith.subf %52, %55 : vector<10x10xf32>
    %57 = math.exp %56 : vector<10x10xf32>
    %cst_45 = arith.constant dense<0.000000e+00> : vector<10xf32>
    %58 = vector.multi_reduction <add>, %57, %cst_45 [1] : vector<10x10xf32> to vector<10xf32>
    %59 = vector.shape_cast %58 : vector<10xf32> to vector<10x1xf32>
    %60 = tpu.reciprocal %59 {approx = true} : vector<10x1xf32> -> vector<10x1xf32>
    %61 = vector.broadcast %60 : vector<10x1xf32> to vector<10x10xf32>
    %62 = arith.mulf %57, %61 : vector<10x10xf32>
    %cst_46 = arith.constant dense<0.000000e+00> : vector<10x8xf32>
    %63 = tpu.matmul %62, %48, %cst_46 {dimension_numbers = #tpu.dot_dimension_numbers<[1], [0], [0], [1], [0, 0, 1, 1], [], []>} : vector<10x10xf32>, vector<10x8xf32>, vector<10x8xf32> -> vector<10x8xf32>
    %c0_47 = arith.constant 0 : index
    %c0_48 = arith.constant 0 : index
    %c0_49 = arith.constant 0 : index
    %c0_50 = arith.constant 0 : index
    %64 = vector.load %arg11[%c0_47, %c0_48, %c0_49, %c0_50] : memref<2x4x8x32xf32, #tpu.memory_space<vmem>>, vector<1x1x8x32xf32>
    %65 = vector.shape_cast %64 : vector<1x1x8x32xf32> to vector<8x32xf32>
    %cst_51 = arith.constant dense<0.000000e+00> : vector<10x32xf32>
    %66 = tpu.matmul %63, %65, %cst_51 {dimension_numbers = #tpu.dot_dimension_numbers<[1], [0], [0], [1], [0, 0, 1, 1], [], []>} : vector<10x8xf32>, vector<8x32xf32>, vector<10x32xf32> -> vector<10x32xf32>
    %c0_52 = arith.constant 0 : index
    %c1 = arith.constant 1 : index
    %c0_53 = arith.constant 0 : index
    %c0_54 = arith.constant 0 : index
    %67 = vector.load %arg5[%c0_52, %c1, %c0_53, %c0_54] : memref<2x4x32x8xf32, #tpu.memory_space<vmem>>, vector<1x1x32x8xf32>
    %68 = vector.shape_cast %67 : vector<1x1x32x8xf32> to vector<32x8xf32>
    %cst_55 = arith.constant dense<0.000000e+00> : vector<10x8xf32>
    %69 = tpu.matmul %27, %68, %cst_55 {dimension_numbers = #tpu.dot_dimension_numbers<[1], [0], [0], [1], [0, 0, 1, 1], [], []>} : vector<10x32xf32>, vector<32x8xf32>, vector<10x8xf32> -> vector<10x8xf32>
    %c0_56 = arith.constant 0 : index
    %c1_57 = arith.constant 1 : index
    %c0_58 = arith.constant 0 : index
    %c0_59 = arith.constant 0 : index
    %70 = vector.load %arg6[%c0_56, %c1_57, %c0_58, %c0_59] : memref<2x4x1x8xf32, #tpu.memory_space<vmem>>, vector<1x1x1x8xf32>
    %71 = vector.shape_cast %70 : vector<1x1x1x8xf32> to vector<1x8xf32>
    %72 = vector.broadcast %71 : vector<1x8xf32> to vector<10x8xf32>
    %73 = arith.addf %69, %72 : vector<10x8xf32>
    %c0_60 = arith.constant 0 : index
    %c1_61 = arith.constant 1 : index
    %c0_62 = arith.constant 0 : index
    %c0_63 = arith.constant 0 : index
    %74 = vector.load %arg7[%c0_60, %c1_61, %c0_62, %c0_63] : memref<2x4x32x8xf32, #tpu.memory_space<vmem>>, vector<1x1x32x8xf32>
    %75 = vector.shape_cast %74 : vector<1x1x32x8xf32> to vector<32x8xf32>
    %cst_64 = arith.constant dense<0.000000e+00> : vector<10x8xf32>
    %76 = tpu.matmul %27, %75, %cst_64 {dimension_numbers = #tpu.dot_dimension_numbers<[1], [0], [0], [1], [0, 0, 1, 1], [], []>} : vector<10x32xf32>, vector<32x8xf32>, vector<10x8xf32> -> vector<10x8xf32>
    %c0_65 = arith.constant 0 : index
    %c1_66 = arith.constant 1 : index
    %c0_67 = arith.constant 0 : index
    %c0_68 = arith.constant 0 : index
    %77 = vector.load %arg8[%c0_65, %c1_66, %c0_67, %c0_68] : memref<2x4x1x8xf32, #tpu.memory_space<vmem>>, vector<1x1x1x8xf32>
    %78 = vector.shape_cast %77 : vector<1x1x1x8xf32> to vector<1x8xf32>
    %79 = vector.broadcast %78 : vector<1x8xf32> to vector<10x8xf32>
    %80 = arith.addf %76, %79 : vector<10x8xf32>
    %c0_69 = arith.constant 0 : index
    %c1_70 = arith.constant 1 : index
    %c0_71 = arith.constant 0 : index
    %c0_72 = arith.constant 0 : index
    %81 = vector.load %arg9[%c0_69, %c1_70, %c0_71, %c0_72] : memref<2x4x32x8xf32, #tpu.memory_space<vmem>>, vector<1x1x32x8xf32>
    %82 = vector.shape_cast %81 : vector<1x1x32x8xf32> to vector<32x8xf32>
    %cst_73 = arith.constant dense<0.000000e+00> : vector<10x8xf32>
    %83 = tpu.matmul %27, %82, %cst_73 {dimension_numbers = #tpu.dot_dimension_numbers<[1], [0], [0], [1], [0, 0, 1, 1], [], []>} : vector<10x32xf32>, vector<32x8xf32>, vector<10x8xf32> -> vector<10x8xf32>
    %c0_74 = arith.constant 0 : index
    %c1_75 = arith.constant 1 : index
    %c0_76 = arith.constant 0 : index
    %c0_77 = arith.constant 0 : index
    %84 = vector.load %arg10[%c0_74, %c1_75, %c0_76, %c0_77] : memref<2x4x1x8xf32, #tpu.memory_space<vmem>>, vector<1x1x1x8xf32>
    %85 = vector.shape_cast %84 : vector<1x1x1x8xf32> to vector<1x8xf32>
    %86 = vector.broadcast %85 : vector<1x8xf32> to vector<10x8xf32>
    %87 = arith.addf %83, %86 : vector<10x8xf32>
    %cst_78 = arith.constant dense<0.000000e+00> : vector<10x10xf32>
    %88 = tpu.matmul %73, %80, %cst_78 {dimension_numbers = #tpu.dot_dimension_numbers<[1], [1], [0], [0], [0, 0, 1, 0], [], []>} : vector<10x8xf32>, vector<10x8xf32>, vector<10x10xf32> -> vector<10x10xf32>
    %cst_79 = arith.constant 0.353553385 : f32
    %89 = vector.broadcast %cst_79 : f32 to vector<10x10xf32>
    %90 = arith.mulf %88, %89 : vector<10x10xf32>
    %91 = arith.addf %90, %3 : vector<10x10xf32>
    %cst_80 = arith.constant dense<0xFF800000> : vector<10xf32>
    %92 = vector.multi_reduction <maximumf>, %91, %cst_80 [1] : vector<10x10xf32> to vector<10xf32>
    %93 = vector.shape_cast %92 : vector<10xf32> to vector<10x1xf32>
    %94 = vector.broadcast %93 : vector<10x1xf32> to vector<10x10xf32>
    %95 = arith.subf %91, %94 : vector<10x10xf32>
    %96 = math.exp %95 : vector<10x10xf32>
    %cst_81 = arith.constant dense<0.000000e+00> : vector<10xf32>
    %97 = vector.multi_reduction <add>, %96, %cst_81 [1] : vector<10x10xf32> to vector<10xf32>
    %98 = vector.shape_cast %97 : vector<10xf32> to vector<10x1xf32>
    %99 = tpu.reciprocal %98 {approx = true} : vector<10x1xf32> -> vector<10x1xf32>
    %100 = vector.broadcast %99 : vector<10x1xf32> to vector<10x10xf32>
    %101 = arith.mulf %96, %100 : vector<10x10xf32>
    %cst_82 = arith.constant dense<0.000000e+00> : vector<10x8xf32>
    %102 = tpu.matmul %101, %87, %cst_82 {dimension_numbers = #tpu.dot_dimension_numbers<[1], [0], [0], [1], [0, 0, 1, 1], [], []>} : vector<10x10xf32>, vector<10x8xf32>, vector<10x8xf32> -> vector<10x8xf32>
    %c0_83 = arith.constant 0 : index
    %c1_84 = arith.constant 1 : index
    %c0_85 = arith.constant 0 : index
    %c0_86 = arith.constant 0 : index
    %103 = vector.load %arg11[%c0_83, %c1_84, %c0_85, %c0_86] : memref<2x4x8x32xf32, #tpu.memory_space<vmem>>, vector<1x1x8x32xf32>
    %104 = vector.shape_cast %103 : vector<1x1x8x32xf32> to vector<8x32xf32>
    %cst_87 = arith.constant dense<0.000000e+00> : vector<10x32xf32>
    %105 = tpu.matmul %102, %104, %cst_87 {dimension_numbers = #tpu.dot_dimension_numbers<[1], [0], [0], [1], [0, 0, 1, 1], [], []>} : vector<10x8xf32>, vector<8x32xf32>, vector<10x32xf32> -> vector<10x32xf32>
    %106 = arith.addf %66, %105 : vector<10x32xf32>
    %c0_88 = arith.constant 0 : index
    %c2 = arith.constant 2 : index
    %c0_89 = arith.constant 0 : index
    %c0_90 = arith.constant 0 : index
    %107 = vector.load %arg5[%c0_88, %c2, %c0_89, %c0_90] : memref<2x4x32x8xf32, #tpu.memory_space<vmem>>, vector<1x1x32x8xf32>
    %108 = vector.shape_cast %107 : vector<1x1x32x8xf32> to vector<32x8xf32>
    %cst_91 = arith.constant dense<0.000000e+00> : vector<10x8xf32>
    %109 = tpu.matmul %27, %108, %cst_91 {dimension_numbers = #tpu.dot_dimension_numbers<[1], [0], [0], [1], [0, 0, 1, 1], [], []>} : vector<10x32xf32>, vector<32x8xf32>, vector<10x8xf32> -> vector<10x8xf32>
    %c0_92 = arith.constant 0 : index
    %c2_93 = arith.constant 2 : index
    %c0_94 = arith.constant 0 : index
    %c0_95 = arith.constant 0 : index
    %110 = vector.load %arg6[%c0_92, %c2_93, %c0_94, %c0_95] : memref<2x4x1x8xf32, #tpu.memory_space<vmem>>, vector<1x1x1x8xf32>
    %111 = vector.shape_cast %110 : vector<1x1x1x8xf32> to vector<1x8xf32>
    %112 = vector.broadcast %111 : vector<1x8xf32> to vector<10x8xf32>
    %113 = arith.addf %109, %112 : vector<10x8xf32>
    %c0_96 = arith.constant 0 : index
    %c2_97 = arith.constant 2 : index
    %c0_98 = arith.constant 0 : index
    %c0_99 = arith.constant 0 : index
    %114 = vector.load %arg7[%c0_96, %c2_97, %c0_98, %c0_99] : memref<2x4x32x8xf32, #tpu.memory_space<vmem>>, vector<1x1x32x8xf32>
    %115 = vector.shape_cast %114 : vector<1x1x32x8xf32> to vector<32x8xf32>
    %cst_100 = arith.constant dense<0.000000e+00> : vector<10x8xf32>
    %116 = tpu.matmul %27, %115, %cst_100 {dimension_numbers = #tpu.dot_dimension_numbers<[1], [0], [0], [1], [0, 0, 1, 1], [], []>} : vector<10x32xf32>, vector<32x8xf32>, vector<10x8xf32> -> vector<10x8xf32>
    %c0_101 = arith.constant 0 : index
    %c2_102 = arith.constant 2 : index
    %c0_103 = arith.constant 0 : index
    %c0_104 = arith.constant 0 : index
    %117 = vector.load %arg8[%c0_101, %c2_102, %c0_103, %c0_104] : memref<2x4x1x8xf32, #tpu.memory_space<vmem>>, vector<1x1x1x8xf32>
    %118 = vector.shape_cast %117 : vector<1x1x1x8xf32> to vector<1x8xf32>
    %119 = vector.broadcast %118 : vector<1x8xf32> to vector<10x8xf32>
    %120 = arith.addf %116, %119 : vector<10x8xf32>
    %c0_105 = arith.constant 0 : index
    %c2_106 = arith.constant 2 : index
    %c0_107 = arith.constant 0 : index
    %c0_108 = arith.constant 0 : index
    %121 = vector.load %arg9[%c0_105, %c2_106, %c0_107, %c0_108] : memref<2x4x32x8xf32, #tpu.memory_space<vmem>>, vector<1x1x32x8xf32>
    %122 = vector.shape_cast %121 : vector<1x1x32x8xf32> to vector<32x8xf32>
    %cst_109 = arith.constant dense<0.000000e+00> : vector<10x8xf32>
    %123 = tpu.matmul %27, %122, %cst_109 {dimension_numbers = #tpu.dot_dimension_numbers<[1], [0], [0], [1], [0, 0, 1, 1], [], []>} : vector<10x32xf32>, vector<32x8xf32>, vector<10x8xf32> -> vector<10x8xf32>
    %c0_110 = arith.constant 0 : index
    %c2_111 = arith.constant 2 : index
    %c0_112 = arith.constant 0 : index
    %c0_113 = arith.constant 0 : index
    %124 = vector.load %arg10[%c0_110, %c2_111, %c0_112, %c0_113] : memref<2x4x1x8xf32, #tpu.memory_space<vmem>>, vector<1x1x1x8xf32>
    %125 = vector.shape_cast %124 : vector<1x1x1x8xf32> to vector<1x8xf32>
    %126 = vector.broadcast %125 : vector<1x8xf32> to vector<10x8xf32>
    %127 = arith.addf %123, %126 : vector<10x8xf32>
    %cst_114 = arith.constant dense<0.000000e+00> : vector<10x10xf32>
    %128 = tpu.matmul %113, %120, %cst_114 {dimension_numbers = #tpu.dot_dimension_numbers<[1], [1], [0], [0], [0, 0, 1, 0], [], []>} : vector<10x8xf32>, vector<10x8xf32>, vector<10x10xf32> -> vector<10x10xf32>
    %cst_115 = arith.constant 0.353553385 : f32
    %129 = vector.broadcast %cst_115 : f32 to vector<10x10xf32>
    %130 = arith.mulf %128, %129 : vector<10x10xf32>
    %131 = arith.addf %130, %3 : vector<10x10xf32>
    %cst_116 = arith.constant dense<0xFF800000> : vector<10xf32>
    %132 = vector.multi_reduction <maximumf>, %131, %cst_116 [1] : vector<10x10xf32> to vector<10xf32>
    %133 = vector.shape_cast %132 : vector<10xf32> to vector<10x1xf32>
    %134 = vector.broadcast %133 : vector<10x1xf32> to vector<10x10xf32>
    %135 = arith.subf %131, %134 : vector<10x10xf32>
    %136 = math.exp %135 : vector<10x10xf32>
    %cst_117 = arith.constant dense<0.000000e+00> : vector<10xf32>
    %137 = vector.multi_reduction <add>, %136, %cst_117 [1] : vector<10x10xf32> to vector<10xf32>
    %138 = vector.shape_cast %137 : vector<10xf32> to vector<10x1xf32>
    %139 = tpu.reciprocal %138 {approx = true} : vector<10x1xf32> -> vector<10x1xf32>
    %140 = vector.broadcast %139 : vector<10x1xf32> to vector<10x10xf32>
    %141 = arith.mulf %136, %140 : vector<10x10xf32>
    %cst_118 = arith.constant dense<0.000000e+00> : vector<10x8xf32>
    %142 = tpu.matmul %141, %127, %cst_118 {dimension_numbers = #tpu.dot_dimension_numbers<[1], [0], [0], [1], [0, 0, 1, 1], [], []>} : vector<10x10xf32>, vector<10x8xf32>, vector<10x8xf32> -> vector<10x8xf32>
    %c0_119 = arith.constant 0 : index
    %c2_120 = arith.constant 2 : index
    %c0_121 = arith.constant 0 : index
    %c0_122 = arith.constant 0 : index
    %143 = vector.load %arg11[%c0_119, %c2_120, %c0_121, %c0_122] : memref<2x4x8x32xf32, #tpu.memory_space<vmem>>, vector<1x1x8x32xf32>
    %144 = vector.shape_cast %143 : vector<1x1x8x32xf32> to vector<8x32xf32>
    %cst_123 = arith.constant dense<0.000000e+00> : vector<10x32xf32>
    %145 = tpu.matmul %142, %144, %cst_123 {dimension_numbers = #tpu.dot_dimension_numbers<[1], [0], [0], [1], [0, 0, 1, 1], [], []>} : vector<10x8xf32>, vector<8x32xf32>, vector<10x32xf32> -> vector<10x32xf32>
    %146 = arith.addf %106, %145 : vector<10x32xf32>
    %c0_124 = arith.constant 0 : index
    %c3 = arith.constant 3 : index
    %c0_125 = arith.constant 0 : index
    %c0_126 = arith.constant 0 : index
    %147 = vector.load %arg5[%c0_124, %c3, %c0_125, %c0_126] : memref<2x4x32x8xf32, #tpu.memory_space<vmem>>, vector<1x1x32x8xf32>
    %148 = vector.shape_cast %147 : vector<1x1x32x8xf32> to vector<32x8xf32>
    %cst_127 = arith.constant dense<0.000000e+00> : vector<10x8xf32>
    %149 = tpu.matmul %27, %148, %cst_127 {dimension_numbers = #tpu.dot_dimension_numbers<[1], [0], [0], [1], [0, 0, 1, 1], [], []>} : vector<10x32xf32>, vector<32x8xf32>, vector<10x8xf32> -> vector<10x8xf32>
    %c0_128 = arith.constant 0 : index
    %c3_129 = arith.constant 3 : index
    %c0_130 = arith.constant 0 : index
    %c0_131 = arith.constant 0 : index
    %150 = vector.load %arg6[%c0_128, %c3_129, %c0_130, %c0_131] : memref<2x4x1x8xf32, #tpu.memory_space<vmem>>, vector<1x1x1x8xf32>
    %151 = vector.shape_cast %150 : vector<1x1x1x8xf32> to vector<1x8xf32>
    %152 = vector.broadcast %151 : vector<1x8xf32> to vector<10x8xf32>
    %153 = arith.addf %149, %152 : vector<10x8xf32>
    %c0_132 = arith.constant 0 : index
    %c3_133 = arith.constant 3 : index
    %c0_134 = arith.constant 0 : index
    %c0_135 = arith.constant 0 : index
    %154 = vector.load %arg7[%c0_132, %c3_133, %c0_134, %c0_135] : memref<2x4x32x8xf32, #tpu.memory_space<vmem>>, vector<1x1x32x8xf32>
    %155 = vector.shape_cast %154 : vector<1x1x32x8xf32> to vector<32x8xf32>
    %cst_136 = arith.constant dense<0.000000e+00> : vector<10x8xf32>
    %156 = tpu.matmul %27, %155, %cst_136 {dimension_numbers = #tpu.dot_dimension_numbers<[1], [0], [0], [1], [0, 0, 1, 1], [], []>} : vector<10x32xf32>, vector<32x8xf32>, vector<10x8xf32> -> vector<10x8xf32>
    %c0_137 = arith.constant 0 : index
    %c3_138 = arith.constant 3 : index
    %c0_139 = arith.constant 0 : index
    %c0_140 = arith.constant 0 : index
    %157 = vector.load %arg8[%c0_137, %c3_138, %c0_139, %c0_140] : memref<2x4x1x8xf32, #tpu.memory_space<vmem>>, vector<1x1x1x8xf32>
    %158 = vector.shape_cast %157 : vector<1x1x1x8xf32> to vector<1x8xf32>
    %159 = vector.broadcast %158 : vector<1x8xf32> to vector<10x8xf32>
    %160 = arith.addf %156, %159 : vector<10x8xf32>
    %c0_141 = arith.constant 0 : index
    %c3_142 = arith.constant 3 : index
    %c0_143 = arith.constant 0 : index
    %c0_144 = arith.constant 0 : index
    %161 = vector.load %arg9[%c0_141, %c3_142, %c0_143, %c0_144] : memref<2x4x32x8xf32, #tpu.memory_space<vmem>>, vector<1x1x32x8xf32>
    %162 = vector.shape_cast %161 : vector<1x1x32x8xf32> to vector<32x8xf32>
    %cst_145 = arith.constant dense<0.000000e+00> : vector<10x8xf32>
    %163 = tpu.matmul %27, %162, %cst_145 {dimension_numbers = #tpu.dot_dimension_numbers<[1], [0], [0], [1], [0, 0, 1, 1], [], []>} : vector<10x32xf32>, vector<32x8xf32>, vector<10x8xf32> -> vector<10x8xf32>
    %c0_146 = arith.constant 0 : index
    %c3_147 = arith.constant 3 : index
    %c0_148 = arith.constant 0 : index
    %c0_149 = arith.constant 0 : index
    %164 = vector.load %arg10[%c0_146, %c3_147, %c0_148, %c0_149] : memref<2x4x1x8xf32, #tpu.memory_space<vmem>>, vector<1x1x1x8xf32>
    %165 = vector.shape_cast %164 : vector<1x1x1x8xf32> to vector<1x8xf32>
    %166 = vector.broadcast %165 : vector<1x8xf32> to vector<10x8xf32>
    %167 = arith.addf %163, %166 : vector<10x8xf32>
    %cst_150 = arith.constant dense<0.000000e+00> : vector<10x10xf32>
    %168 = tpu.matmul %153, %160, %cst_150 {dimension_numbers = #tpu.dot_dimension_numbers<[1], [1], [0], [0], [0, 0, 1, 0], [], []>} : vector<10x8xf32>, vector<10x8xf32>, vector<10x10xf32> -> vector<10x10xf32>
    %cst_151 = arith.constant 0.353553385 : f32
    %169 = vector.broadcast %cst_151 : f32 to vector<10x10xf32>
    %170 = arith.mulf %168, %169 : vector<10x10xf32>
    %171 = arith.addf %170, %3 : vector<10x10xf32>
    %cst_152 = arith.constant dense<0xFF800000> : vector<10xf32>
    %172 = vector.multi_reduction <maximumf>, %171, %cst_152 [1] : vector<10x10xf32> to vector<10xf32>
    %173 = vector.shape_cast %172 : vector<10xf32> to vector<10x1xf32>
    %174 = vector.broadcast %173 : vector<10x1xf32> to vector<10x10xf32>
    %175 = arith.subf %171, %174 : vector<10x10xf32>
    %176 = math.exp %175 : vector<10x10xf32>
    %cst_153 = arith.constant dense<0.000000e+00> : vector<10xf32>
    %177 = vector.multi_reduction <add>, %176, %cst_153 [1] : vector<10x10xf32> to vector<10xf32>
    %178 = vector.shape_cast %177 : vector<10xf32> to vector<10x1xf32>
    %179 = tpu.reciprocal %178 {approx = true} : vector<10x1xf32> -> vector<10x1xf32>
    %180 = vector.broadcast %179 : vector<10x1xf32> to vector<10x10xf32>
    %181 = arith.mulf %176, %180 : vector<10x10xf32>
    %cst_154 = arith.constant dense<0.000000e+00> : vector<10x8xf32>
    %182 = tpu.matmul %181, %167, %cst_154 {dimension_numbers = #tpu.dot_dimension_numbers<[1], [0], [0], [1], [0, 0, 1, 1], [], []>} : vector<10x10xf32>, vector<10x8xf32>, vector<10x8xf32> -> vector<10x8xf32>
    %c0_155 = arith.constant 0 : index
    %c3_156 = arith.constant 3 : index
    %c0_157 = arith.constant 0 : index
    %c0_158 = arith.constant 0 : index
    %183 = vector.load %arg11[%c0_155, %c3_156, %c0_157, %c0_158] : memref<2x4x8x32xf32, #tpu.memory_space<vmem>>, vector<1x1x8x32xf32>
    %184 = vector.shape_cast %183 : vector<1x1x8x32xf32> to vector<8x32xf32>
    %cst_159 = arith.constant dense<0.000000e+00> : vector<10x32xf32>
    %185 = tpu.matmul %182, %184, %cst_159 {dimension_numbers = #tpu.dot_dimension_numbers<[1], [0], [0], [1], [0, 0, 1, 1], [], []>} : vector<10x8xf32>, vector<8x32xf32>, vector<10x32xf32> -> vector<10x32xf32>
    %186 = arith.addf %146, %185 : vector<10x32xf32>
    %187 = arith.addf %1, %186 : vector<10x32xf32>
    %c0_160 = arith.constant 0 : index
    %c0_161 = arith.constant 0 : index
    %c0_162 = arith.constant 0 : index
    %188 = vector.load %arg12[%c0_160, %c0_161, %c0_162] : memref<2x1x32xf32, #tpu.memory_space<vmem>>, vector<1x1x32xf32>
    %189 = vector.shape_cast %188 : vector<1x1x32xf32> to vector<1x32xf32>
    %190 = vector.broadcast %189 : vector<1x32xf32> to vector<10x32xf32>
    %191 = arith.addf %187, %190 : vector<10x32xf32>
    %c0_163 = arith.constant 0 : index
    %c0_164 = arith.constant 0 : index
    %c0_165 = arith.constant 0 : index
    %192 = vector.load %arg13[%c0_163, %c0_164, %c0_165] : memref<2x1x32xf32, #tpu.memory_space<vmem>>, vector<1x1x32xf32>
    %193 = vector.shape_cast %192 : vector<1x1x32xf32> to vector<1x32xf32>
    %c0_166 = arith.constant 0 : index
    %c0_167 = arith.constant 0 : index
    %c0_168 = arith.constant 0 : index
    %194 = vector.load %arg14[%c0_166, %c0_167, %c0_168] : memref<2x1x32xf32, #tpu.memory_space<vmem>>, vector<1x1x32xf32>
    %195 = vector.shape_cast %194 : vector<1x1x32xf32> to vector<1x32xf32>
    %cst_169 = arith.constant dense<0.000000e+00> : vector<10xf32>
    %196 = vector.multi_reduction <add>, %191, %cst_169 [1] : vector<10x32xf32> to vector<10xf32>
    %197 = vector.shape_cast %196 : vector<10xf32> to vector<10x1xf32>
    %cst_170 = arith.constant 3.200000e+01 : f32
    %198 = vector.broadcast %cst_170 : f32 to vector<10x1xf32>
    %199 = arith.divf %197, %198 : vector<10x1xf32>
    %200 = vector.broadcast %199 : vector<10x1xf32> to vector<10x32xf32>
    %201 = arith.subf %191, %200 : vector<10x32xf32>
    %202 = arith.mulf %201, %201 : vector<10x32xf32>
    %cst_171 = arith.constant dense<0.000000e+00> : vector<10xf32>
    %203 = vector.multi_reduction <add>, %202, %cst_171 [1] : vector<10x32xf32> to vector<10xf32>
    %204 = vector.shape_cast %203 : vector<10xf32> to vector<10x1xf32>
    %cst_172 = arith.constant 3.200000e+01 : f32
    %205 = vector.broadcast %cst_172 : f32 to vector<10x1xf32>
    %206 = arith.divf %204, %205 : vector<10x1xf32>
    %cst_173 = arith.constant 9.99999974E-6 : f32
    %207 = vector.broadcast %cst_173 : f32 to vector<10x1xf32>
    %208 = arith.addf %206, %207 : vector<10x1xf32>
    %209 = math.rsqrt %208 : vector<10x1xf32>
    %210 = vector.broadcast %209 : vector<10x1xf32> to vector<10x32xf32>
    %211 = arith.mulf %201, %210 : vector<10x32xf32>
    %212 = vector.broadcast %193 : vector<1x32xf32> to vector<10x32xf32>
    %213 = arith.mulf %211, %212 : vector<10x32xf32>
    %214 = vector.broadcast %195 : vector<1x32xf32> to vector<10x32xf32>
    %215 = arith.addf %213, %214 : vector<10x32xf32>
    %c0_174 = arith.constant 0 : index
    %c0_175 = arith.constant 0 : index
    %c0_176 = arith.constant 0 : index
    %216 = vector.load %arg15[%c0_174, %c0_175, %c0_176] : memref<2x32x128xf32, #tpu.memory_space<vmem>>, vector<1x32x128xf32>
    %217 = vector.shape_cast %216 : vector<1x32x128xf32> to vector<32x128xf32>
    %cst_177 = arith.constant dense<0.000000e+00> : vector<10x128xf32>
    %218 = tpu.matmul %215, %217, %cst_177 {dimension_numbers = #tpu.dot_dimension_numbers<[1], [0], [0], [1], [0, 0, 1, 1], [], []>} : vector<10x32xf32>, vector<32x128xf32>, vector<10x128xf32> -> vector<10x128xf32>
    %c0_178 = arith.constant 0 : index
    %c0_179 = arith.constant 0 : index
    %c0_180 = arith.constant 0 : index
    %219 = vector.load %arg16[%c0_178, %c0_179, %c0_180] : memref<2x1x128xf32, #tpu.memory_space<vmem>>, vector<1x1x128xf32>
    %220 = vector.shape_cast %219 : vector<1x1x128xf32> to vector<1x128xf32>
    %221 = vector.broadcast %220 : vector<1x128xf32> to vector<10x128xf32>
    %222 = arith.addf %218, %221 : vector<10x128xf32>
    %cst_181 = arith.constant 5.000000e-01 : f32
    %223 = vector.broadcast %cst_181 : f32 to vector<10x128xf32>
    %224 = arith.mulf %223, %222 : vector<10x128xf32>
    %cst_182 = arith.constant 0.707106769 : f32
    %225 = vector.broadcast %cst_182 : f32 to vector<10x128xf32>
    %226 = arith.mulf %222, %225 : vector<10x128xf32>
    %227 = math.absf %226 : vector<10x128xf32>
    %cst_183 = arith.constant 0.327591091 : f32
    %228 = vector.broadcast %cst_183 : f32 to vector<10x128xf32>
    %229 = arith.mulf %228, %227 : vector<10x128xf32>
    %cst_184 = arith.constant 1.000000e+00 : f32
    %230 = vector.broadcast %cst_184 : f32 to vector<10x128xf32>
    %231 = arith.addf %230, %229 : vector<10x128xf32>
    %cst_185 = arith.constant 1.000000e+00 : f32
    %232 = vector.broadcast %cst_185 : f32 to vector<10x128xf32>
    %233 = arith.divf %232, %231 : vector<10x128xf32>
    %cst_186 = arith.constant 1.06140542 : f32
    %234 = vector.broadcast %cst_186 : f32 to vector<10x128xf32>
    %235 = arith.mulf %234, %233 : vector<10x128xf32>
    %cst_187 = arith.constant -1.45315206 : f32
    %236 = vector.broadcast %cst_187 : f32 to vector<10x128xf32>
    %237 = arith.addf %235, %236 : vector<10x128xf32>
    %238 = arith.mulf %237, %233 : vector<10x128xf32>
    %cst_188 = arith.constant 1.42141378 : f32
    %239 = vector.broadcast %cst_188 : f32 to vector<10x128xf32>
    %240 = arith.addf %238, %239 : vector<10x128xf32>
    %241 = arith.mulf %240, %233 : vector<10x128xf32>
    %cst_189 = arith.constant -0.284496725 : f32
    %242 = vector.broadcast %cst_189 : f32 to vector<10x128xf32>
    %243 = arith.addf %241, %242 : vector<10x128xf32>
    %244 = arith.mulf %243, %233 : vector<10x128xf32>
    %cst_190 = arith.constant 0.254829586 : f32
    %245 = vector.broadcast %cst_190 : f32 to vector<10x128xf32>
    %246 = arith.addf %244, %245 : vector<10x128xf32>
    %247 = arith.mulf %246, %233 : vector<10x128xf32>
    %cst_191 = arith.constant 0.000000e+00 : f32
    %248 = vector.broadcast %cst_191 : f32 to vector<10x128xf32>
    %249 = arith.subf %248, %227 : vector<10x128xf32>
    %250 = arith.mulf %249, %227 : vector<10x128xf32>
    %251 = math.exp %250 : vector<10x128xf32>
    %252 = arith.mulf %247, %251 : vector<10x128xf32>
    %cst_192 = arith.constant 1.000000e+00 : f32
    %253 = vector.broadcast %cst_192 : f32 to vector<10x128xf32>
    %254 = arith.subf %253, %252 : vector<10x128xf32>
    %cst_193 = arith.constant 0.000000e+00 : f32
    %255 = vector.broadcast %cst_193 : f32 to vector<10x128xf32>
    %256 = arith.cmpf olt, %226, %255 : vector<10x128xf32>
    %cst_194 = arith.constant 0.000000e+00 : f32
    %257 = vector.broadcast %cst_194 : f32 to vector<10x128xf32>
    %258 = arith.subf %257, %254 : vector<10x128xf32>
    %259 = arith.select %256, %258, %254 : vector<10x128xi1>, vector<10x128xf32>
    %cst_195 = arith.constant 1.000000e+00 : f32
    %260 = vector.broadcast %cst_195 : f32 to vector<10x128xf32>
    %261 = arith.addf %260, %259 : vector<10x128xf32>
    %262 = arith.mulf %224, %261 : vector<10x128xf32>
    %c0_196 = arith.constant 0 : index
    %c0_197 = arith.constant 0 : index
    %c0_198 = arith.constant 0 : index
    %263 = vector.load %arg17[%c0_196, %c0_197, %c0_198] : memref<2x128x32xf32, #tpu.memory_space<vmem>>, vector<1x128x32xf32>
    %264 = vector.shape_cast %263 : vector<1x128x32xf32> to vector<128x32xf32>
    %cst_199 = arith.constant dense<0.000000e+00> : vector<10x32xf32>
    %265 = tpu.matmul %262, %264, %cst_199 {dimension_numbers = #tpu.dot_dimension_numbers<[1], [0], [0], [1], [0, 0, 1, 1], [], []>} : vector<10x128xf32>, vector<128x32xf32>, vector<10x32xf32> -> vector<10x32xf32>
    %c0_200 = arith.constant 0 : index
    %c0_201 = arith.constant 0 : index
    %c0_202 = arith.constant 0 : index
    %266 = vector.load %arg18[%c0_200, %c0_201, %c0_202] : memref<2x1x32xf32, #tpu.memory_space<vmem>>, vector<1x1x32xf32>
    %267 = vector.shape_cast %266 : vector<1x1x32xf32> to vector<1x32xf32>
    %268 = vector.broadcast %267 : vector<1x32xf32> to vector<10x32xf32>
    %269 = arith.addf %265, %268 : vector<10x32xf32>
    %270 = arith.addf %191, %269 : vector<10x32xf32>
    %c1_203 = arith.constant 1 : index
    %c0_204 = arith.constant 0 : index
    %c0_205 = arith.constant 0 : index
    %271 = vector.load %arg3[%c1_203, %c0_204, %c0_205] : memref<2x1x32xf32, #tpu.memory_space<vmem>>, vector<1x1x32xf32>
    %272 = vector.shape_cast %271 : vector<1x1x32xf32> to vector<1x32xf32>
    %c1_206 = arith.constant 1 : index
    %c0_207 = arith.constant 0 : index
    %c0_208 = arith.constant 0 : index
    %273 = vector.load %arg4[%c1_206, %c0_207, %c0_208] : memref<2x1x32xf32, #tpu.memory_space<vmem>>, vector<1x1x32xf32>
    %274 = vector.shape_cast %273 : vector<1x1x32xf32> to vector<1x32xf32>
    %cst_209 = arith.constant dense<0.000000e+00> : vector<10xf32>
    %275 = vector.multi_reduction <add>, %270, %cst_209 [1] : vector<10x32xf32> to vector<10xf32>
    %276 = vector.shape_cast %275 : vector<10xf32> to vector<10x1xf32>
    %cst_210 = arith.constant 3.200000e+01 : f32
    %277 = vector.broadcast %cst_210 : f32 to vector<10x1xf32>
    %278 = arith.divf %276, %277 : vector<10x1xf32>
    %279 = vector.broadcast %278 : vector<10x1xf32> to vector<10x32xf32>
    %280 = arith.subf %270, %279 : vector<10x32xf32>
    %281 = arith.mulf %280, %280 : vector<10x32xf32>
    %cst_211 = arith.constant dense<0.000000e+00> : vector<10xf32>
    %282 = vector.multi_reduction <add>, %281, %cst_211 [1] : vector<10x32xf32> to vector<10xf32>
    %283 = vector.shape_cast %282 : vector<10xf32> to vector<10x1xf32>
    %cst_212 = arith.constant 3.200000e+01 : f32
    %284 = vector.broadcast %cst_212 : f32 to vector<10x1xf32>
    %285 = arith.divf %283, %284 : vector<10x1xf32>
    %cst_213 = arith.constant 9.99999974E-6 : f32
    %286 = vector.broadcast %cst_213 : f32 to vector<10x1xf32>
    %287 = arith.addf %285, %286 : vector<10x1xf32>
    %288 = math.rsqrt %287 : vector<10x1xf32>
    %289 = vector.broadcast %288 : vector<10x1xf32> to vector<10x32xf32>
    %290 = arith.mulf %280, %289 : vector<10x32xf32>
    %291 = vector.broadcast %272 : vector<1x32xf32> to vector<10x32xf32>
    %292 = arith.mulf %290, %291 : vector<10x32xf32>
    %293 = vector.broadcast %274 : vector<1x32xf32> to vector<10x32xf32>
    %294 = arith.addf %292, %293 : vector<10x32xf32>
    %c1_214 = arith.constant 1 : index
    %c0_215 = arith.constant 0 : index
    %c0_216 = arith.constant 0 : index
    %c0_217 = arith.constant 0 : index
    %295 = vector.load %arg5[%c1_214, %c0_215, %c0_216, %c0_217] : memref<2x4x32x8xf32, #tpu.memory_space<vmem>>, vector<1x1x32x8xf32>
    %296 = vector.shape_cast %295 : vector<1x1x32x8xf32> to vector<32x8xf32>
    %cst_218 = arith.constant dense<0.000000e+00> : vector<10x8xf32>
    %297 = tpu.matmul %294, %296, %cst_218 {dimension_numbers = #tpu.dot_dimension_numbers<[1], [0], [0], [1], [0, 0, 1, 1], [], []>} : vector<10x32xf32>, vector<32x8xf32>, vector<10x8xf32> -> vector<10x8xf32>
    %c1_219 = arith.constant 1 : index
    %c0_220 = arith.constant 0 : index
    %c0_221 = arith.constant 0 : index
    %c0_222 = arith.constant 0 : index
    %298 = vector.load %arg6[%c1_219, %c0_220, %c0_221, %c0_222] : memref<2x4x1x8xf32, #tpu.memory_space<vmem>>, vector<1x1x1x8xf32>
    %299 = vector.shape_cast %298 : vector<1x1x1x8xf32> to vector<1x8xf32>
    %300 = vector.broadcast %299 : vector<1x8xf32> to vector<10x8xf32>
    %301 = arith.addf %297, %300 : vector<10x8xf32>
    %c1_223 = arith.constant 1 : index
    %c0_224 = arith.constant 0 : index
    %c0_225 = arith.constant 0 : index
    %c0_226 = arith.constant 0 : index
    %302 = vector.load %arg7[%c1_223, %c0_224, %c0_225, %c0_226] : memref<2x4x32x8xf32, #tpu.memory_space<vmem>>, vector<1x1x32x8xf32>
    %303 = vector.shape_cast %302 : vector<1x1x32x8xf32> to vector<32x8xf32>
    %cst_227 = arith.constant dense<0.000000e+00> : vector<10x8xf32>
    %304 = tpu.matmul %294, %303, %cst_227 {dimension_numbers = #tpu.dot_dimension_numbers<[1], [0], [0], [1], [0, 0, 1, 1], [], []>} : vector<10x32xf32>, vector<32x8xf32>, vector<10x8xf32> -> vector<10x8xf32>
    %c1_228 = arith.constant 1 : index
    %c0_229 = arith.constant 0 : index
    %c0_230 = arith.constant 0 : index
    %c0_231 = arith.constant 0 : index
    %305 = vector.load %arg8[%c1_228, %c0_229, %c0_230, %c0_231] : memref<2x4x1x8xf32, #tpu.memory_space<vmem>>, vector<1x1x1x8xf32>
    %306 = vector.shape_cast %305 : vector<1x1x1x8xf32> to vector<1x8xf32>
    %307 = vector.broadcast %306 : vector<1x8xf32> to vector<10x8xf32>
    %308 = arith.addf %304, %307 : vector<10x8xf32>
    %c1_232 = arith.constant 1 : index
    %c0_233 = arith.constant 0 : index
    %c0_234 = arith.constant 0 : index
    %c0_235 = arith.constant 0 : index
    %309 = vector.load %arg9[%c1_232, %c0_233, %c0_234, %c0_235] : memref<2x4x32x8xf32, #tpu.memory_space<vmem>>, vector<1x1x32x8xf32>
    %310 = vector.shape_cast %309 : vector<1x1x32x8xf32> to vector<32x8xf32>
    %cst_236 = arith.constant dense<0.000000e+00> : vector<10x8xf32>
    %311 = tpu.matmul %294, %310, %cst_236 {dimension_numbers = #tpu.dot_dimension_numbers<[1], [0], [0], [1], [0, 0, 1, 1], [], []>} : vector<10x32xf32>, vector<32x8xf32>, vector<10x8xf32> -> vector<10x8xf32>
    %c1_237 = arith.constant 1 : index
    %c0_238 = arith.constant 0 : index
    %c0_239 = arith.constant 0 : index
    %c0_240 = arith.constant 0 : index
    %312 = vector.load %arg10[%c1_237, %c0_238, %c0_239, %c0_240] : memref<2x4x1x8xf32, #tpu.memory_space<vmem>>, vector<1x1x1x8xf32>
    %313 = vector.shape_cast %312 : vector<1x1x1x8xf32> to vector<1x8xf32>
    %314 = vector.broadcast %313 : vector<1x8xf32> to vector<10x8xf32>
    %315 = arith.addf %311, %314 : vector<10x8xf32>
    %cst_241 = arith.constant dense<0.000000e+00> : vector<10x10xf32>
    %316 = tpu.matmul %301, %308, %cst_241 {dimension_numbers = #tpu.dot_dimension_numbers<[1], [1], [0], [0], [0, 0, 1, 0], [], []>} : vector<10x8xf32>, vector<10x8xf32>, vector<10x10xf32> -> vector<10x10xf32>
    %cst_242 = arith.constant 0.353553385 : f32
    %317 = vector.broadcast %cst_242 : f32 to vector<10x10xf32>
    %318 = arith.mulf %316, %317 : vector<10x10xf32>
    %319 = arith.addf %318, %3 : vector<10x10xf32>
    %cst_243 = arith.constant dense<0xFF800000> : vector<10xf32>
    %320 = vector.multi_reduction <maximumf>, %319, %cst_243 [1] : vector<10x10xf32> to vector<10xf32>
    %321 = vector.shape_cast %320 : vector<10xf32> to vector<10x1xf32>
    %322 = vector.broadcast %321 : vector<10x1xf32> to vector<10x10xf32>
    %323 = arith.subf %319, %322 : vector<10x10xf32>
    %324 = math.exp %323 : vector<10x10xf32>
    %cst_244 = arith.constant dense<0.000000e+00> : vector<10xf32>
    %325 = vector.multi_reduction <add>, %324, %cst_244 [1] : vector<10x10xf32> to vector<10xf32>
    %326 = vector.shape_cast %325 : vector<10xf32> to vector<10x1xf32>
    %327 = tpu.reciprocal %326 {approx = true} : vector<10x1xf32> -> vector<10x1xf32>
    %328 = vector.broadcast %327 : vector<10x1xf32> to vector<10x10xf32>
    %329 = arith.mulf %324, %328 : vector<10x10xf32>
    %cst_245 = arith.constant dense<0.000000e+00> : vector<10x8xf32>
    %330 = tpu.matmul %329, %315, %cst_245 {dimension_numbers = #tpu.dot_dimension_numbers<[1], [0], [0], [1], [0, 0, 1, 1], [], []>} : vector<10x10xf32>, vector<10x8xf32>, vector<10x8xf32> -> vector<10x8xf32>
    %c1_246 = arith.constant 1 : index
    %c0_247 = arith.constant 0 : index
    %c0_248 = arith.constant 0 : index
    %c0_249 = arith.constant 0 : index
    %331 = vector.load %arg11[%c1_246, %c0_247, %c0_248, %c0_249] : memref<2x4x8x32xf32, #tpu.memory_space<vmem>>, vector<1x1x8x32xf32>
    %332 = vector.shape_cast %331 : vector<1x1x8x32xf32> to vector<8x32xf32>
    %cst_250 = arith.constant dense<0.000000e+00> : vector<10x32xf32>
    %333 = tpu.matmul %330, %332, %cst_250 {dimension_numbers = #tpu.dot_dimension_numbers<[1], [0], [0], [1], [0, 0, 1, 1], [], []>} : vector<10x8xf32>, vector<8x32xf32>, vector<10x32xf32> -> vector<10x32xf32>
    %c1_251 = arith.constant 1 : index
    %c1_252 = arith.constant 1 : index
    %c0_253 = arith.constant 0 : index
    %c0_254 = arith.constant 0 : index
    %334 = vector.load %arg5[%c1_251, %c1_252, %c0_253, %c0_254] : memref<2x4x32x8xf32, #tpu.memory_space<vmem>>, vector<1x1x32x8xf32>
    %335 = vector.shape_cast %334 : vector<1x1x32x8xf32> to vector<32x8xf32>
    %cst_255 = arith.constant dense<0.000000e+00> : vector<10x8xf32>
    %336 = tpu.matmul %294, %335, %cst_255 {dimension_numbers = #tpu.dot_dimension_numbers<[1], [0], [0], [1], [0, 0, 1, 1], [], []>} : vector<10x32xf32>, vector<32x8xf32>, vector<10x8xf32> -> vector<10x8xf32>
    %c1_256 = arith.constant 1 : index
    %c1_257 = arith.constant 1 : index
    %c0_258 = arith.constant 0 : index
    %c0_259 = arith.constant 0 : index
    %337 = vector.load %arg6[%c1_256, %c1_257, %c0_258, %c0_259] : memref<2x4x1x8xf32, #tpu.memory_space<vmem>>, vector<1x1x1x8xf32>
    %338 = vector.shape_cast %337 : vector<1x1x1x8xf32> to vector<1x8xf32>
    %339 = vector.broadcast %338 : vector<1x8xf32> to vector<10x8xf32>
    %340 = arith.addf %336, %339 : vector<10x8xf32>
    %c1_260 = arith.constant 1 : index
    %c1_261 = arith.constant 1 : index
    %c0_262 = arith.constant 0 : index
    %c0_263 = arith.constant 0 : index
    %341 = vector.load %arg7[%c1_260, %c1_261, %c0_262, %c0_263] : memref<2x4x32x8xf32, #tpu.memory_space<vmem>>, vector<1x1x32x8xf32>
    %342 = vector.shape_cast %341 : vector<1x1x32x8xf32> to vector<32x8xf32>
    %cst_264 = arith.constant dense<0.000000e+00> : vector<10x8xf32>
    %343 = tpu.matmul %294, %342, %cst_264 {dimension_numbers = #tpu.dot_dimension_numbers<[1], [0], [0], [1], [0, 0, 1, 1], [], []>} : vector<10x32xf32>, vector<32x8xf32>, vector<10x8xf32> -> vector<10x8xf32>
    %c1_265 = arith.constant 1 : index
    %c1_266 = arith.constant 1 : index
    %c0_267 = arith.constant 0 : index
    %c0_268 = arith.constant 0 : index
    %344 = vector.load %arg8[%c1_265, %c1_266, %c0_267, %c0_268] : memref<2x4x1x8xf32, #tpu.memory_space<vmem>>, vector<1x1x1x8xf32>
    %345 = vector.shape_cast %344 : vector<1x1x1x8xf32> to vector<1x8xf32>
    %346 = vector.broadcast %345 : vector<1x8xf32> to vector<10x8xf32>
    %347 = arith.addf %343, %346 : vector<10x8xf32>
    %c1_269 = arith.constant 1 : index
    %c1_270 = arith.constant 1 : index
    %c0_271 = arith.constant 0 : index
    %c0_272 = arith.constant 0 : index
    %348 = vector.load %arg9[%c1_269, %c1_270, %c0_271, %c0_272] : memref<2x4x32x8xf32, #tpu.memory_space<vmem>>, vector<1x1x32x8xf32>
    %349 = vector.shape_cast %348 : vector<1x1x32x8xf32> to vector<32x8xf32>
    %cst_273 = arith.constant dense<0.000000e+00> : vector<10x8xf32>
    %350 = tpu.matmul %294, %349, %cst_273 {dimension_numbers = #tpu.dot_dimension_numbers<[1], [0], [0], [1], [0, 0, 1, 1], [], []>} : vector<10x32xf32>, vector<32x8xf32>, vector<10x8xf32> -> vector<10x8xf32>
    %c1_274 = arith.constant 1 : index
    %c1_275 = arith.constant 1 : index
    %c0_276 = arith.constant 0 : index
    %c0_277 = arith.constant 0 : index
    %351 = vector.load %arg10[%c1_274, %c1_275, %c0_276, %c0_277] : memref<2x4x1x8xf32, #tpu.memory_space<vmem>>, vector<1x1x1x8xf32>
    %352 = vector.shape_cast %351 : vector<1x1x1x8xf32> to vector<1x8xf32>
    %353 = vector.broadcast %352 : vector<1x8xf32> to vector<10x8xf32>
    %354 = arith.addf %350, %353 : vector<10x8xf32>
    %cst_278 = arith.constant dense<0.000000e+00> : vector<10x10xf32>
    %355 = tpu.matmul %340, %347, %cst_278 {dimension_numbers = #tpu.dot_dimension_numbers<[1], [1], [0], [0], [0, 0, 1, 0], [], []>} : vector<10x8xf32>, vector<10x8xf32>, vector<10x10xf32> -> vector<10x10xf32>
    %cst_279 = arith.constant 0.353553385 : f32
    %356 = vector.broadcast %cst_279 : f32 to vector<10x10xf32>
    %357 = arith.mulf %355, %356 : vector<10x10xf32>
    %358 = arith.addf %357, %3 : vector<10x10xf32>
    %cst_280 = arith.constant dense<0xFF800000> : vector<10xf32>
    %359 = vector.multi_reduction <maximumf>, %358, %cst_280 [1] : vector<10x10xf32> to vector<10xf32>
    %360 = vector.shape_cast %359 : vector<10xf32> to vector<10x1xf32>
    %361 = vector.broadcast %360 : vector<10x1xf32> to vector<10x10xf32>
    %362 = arith.subf %358, %361 : vector<10x10xf32>
    %363 = math.exp %362 : vector<10x10xf32>
    %cst_281 = arith.constant dense<0.000000e+00> : vector<10xf32>
    %364 = vector.multi_reduction <add>, %363, %cst_281 [1] : vector<10x10xf32> to vector<10xf32>
    %365 = vector.shape_cast %364 : vector<10xf32> to vector<10x1xf32>
    %366 = tpu.reciprocal %365 {approx = true} : vector<10x1xf32> -> vector<10x1xf32>
    %367 = vector.broadcast %366 : vector<10x1xf32> to vector<10x10xf32>
    %368 = arith.mulf %363, %367 : vector<10x10xf32>
    %cst_282 = arith.constant dense<0.000000e+00> : vector<10x8xf32>
    %369 = tpu.matmul %368, %354, %cst_282 {dimension_numbers = #tpu.dot_dimension_numbers<[1], [0], [0], [1], [0, 0, 1, 1], [], []>} : vector<10x10xf32>, vector<10x8xf32>, vector<10x8xf32> -> vector<10x8xf32>
    %c1_283 = arith.constant 1 : index
    %c1_284 = arith.constant 1 : index
    %c0_285 = arith.constant 0 : index
    %c0_286 = arith.constant 0 : index
    %370 = vector.load %arg11[%c1_283, %c1_284, %c0_285, %c0_286] : memref<2x4x8x32xf32, #tpu.memory_space<vmem>>, vector<1x1x8x32xf32>
    %371 = vector.shape_cast %370 : vector<1x1x8x32xf32> to vector<8x32xf32>
    %cst_287 = arith.constant dense<0.000000e+00> : vector<10x32xf32>
    %372 = tpu.matmul %369, %371, %cst_287 {dimension_numbers = #tpu.dot_dimension_numbers<[1], [0], [0], [1], [0, 0, 1, 1], [], []>} : vector<10x8xf32>, vector<8x32xf32>, vector<10x32xf32> -> vector<10x32xf32>
    %373 = arith.addf %333, %372 : vector<10x32xf32>
    %c1_288 = arith.constant 1 : index
    %c2_289 = arith.constant 2 : index
    %c0_290 = arith.constant 0 : index
    %c0_291 = arith.constant 0 : index
    %374 = vector.load %arg5[%c1_288, %c2_289, %c0_290, %c0_291] : memref<2x4x32x8xf32, #tpu.memory_space<vmem>>, vector<1x1x32x8xf32>
    %375 = vector.shape_cast %374 : vector<1x1x32x8xf32> to vector<32x8xf32>
    %cst_292 = arith.constant dense<0.000000e+00> : vector<10x8xf32>
    %376 = tpu.matmul %294, %375, %cst_292 {dimension_numbers = #tpu.dot_dimension_numbers<[1], [0], [0], [1], [0, 0, 1, 1], [], []>} : vector<10x32xf32>, vector<32x8xf32>, vector<10x8xf32> -> vector<10x8xf32>
    %c1_293 = arith.constant 1 : index
    %c2_294 = arith.constant 2 : index
    %c0_295 = arith.constant 0 : index
    %c0_296 = arith.constant 0 : index
    %377 = vector.load %arg6[%c1_293, %c2_294, %c0_295, %c0_296] : memref<2x4x1x8xf32, #tpu.memory_space<vmem>>, vector<1x1x1x8xf32>
    %378 = vector.shape_cast %377 : vector<1x1x1x8xf32> to vector<1x8xf32>
    %379 = vector.broadcast %378 : vector<1x8xf32> to vector<10x8xf32>
    %380 = arith.addf %376, %379 : vector<10x8xf32>
    %c1_297 = arith.constant 1 : index
    %c2_298 = arith.constant 2 : index
    %c0_299 = arith.constant 0 : index
    %c0_300 = arith.constant 0 : index
    %381 = vector.load %arg7[%c1_297, %c2_298, %c0_299, %c0_300] : memref<2x4x32x8xf32, #tpu.memory_space<vmem>>, vector<1x1x32x8xf32>
    %382 = vector.shape_cast %381 : vector<1x1x32x8xf32> to vector<32x8xf32>
    %cst_301 = arith.constant dense<0.000000e+00> : vector<10x8xf32>
    %383 = tpu.matmul %294, %382, %cst_301 {dimension_numbers = #tpu.dot_dimension_numbers<[1], [0], [0], [1], [0, 0, 1, 1], [], []>} : vector<10x32xf32>, vector<32x8xf32>, vector<10x8xf32> -> vector<10x8xf32>
    %c1_302 = arith.constant 1 : index
    %c2_303 = arith.constant 2 : index
    %c0_304 = arith.constant 0 : index
    %c0_305 = arith.constant 0 : index
    %384 = vector.load %arg8[%c1_302, %c2_303, %c0_304, %c0_305] : memref<2x4x1x8xf32, #tpu.memory_space<vmem>>, vector<1x1x1x8xf32>
    %385 = vector.shape_cast %384 : vector<1x1x1x8xf32> to vector<1x8xf32>
    %386 = vector.broadcast %385 : vector<1x8xf32> to vector<10x8xf32>
    %387 = arith.addf %383, %386 : vector<10x8xf32>
    %c1_306 = arith.constant 1 : index
    %c2_307 = arith.constant 2 : index
    %c0_308 = arith.constant 0 : index
    %c0_309 = arith.constant 0 : index
    %388 = vector.load %arg9[%c1_306, %c2_307, %c0_308, %c0_309] : memref<2x4x32x8xf32, #tpu.memory_space<vmem>>, vector<1x1x32x8xf32>
    %389 = vector.shape_cast %388 : vector<1x1x32x8xf32> to vector<32x8xf32>
    %cst_310 = arith.constant dense<0.000000e+00> : vector<10x8xf32>
    %390 = tpu.matmul %294, %389, %cst_310 {dimension_numbers = #tpu.dot_dimension_numbers<[1], [0], [0], [1], [0, 0, 1, 1], [], []>} : vector<10x32xf32>, vector<32x8xf32>, vector<10x8xf32> -> vector<10x8xf32>
    %c1_311 = arith.constant 1 : index
    %c2_312 = arith.constant 2 : index
    %c0_313 = arith.constant 0 : index
    %c0_314 = arith.constant 0 : index
    %391 = vector.load %arg10[%c1_311, %c2_312, %c0_313, %c0_314] : memref<2x4x1x8xf32, #tpu.memory_space<vmem>>, vector<1x1x1x8xf32>
    %392 = vector.shape_cast %391 : vector<1x1x1x8xf32> to vector<1x8xf32>
    %393 = vector.broadcast %392 : vector<1x8xf32> to vector<10x8xf32>
    %394 = arith.addf %390, %393 : vector<10x8xf32>
    %cst_315 = arith.constant dense<0.000000e+00> : vector<10x10xf32>
    %395 = tpu.matmul %380, %387, %cst_315 {dimension_numbers = #tpu.dot_dimension_numbers<[1], [1], [0], [0], [0, 0, 1, 0], [], []>} : vector<10x8xf32>, vector<10x8xf32>, vector<10x10xf32> -> vector<10x10xf32>
    %cst_316 = arith.constant 0.353553385 : f32
    %396 = vector.broadcast %cst_316 : f32 to vector<10x10xf32>
    %397 = arith.mulf %395, %396 : vector<10x10xf32>
    %398 = arith.addf %397, %3 : vector<10x10xf32>
    %cst_317 = arith.constant dense<0xFF800000> : vector<10xf32>
    %399 = vector.multi_reduction <maximumf>, %398, %cst_317 [1] : vector<10x10xf32> to vector<10xf32>
    %400 = vector.shape_cast %399 : vector<10xf32> to vector<10x1xf32>
    %401 = vector.broadcast %400 : vector<10x1xf32> to vector<10x10xf32>
    %402 = arith.subf %398, %401 : vector<10x10xf32>
    %403 = math.exp %402 : vector<10x10xf32>
    %cst_318 = arith.constant dense<0.000000e+00> : vector<10xf32>
    %404 = vector.multi_reduction <add>, %403, %cst_318 [1] : vector<10x10xf32> to vector<10xf32>
    %405 = vector.shape_cast %404 : vector<10xf32> to vector<10x1xf32>
    %406 = tpu.reciprocal %405 {approx = true} : vector<10x1xf32> -> vector<10x1xf32>
    %407 = vector.broadcast %406 : vector<10x1xf32> to vector<10x10xf32>
    %408 = arith.mulf %403, %407 : vector<10x10xf32>
    %cst_319 = arith.constant dense<0.000000e+00> : vector<10x8xf32>
    %409 = tpu.matmul %408, %394, %cst_319 {dimension_numbers = #tpu.dot_dimension_numbers<[1], [0], [0], [1], [0, 0, 1, 1], [], []>} : vector<10x10xf32>, vector<10x8xf32>, vector<10x8xf32> -> vector<10x8xf32>
    %c1_320 = arith.constant 1 : index
    %c2_321 = arith.constant 2 : index
    %c0_322 = arith.constant 0 : index
    %c0_323 = arith.constant 0 : index
    %410 = vector.load %arg11[%c1_320, %c2_321, %c0_322, %c0_323] : memref<2x4x8x32xf32, #tpu.memory_space<vmem>>, vector<1x1x8x32xf32>
    %411 = vector.shape_cast %410 : vector<1x1x8x32xf32> to vector<8x32xf32>
    %cst_324 = arith.constant dense<0.000000e+00> : vector<10x32xf32>
    %412 = tpu.matmul %409, %411, %cst_324 {dimension_numbers = #tpu.dot_dimension_numbers<[1], [0], [0], [1], [0, 0, 1, 1], [], []>} : vector<10x8xf32>, vector<8x32xf32>, vector<10x32xf32> -> vector<10x32xf32>
    %413 = arith.addf %373, %412 : vector<10x32xf32>
    %c1_325 = arith.constant 1 : index
    %c3_326 = arith.constant 3 : index
    %c0_327 = arith.constant 0 : index
    %c0_328 = arith.constant 0 : index
    %414 = vector.load %arg5[%c1_325, %c3_326, %c0_327, %c0_328] : memref<2x4x32x8xf32, #tpu.memory_space<vmem>>, vector<1x1x32x8xf32>
    %415 = vector.shape_cast %414 : vector<1x1x32x8xf32> to vector<32x8xf32>
    %cst_329 = arith.constant dense<0.000000e+00> : vector<10x8xf32>
    %416 = tpu.matmul %294, %415, %cst_329 {dimension_numbers = #tpu.dot_dimension_numbers<[1], [0], [0], [1], [0, 0, 1, 1], [], []>} : vector<10x32xf32>, vector<32x8xf32>, vector<10x8xf32> -> vector<10x8xf32>
    %c1_330 = arith.constant 1 : index
    %c3_331 = arith.constant 3 : index
    %c0_332 = arith.constant 0 : index
    %c0_333 = arith.constant 0 : index
    %417 = vector.load %arg6[%c1_330, %c3_331, %c0_332, %c0_333] : memref<2x4x1x8xf32, #tpu.memory_space<vmem>>, vector<1x1x1x8xf32>
    %418 = vector.shape_cast %417 : vector<1x1x1x8xf32> to vector<1x8xf32>
    %419 = vector.broadcast %418 : vector<1x8xf32> to vector<10x8xf32>
    %420 = arith.addf %416, %419 : vector<10x8xf32>
    %c1_334 = arith.constant 1 : index
    %c3_335 = arith.constant 3 : index
    %c0_336 = arith.constant 0 : index
    %c0_337 = arith.constant 0 : index
    %421 = vector.load %arg7[%c1_334, %c3_335, %c0_336, %c0_337] : memref<2x4x32x8xf32, #tpu.memory_space<vmem>>, vector<1x1x32x8xf32>
    %422 = vector.shape_cast %421 : vector<1x1x32x8xf32> to vector<32x8xf32>
    %cst_338 = arith.constant dense<0.000000e+00> : vector<10x8xf32>
    %423 = tpu.matmul %294, %422, %cst_338 {dimension_numbers = #tpu.dot_dimension_numbers<[1], [0], [0], [1], [0, 0, 1, 1], [], []>} : vector<10x32xf32>, vector<32x8xf32>, vector<10x8xf32> -> vector<10x8xf32>
    %c1_339 = arith.constant 1 : index
    %c3_340 = arith.constant 3 : index
    %c0_341 = arith.constant 0 : index
    %c0_342 = arith.constant 0 : index
    %424 = vector.load %arg8[%c1_339, %c3_340, %c0_341, %c0_342] : memref<2x4x1x8xf32, #tpu.memory_space<vmem>>, vector<1x1x1x8xf32>
    %425 = vector.shape_cast %424 : vector<1x1x1x8xf32> to vector<1x8xf32>
    %426 = vector.broadcast %425 : vector<1x8xf32> to vector<10x8xf32>
    %427 = arith.addf %423, %426 : vector<10x8xf32>
    %c1_343 = arith.constant 1 : index
    %c3_344 = arith.constant 3 : index
    %c0_345 = arith.constant 0 : index
    %c0_346 = arith.constant 0 : index
    %428 = vector.load %arg9[%c1_343, %c3_344, %c0_345, %c0_346] : memref<2x4x32x8xf32, #tpu.memory_space<vmem>>, vector<1x1x32x8xf32>
    %429 = vector.shape_cast %428 : vector<1x1x32x8xf32> to vector<32x8xf32>
    %cst_347 = arith.constant dense<0.000000e+00> : vector<10x8xf32>
    %430 = tpu.matmul %294, %429, %cst_347 {dimension_numbers = #tpu.dot_dimension_numbers<[1], [0], [0], [1], [0, 0, 1, 1], [], []>} : vector<10x32xf32>, vector<32x8xf32>, vector<10x8xf32> -> vector<10x8xf32>
    %c1_348 = arith.constant 1 : index
    %c3_349 = arith.constant 3 : index
    %c0_350 = arith.constant 0 : index
    %c0_351 = arith.constant 0 : index
    %431 = vector.load %arg10[%c1_348, %c3_349, %c0_350, %c0_351] : memref<2x4x1x8xf32, #tpu.memory_space<vmem>>, vector<1x1x1x8xf32>
    %432 = vector.shape_cast %431 : vector<1x1x1x8xf32> to vector<1x8xf32>
    %433 = vector.broadcast %432 : vector<1x8xf32> to vector<10x8xf32>
    %434 = arith.addf %430, %433 : vector<10x8xf32>
    %cst_352 = arith.constant dense<0.000000e+00> : vector<10x10xf32>
    %435 = tpu.matmul %420, %427, %cst_352 {dimension_numbers = #tpu.dot_dimension_numbers<[1], [1], [0], [0], [0, 0, 1, 0], [], []>} : vector<10x8xf32>, vector<10x8xf32>, vector<10x10xf32> -> vector<10x10xf32>
    %cst_353 = arith.constant 0.353553385 : f32
    %436 = vector.broadcast %cst_353 : f32 to vector<10x10xf32>
    %437 = arith.mulf %435, %436 : vector<10x10xf32>
    %438 = arith.addf %437, %3 : vector<10x10xf32>
    %cst_354 = arith.constant dense<0xFF800000> : vector<10xf32>
    %439 = vector.multi_reduction <maximumf>, %438, %cst_354 [1] : vector<10x10xf32> to vector<10xf32>
    %440 = vector.shape_cast %439 : vector<10xf32> to vector<10x1xf32>
    %441 = vector.broadcast %440 : vector<10x1xf32> to vector<10x10xf32>
    %442 = arith.subf %438, %441 : vector<10x10xf32>
    %443 = math.exp %442 : vector<10x10xf32>
    %cst_355 = arith.constant dense<0.000000e+00> : vector<10xf32>
    %444 = vector.multi_reduction <add>, %443, %cst_355 [1] : vector<10x10xf32> to vector<10xf32>
    %445 = vector.shape_cast %444 : vector<10xf32> to vector<10x1xf32>
    %446 = tpu.reciprocal %445 {approx = true} : vector<10x1xf32> -> vector<10x1xf32>
    %447 = vector.broadcast %446 : vector<10x1xf32> to vector<10x10xf32>
    %448 = arith.mulf %443, %447 : vector<10x10xf32>
    %cst_356 = arith.constant dense<0.000000e+00> : vector<10x8xf32>
    %449 = tpu.matmul %448, %434, %cst_356 {dimension_numbers = #tpu.dot_dimension_numbers<[1], [0], [0], [1], [0, 0, 1, 1], [], []>} : vector<10x10xf32>, vector<10x8xf32>, vector<10x8xf32> -> vector<10x8xf32>
    %c1_357 = arith.constant 1 : index
    %c3_358 = arith.constant 3 : index
    %c0_359 = arith.constant 0 : index
    %c0_360 = arith.constant 0 : index
    %450 = vector.load %arg11[%c1_357, %c3_358, %c0_359, %c0_360] : memref<2x4x8x32xf32, #tpu.memory_space<vmem>>, vector<1x1x8x32xf32>
    %451 = vector.shape_cast %450 : vector<1x1x8x32xf32> to vector<8x32xf32>
    %cst_361 = arith.constant dense<0.000000e+00> : vector<10x32xf32>
    %452 = tpu.matmul %449, %451, %cst_361 {dimension_numbers = #tpu.dot_dimension_numbers<[1], [0], [0], [1], [0, 0, 1, 1], [], []>} : vector<10x8xf32>, vector<8x32xf32>, vector<10x32xf32> -> vector<10x32xf32>
    %453 = arith.addf %413, %452 : vector<10x32xf32>
    %454 = arith.addf %270, %453 : vector<10x32xf32>
    %c1_362 = arith.constant 1 : index
    %c0_363 = arith.constant 0 : index
    %c0_364 = arith.constant 0 : index
    %455 = vector.load %arg12[%c1_362, %c0_363, %c0_364] : memref<2x1x32xf32, #tpu.memory_space<vmem>>, vector<1x1x32xf32>
    %456 = vector.shape_cast %455 : vector<1x1x32xf32> to vector<1x32xf32>
    %457 = vector.broadcast %456 : vector<1x32xf32> to vector<10x32xf32>
    %458 = arith.addf %454, %457 : vector<10x32xf32>
    %c1_365 = arith.constant 1 : index
    %c0_366 = arith.constant 0 : index
    %c0_367 = arith.constant 0 : index
    %459 = vector.load %arg13[%c1_365, %c0_366, %c0_367] : memref<2x1x32xf32, #tpu.memory_space<vmem>>, vector<1x1x32xf32>
    %460 = vector.shape_cast %459 : vector<1x1x32xf32> to vector<1x32xf32>
    %c1_368 = arith.constant 1 : index
    %c0_369 = arith.constant 0 : index
    %c0_370 = arith.constant 0 : index
    %461 = vector.load %arg14[%c1_368, %c0_369, %c0_370] : memref<2x1x32xf32, #tpu.memory_space<vmem>>, vector<1x1x32xf32>
    %462 = vector.shape_cast %461 : vector<1x1x32xf32> to vector<1x32xf32>
    %cst_371 = arith.constant dense<0.000000e+00> : vector<10xf32>
    %463 = vector.multi_reduction <add>, %458, %cst_371 [1] : vector<10x32xf32> to vector<10xf32>
    %464 = vector.shape_cast %463 : vector<10xf32> to vector<10x1xf32>
    %cst_372 = arith.constant 3.200000e+01 : f32
    %465 = vector.broadcast %cst_372 : f32 to vector<10x1xf32>
    %466 = arith.divf %464, %465 : vector<10x1xf32>
    %467 = vector.broadcast %466 : vector<10x1xf32> to vector<10x32xf32>
    %468 = arith.subf %458, %467 : vector<10x32xf32>
    %469 = arith.mulf %468, %468 : vector<10x32xf32>
    %cst_373 = arith.constant dense<0.000000e+00> : vector<10xf32>
    %470 = vector.multi_reduction <add>, %469, %cst_373 [1] : vector<10x32xf32> to vector<10xf32>
    %471 = vector.shape_cast %470 : vector<10xf32> to vector<10x1xf32>
    %cst_374 = arith.constant 3.200000e+01 : f32
    %472 = vector.broadcast %cst_374 : f32 to vector<10x1xf32>
    %473 = arith.divf %471, %472 : vector<10x1xf32>
    %cst_375 = arith.constant 9.99999974E-6 : f32
    %474 = vector.broadcast %cst_375 : f32 to vector<10x1xf32>
    %475 = arith.addf %473, %474 : vector<10x1xf32>
    %476 = math.rsqrt %475 : vector<10x1xf32>
    %477 = vector.broadcast %476 : vector<10x1xf32> to vector<10x32xf32>
    %478 = arith.mulf %468, %477 : vector<10x32xf32>
    %479 = vector.broadcast %460 : vector<1x32xf32> to vector<10x32xf32>
    %480 = arith.mulf %478, %479 : vector<10x32xf32>
    %481 = vector.broadcast %462 : vector<1x32xf32> to vector<10x32xf32>
    %482 = arith.addf %480, %481 : vector<10x32xf32>
    %c1_376 = arith.constant 1 : index
    %c0_377 = arith.constant 0 : index
    %c0_378 = arith.constant 0 : index
    %483 = vector.load %arg15[%c1_376, %c0_377, %c0_378] : memref<2x32x128xf32, #tpu.memory_space<vmem>>, vector<1x32x128xf32>
    %484 = vector.shape_cast %483 : vector<1x32x128xf32> to vector<32x128xf32>
    %cst_379 = arith.constant dense<0.000000e+00> : vector<10x128xf32>
    %485 = tpu.matmul %482, %484, %cst_379 {dimension_numbers = #tpu.dot_dimension_numbers<[1], [0], [0], [1], [0, 0, 1, 1], [], []>} : vector<10x32xf32>, vector<32x128xf32>, vector<10x128xf32> -> vector<10x128xf32>
    %c1_380 = arith.constant 1 : index
    %c0_381 = arith.constant 0 : index
    %c0_382 = arith.constant 0 : index
    %486 = vector.load %arg16[%c1_380, %c0_381, %c0_382] : memref<2x1x128xf32, #tpu.memory_space<vmem>>, vector<1x1x128xf32>
    %487 = vector.shape_cast %486 : vector<1x1x128xf32> to vector<1x128xf32>
    %488 = vector.broadcast %487 : vector<1x128xf32> to vector<10x128xf32>
    %489 = arith.addf %485, %488 : vector<10x128xf32>
    %cst_383 = arith.constant 5.000000e-01 : f32
    %490 = vector.broadcast %cst_383 : f32 to vector<10x128xf32>
    %491 = arith.mulf %490, %489 : vector<10x128xf32>
    %cst_384 = arith.constant 0.707106769 : f32
    %492 = vector.broadcast %cst_384 : f32 to vector<10x128xf32>
    %493 = arith.mulf %489, %492 : vector<10x128xf32>
    %494 = math.absf %493 : vector<10x128xf32>
    %cst_385 = arith.constant 0.327591091 : f32
    %495 = vector.broadcast %cst_385 : f32 to vector<10x128xf32>
    %496 = arith.mulf %495, %494 : vector<10x128xf32>
    %cst_386 = arith.constant 1.000000e+00 : f32
    %497 = vector.broadcast %cst_386 : f32 to vector<10x128xf32>
    %498 = arith.addf %497, %496 : vector<10x128xf32>
    %cst_387 = arith.constant 1.000000e+00 : f32
    %499 = vector.broadcast %cst_387 : f32 to vector<10x128xf32>
    %500 = arith.divf %499, %498 : vector<10x128xf32>
    %cst_388 = arith.constant 1.06140542 : f32
    %501 = vector.broadcast %cst_388 : f32 to vector<10x128xf32>
    %502 = arith.mulf %501, %500 : vector<10x128xf32>
    %cst_389 = arith.constant -1.45315206 : f32
    %503 = vector.broadcast %cst_389 : f32 to vector<10x128xf32>
    %504 = arith.addf %502, %503 : vector<10x128xf32>
    %505 = arith.mulf %504, %500 : vector<10x128xf32>
    %cst_390 = arith.constant 1.42141378 : f32
    %506 = vector.broadcast %cst_390 : f32 to vector<10x128xf32>
    %507 = arith.addf %505, %506 : vector<10x128xf32>
    %508 = arith.mulf %507, %500 : vector<10x128xf32>
    %cst_391 = arith.constant -0.284496725 : f32
    %509 = vector.broadcast %cst_391 : f32 to vector<10x128xf32>
    %510 = arith.addf %508, %509 : vector<10x128xf32>
    %511 = arith.mulf %510, %500 : vector<10x128xf32>
    %cst_392 = arith.constant 0.254829586 : f32
    %512 = vector.broadcast %cst_392 : f32 to vector<10x128xf32>
    %513 = arith.addf %511, %512 : vector<10x128xf32>
    %514 = arith.mulf %513, %500 : vector<10x128xf32>
    %cst_393 = arith.constant 0.000000e+00 : f32
    %515 = vector.broadcast %cst_393 : f32 to vector<10x128xf32>
    %516 = arith.subf %515, %494 : vector<10x128xf32>
    %517 = arith.mulf %516, %494 : vector<10x128xf32>
    %518 = math.exp %517 : vector<10x128xf32>
    %519 = arith.mulf %514, %518 : vector<10x128xf32>
    %cst_394 = arith.constant 1.000000e+00 : f32
    %520 = vector.broadcast %cst_394 : f32 to vector<10x128xf32>
    %521 = arith.subf %520, %519 : vector<10x128xf32>
    %cst_395 = arith.constant 0.000000e+00 : f32
    %522 = vector.broadcast %cst_395 : f32 to vector<10x128xf32>
    %523 = arith.cmpf olt, %493, %522 : vector<10x128xf32>
    %cst_396 = arith.constant 0.000000e+00 : f32
    %524 = vector.broadcast %cst_396 : f32 to vector<10x128xf32>
    %525 = arith.subf %524, %521 : vector<10x128xf32>
    %526 = arith.select %523, %525, %521 : vector<10x128xi1>, vector<10x128xf32>
    %cst_397 = arith.constant 1.000000e+00 : f32
    %527 = vector.broadcast %cst_397 : f32 to vector<10x128xf32>
    %528 = arith.addf %527, %526 : vector<10x128xf32>
    %529 = arith.mulf %491, %528 : vector<10x128xf32>
    %c1_398 = arith.constant 1 : index
    %c0_399 = arith.constant 0 : index
    %c0_400 = arith.constant 0 : index
    %530 = vector.load %arg17[%c1_398, %c0_399, %c0_400] : memref<2x128x32xf32, #tpu.memory_space<vmem>>, vector<1x128x32xf32>
    %531 = vector.shape_cast %530 : vector<1x128x32xf32> to vector<128x32xf32>
    %cst_401 = arith.constant dense<0.000000e+00> : vector<10x32xf32>
    %532 = tpu.matmul %529, %531, %cst_401 {dimension_numbers = #tpu.dot_dimension_numbers<[1], [0], [0], [1], [0, 0, 1, 1], [], []>} : vector<10x128xf32>, vector<128x32xf32>, vector<10x32xf32> -> vector<10x32xf32>
    %c1_402 = arith.constant 1 : index
    %c0_403 = arith.constant 0 : index
    %c0_404 = arith.constant 0 : index
    %533 = vector.load %arg18[%c1_402, %c0_403, %c0_404] : memref<2x1x32xf32, #tpu.memory_space<vmem>>, vector<1x1x32xf32>
    %534 = vector.shape_cast %533 : vector<1x1x32xf32> to vector<1x32xf32>
    %535 = vector.broadcast %534 : vector<1x32xf32> to vector<10x32xf32>
    %536 = arith.addf %532, %535 : vector<10x32xf32>
    %537 = arith.addf %458, %536 : vector<10x32xf32>
    %c0_405 = arith.constant 0 : index
    %c0_406 = arith.constant 0 : index
    %538 = vector.load %arg19[%c0_405, %c0_406] : memref<1x32xf32, #tpu.memory_space<vmem>>, vector<1x32xf32>
    %c0_407 = arith.constant 0 : index
    %c0_408 = arith.constant 0 : index
    %539 = vector.load %arg20[%c0_407, %c0_408] : memref<1x32xf32, #tpu.memory_space<vmem>>, vector<1x32xf32>
    %cst_409 = arith.constant dense<0.000000e+00> : vector<10xf32>
    %540 = vector.multi_reduction <add>, %537, %cst_409 [1] : vector<10x32xf32> to vector<10xf32>
    %541 = vector.shape_cast %540 : vector<10xf32> to vector<10x1xf32>
    %cst_410 = arith.constant 3.200000e+01 : f32
    %542 = vector.broadcast %cst_410 : f32 to vector<10x1xf32>
    %543 = arith.divf %541, %542 : vector<10x1xf32>
    %544 = vector.broadcast %543 : vector<10x1xf32> to vector<10x32xf32>
    %545 = arith.subf %537, %544 : vector<10x32xf32>
    %546 = arith.mulf %545, %545 : vector<10x32xf32>
    %cst_411 = arith.constant dense<0.000000e+00> : vector<10xf32>
    %547 = vector.multi_reduction <add>, %546, %cst_411 [1] : vector<10x32xf32> to vector<10xf32>
    %548 = vector.shape_cast %547 : vector<10xf32> to vector<10x1xf32>
    %cst_412 = arith.constant 3.200000e+01 : f32
    %549 = vector.broadcast %cst_412 : f32 to vector<10x1xf32>
    %550 = arith.divf %548, %549 : vector<10x1xf32>
    %cst_413 = arith.constant 9.99999974E-6 : f32
    %551 = vector.broadcast %cst_413 : f32 to vector<10x1xf32>
    %552 = arith.addf %550, %551 : vector<10x1xf32>
    %553 = math.rsqrt %552 : vector<10x1xf32>
    %554 = vector.broadcast %553 : vector<10x1xf32> to vector<10x32xf32>
    %555 = arith.mulf %545, %554 : vector<10x32xf32>
    %556 = vector.broadcast %538 : vector<1x32xf32> to vector<10x32xf32>
    %557 = arith.mulf %555, %556 : vector<10x32xf32>
    %558 = vector.broadcast %539 : vector<1x32xf32> to vector<10x32xf32>
    %559 = arith.addf %557, %558 : vector<10x32xf32>
    %c0_414 = arith.constant 0 : index
    %c0_415 = arith.constant 0 : index
    %560 = vector.load %arg21[%c0_414, %c0_415] : memref<32x16xf32, #tpu.memory_space<vmem>>, vector<32x16xf32>
    %cst_416 = arith.constant dense<0.000000e+00> : vector<10x16xf32>
    %561 = tpu.matmul %559, %560, %cst_416 {dimension_numbers = #tpu.dot_dimension_numbers<[1], [0], [0], [1], [0, 0, 1, 1], [], []>} : vector<10x32xf32>, vector<32x16xf32>, vector<10x16xf32> -> vector<10x16xf32>
    %c0_417 = arith.constant 0 : index
    %c0_418 = arith.constant 0 : index
    %562 = vector.load %arg22[%c0_417, %c0_418] : memref<1x16xf32, #tpu.memory_space<vmem>>, vector<1x16xf32>
    %563 = vector.broadcast %562 : vector<1x16xf32> to vector<10x16xf32>
    %564 = arith.addf %561, %563 : vector<10x16xf32>
    %c0_419 = arith.constant 0 : index
    %c0_420 = arith.constant 0 : index
    %c0_421 = arith.constant 0 : index
    %565 = vector.load %arg23[%c0_419, %c0_420, %c0_421] : memref<1x10x48xf32, #tpu.memory_space<vmem>>, vector<1x10x32xf32>
    %566 = vector.shape_cast %565 : vector<1x10x32xf32> to vector<10x32xf32>
    %567 = vector.shape_cast %559 : vector<10x32xf32> to vector<1x10x32xf32>
    tpu.vector_store %arg23[%c0_419, %c0_420, %c0_421], %567 {strides = array<i32>} : memref<1x10x48xf32, #tpu.memory_space<vmem>>, vector<1x10x32xf32>,
    %c0_422 = arith.constant 0 : index
    %c0_423 = arith.constant 0 : index
    %c32 = arith.constant 32 : index
    %568 = vector.load %arg23[%c0_422, %c0_423, %c32] : memref<1x10x48xf32, #tpu.memory_space<vmem>>, vector<1x10x16xf32>
    %569 = vector.shape_cast %568 : vector<1x10x16xf32> to vector<10x16xf32>
    %570 = vector.shape_cast %564 : vector<10x16xf32> to vector<1x10x16xf32>
    tpu.vector_store %arg23[%c0_422, %c0_423, %c32], %570 {strides = array<i32>} : memref<1x10x48xf32, #tpu.memory_space<vmem>>, vector<1x10x16xf32>,
    return
  }
  func.func @transform_0(%arg0: i32) -> (i32, i32, i32) {
    %c0_i32 = arith.constant 0 : i32
    %c0_i32_0 = arith.constant 0 : i32
    %c0_i32_1 = arith.constant 0 : i32
    return %arg0, %c0_i32, %c0_i32_0 : i32, i32, i32
  }
  func.func @transform_1(%arg0: i32) -> (i32, i32, i32) {
    %c0_i32 = arith.constant 0 : i32
    %c0_i32_0 = arith.constant 0 : i32
    %c0_i32_1 = arith.constant 0 : i32
    return %arg0, %c0_i32, %c0_i32_0 : i32, i32, i32
  }
  func.func @transform_2(%arg0: i32) -> (i32, i32, i32) {
    %c0_i32 = arith.constant 0 : i32
    %c0_i32_0 = arith.constant 0 : i32
    %c0_i32_1 = arith.constant 0 : i32
    %c0_i32_2 = arith.constant 0 : i32
    return %c0_i32, %c0_i32_0, %c0_i32_1 : i32, i32, i32
  }
  func.func @transform_3(%arg0: i32) -> (i32, i32, i32) {
    %c0_i32 = arith.constant 0 : i32
    %c0_i32_0 = arith.constant 0 : i32
    %c0_i32_1 = arith.constant 0 : i32
    %c0_i32_2 = arith.constant 0 : i32
    return %c0_i32, %c0_i32_0, %c0_i32_1 : i32, i32, i32
  }
  func.func @transform_4(%arg0: i32) -> (i32, i32, i32, i32) {
    %c0_i32 = arith.constant 0 : i32
    %c0_i32_0 = arith.constant 0 : i32
    %c0_i32_1 = arith.constant 0 : i32
    %c0_i32_2 = arith.constant 0 : i32
    %c0_i32_3 = arith.constant 0 : i32
    return %c0_i32, %c0_i32_0, %c0_i32_1, %c0_i32_2 : i32, i32, i32, i32
  }
  func.func @transform_5(%arg0: i32) -> (i32, i32, i32, i32) {
    %c0_i32 = arith.constant 0 : i32
    %c0_i32_0 = arith.constant 0 : i32
    %c0_i32_1 = arith.constant 0 : i32
    %c0_i32_2 = arith.constant 0 : i32
    %c0_i32_3 = arith.constant 0 : i32
    return %c0_i32, %c0_i32_0, %c0_i32_1, %c0_i32_2 : i32, i32, i32, i32
  }
  func.func @transform_6(%arg0: i32) -> (i32, i32, i32, i32) {
    %c0_i32 = arith.constant 0 : i32
    %c0_i32_0 = arith.constant 0 : i32
    %c0_i32_1 = arith.constant 0 : i32
    %c0_i32_2 = arith.constant 0 : i32
    %c0_i32_3 = arith.constant 0 : i32
    return %c0_i32, %c0_i32_0, %c0_i32_1, %c0_i32_2 : i32, i32, i32, i32
  }
  func.func @transform_7(%arg0: i32) -> (i32, i32, i32, i32) {
    %c0_i32 = arith.constant 0 : i32
    %c0_i32_0 = arith.constant 0 : i32
    %c0_i32_1 = arith.constant 0 : i32
    %c0_i32_2 = arith.constant 0 : i32
    %c0_i32_3 = arith.constant 0 : i32
    return %c0_i32, %c0_i32_0, %c0_i32_1, %c0_i32_2 : i32, i32, i32, i32
  }
  func.func @transform_8(%arg0: i32) -> (i32, i32, i32, i32) {
    %c0_i32 = arith.constant 0 : i32
    %c0_i32_0 = arith.constant 0 : i32
    %c0_i32_1 = arith.constant 0 : i32
    %c0_i32_2 = arith.constant 0 : i32
    %c0_i32_3 = arith.constant 0 : i32
    return %c0_i32, %c0_i32_0, %c0_i32_1, %c0_i32_2 : i32, i32, i32, i32
  }
  func.func @transform_9(%arg0: i32) -> (i32, i32, i32, i32) {
    %c0_i32 = arith.constant 0 : i32
    %c0_i32_0 = arith.constant 0 : i32
    %c0_i32_1 = arith.constant 0 : i32
    %c0_i32_2 = arith.constant 0 : i32
    %c0_i32_3 = arith.constant 0 : i32
    return %c0_i32, %c0_i32_0, %c0_i32_1, %c0_i32_2 : i32, i32, i32, i32
  }
  func.func @transform_10(%arg0: i32) -> (i32, i32, i32, i32) {
    %c0_i32 = arith.constant 0 : i32
    %c0_i32_0 = arith.constant 0 : i32
    %c0_i32_1 = arith.constant 0 : i32
    %c0_i32_2 = arith.constant 0 : i32
    %c0_i32_3 = arith.constant 0 : i32
    return %c0_i32, %c0_i32_0, %c0_i32_1, %c0_i32_2 : i32, i32, i32, i32
  }
  func.func @transform_11(%arg0: i32) -> (i32, i32, i32) {
    %c0_i32 = arith.constant 0 : i32
    %c0_i32_0 = arith.constant 0 : i32
    %c0_i32_1 = arith.constant 0 : i32
    %c0_i32_2 = arith.constant 0 : i32
    return %c0_i32, %c0_i32_0, %c0_i32_1 : i32, i32, i32
  }
  func.func @transform_12(%arg0: i32) -> (i32, i32, i32) {
    %c0_i32 = arith.constant 0 : i32
    %c0_i32_0 = arith.constant 0 : i32
    %c0_i32_1 = arith.constant 0 : i32
    %c0_i32_2 = arith.constant 0 : i32
    return %c0_i32, %c0_i32_0, %c0_i32_1 : i32, i32, i32
  }
  func.func @transform_13(%arg0: i32) -> (i32, i32, i32) {
    %c0_i32 = arith.constant 0 : i32
    %c0_i32_0 = arith.constant 0 : i32
    %c0_i32_1 = arith.constant 0 : i32
    %c0_i32_2 = arith.constant 0 : i32
    return %c0_i32, %c0_i32_0, %c0_i32_1 : i32, i32, i32
  }
  func.func @transform_14(%arg0: i32) -> (i32, i32, i32) {
    %c0_i32 = arith.constant 0 : i32
    %c0_i32_0 = arith.constant 0 : i32
    %c0_i32_1 = arith.constant 0 : i32
    %c0_i32_2 = arith.constant 0 : i32
    return %c0_i32, %c0_i32_0, %c0_i32_1 : i32, i32, i32
  }
  func.func @transform_15(%arg0: i32) -> (i32, i32, i32) {
    %c0_i32 = arith.constant 0 : i32
    %c0_i32_0 = arith.constant 0 : i32
    %c0_i32_1 = arith.constant 0 : i32
    %c0_i32_2 = arith.constant 0 : i32
    return %c0_i32, %c0_i32_0, %c0_i32_1 : i32, i32, i32
  }
  func.func @transform_16(%arg0: i32) -> (i32, i32, i32) {
    %c0_i32 = arith.constant 0 : i32
    %c0_i32_0 = arith.constant 0 : i32
    %c0_i32_1 = arith.constant 0 : i32
    %c0_i32_2 = arith.constant 0 : i32
    return %c0_i32, %c0_i32_0, %c0_i32_1 : i32, i32, i32
  }
  func.func @transform_17(%arg0: i32) -> (i32, i32, i32) {
    %c0_i32 = arith.constant 0 : i32
    %c0_i32_0 = arith.constant 0 : i32
    %c0_i32_1 = arith.constant 0 : i32
    %c0_i32_2 = arith.constant 0 : i32
    return %c0_i32, %c0_i32_0, %c0_i32_1 : i32, i32, i32
  }
  func.func @transform_18(%arg0: i32) -> (i32, i32) {
    %c0_i32 = arith.constant 0 : i32
    %c0_i32_0 = arith.constant 0 : i32
    %c0_i32_1 = arith.constant 0 : i32
    return %c0_i32, %c0_i32_0 : i32, i32
  }
  func.func @transform_19(%arg0: i32) -> (i32, i32) {
    %c0_i32 = arith.constant 0 : i32
    %c0_i32_0 = arith.constant 0 : i32
    %c0_i32_1 = arith.constant 0 : i32
    return %c0_i32, %c0_i32_0 : i32, i32
  }
  func.func @transform_20(%arg0: i32) -> (i32, i32) {
    %c0_i32 = arith.constant 0 : i32
    %c0_i32_0 = arith.constant 0 : i32
    %c0_i32_1 = arith.constant 0 : i32
    return %c0_i32, %c0_i32_0 : i32, i32
  }
  func.func @transform_21(%arg0: i32) -> (i32, i32) {
    %c0_i32 = arith.constant 0 : i32
    %c0_i32_0 = arith.constant 0 : i32
    %c0_i32_1 = arith.constant 0 : i32
    return %c0_i32, %c0_i32_0 : i32, i32
  }
  func.func @transform_22(%arg0: i32) -> (i32, i32, i32) {
    %c0_i32 = arith.constant 0 : i32
    %c0_i32_0 = arith.constant 0 : i32
    %c0_i32_1 = arith.constant 0 : i32
    return %arg0, %c0_i32, %c0_i32_0 : i32, i32, i32
  }
}

module attributes {stable_mosaic.version = 11 : i64} {
  func.func @_tower_kernel(%arg0: i32, %arg1: memref<1x10x16xf32, #tpu.memory_space<vmem>>, %arg2: memref<1x10x10xf32, #tpu.memory_space<vmem>>, %arg3: memref<1x1x16xf32, #tpu.memory_space<vmem>>, %arg4: memref<1x1x16xf32, #tpu.memory_space<vmem>>, %arg5: memref<1x4x16x4xf32, #tpu.memory_space<vmem>>, %arg6: memref<1x4x1x4xf32, #tpu.memory_space<vmem>>, %arg7: memref<1x4x16x4xf32, #tpu.memory_space<vmem>>, %arg8: memref<1x4x1x4xf32, #tpu.memory_space<vmem>>, %arg9: memref<1x4x16x4xf32, #tpu.memory_space<vmem>>, %arg10: memref<1x4x1x4xf32, #tpu.memory_space<vmem>>, %arg11: memref<1x4x4x16xf32, #tpu.memory_space<vmem>>, %arg12: memref<1x1x16xf32, #tpu.memory_space<vmem>>, %arg13: memref<1x1x16xf32, #tpu.memory_space<vmem>>, %arg14: memref<1x1x16xf32, #tpu.memory_space<vmem>>, %arg15: memref<1x16x64xf32, #tpu.memory_space<vmem>>, %arg16: memref<1x1x64xf32, #tpu.memory_space<vmem>>, %arg17: memref<1x64x16xf32, #tpu.memory_space<vmem>>, %arg18: memref<1x1x16xf32, #tpu.memory_space<vmem>>, %arg19: memref<1x16xf32, #tpu.memory_space<vmem>>, %arg20: memref<1x16xf32, #tpu.memory_space<vmem>>, %arg21: memref<16x192xf32, #tpu.memory_space<vmem>>, %arg22: memref<1x192xf32, #tpu.memory_space<vmem>>, %arg23: memref<1x10x192xf32, #tpu.memory_space<vmem>>) attributes {dimension_semantics = [#tpu.dimension_semantics<parallel>], iteration_bounds = array<i64: 1>, scalar_prefetch = 0 : i64, scratch_operands = 0 : i64, tpu.core_type = #tpu.core_type<tc>, window_params = [{transform_indices = @transform_0, window_bounds = array<i64: 1, 10, 16>}, {transform_indices = @transform_1, window_bounds = array<i64: 1, 10, 10>}, {pipeline_mode = #tpu.pipeline_mode<synchronous>, transform_indices = @transform_2, window_bounds = array<i64: 1, 1, 16>}, {pipeline_mode = #tpu.pipeline_mode<synchronous>, transform_indices = @transform_3, window_bounds = array<i64: 1, 1, 16>}, {pipeline_mode = #tpu.pipeline_mode<synchronous>, transform_indices = @transform_4, window_bounds = array<i64: 1, 4, 16, 4>}, {pipeline_mode = #tpu.pipeline_mode<synchronous>, transform_indices = @transform_5, window_bounds = array<i64: 1, 4, 1, 4>}, {pipeline_mode = #tpu.pipeline_mode<synchronous>, transform_indices = @transform_6, window_bounds = array<i64: 1, 4, 16, 4>}, {pipeline_mode = #tpu.pipeline_mode<synchronous>, transform_indices = @transform_7, window_bounds = array<i64: 1, 4, 1, 4>}, {pipeline_mode = #tpu.pipeline_mode<synchronous>, transform_indices = @transform_8, window_bounds = array<i64: 1, 4, 16, 4>}, {pipeline_mode = #tpu.pipeline_mode<synchronous>, transform_indices = @transform_9, window_bounds = array<i64: 1, 4, 1, 4>}, {pipeline_mode = #tpu.pipeline_mode<synchronous>, transform_indices = @transform_10, window_bounds = array<i64: 1, 4, 4, 16>}, {pipeline_mode = #tpu.pipeline_mode<synchronous>, transform_indices = @transform_11, window_bounds = array<i64: 1, 1, 16>}, {pipeline_mode = #tpu.pipeline_mode<synchronous>, transform_indices = @transform_12, window_bounds = array<i64: 1, 1, 16>}, {pipeline_mode = #tpu.pipeline_mode<synchronous>, transform_indices = @transform_13, window_bounds = array<i64: 1, 1, 16>}, {pipeline_mode = #tpu.pipeline_mode<synchronous>, transform_indices = @transform_14, window_bounds = array<i64: 1, 16, 64>}, {pipeline_mode = #tpu.pipeline_mode<synchronous>, transform_indices = @transform_15, window_bounds = array<i64: 1, 1, 64>}, {pipeline_mode = #tpu.pipeline_mode<synchronous>, transform_indices = @transform_16, window_bounds = array<i64: 1, 64, 16>}, {pipeline_mode = #tpu.pipeline_mode<synchronous>, transform_indices = @transform_17, window_bounds = array<i64: 1, 1, 16>}, {pipeline_mode = #tpu.pipeline_mode<synchronous>, transform_indices = @transform_18, window_bounds = array<i64: 1, 16>}, {pipeline_mode = #tpu.pipeline_mode<synchronous>, transform_indices = @transform_19, window_bounds = array<i64: 1, 16>}, {pipeline_mode = #tpu.pipeline_mode<synchronous>, transform_indices = @transform_20, window_bounds = array<i64: 16, 192>}, {pipeline_mode = #tpu.pipeline_mode<synchronous>, transform_indices = @transform_21, window_bounds = array<i64: 1, 192>}, {transform_indices = @transform_22, window_bounds = array<i64: 1, 10, 192>}]} {
    %c0 = arith.constant 0 : index
    %c0_0 = arith.constant 0 : index
    %c0_1 = arith.constant 0 : index
    %0 = vector.load %arg1[%c0, %c0_0, %c0_1] : memref<1x10x16xf32, #tpu.memory_space<vmem>>, vector<1x10x16xf32>
    %1 = vector.shape_cast %0 : vector<1x10x16xf32> to vector<10x16xf32>
    %c0_2 = arith.constant 0 : index
    %c0_3 = arith.constant 0 : index
    %c0_4 = arith.constant 0 : index
    %2 = vector.load %arg2[%c0_2, %c0_3, %c0_4] : memref<1x10x10xf32, #tpu.memory_space<vmem>>, vector<1x10x10xf32>
    %3 = vector.shape_cast %2 : vector<1x10x10xf32> to vector<10x10xf32>
    %c0_5 = arith.constant 0 : index
    %c0_6 = arith.constant 0 : index
    %c0_7 = arith.constant 0 : index
    %4 = vector.load %arg3[%c0_5, %c0_6, %c0_7] : memref<1x1x16xf32, #tpu.memory_space<vmem>>, vector<1x1x16xf32>
    %5 = vector.shape_cast %4 : vector<1x1x16xf32> to vector<1x16xf32>
    %c0_8 = arith.constant 0 : index
    %c0_9 = arith.constant 0 : index
    %c0_10 = arith.constant 0 : index
    %6 = vector.load %arg4[%c0_8, %c0_9, %c0_10] : memref<1x1x16xf32, #tpu.memory_space<vmem>>, vector<1x1x16xf32>
    %7 = vector.shape_cast %6 : vector<1x1x16xf32> to vector<1x16xf32>
    %cst = arith.constant dense<0.000000e+00> : vector<10xf32>
    %8 = vector.multi_reduction <add>, %1, %cst [1] : vector<10x16xf32> to vector<10xf32>
    %9 = vector.shape_cast %8 : vector<10xf32> to vector<10x1xf32>
    %cst_11 = arith.constant 1.600000e+01 : f32
    %10 = vector.broadcast %cst_11 : f32 to vector<10x1xf32>
    %11 = arith.divf %9, %10 : vector<10x1xf32>
    %12 = vector.broadcast %11 : vector<10x1xf32> to vector<10x16xf32>
    %13 = arith.subf %1, %12 : vector<10x16xf32>
    %14 = arith.mulf %13, %13 : vector<10x16xf32>
    %cst_12 = arith.constant dense<0.000000e+00> : vector<10xf32>
    %15 = vector.multi_reduction <add>, %14, %cst_12 [1] : vector<10x16xf32> to vector<10xf32>
    %16 = vector.shape_cast %15 : vector<10xf32> to vector<10x1xf32>
    %cst_13 = arith.constant 1.600000e+01 : f32
    %17 = vector.broadcast %cst_13 : f32 to vector<10x1xf32>
    %18 = arith.divf %16, %17 : vector<10x1xf32>
    %cst_14 = arith.constant 9.99999974E-6 : f32
    %19 = vector.broadcast %cst_14 : f32 to vector<10x1xf32>
    %20 = arith.addf %18, %19 : vector<10x1xf32>
    %21 = math.rsqrt %20 : vector<10x1xf32>
    %22 = vector.broadcast %21 : vector<10x1xf32> to vector<10x16xf32>
    %23 = arith.mulf %13, %22 : vector<10x16xf32>
    %24 = vector.broadcast %5 : vector<1x16xf32> to vector<10x16xf32>
    %25 = arith.mulf %23, %24 : vector<10x16xf32>
    %26 = vector.broadcast %7 : vector<1x16xf32> to vector<10x16xf32>
    %27 = arith.addf %25, %26 : vector<10x16xf32>
    %c0_15 = arith.constant 0 : index
    %c0_16 = arith.constant 0 : index
    %c0_17 = arith.constant 0 : index
    %c0_18 = arith.constant 0 : index
    %28 = vector.load %arg5[%c0_15, %c0_16, %c0_17, %c0_18] : memref<1x4x16x4xf32, #tpu.memory_space<vmem>>, vector<1x1x16x4xf32>
    %29 = vector.shape_cast %28 : vector<1x1x16x4xf32> to vector<16x4xf32>
    %cst_19 = arith.constant dense<0.000000e+00> : vector<10x4xf32>
    %30 = tpu.matmul %27, %29, %cst_19 {dimension_numbers = #tpu.dot_dimension_numbers<[1], [0], [0], [1], [0, 0, 1, 1], [], []>} : vector<10x16xf32>, vector<16x4xf32>, vector<10x4xf32> -> vector<10x4xf32>
    %c0_20 = arith.constant 0 : index
    %c0_21 = arith.constant 0 : index
    %c0_22 = arith.constant 0 : index
    %c0_23 = arith.constant 0 : index
    %31 = vector.load %arg6[%c0_20, %c0_21, %c0_22, %c0_23] : memref<1x4x1x4xf32, #tpu.memory_space<vmem>>, vector<1x1x1x4xf32>
    %32 = vector.shape_cast %31 : vector<1x1x1x4xf32> to vector<1x4xf32>
    %33 = vector.broadcast %32 : vector<1x4xf32> to vector<10x4xf32>
    %34 = arith.addf %30, %33 : vector<10x4xf32>
    %c0_24 = arith.constant 0 : index
    %c0_25 = arith.constant 0 : index
    %c0_26 = arith.constant 0 : index
    %c0_27 = arith.constant 0 : index
    %35 = vector.load %arg7[%c0_24, %c0_25, %c0_26, %c0_27] : memref<1x4x16x4xf32, #tpu.memory_space<vmem>>, vector<1x1x16x4xf32>
    %36 = vector.shape_cast %35 : vector<1x1x16x4xf32> to vector<16x4xf32>
    %cst_28 = arith.constant dense<0.000000e+00> : vector<10x4xf32>
    %37 = tpu.matmul %27, %36, %cst_28 {dimension_numbers = #tpu.dot_dimension_numbers<[1], [0], [0], [1], [0, 0, 1, 1], [], []>} : vector<10x16xf32>, vector<16x4xf32>, vector<10x4xf32> -> vector<10x4xf32>
    %c0_29 = arith.constant 0 : index
    %c0_30 = arith.constant 0 : index
    %c0_31 = arith.constant 0 : index
    %c0_32 = arith.constant 0 : index
    %38 = vector.load %arg8[%c0_29, %c0_30, %c0_31, %c0_32] : memref<1x4x1x4xf32, #tpu.memory_space<vmem>>, vector<1x1x1x4xf32>
    %39 = vector.shape_cast %38 : vector<1x1x1x4xf32> to vector<1x4xf32>
    %40 = vector.broadcast %39 : vector<1x4xf32> to vector<10x4xf32>
    %41 = arith.addf %37, %40 : vector<10x4xf32>
    %c0_33 = arith.constant 0 : index
    %c0_34 = arith.constant 0 : index
    %c0_35 = arith.constant 0 : index
    %c0_36 = arith.constant 0 : index
    %42 = vector.load %arg9[%c0_33, %c0_34, %c0_35, %c0_36] : memref<1x4x16x4xf32, #tpu.memory_space<vmem>>, vector<1x1x16x4xf32>
    %43 = vector.shape_cast %42 : vector<1x1x16x4xf32> to vector<16x4xf32>
    %cst_37 = arith.constant dense<0.000000e+00> : vector<10x4xf32>
    %44 = tpu.matmul %27, %43, %cst_37 {dimension_numbers = #tpu.dot_dimension_numbers<[1], [0], [0], [1], [0, 0, 1, 1], [], []>} : vector<10x16xf32>, vector<16x4xf32>, vector<10x4xf32> -> vector<10x4xf32>
    %c0_38 = arith.constant 0 : index
    %c0_39 = arith.constant 0 : index
    %c0_40 = arith.constant 0 : index
    %c0_41 = arith.constant 0 : index
    %45 = vector.load %arg10[%c0_38, %c0_39, %c0_40, %c0_41] : memref<1x4x1x4xf32, #tpu.memory_space<vmem>>, vector<1x1x1x4xf32>
    %46 = vector.shape_cast %45 : vector<1x1x1x4xf32> to vector<1x4xf32>
    %47 = vector.broadcast %46 : vector<1x4xf32> to vector<10x4xf32>
    %48 = arith.addf %44, %47 : vector<10x4xf32>
    %cst_42 = arith.constant dense<0.000000e+00> : vector<10x10xf32>
    %49 = tpu.matmul %34, %41, %cst_42 {dimension_numbers = #tpu.dot_dimension_numbers<[1], [1], [0], [0], [0, 0, 1, 0], [], []>} : vector<10x4xf32>, vector<10x4xf32>, vector<10x10xf32> -> vector<10x10xf32>
    %cst_43 = arith.constant 5.000000e-01 : f32
    %50 = vector.broadcast %cst_43 : f32 to vector<10x10xf32>
    %51 = arith.mulf %49, %50 : vector<10x10xf32>
    %52 = arith.addf %51, %3 : vector<10x10xf32>
    %cst_44 = arith.constant dense<0xFF800000> : vector<10xf32>
    %53 = vector.multi_reduction <maximumf>, %52, %cst_44 [1] : vector<10x10xf32> to vector<10xf32>
    %54 = vector.shape_cast %53 : vector<10xf32> to vector<10x1xf32>
    %55 = vector.broadcast %54 : vector<10x1xf32> to vector<10x10xf32>
    %56 = arith.subf %52, %55 : vector<10x10xf32>
    %57 = math.exp %56 : vector<10x10xf32>
    %cst_45 = arith.constant dense<0.000000e+00> : vector<10xf32>
    %58 = vector.multi_reduction <add>, %57, %cst_45 [1] : vector<10x10xf32> to vector<10xf32>
    %59 = vector.shape_cast %58 : vector<10xf32> to vector<10x1xf32>
    %60 = tpu.reciprocal %59 {approx = true} : vector<10x1xf32> -> vector<10x1xf32>
    %61 = vector.broadcast %60 : vector<10x1xf32> to vector<10x10xf32>
    %62 = arith.mulf %57, %61 : vector<10x10xf32>
    %cst_46 = arith.constant dense<0.000000e+00> : vector<10x4xf32>
    %63 = tpu.matmul %62, %48, %cst_46 {dimension_numbers = #tpu.dot_dimension_numbers<[1], [0], [0], [1], [0, 0, 1, 1], [], []>} : vector<10x10xf32>, vector<10x4xf32>, vector<10x4xf32> -> vector<10x4xf32>
    %c0_47 = arith.constant 0 : index
    %c0_48 = arith.constant 0 : index
    %c0_49 = arith.constant 0 : index
    %c0_50 = arith.constant 0 : index
    %64 = vector.load %arg11[%c0_47, %c0_48, %c0_49, %c0_50] : memref<1x4x4x16xf32, #tpu.memory_space<vmem>>, vector<1x1x4x16xf32>
    %65 = vector.shape_cast %64 : vector<1x1x4x16xf32> to vector<4x16xf32>
    %cst_51 = arith.constant dense<0.000000e+00> : vector<10x16xf32>
    %66 = tpu.matmul %63, %65, %cst_51 {dimension_numbers = #tpu.dot_dimension_numbers<[1], [0], [0], [1], [0, 0, 1, 1], [], []>} : vector<10x4xf32>, vector<4x16xf32>, vector<10x16xf32> -> vector<10x16xf32>
    %c0_52 = arith.constant 0 : index
    %c1 = arith.constant 1 : index
    %c0_53 = arith.constant 0 : index
    %c0_54 = arith.constant 0 : index
    %67 = vector.load %arg5[%c0_52, %c1, %c0_53, %c0_54] : memref<1x4x16x4xf32, #tpu.memory_space<vmem>>, vector<1x1x16x4xf32>
    %68 = vector.shape_cast %67 : vector<1x1x16x4xf32> to vector<16x4xf32>
    %cst_55 = arith.constant dense<0.000000e+00> : vector<10x4xf32>
    %69 = tpu.matmul %27, %68, %cst_55 {dimension_numbers = #tpu.dot_dimension_numbers<[1], [0], [0], [1], [0, 0, 1, 1], [], []>} : vector<10x16xf32>, vector<16x4xf32>, vector<10x4xf32> -> vector<10x4xf32>
    %c0_56 = arith.constant 0 : index
    %c1_57 = arith.constant 1 : index
    %c0_58 = arith.constant 0 : index
    %c0_59 = arith.constant 0 : index
    %70 = vector.load %arg6[%c0_56, %c1_57, %c0_58, %c0_59] : memref<1x4x1x4xf32, #tpu.memory_space<vmem>>, vector<1x1x1x4xf32>
    %71 = vector.shape_cast %70 : vector<1x1x1x4xf32> to vector<1x4xf32>
    %72 = vector.broadcast %71 : vector<1x4xf32> to vector<10x4xf32>
    %73 = arith.addf %69, %72 : vector<10x4xf32>
    %c0_60 = arith.constant 0 : index
    %c1_61 = arith.constant 1 : index
    %c0_62 = arith.constant 0 : index
    %c0_63 = arith.constant 0 : index
    %74 = vector.load %arg7[%c0_60, %c1_61, %c0_62, %c0_63] : memref<1x4x16x4xf32, #tpu.memory_space<vmem>>, vector<1x1x16x4xf32>
    %75 = vector.shape_cast %74 : vector<1x1x16x4xf32> to vector<16x4xf32>
    %cst_64 = arith.constant dense<0.000000e+00> : vector<10x4xf32>
    %76 = tpu.matmul %27, %75, %cst_64 {dimension_numbers = #tpu.dot_dimension_numbers<[1], [0], [0], [1], [0, 0, 1, 1], [], []>} : vector<10x16xf32>, vector<16x4xf32>, vector<10x4xf32> -> vector<10x4xf32>
    %c0_65 = arith.constant 0 : index
    %c1_66 = arith.constant 1 : index
    %c0_67 = arith.constant 0 : index
    %c0_68 = arith.constant 0 : index
    %77 = vector.load %arg8[%c0_65, %c1_66, %c0_67, %c0_68] : memref<1x4x1x4xf32, #tpu.memory_space<vmem>>, vector<1x1x1x4xf32>
    %78 = vector.shape_cast %77 : vector<1x1x1x4xf32> to vector<1x4xf32>
    %79 = vector.broadcast %78 : vector<1x4xf32> to vector<10x4xf32>
    %80 = arith.addf %76, %79 : vector<10x4xf32>
    %c0_69 = arith.constant 0 : index
    %c1_70 = arith.constant 1 : index
    %c0_71 = arith.constant 0 : index
    %c0_72 = arith.constant 0 : index
    %81 = vector.load %arg9[%c0_69, %c1_70, %c0_71, %c0_72] : memref<1x4x16x4xf32, #tpu.memory_space<vmem>>, vector<1x1x16x4xf32>
    %82 = vector.shape_cast %81 : vector<1x1x16x4xf32> to vector<16x4xf32>
    %cst_73 = arith.constant dense<0.000000e+00> : vector<10x4xf32>
    %83 = tpu.matmul %27, %82, %cst_73 {dimension_numbers = #tpu.dot_dimension_numbers<[1], [0], [0], [1], [0, 0, 1, 1], [], []>} : vector<10x16xf32>, vector<16x4xf32>, vector<10x4xf32> -> vector<10x4xf32>
    %c0_74 = arith.constant 0 : index
    %c1_75 = arith.constant 1 : index
    %c0_76 = arith.constant 0 : index
    %c0_77 = arith.constant 0 : index
    %84 = vector.load %arg10[%c0_74, %c1_75, %c0_76, %c0_77] : memref<1x4x1x4xf32, #tpu.memory_space<vmem>>, vector<1x1x1x4xf32>
    %85 = vector.shape_cast %84 : vector<1x1x1x4xf32> to vector<1x4xf32>
    %86 = vector.broadcast %85 : vector<1x4xf32> to vector<10x4xf32>
    %87 = arith.addf %83, %86 : vector<10x4xf32>
    %cst_78 = arith.constant dense<0.000000e+00> : vector<10x10xf32>
    %88 = tpu.matmul %73, %80, %cst_78 {dimension_numbers = #tpu.dot_dimension_numbers<[1], [1], [0], [0], [0, 0, 1, 0], [], []>} : vector<10x4xf32>, vector<10x4xf32>, vector<10x10xf32> -> vector<10x10xf32>
    %cst_79 = arith.constant 5.000000e-01 : f32
    %89 = vector.broadcast %cst_79 : f32 to vector<10x10xf32>
    %90 = arith.mulf %88, %89 : vector<10x10xf32>
    %91 = arith.addf %90, %3 : vector<10x10xf32>
    %cst_80 = arith.constant dense<0xFF800000> : vector<10xf32>
    %92 = vector.multi_reduction <maximumf>, %91, %cst_80 [1] : vector<10x10xf32> to vector<10xf32>
    %93 = vector.shape_cast %92 : vector<10xf32> to vector<10x1xf32>
    %94 = vector.broadcast %93 : vector<10x1xf32> to vector<10x10xf32>
    %95 = arith.subf %91, %94 : vector<10x10xf32>
    %96 = math.exp %95 : vector<10x10xf32>
    %cst_81 = arith.constant dense<0.000000e+00> : vector<10xf32>
    %97 = vector.multi_reduction <add>, %96, %cst_81 [1] : vector<10x10xf32> to vector<10xf32>
    %98 = vector.shape_cast %97 : vector<10xf32> to vector<10x1xf32>
    %99 = tpu.reciprocal %98 {approx = true} : vector<10x1xf32> -> vector<10x1xf32>
    %100 = vector.broadcast %99 : vector<10x1xf32> to vector<10x10xf32>
    %101 = arith.mulf %96, %100 : vector<10x10xf32>
    %cst_82 = arith.constant dense<0.000000e+00> : vector<10x4xf32>
    %102 = tpu.matmul %101, %87, %cst_82 {dimension_numbers = #tpu.dot_dimension_numbers<[1], [0], [0], [1], [0, 0, 1, 1], [], []>} : vector<10x10xf32>, vector<10x4xf32>, vector<10x4xf32> -> vector<10x4xf32>
    %c0_83 = arith.constant 0 : index
    %c1_84 = arith.constant 1 : index
    %c0_85 = arith.constant 0 : index
    %c0_86 = arith.constant 0 : index
    %103 = vector.load %arg11[%c0_83, %c1_84, %c0_85, %c0_86] : memref<1x4x4x16xf32, #tpu.memory_space<vmem>>, vector<1x1x4x16xf32>
    %104 = vector.shape_cast %103 : vector<1x1x4x16xf32> to vector<4x16xf32>
    %cst_87 = arith.constant dense<0.000000e+00> : vector<10x16xf32>
    %105 = tpu.matmul %102, %104, %cst_87 {dimension_numbers = #tpu.dot_dimension_numbers<[1], [0], [0], [1], [0, 0, 1, 1], [], []>} : vector<10x4xf32>, vector<4x16xf32>, vector<10x16xf32> -> vector<10x16xf32>
    %106 = arith.addf %66, %105 : vector<10x16xf32>
    %c0_88 = arith.constant 0 : index
    %c2 = arith.constant 2 : index
    %c0_89 = arith.constant 0 : index
    %c0_90 = arith.constant 0 : index
    %107 = vector.load %arg5[%c0_88, %c2, %c0_89, %c0_90] : memref<1x4x16x4xf32, #tpu.memory_space<vmem>>, vector<1x1x16x4xf32>
    %108 = vector.shape_cast %107 : vector<1x1x16x4xf32> to vector<16x4xf32>
    %cst_91 = arith.constant dense<0.000000e+00> : vector<10x4xf32>
    %109 = tpu.matmul %27, %108, %cst_91 {dimension_numbers = #tpu.dot_dimension_numbers<[1], [0], [0], [1], [0, 0, 1, 1], [], []>} : vector<10x16xf32>, vector<16x4xf32>, vector<10x4xf32> -> vector<10x4xf32>
    %c0_92 = arith.constant 0 : index
    %c2_93 = arith.constant 2 : index
    %c0_94 = arith.constant 0 : index
    %c0_95 = arith.constant 0 : index
    %110 = vector.load %arg6[%c0_92, %c2_93, %c0_94, %c0_95] : memref<1x4x1x4xf32, #tpu.memory_space<vmem>>, vector<1x1x1x4xf32>
    %111 = vector.shape_cast %110 : vector<1x1x1x4xf32> to vector<1x4xf32>
    %112 = vector.broadcast %111 : vector<1x4xf32> to vector<10x4xf32>
    %113 = arith.addf %109, %112 : vector<10x4xf32>
    %c0_96 = arith.constant 0 : index
    %c2_97 = arith.constant 2 : index
    %c0_98 = arith.constant 0 : index
    %c0_99 = arith.constant 0 : index
    %114 = vector.load %arg7[%c0_96, %c2_97, %c0_98, %c0_99] : memref<1x4x16x4xf32, #tpu.memory_space<vmem>>, vector<1x1x16x4xf32>
    %115 = vector.shape_cast %114 : vector<1x1x16x4xf32> to vector<16x4xf32>
    %cst_100 = arith.constant dense<0.000000e+00> : vector<10x4xf32>
    %116 = tpu.matmul %27, %115, %cst_100 {dimension_numbers = #tpu.dot_dimension_numbers<[1], [0], [0], [1], [0, 0, 1, 1], [], []>} : vector<10x16xf32>, vector<16x4xf32>, vector<10x4xf32> -> vector<10x4xf32>
    %c0_101 = arith.constant 0 : index
    %c2_102 = arith.constant 2 : index
    %c0_103 = arith.constant 0 : index
    %c0_104 = arith.constant 0 : index
    %117 = vector.load %arg8[%c0_101, %c2_102, %c0_103, %c0_104] : memref<1x4x1x4xf32, #tpu.memory_space<vmem>>, vector<1x1x1x4xf32>
    %118 = vector.shape_cast %117 : vector<1x1x1x4xf32> to vector<1x4xf32>
    %119 = vector.broadcast %118 : vector<1x4xf32> to vector<10x4xf32>
    %120 = arith.addf %116, %119 : vector<10x4xf32>
    %c0_105 = arith.constant 0 : index
    %c2_106 = arith.constant 2 : index
    %c0_107 = arith.constant 0 : index
    %c0_108 = arith.constant 0 : index
    %121 = vector.load %arg9[%c0_105, %c2_106, %c0_107, %c0_108] : memref<1x4x16x4xf32, #tpu.memory_space<vmem>>, vector<1x1x16x4xf32>
    %122 = vector.shape_cast %121 : vector<1x1x16x4xf32> to vector<16x4xf32>
    %cst_109 = arith.constant dense<0.000000e+00> : vector<10x4xf32>
    %123 = tpu.matmul %27, %122, %cst_109 {dimension_numbers = #tpu.dot_dimension_numbers<[1], [0], [0], [1], [0, 0, 1, 1], [], []>} : vector<10x16xf32>, vector<16x4xf32>, vector<10x4xf32> -> vector<10x4xf32>
    %c0_110 = arith.constant 0 : index
    %c2_111 = arith.constant 2 : index
    %c0_112 = arith.constant 0 : index
    %c0_113 = arith.constant 0 : index
    %124 = vector.load %arg10[%c0_110, %c2_111, %c0_112, %c0_113] : memref<1x4x1x4xf32, #tpu.memory_space<vmem>>, vector<1x1x1x4xf32>
    %125 = vector.shape_cast %124 : vector<1x1x1x4xf32> to vector<1x4xf32>
    %126 = vector.broadcast %125 : vector<1x4xf32> to vector<10x4xf32>
    %127 = arith.addf %123, %126 : vector<10x4xf32>
    %cst_114 = arith.constant dense<0.000000e+00> : vector<10x10xf32>
    %128 = tpu.matmul %113, %120, %cst_114 {dimension_numbers = #tpu.dot_dimension_numbers<[1], [1], [0], [0], [0, 0, 1, 0], [], []>} : vector<10x4xf32>, vector<10x4xf32>, vector<10x10xf32> -> vector<10x10xf32>
    %cst_115 = arith.constant 5.000000e-01 : f32
    %129 = vector.broadcast %cst_115 : f32 to vector<10x10xf32>
    %130 = arith.mulf %128, %129 : vector<10x10xf32>
    %131 = arith.addf %130, %3 : vector<10x10xf32>
    %cst_116 = arith.constant dense<0xFF800000> : vector<10xf32>
    %132 = vector.multi_reduction <maximumf>, %131, %cst_116 [1] : vector<10x10xf32> to vector<10xf32>
    %133 = vector.shape_cast %132 : vector<10xf32> to vector<10x1xf32>
    %134 = vector.broadcast %133 : vector<10x1xf32> to vector<10x10xf32>
    %135 = arith.subf %131, %134 : vector<10x10xf32>
    %136 = math.exp %135 : vector<10x10xf32>
    %cst_117 = arith.constant dense<0.000000e+00> : vector<10xf32>
    %137 = vector.multi_reduction <add>, %136, %cst_117 [1] : vector<10x10xf32> to vector<10xf32>
    %138 = vector.shape_cast %137 : vector<10xf32> to vector<10x1xf32>
    %139 = tpu.reciprocal %138 {approx = true} : vector<10x1xf32> -> vector<10x1xf32>
    %140 = vector.broadcast %139 : vector<10x1xf32> to vector<10x10xf32>
    %141 = arith.mulf %136, %140 : vector<10x10xf32>
    %cst_118 = arith.constant dense<0.000000e+00> : vector<10x4xf32>
    %142 = tpu.matmul %141, %127, %cst_118 {dimension_numbers = #tpu.dot_dimension_numbers<[1], [0], [0], [1], [0, 0, 1, 1], [], []>} : vector<10x10xf32>, vector<10x4xf32>, vector<10x4xf32> -> vector<10x4xf32>
    %c0_119 = arith.constant 0 : index
    %c2_120 = arith.constant 2 : index
    %c0_121 = arith.constant 0 : index
    %c0_122 = arith.constant 0 : index
    %143 = vector.load %arg11[%c0_119, %c2_120, %c0_121, %c0_122] : memref<1x4x4x16xf32, #tpu.memory_space<vmem>>, vector<1x1x4x16xf32>
    %144 = vector.shape_cast %143 : vector<1x1x4x16xf32> to vector<4x16xf32>
    %cst_123 = arith.constant dense<0.000000e+00> : vector<10x16xf32>
    %145 = tpu.matmul %142, %144, %cst_123 {dimension_numbers = #tpu.dot_dimension_numbers<[1], [0], [0], [1], [0, 0, 1, 1], [], []>} : vector<10x4xf32>, vector<4x16xf32>, vector<10x16xf32> -> vector<10x16xf32>
    %146 = arith.addf %106, %145 : vector<10x16xf32>
    %c0_124 = arith.constant 0 : index
    %c3 = arith.constant 3 : index
    %c0_125 = arith.constant 0 : index
    %c0_126 = arith.constant 0 : index
    %147 = vector.load %arg5[%c0_124, %c3, %c0_125, %c0_126] : memref<1x4x16x4xf32, #tpu.memory_space<vmem>>, vector<1x1x16x4xf32>
    %148 = vector.shape_cast %147 : vector<1x1x16x4xf32> to vector<16x4xf32>
    %cst_127 = arith.constant dense<0.000000e+00> : vector<10x4xf32>
    %149 = tpu.matmul %27, %148, %cst_127 {dimension_numbers = #tpu.dot_dimension_numbers<[1], [0], [0], [1], [0, 0, 1, 1], [], []>} : vector<10x16xf32>, vector<16x4xf32>, vector<10x4xf32> -> vector<10x4xf32>
    %c0_128 = arith.constant 0 : index
    %c3_129 = arith.constant 3 : index
    %c0_130 = arith.constant 0 : index
    %c0_131 = arith.constant 0 : index
    %150 = vector.load %arg6[%c0_128, %c3_129, %c0_130, %c0_131] : memref<1x4x1x4xf32, #tpu.memory_space<vmem>>, vector<1x1x1x4xf32>
    %151 = vector.shape_cast %150 : vector<1x1x1x4xf32> to vector<1x4xf32>
    %152 = vector.broadcast %151 : vector<1x4xf32> to vector<10x4xf32>
    %153 = arith.addf %149, %152 : vector<10x4xf32>
    %c0_132 = arith.constant 0 : index
    %c3_133 = arith.constant 3 : index
    %c0_134 = arith.constant 0 : index
    %c0_135 = arith.constant 0 : index
    %154 = vector.load %arg7[%c0_132, %c3_133, %c0_134, %c0_135] : memref<1x4x16x4xf32, #tpu.memory_space<vmem>>, vector<1x1x16x4xf32>
    %155 = vector.shape_cast %154 : vector<1x1x16x4xf32> to vector<16x4xf32>
    %cst_136 = arith.constant dense<0.000000e+00> : vector<10x4xf32>
    %156 = tpu.matmul %27, %155, %cst_136 {dimension_numbers = #tpu.dot_dimension_numbers<[1], [0], [0], [1], [0, 0, 1, 1], [], []>} : vector<10x16xf32>, vector<16x4xf32>, vector<10x4xf32> -> vector<10x4xf32>
    %c0_137 = arith.constant 0 : index
    %c3_138 = arith.constant 3 : index
    %c0_139 = arith.constant 0 : index
    %c0_140 = arith.constant 0 : index
    %157 = vector.load %arg8[%c0_137, %c3_138, %c0_139, %c0_140] : memref<1x4x1x4xf32, #tpu.memory_space<vmem>>, vector<1x1x1x4xf32>
    %158 = vector.shape_cast %157 : vector<1x1x1x4xf32> to vector<1x4xf32>
    %159 = vector.broadcast %158 : vector<1x4xf32> to vector<10x4xf32>
    %160 = arith.addf %156, %159 : vector<10x4xf32>
    %c0_141 = arith.constant 0 : index
    %c3_142 = arith.constant 3 : index
    %c0_143 = arith.constant 0 : index
    %c0_144 = arith.constant 0 : index
    %161 = vector.load %arg9[%c0_141, %c3_142, %c0_143, %c0_144] : memref<1x4x16x4xf32, #tpu.memory_space<vmem>>, vector<1x1x16x4xf32>
    %162 = vector.shape_cast %161 : vector<1x1x16x4xf32> to vector<16x4xf32>
    %cst_145 = arith.constant dense<0.000000e+00> : vector<10x4xf32>
    %163 = tpu.matmul %27, %162, %cst_145 {dimension_numbers = #tpu.dot_dimension_numbers<[1], [0], [0], [1], [0, 0, 1, 1], [], []>} : vector<10x16xf32>, vector<16x4xf32>, vector<10x4xf32> -> vector<10x4xf32>
    %c0_146 = arith.constant 0 : index
    %c3_147 = arith.constant 3 : index
    %c0_148 = arith.constant 0 : index
    %c0_149 = arith.constant 0 : index
    %164 = vector.load %arg10[%c0_146, %c3_147, %c0_148, %c0_149] : memref<1x4x1x4xf32, #tpu.memory_space<vmem>>, vector<1x1x1x4xf32>
    %165 = vector.shape_cast %164 : vector<1x1x1x4xf32> to vector<1x4xf32>
    %166 = vector.broadcast %165 : vector<1x4xf32> to vector<10x4xf32>
    %167 = arith.addf %163, %166 : vector<10x4xf32>
    %cst_150 = arith.constant dense<0.000000e+00> : vector<10x10xf32>
    %168 = tpu.matmul %153, %160, %cst_150 {dimension_numbers = #tpu.dot_dimension_numbers<[1], [1], [0], [0], [0, 0, 1, 0], [], []>} : vector<10x4xf32>, vector<10x4xf32>, vector<10x10xf32> -> vector<10x10xf32>
    %cst_151 = arith.constant 5.000000e-01 : f32
    %169 = vector.broadcast %cst_151 : f32 to vector<10x10xf32>
    %170 = arith.mulf %168, %169 : vector<10x10xf32>
    %171 = arith.addf %170, %3 : vector<10x10xf32>
    %cst_152 = arith.constant dense<0xFF800000> : vector<10xf32>
    %172 = vector.multi_reduction <maximumf>, %171, %cst_152 [1] : vector<10x10xf32> to vector<10xf32>
    %173 = vector.shape_cast %172 : vector<10xf32> to vector<10x1xf32>
    %174 = vector.broadcast %173 : vector<10x1xf32> to vector<10x10xf32>
    %175 = arith.subf %171, %174 : vector<10x10xf32>
    %176 = math.exp %175 : vector<10x10xf32>
    %cst_153 = arith.constant dense<0.000000e+00> : vector<10xf32>
    %177 = vector.multi_reduction <add>, %176, %cst_153 [1] : vector<10x10xf32> to vector<10xf32>
    %178 = vector.shape_cast %177 : vector<10xf32> to vector<10x1xf32>
    %179 = tpu.reciprocal %178 {approx = true} : vector<10x1xf32> -> vector<10x1xf32>
    %180 = vector.broadcast %179 : vector<10x1xf32> to vector<10x10xf32>
    %181 = arith.mulf %176, %180 : vector<10x10xf32>
    %cst_154 = arith.constant dense<0.000000e+00> : vector<10x4xf32>
    %182 = tpu.matmul %181, %167, %cst_154 {dimension_numbers = #tpu.dot_dimension_numbers<[1], [0], [0], [1], [0, 0, 1, 1], [], []>} : vector<10x10xf32>, vector<10x4xf32>, vector<10x4xf32> -> vector<10x4xf32>
    %c0_155 = arith.constant 0 : index
    %c3_156 = arith.constant 3 : index
    %c0_157 = arith.constant 0 : index
    %c0_158 = arith.constant 0 : index
    %183 = vector.load %arg11[%c0_155, %c3_156, %c0_157, %c0_158] : memref<1x4x4x16xf32, #tpu.memory_space<vmem>>, vector<1x1x4x16xf32>
    %184 = vector.shape_cast %183 : vector<1x1x4x16xf32> to vector<4x16xf32>
    %cst_159 = arith.constant dense<0.000000e+00> : vector<10x16xf32>
    %185 = tpu.matmul %182, %184, %cst_159 {dimension_numbers = #tpu.dot_dimension_numbers<[1], [0], [0], [1], [0, 0, 1, 1], [], []>} : vector<10x4xf32>, vector<4x16xf32>, vector<10x16xf32> -> vector<10x16xf32>
    %186 = arith.addf %146, %185 : vector<10x16xf32>
    %187 = arith.addf %1, %186 : vector<10x16xf32>
    %c0_160 = arith.constant 0 : index
    %c0_161 = arith.constant 0 : index
    %c0_162 = arith.constant 0 : index
    %188 = vector.load %arg12[%c0_160, %c0_161, %c0_162] : memref<1x1x16xf32, #tpu.memory_space<vmem>>, vector<1x1x16xf32>
    %189 = vector.shape_cast %188 : vector<1x1x16xf32> to vector<1x16xf32>
    %190 = vector.broadcast %189 : vector<1x16xf32> to vector<10x16xf32>
    %191 = arith.addf %187, %190 : vector<10x16xf32>
    %c0_163 = arith.constant 0 : index
    %c0_164 = arith.constant 0 : index
    %c0_165 = arith.constant 0 : index
    %192 = vector.load %arg13[%c0_163, %c0_164, %c0_165] : memref<1x1x16xf32, #tpu.memory_space<vmem>>, vector<1x1x16xf32>
    %193 = vector.shape_cast %192 : vector<1x1x16xf32> to vector<1x16xf32>
    %c0_166 = arith.constant 0 : index
    %c0_167 = arith.constant 0 : index
    %c0_168 = arith.constant 0 : index
    %194 = vector.load %arg14[%c0_166, %c0_167, %c0_168] : memref<1x1x16xf32, #tpu.memory_space<vmem>>, vector<1x1x16xf32>
    %195 = vector.shape_cast %194 : vector<1x1x16xf32> to vector<1x16xf32>
    %cst_169 = arith.constant dense<0.000000e+00> : vector<10xf32>
    %196 = vector.multi_reduction <add>, %191, %cst_169 [1] : vector<10x16xf32> to vector<10xf32>
    %197 = vector.shape_cast %196 : vector<10xf32> to vector<10x1xf32>
    %cst_170 = arith.constant 1.600000e+01 : f32
    %198 = vector.broadcast %cst_170 : f32 to vector<10x1xf32>
    %199 = arith.divf %197, %198 : vector<10x1xf32>
    %200 = vector.broadcast %199 : vector<10x1xf32> to vector<10x16xf32>
    %201 = arith.subf %191, %200 : vector<10x16xf32>
    %202 = arith.mulf %201, %201 : vector<10x16xf32>
    %cst_171 = arith.constant dense<0.000000e+00> : vector<10xf32>
    %203 = vector.multi_reduction <add>, %202, %cst_171 [1] : vector<10x16xf32> to vector<10xf32>
    %204 = vector.shape_cast %203 : vector<10xf32> to vector<10x1xf32>
    %cst_172 = arith.constant 1.600000e+01 : f32
    %205 = vector.broadcast %cst_172 : f32 to vector<10x1xf32>
    %206 = arith.divf %204, %205 : vector<10x1xf32>
    %cst_173 = arith.constant 9.99999974E-6 : f32
    %207 = vector.broadcast %cst_173 : f32 to vector<10x1xf32>
    %208 = arith.addf %206, %207 : vector<10x1xf32>
    %209 = math.rsqrt %208 : vector<10x1xf32>
    %210 = vector.broadcast %209 : vector<10x1xf32> to vector<10x16xf32>
    %211 = arith.mulf %201, %210 : vector<10x16xf32>
    %212 = vector.broadcast %193 : vector<1x16xf32> to vector<10x16xf32>
    %213 = arith.mulf %211, %212 : vector<10x16xf32>
    %214 = vector.broadcast %195 : vector<1x16xf32> to vector<10x16xf32>
    %215 = arith.addf %213, %214 : vector<10x16xf32>
    %c0_174 = arith.constant 0 : index
    %c0_175 = arith.constant 0 : index
    %c0_176 = arith.constant 0 : index
    %216 = vector.load %arg15[%c0_174, %c0_175, %c0_176] : memref<1x16x64xf32, #tpu.memory_space<vmem>>, vector<1x16x64xf32>
    %217 = vector.shape_cast %216 : vector<1x16x64xf32> to vector<16x64xf32>
    %cst_177 = arith.constant dense<0.000000e+00> : vector<10x64xf32>
    %218 = tpu.matmul %215, %217, %cst_177 {dimension_numbers = #tpu.dot_dimension_numbers<[1], [0], [0], [1], [0, 0, 1, 1], [], []>} : vector<10x16xf32>, vector<16x64xf32>, vector<10x64xf32> -> vector<10x64xf32>
    %c0_178 = arith.constant 0 : index
    %c0_179 = arith.constant 0 : index
    %c0_180 = arith.constant 0 : index
    %219 = vector.load %arg16[%c0_178, %c0_179, %c0_180] : memref<1x1x64xf32, #tpu.memory_space<vmem>>, vector<1x1x64xf32>
    %220 = vector.shape_cast %219 : vector<1x1x64xf32> to vector<1x64xf32>
    %221 = vector.broadcast %220 : vector<1x64xf32> to vector<10x64xf32>
    %222 = arith.addf %218, %221 : vector<10x64xf32>
    %cst_181 = arith.constant 5.000000e-01 : f32
    %223 = vector.broadcast %cst_181 : f32 to vector<10x64xf32>
    %224 = arith.mulf %223, %222 : vector<10x64xf32>
    %cst_182 = arith.constant 0.707106769 : f32
    %225 = vector.broadcast %cst_182 : f32 to vector<10x64xf32>
    %226 = arith.mulf %222, %225 : vector<10x64xf32>
    %227 = math.absf %226 : vector<10x64xf32>
    %cst_183 = arith.constant 0.327591091 : f32
    %228 = vector.broadcast %cst_183 : f32 to vector<10x64xf32>
    %229 = arith.mulf %228, %227 : vector<10x64xf32>
    %cst_184 = arith.constant 1.000000e+00 : f32
    %230 = vector.broadcast %cst_184 : f32 to vector<10x64xf32>
    %231 = arith.addf %230, %229 : vector<10x64xf32>
    %cst_185 = arith.constant 1.000000e+00 : f32
    %232 = vector.broadcast %cst_185 : f32 to vector<10x64xf32>
    %233 = arith.divf %232, %231 : vector<10x64xf32>
    %cst_186 = arith.constant 1.06140542 : f32
    %234 = vector.broadcast %cst_186 : f32 to vector<10x64xf32>
    %235 = arith.mulf %234, %233 : vector<10x64xf32>
    %cst_187 = arith.constant -1.45315206 : f32
    %236 = vector.broadcast %cst_187 : f32 to vector<10x64xf32>
    %237 = arith.addf %235, %236 : vector<10x64xf32>
    %238 = arith.mulf %237, %233 : vector<10x64xf32>
    %cst_188 = arith.constant 1.42141378 : f32
    %239 = vector.broadcast %cst_188 : f32 to vector<10x64xf32>
    %240 = arith.addf %238, %239 : vector<10x64xf32>
    %241 = arith.mulf %240, %233 : vector<10x64xf32>
    %cst_189 = arith.constant -0.284496725 : f32
    %242 = vector.broadcast %cst_189 : f32 to vector<10x64xf32>
    %243 = arith.addf %241, %242 : vector<10x64xf32>
    %244 = arith.mulf %243, %233 : vector<10x64xf32>
    %cst_190 = arith.constant 0.254829586 : f32
    %245 = vector.broadcast %cst_190 : f32 to vector<10x64xf32>
    %246 = arith.addf %244, %245 : vector<10x64xf32>
    %247 = arith.mulf %246, %233 : vector<10x64xf32>
    %cst_191 = arith.constant 0.000000e+00 : f32
    %248 = vector.broadcast %cst_191 : f32 to vector<10x64xf32>
    %249 = arith.subf %248, %227 : vector<10x64xf32>
    %250 = arith.mulf %249, %227 : vector<10x64xf32>
    %251 = math.exp %250 : vector<10x64xf32>
    %252 = arith.mulf %247, %251 : vector<10x64xf32>
    %cst_192 = arith.constant 1.000000e+00 : f32
    %253 = vector.broadcast %cst_192 : f32 to vector<10x64xf32>
    %254 = arith.subf %253, %252 : vector<10x64xf32>
    %cst_193 = arith.constant 0.000000e+00 : f32
    %255 = vector.broadcast %cst_193 : f32 to vector<10x64xf32>
    %256 = arith.cmpf olt, %226, %255 : vector<10x64xf32>
    %cst_194 = arith.constant 0.000000e+00 : f32
    %257 = vector.broadcast %cst_194 : f32 to vector<10x64xf32>
    %258 = arith.subf %257, %254 : vector<10x64xf32>
    %259 = arith.select %256, %258, %254 : vector<10x64xi1>, vector<10x64xf32>
    %cst_195 = arith.constant 1.000000e+00 : f32
    %260 = vector.broadcast %cst_195 : f32 to vector<10x64xf32>
    %261 = arith.addf %260, %259 : vector<10x64xf32>
    %262 = arith.mulf %224, %261 : vector<10x64xf32>
    %c0_196 = arith.constant 0 : index
    %c0_197 = arith.constant 0 : index
    %c0_198 = arith.constant 0 : index
    %263 = vector.load %arg17[%c0_196, %c0_197, %c0_198] : memref<1x64x16xf32, #tpu.memory_space<vmem>>, vector<1x64x16xf32>
    %264 = vector.shape_cast %263 : vector<1x64x16xf32> to vector<64x16xf32>
    %cst_199 = arith.constant dense<0.000000e+00> : vector<10x16xf32>
    %265 = tpu.matmul %262, %264, %cst_199 {dimension_numbers = #tpu.dot_dimension_numbers<[1], [0], [0], [1], [0, 0, 1, 1], [], []>} : vector<10x64xf32>, vector<64x16xf32>, vector<10x16xf32> -> vector<10x16xf32>
    %c0_200 = arith.constant 0 : index
    %c0_201 = arith.constant 0 : index
    %c0_202 = arith.constant 0 : index
    %266 = vector.load %arg18[%c0_200, %c0_201, %c0_202] : memref<1x1x16xf32, #tpu.memory_space<vmem>>, vector<1x1x16xf32>
    %267 = vector.shape_cast %266 : vector<1x1x16xf32> to vector<1x16xf32>
    %268 = vector.broadcast %267 : vector<1x16xf32> to vector<10x16xf32>
    %269 = arith.addf %265, %268 : vector<10x16xf32>
    %270 = arith.addf %191, %269 : vector<10x16xf32>
    %c0_203 = arith.constant 0 : index
    %c0_204 = arith.constant 0 : index
    %271 = vector.load %arg19[%c0_203, %c0_204] : memref<1x16xf32, #tpu.memory_space<vmem>>, vector<1x16xf32>
    %c0_205 = arith.constant 0 : index
    %c0_206 = arith.constant 0 : index
    %272 = vector.load %arg20[%c0_205, %c0_206] : memref<1x16xf32, #tpu.memory_space<vmem>>, vector<1x16xf32>
    %cst_207 = arith.constant dense<0.000000e+00> : vector<10xf32>
    %273 = vector.multi_reduction <add>, %270, %cst_207 [1] : vector<10x16xf32> to vector<10xf32>
    %274 = vector.shape_cast %273 : vector<10xf32> to vector<10x1xf32>
    %cst_208 = arith.constant 1.600000e+01 : f32
    %275 = vector.broadcast %cst_208 : f32 to vector<10x1xf32>
    %276 = arith.divf %274, %275 : vector<10x1xf32>
    %277 = vector.broadcast %276 : vector<10x1xf32> to vector<10x16xf32>
    %278 = arith.subf %270, %277 : vector<10x16xf32>
    %279 = arith.mulf %278, %278 : vector<10x16xf32>
    %cst_209 = arith.constant dense<0.000000e+00> : vector<10xf32>
    %280 = vector.multi_reduction <add>, %279, %cst_209 [1] : vector<10x16xf32> to vector<10xf32>
    %281 = vector.shape_cast %280 : vector<10xf32> to vector<10x1xf32>
    %cst_210 = arith.constant 1.600000e+01 : f32
    %282 = vector.broadcast %cst_210 : f32 to vector<10x1xf32>
    %283 = arith.divf %281, %282 : vector<10x1xf32>
    %cst_211 = arith.constant 9.99999974E-6 : f32
    %284 = vector.broadcast %cst_211 : f32 to vector<10x1xf32>
    %285 = arith.addf %283, %284 : vector<10x1xf32>
    %286 = math.rsqrt %285 : vector<10x1xf32>
    %287 = vector.broadcast %286 : vector<10x1xf32> to vector<10x16xf32>
    %288 = arith.mulf %278, %287 : vector<10x16xf32>
    %289 = vector.broadcast %271 : vector<1x16xf32> to vector<10x16xf32>
    %290 = arith.mulf %288, %289 : vector<10x16xf32>
    %291 = vector.broadcast %272 : vector<1x16xf32> to vector<10x16xf32>
    %292 = arith.addf %290, %291 : vector<10x16xf32>
    %c0_212 = arith.constant 0 : index
    %c0_213 = arith.constant 0 : index
    %293 = vector.load %arg21[%c0_212, %c0_213] : memref<16x192xf32, #tpu.memory_space<vmem>>, vector<16x192xf32>
    %cst_214 = arith.constant dense<0.000000e+00> : vector<10x192xf32>
    %294 = tpu.matmul %292, %293, %cst_214 {dimension_numbers = #tpu.dot_dimension_numbers<[1], [0], [0], [1], [0, 0, 1, 1], [], []>} : vector<10x16xf32>, vector<16x192xf32>, vector<10x192xf32> -> vector<10x192xf32>
    %c0_215 = arith.constant 0 : index
    %c0_216 = arith.constant 0 : index
    %295 = vector.load %arg22[%c0_215, %c0_216] : memref<1x192xf32, #tpu.memory_space<vmem>>, vector<1x192xf32>
    %296 = vector.broadcast %295 : vector<1x192xf32> to vector<10x192xf32>
    %297 = arith.addf %294, %296 : vector<10x192xf32>
    %c0_217 = arith.constant 0 : index
    %c0_218 = arith.constant 0 : index
    %c0_219 = arith.constant 0 : index
    %298 = vector.load %arg23[%c0_217, %c0_218, %c0_219] : memref<1x10x192xf32, #tpu.memory_space<vmem>>, vector<1x10x192xf32>
    %299 = vector.shape_cast %298 : vector<1x10x192xf32> to vector<10x192xf32>
    %300 = vector.shape_cast %297 : vector<10x192xf32> to vector<1x10x192xf32>
    tpu.vector_store %arg23[%c0_217, %c0_218, %c0_219], %300 {strides = array<i32>} : memref<1x10x192xf32, #tpu.memory_space<vmem>>, vector<1x10x192xf32>,
    return
  }
  func.func @transform_0(%arg0: i32) -> (i32, i32, i32) {
    %c0_i32 = arith.constant 0 : i32
    %c0_i32_0 = arith.constant 0 : i32
    %c0_i32_1 = arith.constant 0 : i32
    return %arg0, %c0_i32, %c0_i32_0 : i32, i32, i32
  }
  func.func @transform_1(%arg0: i32) -> (i32, i32, i32) {
    %c0_i32 = arith.constant 0 : i32
    %c0_i32_0 = arith.constant 0 : i32
    %c0_i32_1 = arith.constant 0 : i32
    return %arg0, %c0_i32, %c0_i32_0 : i32, i32, i32
  }
  func.func @transform_2(%arg0: i32) -> (i32, i32, i32) {
    %c0_i32 = arith.constant 0 : i32
    %c0_i32_0 = arith.constant 0 : i32
    %c0_i32_1 = arith.constant 0 : i32
    %c0_i32_2 = arith.constant 0 : i32
    return %c0_i32, %c0_i32_0, %c0_i32_1 : i32, i32, i32
  }
  func.func @transform_3(%arg0: i32) -> (i32, i32, i32) {
    %c0_i32 = arith.constant 0 : i32
    %c0_i32_0 = arith.constant 0 : i32
    %c0_i32_1 = arith.constant 0 : i32
    %c0_i32_2 = arith.constant 0 : i32
    return %c0_i32, %c0_i32_0, %c0_i32_1 : i32, i32, i32
  }
  func.func @transform_4(%arg0: i32) -> (i32, i32, i32, i32) {
    %c0_i32 = arith.constant 0 : i32
    %c0_i32_0 = arith.constant 0 : i32
    %c0_i32_1 = arith.constant 0 : i32
    %c0_i32_2 = arith.constant 0 : i32
    %c0_i32_3 = arith.constant 0 : i32
    return %c0_i32, %c0_i32_0, %c0_i32_1, %c0_i32_2 : i32, i32, i32, i32
  }
  func.func @transform_5(%arg0: i32) -> (i32, i32, i32, i32) {
    %c0_i32 = arith.constant 0 : i32
    %c0_i32_0 = arith.constant 0 : i32
    %c0_i32_1 = arith.constant 0 : i32
    %c0_i32_2 = arith.constant 0 : i32
    %c0_i32_3 = arith.constant 0 : i32
    return %c0_i32, %c0_i32_0, %c0_i32_1, %c0_i32_2 : i32, i32, i32, i32
  }
  func.func @transform_6(%arg0: i32) -> (i32, i32, i32, i32) {
    %c0_i32 = arith.constant 0 : i32
    %c0_i32_0 = arith.constant 0 : i32
    %c0_i32_1 = arith.constant 0 : i32
    %c0_i32_2 = arith.constant 0 : i32
    %c0_i32_3 = arith.constant 0 : i32
    return %c0_i32, %c0_i32_0, %c0_i32_1, %c0_i32_2 : i32, i32, i32, i32
  }
  func.func @transform_7(%arg0: i32) -> (i32, i32, i32, i32) {
    %c0_i32 = arith.constant 0 : i32
    %c0_i32_0 = arith.constant 0 : i32
    %c0_i32_1 = arith.constant 0 : i32
    %c0_i32_2 = arith.constant 0 : i32
    %c0_i32_3 = arith.constant 0 : i32
    return %c0_i32, %c0_i32_0, %c0_i32_1, %c0_i32_2 : i32, i32, i32, i32
  }
  func.func @transform_8(%arg0: i32) -> (i32, i32, i32, i32) {
    %c0_i32 = arith.constant 0 : i32
    %c0_i32_0 = arith.constant 0 : i32
    %c0_i32_1 = arith.constant 0 : i32
    %c0_i32_2 = arith.constant 0 : i32
    %c0_i32_3 = arith.constant 0 : i32
    return %c0_i32, %c0_i32_0, %c0_i32_1, %c0_i32_2 : i32, i32, i32, i32
  }
  func.func @transform_9(%arg0: i32) -> (i32, i32, i32, i32) {
    %c0_i32 = arith.constant 0 : i32
    %c0_i32_0 = arith.constant 0 : i32
    %c0_i32_1 = arith.constant 0 : i32
    %c0_i32_2 = arith.constant 0 : i32
    %c0_i32_3 = arith.constant 0 : i32
    return %c0_i32, %c0_i32_0, %c0_i32_1, %c0_i32_2 : i32, i32, i32, i32
  }
  func.func @transform_10(%arg0: i32) -> (i32, i32, i32, i32) {
    %c0_i32 = arith.constant 0 : i32
    %c0_i32_0 = arith.constant 0 : i32
    %c0_i32_1 = arith.constant 0 : i32
    %c0_i32_2 = arith.constant 0 : i32
    %c0_i32_3 = arith.constant 0 : i32
    return %c0_i32, %c0_i32_0, %c0_i32_1, %c0_i32_2 : i32, i32, i32, i32
  }
  func.func @transform_11(%arg0: i32) -> (i32, i32, i32) {
    %c0_i32 = arith.constant 0 : i32
    %c0_i32_0 = arith.constant 0 : i32
    %c0_i32_1 = arith.constant 0 : i32
    %c0_i32_2 = arith.constant 0 : i32
    return %c0_i32, %c0_i32_0, %c0_i32_1 : i32, i32, i32
  }
  func.func @transform_12(%arg0: i32) -> (i32, i32, i32) {
    %c0_i32 = arith.constant 0 : i32
    %c0_i32_0 = arith.constant 0 : i32
    %c0_i32_1 = arith.constant 0 : i32
    %c0_i32_2 = arith.constant 0 : i32
    return %c0_i32, %c0_i32_0, %c0_i32_1 : i32, i32, i32
  }
  func.func @transform_13(%arg0: i32) -> (i32, i32, i32) {
    %c0_i32 = arith.constant 0 : i32
    %c0_i32_0 = arith.constant 0 : i32
    %c0_i32_1 = arith.constant 0 : i32
    %c0_i32_2 = arith.constant 0 : i32
    return %c0_i32, %c0_i32_0, %c0_i32_1 : i32, i32, i32
  }
  func.func @transform_14(%arg0: i32) -> (i32, i32, i32) {
    %c0_i32 = arith.constant 0 : i32
    %c0_i32_0 = arith.constant 0 : i32
    %c0_i32_1 = arith.constant 0 : i32
    %c0_i32_2 = arith.constant 0 : i32
    return %c0_i32, %c0_i32_0, %c0_i32_1 : i32, i32, i32
  }
  func.func @transform_15(%arg0: i32) -> (i32, i32, i32) {
    %c0_i32 = arith.constant 0 : i32
    %c0_i32_0 = arith.constant 0 : i32
    %c0_i32_1 = arith.constant 0 : i32
    %c0_i32_2 = arith.constant 0 : i32
    return %c0_i32, %c0_i32_0, %c0_i32_1 : i32, i32, i32
  }
  func.func @transform_16(%arg0: i32) -> (i32, i32, i32) {
    %c0_i32 = arith.constant 0 : i32
    %c0_i32_0 = arith.constant 0 : i32
    %c0_i32_1 = arith.constant 0 : i32
    %c0_i32_2 = arith.constant 0 : i32
    return %c0_i32, %c0_i32_0, %c0_i32_1 : i32, i32, i32
  }
  func.func @transform_17(%arg0: i32) -> (i32, i32, i32) {
    %c0_i32 = arith.constant 0 : i32
    %c0_i32_0 = arith.constant 0 : i32
    %c0_i32_1 = arith.constant 0 : i32
    %c0_i32_2 = arith.constant 0 : i32
    return %c0_i32, %c0_i32_0, %c0_i32_1 : i32, i32, i32
  }
  func.func @transform_18(%arg0: i32) -> (i32, i32) {
    %c0_i32 = arith.constant 0 : i32
    %c0_i32_0 = arith.constant 0 : i32
    %c0_i32_1 = arith.constant 0 : i32
    return %c0_i32, %c0_i32_0 : i32, i32
  }
  func.func @transform_19(%arg0: i32) -> (i32, i32) {
    %c0_i32 = arith.constant 0 : i32
    %c0_i32_0 = arith.constant 0 : i32
    %c0_i32_1 = arith.constant 0 : i32
    return %c0_i32, %c0_i32_0 : i32, i32
  }
  func.func @transform_20(%arg0: i32) -> (i32, i32) {
    %c0_i32 = arith.constant 0 : i32
    %c0_i32_0 = arith.constant 0 : i32
    %c0_i32_1 = arith.constant 0 : i32
    return %c0_i32, %c0_i32_0 : i32, i32
  }
  func.func @transform_21(%arg0: i32) -> (i32, i32) {
    %c0_i32 = arith.constant 0 : i32
    %c0_i32_0 = arith.constant 0 : i32
    %c0_i32_1 = arith.constant 0 : i32
    return %c0_i32, %c0_i32_0 : i32, i32
  }
  func.func @transform_22(%arg0: i32) -> (i32, i32, i32) {
    %c0_i32 = arith.constant 0 : i32
    %c0_i32_0 = arith.constant 0 : i32
    %c0_i32_1 = arith.constant 0 : i32
    return %arg0, %c0_i32, %c0_i32_0 : i32, i32, i32
  }
}

module attributes {stable_mosaic.version = 11 : i64} {
  func.func @_epilogue_kernel(%arg0: memref<8x32xf32, #tpu.memory_space<vmem>>, %arg1: memref<8x1xi32, #tpu.memory_space<vmem>>, %arg2: memref<2x32xf32, #tpu.memory_space<vmem>>, %arg3: memref<2x32xf32, #tpu.memory_space<vmem>>, %arg4: memref<8x192xf32, #tpu.memory_space<vmem>>, %arg5: memref<8x192xf32, #tpu.memory_space<vmem>>, %arg6: memref<8x1xf32, #tpu.memory_space<vmem>>, %arg7: memref<32x32xf32, #tpu.memory_space<vmem>>, %arg8: memref<1x32xf32, #tpu.memory_space<vmem>>, %arg9: memref<32x32xf32, #tpu.memory_space<vmem>>, %arg10: memref<1x32xf32, #tpu.memory_space<vmem>>, %arg11: memref<32x4xf32, #tpu.memory_space<vmem>>, %arg12: memref<1x4xf32, #tpu.memory_space<vmem>>, %arg13: memref<32x16xf32, #tpu.memory_space<vmem>>, %arg14: memref<16x32xf32, #tpu.memory_space<vmem>>, %arg15: memref<1x32xf32, #tpu.memory_space<vmem>>, %arg16: memref<1x4xf32, #tpu.memory_space<vmem>>) attributes {dimension_semantics = [], scalar_prefetch = 0 : i64, scratch_operands = 0 : i64, tpu.core_type = #tpu.core_type<tc>} {
    %c0 = arith.constant 0 : index
    %c0_0 = arith.constant 0 : index
    %0 = vector.load %arg0[%c0, %c0_0] : memref<8x32xf32, #tpu.memory_space<vmem>>, vector<8x32xf32>
    %c0_1 = arith.constant 0 : index
    %c0_2 = arith.constant 0 : index
    %1 = vector.load %arg7[%c0_1, %c0_2] : memref<32x32xf32, #tpu.memory_space<vmem>>, vector<32x32xf32>
    %cst = arith.constant dense<0.000000e+00> : vector<8x32xf32>
    %2 = tpu.matmul %0, %1, %cst {dimension_numbers = #tpu.dot_dimension_numbers<[1], [0], [0], [1], [0, 0, 1, 1], [], []>} : vector<8x32xf32>, vector<32x32xf32>, vector<8x32xf32> -> vector<8x32xf32>
    %c0_3 = arith.constant 0 : index
    %c0_4 = arith.constant 0 : index
    %3 = vector.load %arg8[%c0_3, %c0_4] : memref<1x32xf32, #tpu.memory_space<vmem>>, vector<1x32xf32>
    %4 = vector.broadcast %3 : vector<1x32xf32> to vector<8x32xf32>
    %5 = arith.addf %2, %4 : vector<8x32xf32>
    %cst_5 = arith.constant 0.000000e+00 : f32
    %6 = vector.broadcast %cst_5 : f32 to vector<8x32xf32>
    %7 = arith.maximumf %5, %6 : vector<8x32xf32>
    %c0_6 = arith.constant 0 : index
    %c0_7 = arith.constant 0 : index
    %8 = vector.load %arg9[%c0_6, %c0_7] : memref<32x32xf32, #tpu.memory_space<vmem>>, vector<32x32xf32>
    %cst_8 = arith.constant dense<0.000000e+00> : vector<8x32xf32>
    %9 = tpu.matmul %7, %8, %cst_8 {dimension_numbers = #tpu.dot_dimension_numbers<[1], [0], [0], [1], [0, 0, 1, 1], [], []>} : vector<8x32xf32>, vector<32x32xf32>, vector<8x32xf32> -> vector<8x32xf32>
    %c0_9 = arith.constant 0 : index
    %c0_10 = arith.constant 0 : index
    %10 = vector.load %arg10[%c0_9, %c0_10] : memref<1x32xf32, #tpu.memory_space<vmem>>, vector<1x32xf32>
    %11 = vector.broadcast %10 : vector<1x32xf32> to vector<8x32xf32>
    %12 = arith.addf %9, %11 : vector<8x32xf32>
    %cst_11 = arith.constant 0.000000e+00 : f32
    %13 = vector.broadcast %cst_11 : f32 to vector<8x32xf32>
    %14 = arith.maximumf %12, %13 : vector<8x32xf32>
    %c0_12 = arith.constant 0 : index
    %c0_13 = arith.constant 0 : index
    %15 = vector.load %arg11[%c0_12, %c0_13] : memref<32x4xf32, #tpu.memory_space<vmem>>, vector<32x4xf32>
    %cst_14 = arith.constant dense<0.000000e+00> : vector<8x4xf32>
    %16 = tpu.matmul %14, %15, %cst_14 {dimension_numbers = #tpu.dot_dimension_numbers<[1], [0], [0], [1], [0, 0, 1, 1], [], []>} : vector<8x32xf32>, vector<32x4xf32>, vector<8x4xf32> -> vector<8x4xf32>
    %c0_15 = arith.constant 0 : index
    %c0_16 = arith.constant 0 : index
    %17 = vector.load %arg12[%c0_15, %c0_16] : memref<1x4xf32, #tpu.memory_space<vmem>>, vector<1x4xf32>
    %18 = vector.broadcast %17 : vector<1x4xf32> to vector<8x4xf32>
    %19 = arith.addf %16, %18 : vector<8x4xf32>
    %cst_17 = arith.constant dense<0xFF800000> : vector<8xf32>
    %20 = vector.multi_reduction <maximumf>, %19, %cst_17 [1] : vector<8x4xf32> to vector<8xf32>
    %21 = vector.shape_cast %20 : vector<8xf32> to vector<8x1xf32>
    %22 = vector.broadcast %21 : vector<8x1xf32> to vector<8x4xf32>
    %23 = arith.subf %19, %22 : vector<8x4xf32>
    %24 = math.exp %23 : vector<8x4xf32>
    %cst_18 = arith.constant dense<0.000000e+00> : vector<8xf32>
    %25 = vector.multi_reduction <add>, %24, %cst_18 [1] : vector<8x4xf32> to vector<8xf32>
    %26 = vector.shape_cast %25 : vector<8xf32> to vector<8x1xf32>
    %27 = math.log %26 : vector<8x1xf32>
    %28 = arith.addf %21, %27 : vector<8x1xf32>
    %29 = tpu.iota {dimensions = array<i32: 1>} : vector<8x4xi32>
    %c0_19 = arith.constant 0 : index
    %c0_20 = arith.constant 0 : index
    %30 = vector.load %arg1[%c0_19, %c0_20] : memref<8x1xi32, #tpu.memory_space<vmem>>, vector<8x1xi32>
    %31 = vector.broadcast %30 : vector<8x1xi32> to vector<8x4xi32>
    %32 = arith.cmpi eq, %29, %31 : vector<8x4xi32>
    %33 = arith.extui %32 : vector<8x4xi1> to vector<8x4xi32>
    %34 = arith.sitofp %33 : vector<8x4xi32> to vector<8x4xf32>
    %35 = arith.mulf %19, %34 : vector<8x4xf32>
    %cst_21 = arith.constant dense<0.000000e+00> : vector<8xf32>
    %36 = vector.multi_reduction <add>, %35, %cst_21 [1] : vector<8x4xf32> to vector<8xf32>
    %37 = vector.shape_cast %36 : vector<8xf32> to vector<8x1xf32>
    %38 = arith.subf %28, %37 : vector<8x1xf32>
    %cst_22 = arith.constant dense<0.000000e+00> : vector<1xf32>
    %39 = vector.multi_reduction <add>, %38, %cst_22 [0] : vector<8x1xf32> to vector<1xf32>
    %40 = vector.shape_cast %39 : vector<1xf32> to vector<1x1xf32>
    %cst_23 = arith.constant 1.250000e-01 : f32
    %41 = vector.broadcast %cst_23 : f32 to vector<1x1xf32>
    %42 = arith.mulf %40, %41 : vector<1x1xf32>
    %c0_24 = arith.constant 0 : index
    %c0_25 = arith.constant 0 : index
    %43 = vector.load %arg2[%c0_24, %c0_25] : memref<2x32xf32, #tpu.memory_space<vmem>>, vector<2x32xf32>
    %c0_26 = arith.constant 0 : index
    %c0_27 = arith.constant 0 : index
    %44 = vector.load %arg13[%c0_26, %c0_27] : memref<32x16xf32, #tpu.memory_space<vmem>>, vector<32x16xf32>
    %cst_28 = arith.constant dense<0.000000e+00> : vector<2x16xf32>
    %45 = tpu.matmul %43, %44, %cst_28 {dimension_numbers = #tpu.dot_dimension_numbers<[1], [0], [0], [1], [0, 0, 1, 1], [], []>} : vector<2x32xf32>, vector<32x16xf32>, vector<2x16xf32> -> vector<2x16xf32>
    %cst_29 = arith.constant dense<0.000000e+00> : vector<16xf32>
    %46 = vector.multi_reduction <add>, %45, %cst_29 [0] : vector<2x16xf32> to vector<16xf32>
    %47 = vector.shape_cast %46 : vector<16xf32> to vector<1x16xf32>
    %cst_30 = arith.constant 2.000000e+00 : f32
    %48 = vector.broadcast %cst_30 : f32 to vector<1x16xf32>
    %49 = arith.divf %47, %48 : vector<1x16xf32>
    %50 = vector.broadcast %49 : vector<1x16xf32> to vector<2x16xf32>
    %51 = arith.subf %45, %50 : vector<2x16xf32>
    %52 = arith.mulf %51, %51 : vector<2x16xf32>
    %cst_31 = arith.constant dense<0.000000e+00> : vector<16xf32>
    %53 = vector.multi_reduction <add>, %52, %cst_31 [0] : vector<2x16xf32> to vector<16xf32>
    %54 = vector.shape_cast %53 : vector<16xf32> to vector<1x16xf32>
    %cst_32 = arith.constant 2.000000e+00 : f32
    %55 = vector.broadcast %cst_32 : f32 to vector<1x16xf32>
    %56 = arith.divf %54, %55 : vector<1x16xf32>
    %cst_33 = arith.constant 9.99999974E-6 : f32
    %57 = vector.broadcast %cst_33 : f32 to vector<1x16xf32>
    %58 = arith.addf %56, %57 : vector<1x16xf32>
    %59 = math.rsqrt %58 : vector<1x16xf32>
    %60 = vector.broadcast %59 : vector<1x16xf32> to vector<2x16xf32>
    %61 = arith.mulf %51, %60 : vector<2x16xf32>
    %cst_34 = arith.constant 0.000000e+00 : f32
    %62 = vector.broadcast %cst_34 : f32 to vector<2x16xf32>
    %63 = arith.maximumf %61, %62 : vector<2x16xf32>
    %c0_35 = arith.constant 0 : index
    %c0_36 = arith.constant 0 : index
    %64 = vector.load %arg14[%c0_35, %c0_36] : memref<16x32xf32, #tpu.memory_space<vmem>>, vector<16x32xf32>
    %cst_37 = arith.constant dense<0.000000e+00> : vector<2x32xf32>
    %65 = tpu.matmul %63, %64, %cst_37 {dimension_numbers = #tpu.dot_dimension_numbers<[1], [0], [0], [1], [0, 0, 1, 1], [], []>} : vector<2x16xf32>, vector<16x32xf32>, vector<2x32xf32> -> vector<2x32xf32>
    %c0_38 = arith.constant 0 : index
    %c0_39 = arith.constant 0 : index
    %66 = vector.load %arg15[%c0_38, %c0_39] : memref<1x32xf32, #tpu.memory_space<vmem>>, vector<1x32xf32>
    %67 = vector.broadcast %66 : vector<1x32xf32> to vector<2x32xf32>
    %68 = arith.addf %65, %67 : vector<2x32xf32>
    %69 = arith.mulf %68, %68 : vector<2x32xf32>
    %cst_40 = arith.constant dense<0.000000e+00> : vector<2xf32>
    %70 = vector.multi_reduction <add>, %69, %cst_40 [1] : vector<2x32xf32> to vector<2xf32>
    %71 = vector.shape_cast %70 : vector<2xf32> to vector<2x1xf32>
    %72 = math.sqrt %71 : vector<2x1xf32>
    %cst_41 = arith.constant 9.99999996E-13 : f32
    %73 = vector.broadcast %cst_41 : f32 to vector<2x1xf32>
    %74 = arith.maximumf %72, %73 : vector<2x1xf32>
    %75 = vector.broadcast %74 : vector<2x1xf32> to vector<2x32xf32>
    %76 = arith.divf %68, %75 : vector<2x32xf32>
    %c0_42 = arith.constant 0 : index
    %c0_43 = arith.constant 0 : index
    %77 = vector.load %arg3[%c0_42, %c0_43] : memref<2x32xf32, #tpu.memory_space<vmem>>, vector<2x32xf32>
    %c0_44 = arith.constant 0 : index
    %c0_45 = arith.constant 0 : index
    %78 = vector.load %arg13[%c0_44, %c0_45] : memref<32x16xf32, #tpu.memory_space<vmem>>, vector<32x16xf32>
    %cst_46 = arith.constant dense<0.000000e+00> : vector<2x16xf32>
    %79 = tpu.matmul %77, %78, %cst_46 {dimension_numbers = #tpu.dot_dimension_numbers<[1], [0], [0], [1], [0, 0, 1, 1], [], []>} : vector<2x32xf32>, vector<32x16xf32>, vector<2x16xf32> -> vector<2x16xf32>
    %cst_47 = arith.constant dense<0.000000e+00> : vector<16xf32>
    %80 = vector.multi_reduction <add>, %79, %cst_47 [0] : vector<2x16xf32> to vector<16xf32>
    %81 = vector.shape_cast %80 : vector<16xf32> to vector<1x16xf32>
    %cst_48 = arith.constant 2.000000e+00 : f32
    %82 = vector.broadcast %cst_48 : f32 to vector<1x16xf32>
    %83 = arith.divf %81, %82 : vector<1x16xf32>
    %84 = vector.broadcast %83 : vector<1x16xf32> to vector<2x16xf32>
    %85 = arith.subf %79, %84 : vector<2x16xf32>
    %86 = arith.mulf %85, %85 : vector<2x16xf32>
    %cst_49 = arith.constant dense<0.000000e+00> : vector<16xf32>
    %87 = vector.multi_reduction <add>, %86, %cst_49 [0] : vector<2x16xf32> to vector<16xf32>
    %88 = vector.shape_cast %87 : vector<16xf32> to vector<1x16xf32>
    %cst_50 = arith.constant 2.000000e+00 : f32
    %89 = vector.broadcast %cst_50 : f32 to vector<1x16xf32>
    %90 = arith.divf %88, %89 : vector<1x16xf32>
    %cst_51 = arith.constant 9.99999974E-6 : f32
    %91 = vector.broadcast %cst_51 : f32 to vector<1x16xf32>
    %92 = arith.addf %90, %91 : vector<1x16xf32>
    %93 = math.rsqrt %92 : vector<1x16xf32>
    %94 = vector.broadcast %93 : vector<1x16xf32> to vector<2x16xf32>
    %95 = arith.mulf %85, %94 : vector<2x16xf32>
    %cst_52 = arith.constant 0.000000e+00 : f32
    %96 = vector.broadcast %cst_52 : f32 to vector<2x16xf32>
    %97 = arith.maximumf %95, %96 : vector<2x16xf32>
    %c0_53 = arith.constant 0 : index
    %c0_54 = arith.constant 0 : index
    %98 = vector.load %arg14[%c0_53, %c0_54] : memref<16x32xf32, #tpu.memory_space<vmem>>, vector<16x32xf32>
    %cst_55 = arith.constant dense<0.000000e+00> : vector<2x32xf32>
    %99 = tpu.matmul %97, %98, %cst_55 {dimension_numbers = #tpu.dot_dimension_numbers<[1], [0], [0], [1], [0, 0, 1, 1], [], []>} : vector<2x16xf32>, vector<16x32xf32>, vector<2x32xf32> -> vector<2x32xf32>
    %c0_56 = arith.constant 0 : index
    %c0_57 = arith.constant 0 : index
    %100 = vector.load %arg15[%c0_56, %c0_57] : memref<1x32xf32, #tpu.memory_space<vmem>>, vector<1x32xf32>
    %101 = vector.broadcast %100 : vector<1x32xf32> to vector<2x32xf32>
    %102 = arith.addf %99, %101 : vector<2x32xf32>
    %103 = arith.mulf %102, %102 : vector<2x32xf32>
    %cst_58 = arith.constant dense<0.000000e+00> : vector<2xf32>
    %104 = vector.multi_reduction <add>, %103, %cst_58 [1] : vector<2x32xf32> to vector<2xf32>
    %105 = vector.shape_cast %104 : vector<2xf32> to vector<2x1xf32>
    %106 = math.sqrt %105 : vector<2x1xf32>
    %cst_59 = arith.constant 9.99999996E-13 : f32
    %107 = vector.broadcast %cst_59 : f32 to vector<2x1xf32>
    %108 = arith.maximumf %106, %107 : vector<2x1xf32>
    %109 = vector.broadcast %108 : vector<2x1xf32> to vector<2x32xf32>
    %110 = arith.divf %102, %109 : vector<2x32xf32>
    %cst_60 = arith.constant dense<0.000000e+00> : vector<2x2xf32>
    %111 = tpu.matmul %76, %110, %cst_60 {dimension_numbers = #tpu.dot_dimension_numbers<[1], [1], [0], [0], [0, 0, 1, 0], [], []>} : vector<2x32xf32>, vector<2x32xf32>, vector<2x2xf32> -> vector<2x2xf32>
    %cst_61 = arith.constant 1.000000e+01 : f32
    %112 = vector.broadcast %cst_61 : f32 to vector<2x2xf32>
    %113 = arith.mulf %111, %112 : vector<2x2xf32>
    %cst_62 = arith.constant dense<0xFF800000> : vector<2xf32>
    %114 = vector.multi_reduction <maximumf>, %113, %cst_62 [1] : vector<2x2xf32> to vector<2xf32>
    %115 = vector.shape_cast %114 : vector<2xf32> to vector<2x1xf32>
    %116 = vector.broadcast %115 : vector<2x1xf32> to vector<2x2xf32>
    %117 = arith.subf %113, %116 : vector<2x2xf32>
    %118 = math.exp %117 : vector<2x2xf32>
    %cst_63 = arith.constant dense<0.000000e+00> : vector<2xf32>
    %119 = vector.multi_reduction <add>, %118, %cst_63 [1] : vector<2x2xf32> to vector<2xf32>
    %120 = vector.shape_cast %119 : vector<2xf32> to vector<2x1xf32>
    %121 = math.log %120 : vector<2x1xf32>
    %122 = arith.addf %115, %121 : vector<2x1xf32>
    %123 = tpu.iota {dimensions = array<i32: 0>} : vector<2x2xi32>
    %124 = tpu.iota {dimensions = array<i32: 1>} : vector<2x2xi32>
    %125 = arith.cmpi eq, %123, %124 : vector<2x2xi32>
    %126 = arith.extui %125 : vector<2x2xi1> to vector<2x2xi32>
    %127 = arith.sitofp %126 : vector<2x2xi32> to vector<2x2xf32>
    %128 = arith.mulf %113, %127 : vector<2x2xf32>
    %cst_64 = arith.constant dense<0.000000e+00> : vector<2xf32>
    %129 = vector.multi_reduction <add>, %128, %cst_64 [1] : vector<2x2xf32> to vector<2xf32>
    %130 = vector.shape_cast %129 : vector<2xf32> to vector<2x1xf32>
    %131 = arith.subf %122, %130 : vector<2x1xf32>
    %cst_65 = arith.constant dense<0.000000e+00> : vector<1xf32>
    %132 = vector.multi_reduction <add>, %131, %cst_65 [0] : vector<2x1xf32> to vector<1xf32>
    %133 = vector.shape_cast %132 : vector<1xf32> to vector<1x1xf32>
    %cst_66 = arith.constant 5.000000e-01 : f32
    %134 = vector.broadcast %cst_66 : f32 to vector<1x1xf32>
    %135 = arith.mulf %133, %134 : vector<1x1xf32>
    %c0_67 = arith.constant 0 : index
    %c0_68 = arith.constant 0 : index
    %136 = vector.load %arg4[%c0_67, %c0_68] : memref<8x192xf32, #tpu.memory_space<vmem>>, vector<8x192xf32>
    %c0_69 = arith.constant 0 : index
    %c0_70 = arith.constant 0 : index
    %137 = vector.load %arg5[%c0_69, %c0_70] : memref<8x192xf32, #tpu.memory_space<vmem>>, vector<8x192xf32>
    %138 = arith.subf %136, %137 : vector<8x192xf32>
    %139 = arith.mulf %138, %138 : vector<8x192xf32>
    %cst_71 = arith.constant dense<0.000000e+00> : vector<8xf32>
    %140 = vector.multi_reduction <add>, %139, %cst_71 [1] : vector<8x192xf32> to vector<8xf32>
    %141 = vector.shape_cast %140 : vector<8xf32> to vector<8x1xf32>
    %cst_72 = arith.constant 1.920000e+02 : f32
    %142 = vector.broadcast %cst_72 : f32 to vector<8x1xf32>
    %143 = arith.divf %141, %142 : vector<8x1xf32>
    %c0_73 = arith.constant 0 : index
    %c0_74 = arith.constant 0 : index
    %144 = vector.load %arg6[%c0_73, %c0_74] : memref<8x1xf32, #tpu.memory_space<vmem>>, vector<8x1xf32>
    %145 = arith.mulf %143, %144 : vector<8x1xf32>
    %cst_75 = arith.constant dense<0.000000e+00> : vector<1xf32>
    %146 = vector.multi_reduction <add>, %145, %cst_75 [0] : vector<8x1xf32> to vector<1xf32>
    %147 = vector.shape_cast %146 : vector<1xf32> to vector<1x1xf32>
    %cst_76 = arith.constant dense<0.000000e+00> : vector<1xf32>
    %148 = vector.multi_reduction <add>, %144, %cst_76 [0] : vector<8x1xf32> to vector<1xf32>
    %149 = vector.shape_cast %148 : vector<1xf32> to vector<1x1xf32>
    %150 = arith.divf %147, %149 : vector<1x1xf32>
    %cst_77 = arith.constant 1.000000e+00 : f32
    %151 = vector.broadcast %cst_77 : f32 to vector<1x1xf32>
    %152 = arith.mulf %151, %150 : vector<1x1xf32>
    %cst_78 = arith.constant 5.000000e-02 : f32
    %153 = vector.broadcast %cst_78 : f32 to vector<1x1xf32>
    %154 = arith.mulf %153, %42 : vector<1x1xf32>
    %cst_79 = arith.constant 1.000000e+00 : f32
    %155 = vector.broadcast %cst_79 : f32 to vector<1x1xf32>
    %156 = arith.mulf %155, %135 : vector<1x1xf32>
    %157 = arith.addf %152, %154 : vector<1x1xf32>
    %158 = arith.addf %157, %156 : vector<1x1xf32>
    %159 = tpu.iota {dimensions = array<i32: 1>} : vector<1x4xi32>
    %c0_i32 = arith.constant 0 : i32
    %160 = vector.broadcast %c0_i32 : i32 to vector<1x4xi32>
    %161 = arith.cmpi eq, %159, %160 : vector<1x4xi32>
    %c1_i32 = arith.constant 1 : i32
    %162 = vector.broadcast %c1_i32 : i32 to vector<1x4xi32>
    %163 = arith.cmpi eq, %159, %162 : vector<1x4xi32>
    %c2_i32 = arith.constant 2 : i32
    %164 = vector.broadcast %c2_i32 : i32 to vector<1x4xi32>
    %165 = arith.cmpi eq, %159, %164 : vector<1x4xi32>
    %166 = vector.shape_cast %154 : vector<1x1xf32> to vector<1x1xf32>
    %167 = vector.broadcast %166 : vector<1x1xf32> to vector<1x4xf32>
    %168 = vector.shape_cast %156 : vector<1x1xf32> to vector<1x1xf32>
    %169 = vector.broadcast %168 : vector<1x1xf32> to vector<1x4xf32>
    %170 = arith.select %165, %167, %169 : vector<1x4xi1>, vector<1x4xf32>
    %171 = vector.shape_cast %152 : vector<1x1xf32> to vector<1x1xf32>
    %172 = vector.broadcast %171 : vector<1x1xf32> to vector<1x4xf32>
    %173 = arith.select %163, %172, %170 : vector<1x4xi1>, vector<1x4xf32>
    %174 = vector.shape_cast %158 : vector<1x1xf32> to vector<1x1xf32>
    %175 = vector.broadcast %174 : vector<1x1xf32> to vector<1x4xf32>
    %176 = arith.select %161, %175, %173 : vector<1x4xi1>, vector<1x4xf32>
    %c0_80 = arith.constant 0 : index
    %c0_81 = arith.constant 0 : index
    %177 = vector.load %arg16[%c0_80, %c0_81] : memref<1x4xf32, #tpu.memory_space<vmem>>, vector<1x4xf32>
    tpu.vector_store %arg16[%c0_80, %c0_81], %176 {strides = array<i32>} : memref<1x4xf32, #tpu.memory_space<vmem>>, vector<1x4xf32>,
    return
  }
}

</mosaic_0001>

<bundles_post_ra>
// kernel: forward.4
= control target key start
LH: loop header
LB: loop body
LE: loop exit
PB: predicated region body
PF: predicated region fallthrough
CT: control target
= control target key end

     0   :  { %v130_v0 = vmov 0.0   ;;  %vm47_vm0 = vcmask 523264   ;;  %vm121_vm1 = vcmask 261120   ;;  %s259_s1 = inlined_call_operand.vmem [shape: f32[192,32], index: 1, kind: input, shape index: {}]   ;;  %s260_s0 = inlined_call_operand.vmem [shape: f32[8,192], index: 0, kind: input, shape index: {}]   ;;  %s261_s2 = inlined_call_operand.vmem [shape: f32[1,32], index: 2, kind: input, shape index: {}]   ;;  %s262_s3 = inlined_call_operand.vmem [shape: f32[8,32], index: 3, kind: output, shape index: {}]  }
   0x1   :  { %51 = vmatprep.subr.mxu0 %v130_v0  ;;  %v31_v1 = vld [vmem:[%s259_s1 + $0x78] sm:$0xff]  ;;  %v30_v2 = vld [vmem:[%s259_s1 + $0x70] sm:$0xff]  ;;  %v29_v3 = vld [vmem:[%s259_s1 + $0x68] sm:$0xff] }
   0x2   :  { %52 = vmatpush1.msra.mxu0 %v31_v1  ;;  %v28_v4 = vld [vmem:[%s259_s1 + $0x60] sm:$0xff]  ;;  %v27_v5 = vld [vmem:[%s259_s1 + $0x58] sm:$0xff]  ;;  %v26_v6 = vld [vmem:[%s259_s1 + $0x50] sm:$0xff] }
   0x3   :  { %53 = vmatprep.subr.mxu0 %v130_v0  ;;  %v15_v7 = vld [vmem:[%s260_s0 + $0x8] sm:$0xff]  ;;  %v24_v9 = vld [vmem:[%s259_s1 + $0x40] sm:$0xff]  ;;  %v23_v10 = vld [vmem:[%s259_s1 + $0x38] sm:$0xff] }
   0x4   :  { %54 = vmatpush1.msra.mxu0 %v30_v2  ;;  %128 = vmatprep.mubr.msk.f32.mxu0 %vm47_vm0, %v15_v7  ;;  %v25_v8 = vld [vmem:[%s259_s1 + $0x48] sm:$0xff]  ;;  %v22_v11 = vld [vmem:[%s259_s1 + $0x30] sm:$0xff]  ;;  %v20_v13 = vld [vmem:[%s259_s1 + $0x20] sm:$0xff] }
   0x5   :  { %55 = vmatprep.subr.mxu0 %v130_v0  ;;  %v21_v12 = vld [vmem:[%s259_s1 + $0x28] sm:$0xff]  ;;  %v19_v14 = vld [vmem:[%s259_s1 + $0x18] sm:$0xff]  ;;  %v18_v15 = vld [vmem:[%s259_s1 + $0x10] sm:$0xff] }
   0x6   :  { %56 = vmatpush1.msra.mxu0 %v29_v3  ;;  %v17_v16 = vld [vmem:[%s259_s1 + $0x8] sm:$0xff]  ;;  %v16_v17 = vld [vmem:[%s259_s1] sm:$0xff]  ;;  %v39_v18 = vld [vmem:[%s259_s1 + $0xb8] sm:$0xff] }
   0x7   :  { %57 = vmatprep.subr.mxu0 %v130_v0  ;;  %v38_v19 = vld [vmem:[%s259_s1 + $0xb0] sm:$0xff]  ;;  %v37_v20 = vld [vmem:[%s259_s1 + $0xa8] sm:$0xff]  ;;  %v36_v21 = vld [vmem:[%s259_s1 + $0xa0] sm:$0xff] }
   0x8   :  { %58 = vmatpush1.msra.mxu0 %v28_v4  ;;  %v35_v22 = vld [vmem:[%s259_s1 + $0x98] sm:$0xff]  ;;  %v34_v23 = vld [vmem:[%s259_s1 + $0x90] sm:$0xff]  ;;  %v33_v24 = vld [vmem:[%s259_s1 + $0x88] sm:$0xff] }
   0x9   :  { %59 = vmatprep.subr.mxu0 %v130_v0  ;;  %v32_v25 = vld [vmem:[%s259_s1 + $0x80] sm:$0xff] }
   0xa   :  { %60 = vmatpush1.msra.mxu0 %v27_v5  ;;  %v14_v26 = vld [vmem:[%s260_s0] sm:$0xff] }
   0xb   :  { %61 = vmatprep.subr.mxu0 %v130_v0  ;;  %v127_v27 = vld [vmem:[%s261_s2] ss:$0 sm:$0xff] }
   0xc   :  { %62 = vmatpush1.msra.mxu0 %v26_v6 }
   0xd   :  { %63 = vmatprep.subr.mxu0 %v130_v0 }
   0xe   :  { %64 = vmatpush1.msra.mxu0 %v25_v8 }
   0xf   :  { %65 = vmatprep.subr.mxu0 %v130_v0 }
  0x10   :  { %66 = vmatpush1.msra.mxu0 %v24_v9 }
  0x11   :  { %67 = vmatprep.subr.mxu0 %v130_v0 }
  0x12   :  { %68 = vmatpush1.msra.mxu0 %v23_v10 }
  0x13   :  { %69 = vmatprep.subr.mxu0 %v130_v0 }
  0x14   :  { %70 = vmatpush1.msra.mxu0 %v22_v11 }
  0x15   :  { %71 = vmatprep.subr.mxu0 %v130_v0 }
  0x16   :  { %72 = vmatpush1.msra.mxu0 %v21_v12 }
  0x17   :  { %73 = vmatprep.subr.mxu0 %v130_v0 }
  0x18   :  { %74 = vmatpush1.msra.mxu0 %v20_v13 }
  0x19   :  { %75 = vmatprep.subr.mxu0 %v130_v0 }
  0x1a   :  { %76 = vmatpush1.msra.mxu0 %v19_v14 }
  0x1b   :  { %77 = vmatprep.subr.mxu0 %v130_v0 }
  0x1c   :  { %78 = vmatpush1.msra.mxu0 %v18_v15 }
  0x1d   :  { %79 = vmatprep.subr.mxu0 %v130_v0 }
  0x1e   :  { %80 = vmatpush1.msra.mxu0 %v17_v16 }
  0x1f   :  { %81 = vmatprep.subr.mxu0 %v130_v0 }
  0x20   :  { %82 = vmatpush1.msra.mxu0 %v16_v17 }
  0x21   :  { %99 = vmatprep.subr.mxu0 %v130_v0 }
  0x22   :  { %100 = vmatpush2.msra.mxu0 %v39_v18 }
  0x23   :  { %101 = vmatprep.subr.mxu0 %v130_v0 }
  0x24   :  { %102 = vmatpush2.msra.mxu0 %v38_v19 }
  0x25   :  { %103 = vmatprep.subr.mxu0 %v130_v0 }
  0x26   :  { %104 = vmatpush2.msra.mxu0 %v37_v20 }
  0x27   :  { %105 = vmatprep.subr.mxu0 %v130_v0 }
  0x28   :  { %106 = vmatpush2.msra.mxu0 %v36_v21 }
  0x29   :  { %107 = vmatprep.subr.mxu0 %v130_v0 }
  0x2a   :  { %108 = vmatpush2.msra.mxu0 %v35_v22 }
  0x2b   :  { %109 = vmatprep.subr.mxu0 %v130_v0 }
  0x2c   :  { %110 = vmatpush2.msra.mxu0 %v34_v23 }
  0x2d   :  { %111 = vmatprep.subr.mxu0 %v130_v0 }
  0x2e   :  { %112 = vmatpush2.msra.mxu0 %v33_v24 }
  0x2f   :  { %113 = vmatprep.subr.mxu0 %v130_v0 }
  0x30   :  { %114 = vmatpush2.msra.mxu0 %v32_v25 }
  0x31   :  { %116 = vmatmul.mubr.f32.vlgmr.msra.gmra.mxu0 %v14_v26 }
  0xf1   :  { %v117_v28 = vpop.f32.mrf.mxu0 }
  0xf2   :  { %v118_v29 = vadd.f32 %v127_v27, %v117_v28 }
  0xf3   :  { %v119_v30 = vpop.f32.mrf.mxu0 }
  0xf4   :  { %122 = vst.msk [vmem:[%s262_s3] sm:$0xff] %vm121_vm1, %v118_v29 }

// kernel: forward.7
= control target key start
LH: loop header
LB: loop body
LE: loop exit
PB: predicated region body
PF: predicated region fallthrough
CT: control target
= control target key end

     0   :  { %v1043_v0 = vmov 0.0   ;;  %vm1044_vm0 = vmmov 0   ;;  %vm65_vm1 = vcmask 261120   ;;  %vm421_vm2 = vcmask 123904   ;;  %s1309_s7 = inlined_call_operand.vmem [shape: f32[32,32], index: 7, kind: input, shape index: {}]   ;;  %s1310_s9 = inlined_call_operand.vmem [shape: f32[32,32], index: 9, kind: input, shape index: {}]   ;;  %s1311_s0 = inlined_call_operand.vmem [shape: f32[8,32], index: 0, kind: input, shape index: {}]   ;;  %s1312_s11 = inlined_call_operand.vmem [shape: f32[32,4], index: 11, kind: input, shape index: {}]   ;;  %s1313_s8 = inlined_call_operand.vmem [shape: f32[1,32], index: 8, kind: input, shape index: {}]   ;;  %s1314_s13 = inlined_call_operand.vmem [shape: f32[32,16], index: 13, kind: input, shape index: {}]   ;;  %s1315_s2 = inlined_call_operand.vmem [shape: f32[2,32], index: 2, kind: input, shape index: {}]   ;;  %s1316_s3 = inlined_call_operand.vmem [shape: f32[2,32], index: 3, kind: input, shape index: {}]   ;;  %s1317_s10 = inlined_call_operand.vmem [shape: f32[1,32], index: 10, kind: input, shape index: {}]   ;;  %s1318_s14 = inlined_call_operand.vmem [shape: f32[16,32], index: 14, kind: input, shape index: {}]   ;;  %s1319_s12 = inlined_call_operand.vmem [shape: f32[1,4], index: 12, kind: input, shape index: {}]   ;;  %s1320_s15 = inlined_call_operand.vmem [shape: f32[1,32], index: 15, kind: input, shape index: {}]   ;;  %s1321_s1 = inlined_call_operand.vmem [shape: s32[8,1], index: 1, kind: input, shape index: {}]   ;;  %s1322_s4 = inlined_call_operand.vmem [shape: f32[8,192], index: 4, kind: input, shape index: {}]   ;;  %s1323_s5 = inlined_call_operand.vmem [shape: f32[8,192], index: 5, kind: input, shape index: {}]   ;;  %s1324_s6 = inlined_call_operand.vmem [shape: f32[8,1], index: 6, kind: input, shape index: {}]   ;;  %s1325_s16 = inlined_call_operand.vmem [shape: f32[1,4], index: 16, kind: output, shape index: {}]  }
   0x1   :  { %1327 = sst [smem:[#allocation2_spill]] %s1309_s7  ;;  %942 = vmatprep.subr.mxu0 %v1043_v0  ;;  %950 = vmatprep.mubr.msk.f32.mxu0 %vm1044_vm0, %v1043_v0  ;;  %v143_v3 = vld [vmem:[%s1310_s9 + $0x18] sm:$0xff]  ;;  %v142_v5 = vld [vmem:[%s1310_s9 + $0x10] sm:$0xff]  ;;  %v53_v7 = vld [vmem:[%s1311_s0] sm:$0xff]  ;;  %vm454_vm3 = vcmask 130048   ;;  %vm309_vm4 = vcmask 31744  }
   0x2   :  { %s1328_s23 = sld [smem:[#allocation2_spill]]  ;;  %953 = vmatprep.subr.mxu1 %v1043_v0  ;;  %961 = vmatprep.mubr.msk.f32.mxu1 %vm1044_vm0, %v1043_v0  ;;  %v141_v8 = vld [vmem:[%s1310_s9 + $0x8] sm:$0xff]  ;;  %v140_v9 = vld [vmem:[%s1310_s9] sm:$0xff]  ;;  %v228_v10 = vld [vmem:[%s1312_s11 + $0x18] sm:$0xff]  ;;  %vm529_vm5 = vcmask 254976   ;;  %vm803_vm10 = vcmask 9216  }
   0x3   :  { %954 = vmatpush3.msra.mxu1 %v143_v3  ;;  %v894_v11 = vld [vmem:[%s1313_s8] ss:$0 sm:$0xff]  ;;  %v347_v16 = vld [vmem:[%s1314_s13 + $0x18] sm:$0xff]  ;;  %v346_v17 = vld [vmem:[%s1314_s13 + $0x10] sm:$0xff]  ;;  %vm843_vm11 = vcmask 523264   ;;  %vm852_vm14 = vcmask 7168  }
   0x4   :  { %955 = vmatprep.subr.mxu1 %v1043_v0  ;;  %v345_v18 = vld [vmem:[%s1314_s13 + $0x8] sm:$0xff]  ;;  %v344_v19 = vld [vmem:[%s1314_s13] sm:$0xff]  ;;  %v227_v22 = vld [vmem:[%s1312_s11 + $0x10] sm:$0xff]  ;;  %vm826_vm15 = vcmask 1041408  }
   0x5   :  { %956 = vmatpush3.msra.mxu1 %v142_v5  ;;  %v343_v20 = vld [vmem:[%s1315_s2] sm:$0x3]  ;;  %v226_v23 = vld [vmem:[%s1312_s11 + $0x8] sm:$0xff] }
   0x6   :  { %957 = vmatprep.subr.mxu1 %v1043_v0  ;;  %v543_v21 = vld [vmem:[%s1316_s3] sm:$0x3]  ;;  %v446_v30 = vld [vmem:[%s1318_s14 + $0x8] sm:$0xff] }
   0x7   :  { %958 = vmatpush3.msra.mxu1 %v141_v8  ;;  %v225_v24 = vld [vmem:[%s1312_s11] sm:$0xff] }
   0x8   :  { %v57_v1 = vld [vmem:[%s1328_s23 + $0x18] sm:$0xff]  ;;  %v56_v2 = vld [vmem:[%s1328_s23 + $0x10] sm:$0xff]  ;;  %v55_v4 = vld [vmem:[%s1328_s23 + $0x8] sm:$0xff]  ;;  %959 = vmatprep.subr.mxu1 %v1043_v0 }
   0x9   :  { %943 = vmatpush3.msra.mxu0 %v57_v1  ;;  %v54_v6 = vld [vmem:[%s1328_s23] sm:$0xff]  ;;  %960 = vmatpush3.msra.mxu1 %v140_v9 }
   0xa   :  { %944 = vmatprep.subr.mxu0 %v1043_v0  ;;  %975 = vmatprep.subr.mxu1 %v1043_v0  ;;  %v896_v25 = vld [vmem:[%s1317_s10] ss:$0 sm:$0xff] }
   0xb   :  { %945 = vmatpush3.msra.mxu0 %v56_v2  ;;  %v445_v31 = vld [vmem:[%s1318_s14] sm:$0xff] }
   0xc   :  { %946 = vmatprep.subr.mxu0 %v1043_v0 }
   0xd   :  { %947 = vmatpush3.msra.mxu0 %v55_v4 }
   0xe   :  { %948 = vmatprep.subr.mxu0 %v1043_v0 }
   0xf   :  { %949 = vmatpush3.msra.mxu0 %v54_v6 }
  0x10   :  { %951 = vmatmul.mubr.msk.f32.vlgmr.msra.gmra.mxu0 %vm65_vm1, %v53_v7  ;;  %964 = vmatprep.subr.mxu0 %v1043_v0 }
  0x11   :  { %972 = vmatprep.mubr.msk.f32.mxu0 %vm1044_vm0, %v1043_v0  ;;  %965 = vmatpush3.msra.mxu0 %v228_v10 }
  0x12   :  { %966 = vmatprep.subr.mxu0 %v1043_v0 }
  0x13   :  { %967 = vmatpush3.msra.mxu0 %v227_v22 }
  0x14   :  { %968 = vmatprep.subr.mxu0 %v1043_v0 }
  0x15   :  { %969 = vmatpush3.msra.mxu0 %v226_v23 }
  0x16   :  { %970 = vmatprep.subr.mxu0 %v1043_v0 }
  0x17   :  { %971 = vmatpush3.msra.mxu0 %v225_v24 }
  0x18   :  { %986 = vmatprep.subr.mxu0 %v1043_v0 }
  0xd0   :  { %v135_v12 = vpop.f32.mrf.mxu0 }
  0xd1   :  { %v136_v13 = vadd.f32 %v894_v11, %v135_v12 }
  0xd2   :  { %v952_v14 = vpop.f32.mrf.mxu0 }
  0xd3   :  { %v139_v15 = vmax.f32 %v136_v13, 0.0 }
  0xd5   :  { %962 = vmatmul.mubr.msk.f32.vlgmr.msra.gmra.mxu1 %vm65_vm1, %v139_v15 }
  0xd6   :  { %976 = vmatpush3.msra.mxu1 %v347_v16  ;;  %983 = vmatprep.mubr.msk.f32.mxu1 %vm1044_vm0, %v1043_v0 }
  0xd7   :  { %977 = vmatprep.subr.mxu1 %v1043_v0 }
  0xd8   :  { %978 = vmatpush3.msra.mxu1 %v346_v17 }
  0xd9   :  { %979 = vmatprep.subr.mxu1 %v1043_v0 }
  0xda   :  { %980 = vmatpush3.msra.mxu1 %v345_v18 }
  0xdb   :  { %981 = vmatprep.subr.mxu1 %v1043_v0 }
  0xdc   :  { %982 = vmatpush3.msra.mxu1 %v344_v19 }
  0xdd   :  { %984 = vmatmul.mubr.msk.f32.vlgmr.msra.gmra.mxu1 %vm65_vm1, %v343_v20  ;;  %993 = vmatprep.subr.mxu1 %v1043_v0 }
  0xde   :  { %994 = vmatpush3.msra.mxu1 %v347_v16  ;;  %1001 = vmatprep.mubr.msk.f32.mxu1 %vm1044_vm0, %v1043_v0 }
  0xdf   :  { %995 = vmatprep.subr.mxu1 %v1043_v0 }
  0xe0   :  { %996 = vmatpush3.msra.mxu1 %v346_v17  ;;  %v1045_v17 = vmov 0  }
  0xe1   :  { %997 = vmatprep.subr.mxu1 %v1043_v0  ;;  %1019 = vset.pattern.permute.xlu0 %v1045_v17 }
  0xe2   :  { %998 = vmatpush3.msra.mxu1 %v345_v18  ;;  %1020 = vset.pattern.permute.xlu1 %v1045_v17  ;;  %v898_v18 = vld [vmem:[%s1319_s12] ss:$0 sm:$0xff] }
  0xe3   :  { %999 = vmatprep.subr.mxu1 %v1043_v0 }
  0xe4   :  { %1000 = vmatpush3.msra.mxu1 %v344_v19 }
  0xe5   :  { %1002 = vmatmul.mubr.msk.f32.vlgmr.msra.gmra.mxu1 %vm65_vm1, %v543_v21 }
 0x195   :  { %v220_v26 = vpop.f32.mrf.mxu1 }
 0x196   :  { %v221_v27 = vadd.f32 %v896_v25, %v220_v26  ;;  %v902_v25 = vld [vmem:[%s1320_s15] ss:$0 sm:$0xff] }
 0x197   :  { %v963_v28 = vpop.f32.mrf.mxu1 }
 0x198   :  { %v224_v29 = vmax.f32 %v221_v27, 0.0 }
 0x19a   :  { %973 = vmatmul.mubr.msk.f32.vlgmr.msra.gmra.mxu0 %vm65_vm1, %v224_v29 }
 0x19b   :  { %987 = vmatpush3.msra.mxu0 %v446_v30  ;;  %990 = vmatprep.mubr.msk.f32.mxu0 %vm1044_vm0, %v1043_v0 }
 0x19c   :  { %988 = vmatprep.subr.mxu0 %v1043_v0 }
 0x19d   :  { %v417_v32 = vpop.f32.mrf.mxu1  ;;  %989 = vmatpush3.msra.mxu0 %v445_v31 }
 0x19e   :  { %v422_v33 = vsel %vm421_vm2, %v417_v32, 0.0  ;;  %1004 = vmatprep.subr.mxu0 %v1043_v0 }
 0x19f   :  { %v423_v34 = vrot.slane %v422_v33, 4  ;;  %v985_v35 = vpop.f32.mrf.mxu1 }
 0x1a1   :  { %v424_v36 = vadd.f32 %v423_v34, %v422_v33  ;;  %v324_v34 = vld [vmem:[%s1321_s1] sm:$0xff] }
 0x1a3   :  { %v425_v37 = vrot.slane %v424_v36, 2 }
 0x1a5   :  { %v426_v38 = vadd.f32 %v425_v37, %v424_v36  ;;  %v613_v39 = vpop.f32.mrf.mxu1 }
 0x1a6   :  { %v617_v40 = vsel %vm421_vm2, %v613_v39, 0.0 }
 0x1a7   :  { %v427_v41 = vrot.slane %v426_v38, 1  ;;  %v618_v42 = vrot.slane %v617_v40, 4  ;;  %v1003_v43 = vpop.f32.mrf.mxu1 }
 0x1a9   :  { %v428_v44 = vadd.f32 %v427_v41, %v426_v38  ;;  %v619_v45 = vadd.f32 %v618_v42, %v617_v40 }
 0x1ab   :  { %v430_v46 = vmul.f32 0.5, %v428_v44  ;;  %v620_v47 = vrot.slane %v619_v45, 2 }
 0x1ad   :  { %v431_v48 = vsub.f32 %v417_v32, %v430_v46  ;;  %v621_v49 = vadd.f32 %v620_v47, %v619_v45 }
 0x1af   :  { %v432_v50 = vmul.f32 %v431_v48, %v431_v48  ;;  %v622_v51 = vrot.slane %v621_v49, 1 }
 0x1b1   :  { %v433_v52 = vsel %vm421_vm2, %v432_v50, 0.0  ;;  %v623_v53 = vadd.f32 %v622_v51, %v621_v49 }
 0x1b2   :  { %v434_v54 = vrot.slane %v433_v52, 4 }
 0x1b3   :  { %v624_v55 = vmul.f32 0.5, %v623_v53 }
 0x1b4   :  { %v435_v56 = vadd.f32 %v434_v54, %v433_v52 }
 0x1b5   :  { %v625_v57 = vsub.f32 %v613_v39, %v624_v55 }
 0x1b6   :  { %v436_v58 = vrot.slane %v435_v56, 2 }
 0x1b7   :  { %v626_v59 = vmul.f32 %v625_v57, %v625_v57 }
 0x1b8   :  { %v437_v60 = vadd.f32 %v436_v58, %v435_v56 }
 0x1b9   :  { %v627_v61 = vsel %vm421_vm2, %v626_v59, 0.0 }
 0x1ba   :  { %v438_v62 = vrot.slane %v437_v60, 1  ;;  %v628_v63 = vrot.slane %v627_v61, 4 }
 0x1bc   :  { %v439_v1 = vadd.f32 %v438_v62, %v437_v60  ;;  %v629_v2 = vadd.f32 %v628_v63, %v627_v61 }
 0x1be   :  { %v440_v3 = vmul.f32 0.5, %v439_v1  ;;  %v630_v4 = vrot.slane %v629_v2, 2 }
 0x1c0   :  { %v441_v5 = vadd.f32 1e-05, %v440_v3  ;;  %v631_v6 = vadd.f32 %v630_v4, %v629_v2  ;;  %v836_v2 = vld [vmem:[%s1322_s4 + $0x8] sm:$0xff]  ;;  %v322_v4 = vlaneseq }
 0x1c1   :  { %v838_v3 = vld [vmem:[%s1323_s5 + $0x8] sm:$0xff] }
 0x1c2   :  { %1021 = vrsqrt.f32 %v441_v5  ;;  %v632_v7 = vrot.slane %v631_v6, 1  ;;  %v835_v5 = vld [vmem:[%s1322_s4] sm:$0xff] }
 0x1c4   :  { %v633_v8 = vadd.f32 %v632_v7, %v631_v6  ;;  %v837_v6 = vld [vmem:[%s1323_s5] sm:$0xff]  ;;  %v840_v7 = vsub.f32 %v836_v2, %v838_v3 }
 0x1c6   :  { %v634_v9 = vmul.f32 0.5, %v633_v8  ;;  %v839_v8 = vsub.f32 %v835_v5, %v837_v6 }
 0x1c8   :  { %v635_v10 = vadd.f32 1e-05, %v634_v9  ;;  %v1286_v9 = vand.u32 127, %v322_v4 }
 0x1ca   :  { %1023 = vrsqrt.f32 %v635_v10  ;;  %v842_v10 = vmul.f32 %v840_v7, %v840_v7  ;;  %vm872_vm2 = vcmp.eq.s32.totalorder %v1286_v9, 0 }
 0x1cf   :  { %v1022_v11 = vpop.eup %1021 }
 0x1d0   :  { %v443_v12 = vmul.f32 %v1022_v11, %v431_v48 }
 0x1d2   :  { %v444_v13 = vmax.f32 %v443_v12, 0.0  ;;  %v841_v12 = vmul.f32 %v839_v8, %v839_v8 }
 0x1d4   :  { %991 = vmatmul.mubr.msk.f32.vlgmr.msra.gmra.mxu0 %vm454_vm3, %v444_v13  ;;  %v844_v13 = vsel %vm843_vm11, %v842_v10, 0.0 }
 0x1d5   :  { %1005 = vmatpush3.msra.mxu0 %v446_v30  ;;  %1008 = vmatprep.mubr.msk.f32.mxu0 %vm1044_vm0, %v1043_v0 }
 0x1d6   :  { %1006 = vmatprep.subr.mxu0 %v1043_v0 }
 0x1d7   :  { %v1024_v14 = vpop.eup %1023  ;;  %1007 = vmatpush3.msra.mxu0 %v445_v31 }
 0x1d8   :  { %v637_v15 = vmul.f32 %v1024_v14, %v625_v57  ;;  %1011 = vmatprep.subr.mxu0 %v1043_v0  ;;  %v817_v14 = vshrl.u32 %v322_v4, 7 }
 0x1da   :  { %v638_v16 = vmax.f32 %v637_v15, 0.0  ;;  %vm818_vm13 = vcmp.eq.s32.totalorder %v817_v14, %v1286_v9 }
 0x1dc   :  { %1009 = vmatmul.mubr.msk.f32.vlgmr.msra.gmra.mxu0 %vm454_vm3, %v638_v16  ;;  %vm888_vm3 = vcmask 24576  }
 0x1dd   :  { %1013 = vmatprep.mubr.msk.f32.mxu0 %vm1044_vm0, %v1043_v0  ;;  %vm874_vm0 = vcmp.eq.s32.totalorder %v1286_v9, 2 }
 0x25a   :  { %v305_v19 = vpop.f32.mrf.mxu0 }
 0x25b   :  { %v1253_v20 = vadd.f32 %v898_v18, %v305_v19  ;;  %v845_v18 = vadd.f32 %v844_v13, %v841_v12 }
 0x25c   :  { %v974_v21 = vpop.f32.mrf.mxu0 }
 0x25d   :  { %v310_v22 = vsel %vm309_vm4, %v1253_v20, -inf  ;;  %v908_v21 = vsel %vm818_vm13, 1.0, %v1043_v0 }
 0x25e   :  { %311 = vmax.xlane.f32.xlu1 %v310_v22 }
 0x294   :  { %v524_v23 = vpop.f32.mrf.mxu0 }
 0x295   :  { %v525_v27 = vadd.f32 %v902_v25, %v524_v23 }
 0x296   :  { %v992_v24 = vpop.f32.mrf.mxu0 }
 0x297   :  { %v528_v32 = vmul.f32 %v525_v27, %v525_v27 }
 0x299   :  { %v530_v33 = vsel %vm529_vm5, %v528_v32, 0.0 }
 0x29c   :  { %v708_v26 = vpop.f32.mrf.mxu0 }
 0x29d   :  { %v709_v28 = vadd.f32 %v902_v25, %v708_v26  ;;  %v850_v25 = vld [vmem:[%s1324_s6] sm:$0xff] }
 0x29e   :  { %v1010_v29 = vpop.f32.mrf.mxu0  ;;  %v860_v26 = vsel %vm852_vm14, %v850_v25, 0.0 }
 0x29f   :  { %v712_v30 = vmul.f32 %v709_v28, %v709_v28 }
 0x2a1   :  { %v713_v31 = vsel %vm529_vm5, %v712_v30, 0.0 }
 0x2a2   :  { %714 = vadd.xlane.f32.xlu0 %v713_v31 }
 0x2a6   :  { %531 = vadd.xlane.f32.xlu0 %v530_v33 }
 0x2bc   :  { %326 = vperm.xlu0 %1019, %v324_v34  }
 0x2e7   :  { %v1265_v53 = vpop.xlane.xlu1 %311 }
 0x2e8   :  { %v313_v54 = vsub.f32 %v1253_v20, %v1265_v53 }
 0x2ea   :  { %v314_v55 = vmul.f32 1.442695, %v313_v54 }
 0x32b   :  { %v715_v35 = vpop.xlane.xlu0 %714 }
 0x32c   :  { %1025 = vrsqrt.f32 %v715_v35  ;;  %vm718_vm6 = vcmp.eq.f32.partialorder %v715_v35, inf  ;;  %v721_v39 = vand.u32 2147483648, %v715_v35  ;;  %vm720_vm7 = vcmp.eq.f32.partialorder %v715_v35, 0.0 }
 0x32f   :  { %v532_v36 = vpop.xlane.xlu0 %531 }
 0x330   :  { %1027 = vrsqrt.f32 %v532_v36  ;;  %vm535_vm8 = vcmp.eq.f32.partialorder %v532_v36, inf  ;;  %v538_v45 = vand.u32 2147483648, %v532_v36  ;;  %vm537_vm9 = vcmp.eq.f32.partialorder %v532_v36, 0.0 }
 0x337   :  { %v327_v11 = vpop.permute.xlu0 %326 }
 0x338   :  { %vm328_vm12 = vcmp.eq.s32.totalorder %v1286_v9, %v327_v11 }
 0x339   :  { %v1026_v37 = vpop.eup %1025  ;;  %v900_v17 = vsel %vm328_vm12, 1.0, %v1043_v0 }
 0x33a   :  { %v717_v38 = vmul.f32 %v1026_v37, %v715_v35  ;;  %v331_v19 = vmul.f32 %v900_v17, %v1253_v20 }
 0x33c   :  { %v719_v40 = vsel %vm718_vm6, %v715_v35, %v717_v38  ;;  %v332_v22 = vsel %vm309_vm4, %v331_v19, 0.0 }
 0x33d   :  { %v1028_v41 = vpop.eup %1027  ;;  %v722_v42 = vsel %vm720_vm7, %v721_v39, %v719_v40 }
 0x33e   :  { %v723_v43 = vmax.f32 %v722_v42, 1e-12  ;;  %v534_v44 = vmul.f32 %v1028_v41, %v532_v36 }
 0x340   :  { %1029 = vrcp.f32 %v723_v43  ;;  %v536_v46 = vsel %vm535_vm8, %v532_v36, %v534_v44 }
 0x341   :  { %v539_v47 = vsel %vm537_vm9, %v538_v45, %v536_v46 }
 0x342   :  { %v540_v48 = vmax.f32 %v539_v47, 1e-12 }
 0x344   :  { %1031 = vrcp.f32 %v540_v48 }
 0x345   :  { %1033 = vpow2.f32 %v314_v55 }
 0x34d   :  { %v1030_v49 = vpop.eup %1029 }
 0x34e   :  { %v725_v50 = vmul.f32 %v1030_v49, %v709_v28 }
 0x350   :  { %1012 = vmatpush3.xpose.msk.msra.mxu0 %vm65_vm1, %v725_v50 }
 0x351   :  { %v1032_v51 = vpop.eup %1031 }
 0x352   :  { %v542_v52 = vmul.f32 %v1032_v51, %v525_v27  ;;  %v1034_v60 = vpop.eup %1033  ;;  %v861_v27 = vrot.slane %v860_v26, 4 }
 0x353   :  { %v316_v61 = vsel %vm309_vm4, %v1034_v60, 0.0 }
 0x354   :  { %1014 = vmatmul.mubr.msk.f32.vlgmr.msra.gmra.mxu0 %vm65_vm1, %v542_v52  ;;  %v862_v20 = vadd.f32 %v861_v27, %v860_v26  ;;  %vm873_vm1 = vcmp.eq.s32.totalorder %v1286_v9, 1 }
 0x356   :  { %v863_v29 = vrot.slane %v862_v20, 2 }
 0x358   :  { %v864_v0 = vadd.f32 %v863_v29, %v862_v20 }
 0x35a   :  { %v865_v30 = vrot.slane %v864_v0, 1 }
 0x35c   :  { %v866_v33 = vadd.f32 %v865_v30, %v864_v0 }
 0x414   :  { %v798_v56 = vpop.f32.mrf.mxu0 }
 0x415   :  { %v802_v57 = vmul.f32 10.0, %v798_v56 }
 0x416   :  { %v1015_v58 = vpop.f32.mrf.mxu0 }
 0x417   :  { %v804_v59 = vsel %vm803_vm10, %v802_v57, -inf  ;;  %v821_v23 = vmul.f32 %v908_v21, %v802_v57 }
 0x418   :  { %805 = vmax.xlane.f32.xlu1 %v804_v59 }
 0x419   :  { %v822_v24 = vsel %vm803_vm10, %v821_v23, 0.0 }
 0x41c   :  { %317 = vadd.xlane.f32.xlu1 %v316_v61 }
 0x4a1   :  { %v1271_v62 = vpop.xlane.xlu1 %805 }
 0x4a2   :  { %v807_v63 = vsub.f32 %v802_v57, %v1271_v62 }
 0x4a4   :  { %v808_v1 = vmul.f32 1.442695, %v807_v63 }
 0x4a5   :  { %v318_v28 = vpop.xlane.xlu1 %317 }
 0x4a6   :  { %1035 = vpow2.f32 %v808_v1 }
 0x4a7   :  { %1037 = vlog2.f32 %v318_v28 }
 0x4b3   :  { %v1036_v15 = vpop.eup %1035 }
 0x4b4   :  { %v810_v16 = vsel %vm803_vm10, %v1036_v15, 0.0  ;;  %v1038_v31 = vpop.eup %1037 }
 0x4b5   :  { %811 = vadd.xlane.f32.xlu1 %v810_v16  ;;  %v320_v34 = vmul.f32 0.6931472, %v1038_v31 }
 0x4b7   :  { %v321_v38 = vadd.f32 %v320_v34, %v1265_v53 }
 0x4b9   :  { %846 = vadd.xlane.f32.xlu1 %v845_v18 }
 0x4bd   :  { %333 = vadd.xlane.f32.xlu1 %v332_v22 }
 0x4c1   :  { %823 = vadd.xlane.f32.xlu1 %v822_v24 }
 0x53e   :  { %v812_v32 = vpop.xlane.xlu1 %811 }
 0x53f   :  { %1039 = vlog2.f32 %v812_v32 }
 0x540   :  { %1041 = vrcp.f32 %v866_v33 }
 0x542   :  { %v847_v35 = vpop.xlane.xlu1 %846 }
 0x543   :  { %v849_v36 = vmul.f32 0.0052083335, %v847_v35 }
 0x545   :  { %v851_v37 = vmul.f32 %v850_v25, %v849_v36 }
 0x546   :  { %v334_v39 = vpop.xlane.xlu1 %333 }
 0x547   :  { %v853_v40 = vsel %vm852_vm14, %v851_v37, 0.0  ;;  %v335_v41 = vsub.f32 %v321_v38, %v334_v39 }
 0x548   :  { %v854_v42 = vrot.slane %v853_v40, 4 }
 0x549   :  { %v336_v43 = vrot.slane %v335_v41, 4 }
 0x54a   :  { %v855_v44 = vadd.f32 %v854_v42, %v853_v40  ;;  %v824_v54 = vpop.xlane.xlu1 %823 }
 0x54b   :  { %v337_v45 = vadd.f32 %v336_v43, %v335_v41 }
 0x54c   :  { %v1040_v46 = vpop.eup %1039  ;;  %v856_v47 = vrot.slane %v855_v44, 2 }
 0x54d   :  { %v814_v48 = vmul.f32 0.6931472, %v1040_v46  ;;  %v338_v49 = vrot.slane %v337_v45, 2  ;;  %v1042_v53 = vpop.eup %1041 }
 0x54e   :  { %v857_v50 = vadd.f32 %v856_v47, %v855_v44 }
 0x54f   :  { %v339_v51 = vadd.f32 %v338_v49, %v337_v45  ;;  %v815_v52 = vadd.f32 %v814_v48, %v1271_v62 }
 0x550   :  { %v858_v55 = vrot.slane %v857_v50, 1 }
 0x551   :  { %v340_v56 = vrot.slane %v339_v51, 1  ;;  %v825_v57 = vsub.f32 %v815_v52, %v824_v54 }
 0x552   :  { %v859_v58 = vadd.f32 %v858_v55, %v857_v50 }
 0x553   :  { %v827_v59 = vsel %vm826_vm15, %v825_v57, 0.0  ;;  %v341_v60 = vadd.f32 %v340_v56, %v339_v51 }
 0x554   :  { %v828_v61 = vrot.slane %v827_v59, 4  ;;  %v868_v63 = vmul.f32 %v1042_v53, %v859_v58 }
 0x555   :  { %v342_v2 = vmul.f32 0.125, %v341_v60 }
 0x556   :  { %v829_v1 = vadd.f32 %v828_v61, %v827_v59  ;;  %878 = vperm.xlu1 %1020, %v868_v63  }
 0x557   :  { %v869_v5 = vmul.f32 0.05, %v342_v2 }
 0x558   :  { %v830_v3 = vrot.slane %v829_v1, 2 }
 0x559   :  { %v870_v8 = vadd.f32 %v869_v5, %v868_v63 }
 0x55a   :  { %v831_v4 = vadd.f32 %v830_v3, %v829_v1 }
 0x55c   :  { %v832_v6 = vrot.slane %v831_v4, 1 }
 0x55e   :  { %v833_v7 = vadd.f32 %v832_v6, %v831_v4 }
 0x560   :  { %v834_v62 = vmul.f32 0.5, %v833_v7 }
 0x562   :  { %v871_v10 = vadd.f32 %v870_v8, %v834_v62  ;;  %v875_v11 = vsel %vm874_vm0, %v869_v5, %v834_v62 }
 0x564   :  { %884 = vperm.xlu1 %1020, %v871_v10  }
 0x5d1   :  { %v879_v12 = vpop.permute.xlu1 %878 }
 0x5d2   :  { %v881_v13 = vsel %vm873_vm1, %v879_v12, %v875_v11 }
 0x5df   :  { %v885_v14 = vpop.permute.xlu1 %884 }
 0x5e0   :  { %v887_v15 = vsel %vm872_vm2, %v885_v14, %v881_v13 }
 0x5e1   :  { %889 = vst.msk [vmem:[%s1325_s16] sm:$0x1] %vm888_vm3, %v887_v15 }

// kernel: forward.6
= control target key start
LH: loop header
LB: loop body
LE: loop exit
PB: predicated region body
PF: predicated region fallthrough
CT: control target
= control target key end

     0   :  { %vm77_vm0 = vcmask 130048   ;;  %vm81_vm1 = vcmask 123904   ;;  %vm380_vm2 = vcmask 31744   ;;  %vm502_vm3 = vcmask 1041408   ;;  %s3732_s0 = inlined_call_operand.vmem [shape: f32[1,10,16], index: 0, kind: input, shape index: {}]   ;;  %s3733_s4 = inlined_call_operand.vmem [shape: f32[1,4,16,4], index: 4, kind: input, shape index: {}]   ;;  %s3734_s6 = inlined_call_operand.vmem [shape: f32[1,4,16,4], index: 6, kind: input, shape index: {}]   ;;  %s3735_s8 = inlined_call_operand.vmem [shape: f32[1,4,16,4], index: 8, kind: input, shape index: {}]   ;;  %s3736_s2 = inlined_call_operand.vmem [shape: f32[1,1,16], index: 2, kind: input, shape index: {}]   ;;  %s3737_s3 = inlined_call_operand.vmem [shape: f32[1,1,16], index: 3, kind: input, shape index: {}]   ;;  %s3738_s7 = inlined_call_operand.vmem [shape: f32[1,4,1,4], index: 7, kind: input, shape index: {}]   ;;  %s3739_s5 = inlined_call_operand.vmem [shape: f32[1,4,1,4], index: 5, kind: input, shape index: {}]   ;;  %s3740_s9 = inlined_call_operand.vmem [shape: f32[1,4,1,4], index: 9, kind: input, shape index: {}]   ;;  %s3741_s1 = inlined_call_operand.vmem [shape: f32[1,10,10], index: 1, kind: input, shape index: {}]   ;;  %s3742_s10 = inlined_call_operand.vmem [shape: f32[1,4,4,16], index: 10, kind: input, shape index: {}]   ;;  %s3743_s11 = inlined_call_operand.vmem [shape: f32[1,1,16], index: 11, kind: input, shape index: {}]   ;;  %s3744_s14 = inlined_call_operand.vmem [shape: f32[1,16,64], index: 14, kind: input, shape index: {}]   ;;  %s3745_s12 = inlined_call_operand.vmem [shape: f32[1,1,16], index: 12, kind: input, shape index: {}]   ;;  %s3746_s13 = inlined_call_operand.vmem [shape: f32[1,1,16], index: 13, kind: input, shape index: {}]   ;;  %s3747_s16 = inlined_call_operand.vmem [shape: f32[1,64,16], index: 16, kind: input, shape index: {}]   ;;  %s3748_s15 = inlined_call_operand.vmem [shape: f32[1,1,64], index: 15, kind: input, shape index: {}]   ;;  %s3749_s17 = inlined_call_operand.vmem [shape: f32[1,1,16], index: 17, kind: input, shape index: {}]   ;;  %s3750_s20 = inlined_call_operand.vmem [shape: f32[16,192], index: 20, kind: input, shape index: {}]   ;;  %s3751_s18 = inlined_call_operand.vmem [shape: f32[1,16], index: 18, kind: input, shape index: {}]   ;;  %s3752_s19 = inlined_call_operand.vmem [shape: f32[1,16], index: 19, kind: input, shape index: {}]   ;;  %s3753_s21 = inlined_call_operand.vmem [shape: f32[1,192], index: 21, kind: input, shape index: {}]   ;;  %s3754_s22 = inlined_call_operand.vmem [shape: f32[1,10,192], index: 22, kind: output, shape index: {}]  }
   0x1   :  { %3760 = sst [smem:[#allocation2_spill]] %s3732_s0  ;;  %v2746_v40 = vld [vmem:[%s3739_s5] ss:$0 sm:$0xff]  ;;  %v3414_v54 = vld [vmem:[%s3741_s1 + $0x8] sm:$0x3]  ;;  %vm476_vm4 = vcmask 74752  }
   0x2   :  { %3761 = sst [smem:[#allocation3_spill]] %s3733_s4  ;;  %v2752_v43 = vld [vmem:[%s3740_s9] ss:$0 sm:$0xff]  ;;  %vm472_vm5 = vcmask 80896   ;;  %vm1045_vm6 = vcmask 1043456   ;;  %vm2508_vm9 = vcmask 523264  }
   0x3   :  { %3762 = sst [smem:[#allocation4_spill]] %s3734_s6  ;;  %v3422_v58 = vld [vmem:[%s3741_s1] sm:$0xff]  ;;  %vm2738_vm10 = vcmask 517120  }
   0x4   :  { %3763 = sst [smem:[#allocation5_spill]] %s3735_s8 }
   0x5   :  { %3764 = sst [smem:[#allocation6_spill]] %s3736_s2 }
   0x6   :  { %3765 = sst [smem:[#allocation7_spill]] %s3737_s3 }
   0x7   :  { %3766 = sst [smem:[#allocation8_spill]] %s3738_s7 }
   0x8   :  { %s3767_s29 = sld [smem:[#allocation2_spill]] }
   0x9   :  { %s3768_s23 = sld [smem:[#allocation3_spill]] }
   0xa   :  { %s3769_s7 = sld [smem:[#allocation4_spill]] }
   0xb   :  { %s3771_s0 = sld [smem:[#allocation6_spill]] }
   0xc   :  { %s3772_s24 = sld [smem:[#allocation7_spill]] }
   0xd   :  { %s3773_s8 = sld [smem:[#allocation8_spill]] }
   0xe   :  { %v3329_v0 = vld [vmem:[%s3767_s29] sm:$0xff]  ;;  %v3334_v1 = vld [vmem:[%s3767_s29 + $0x8] sm:$0x3]  ;;  %s3770_s29 = sld [smem:[#allocation5_spill]] }
   0xf   :  { %v78_v2 = vsel %vm77_vm0, %v3329_v0, 0.0  ;;  %v82_v3 = vsel %vm81_vm1, %v3334_v1, 0.0  ;;  %v123_v14 = vld [vmem:[%s3768_s23 + $0x8] sm:$0xff]  ;;  %v122_v16 = vld [vmem:[%s3768_s23] sm:$0xff] }
  0x10   :  { %79 = vadd.xlane.f32.xlu0 %v78_v2  ;;  %v213_v15 = vld [vmem:[%s3769_s7 + $0x8] sm:$0xff]  ;;  %2971 = vmatprep.subr.mxu0 %v123_v14  ;;  %v212_v17 = vld [vmem:[%s3769_s7] sm:$0xff]  ;;  %v2769_v49 = vld [vmem:[%s3769_s7 + $0x18] sm:$0xff] }
  0x11   :  { %2978 = vmatprep.subr.mxu1 %v213_v15  ;;  %2972 = vmatpush3.msra.mxu0 %v123_v14  ;;  %v2744_v26 = vld [vmem:[%s3771_s0] ss:$0 sm:$0xff]  ;;  %v2768_v52 = vld [vmem:[%s3769_s7 + $0x10] sm:$0xff] }
  0x12   :  { %2979 = vmatpush3.msra.mxu1 %v213_v15  ;;  %2973 = vmatprep.subr.mxu0 %v122_v16  ;;  %v2745_v28 = vld [vmem:[%s3772_s24] ss:$0 sm:$0xff] }
  0x13   :  { %2980 = vmatprep.subr.mxu1 %v212_v17  ;;  %2974 = vmatpush3.msra.mxu0 %v122_v16  ;;  %v2749_v36 = vld [vmem:[%s3773_s8] ss:$0 sm:$0xff]  ;;  %v2771_v57 = vld [vmem:[%s3773_s8 + $0x1] ss:$0 sm:$0xff]  ;;  %v2763_v16 = vld [vmem:[%s3768_s23 + $0x18] sm:$0xff] }
  0x14   :  { %83 = vadd.xlane.f32.xlu0 %v82_v3  ;;  %2981 = vmatpush3.msra.mxu1 %v212_v17  ;;  %v297_v18 = vld [vmem:[%s3770_s29 + $0x8] sm:$0xff]  ;;  %v296_v35 = vld [vmem:[%s3770_s29] sm:$0xff] }
  0x15   :  { %2985 = vmatprep.subr.mxu0 %v297_v18 }
  0x99   :  { %v80_v4 = vpop.xlane.xlu0 %79 }
  0x9a   :  { %v86_v5 = vmul.f32 0.0625, %v80_v4 }
  0x9c   :  { %v88_v6 = vsub.f32 %v3329_v0, %v86_v5 }
  0x9d   :  { %v84_v7 = vpop.xlane.xlu0 %83 }
  0x9e   :  { %v87_v8 = vmul.f32 0.0625, %v84_v7  ;;  %v90_v9 = vmul.f32 %v88_v6, %v88_v6 }
  0xa0   :  { %v89_v10 = vsub.f32 %v3334_v1, %v87_v8  ;;  %v92_v11 = vsel %vm77_vm0, %v90_v9, 0.0 }
  0xa1   :  { %93 = vadd.xlane.f32.xlu1 %v92_v11 }
  0xa2   :  { %v91_v12 = vmul.f32 %v89_v10, %v89_v10 }
  0xa4   :  { %v95_v13 = vsel %vm81_vm1, %v91_v12, 0.0 }
  0xa5   :  { %96 = vadd.xlane.f32.xlu1 %v95_v13 }
 0x12a   :  { %v94_v19 = vpop.xlane.xlu1 %93 }
 0x12b   :  { %v98_v20 = vmul.f32 0.0625, %v94_v19 }
 0x12d   :  { %v100_v21 = vadd.f32 1e-05, %v98_v20 }
 0x12e   :  { %v97_v22 = vpop.xlane.xlu1 %96 }
 0x12f   :  { %3158 = vrsqrt.f32 %v100_v21  ;;  %v99_v23 = vmul.f32 0.0625, %v97_v22 }
 0x131   :  { %v101_v24 = vadd.f32 1e-05, %v99_v23  ;;  %v2762_v23 = vld [vmem:[%s3768_s23 + $0x10] sm:$0xff] }
 0x133   :  { %3160 = vrsqrt.f32 %v101_v24  ;;  %v2775_v24 = vld [vmem:[%s3770_s29 + $0x18] sm:$0xff] }
 0x13c   :  { %v3159_v25 = vpop.eup %3158 }
 0x13d   :  { %v104_v27 = vmul.f32 %v3159_v25, %v88_v6  ;;  %v2774_v25 = vld [vmem:[%s3770_s29 + $0x10] sm:$0xff] }
 0x13f   :  { %v112_v29 = vmul.f32 %v2744_v26, %v104_v27 }
 0x140   :  { %v3161_v30 = vpop.eup %3160 }
 0x141   :  { %v3365_v31 = vadd.f32 %v2745_v28, %v112_v29  ;;  %v105_v32 = vmul.f32 %v3161_v30, %v89_v10  ;;  %v2765_v30 = vld [vmem:[%s3739_s5 + $0x1] ss:$0 sm:$0xff] }
 0x143   :  { %v113_v33 = vmul.f32 %v2744_v26, %v105_v32  ;;  %2975 = vmatprep.mubr.msk.f32.mxu0 %vm77_vm0, %v3365_v31  ;;  %2982 = vmatprep.mubr.msk.f32.mxu1 %vm77_vm0, %v3365_v31  ;;  %v581_v26 = vld [vmem:[%s3742_s10] sm:$0xf] }
 0x145   :  { %v3371_v34 = vadd.f32 %v2745_v28, %v113_v33  ;;  %v2777_v33 = vld [vmem:[%s3740_s9 + $0x1] ss:$0 sm:$0xff] }
 0x147   :  { %2976 = vmatmul.mubr.msk.f32.vlgmr.msra.gmra.mxu0 %vm77_vm0, %v3371_v34  ;;  %2983 = vmatmul.mubr.msk.f32.vlgmr.msra.gmra.mxu1 %vm77_vm0, %v3371_v34 }
 0x148   :  { %2986 = vmatpush3.msra.mxu0 %v297_v18  ;;  %2989 = vmatprep.mubr.msk.f32.mxu0 %vm77_vm0, %v3365_v31 }
 0x149   :  { %2987 = vmatprep.subr.mxu0 %v296_v35 }
 0x14a   :  { %2988 = vmatpush3.msra.mxu0 %v296_v35 }
 0x14b   :  { %2990 = vmatmul.mubr.msk.f32.vlgmr.msra.gmra.mxu0 %vm77_vm0, %v3371_v34 }
 0x207   :  { %v2977_v37 = vpop.f32.mrf.mxu0  ;;  %v2984_v38 = vpop.f32.mrf.mxu1 }
 0x208   :  { %v293_v39 = vadd.f32 %v2984_v38, %v2749_v36  ;;  %v209_v51 = vadd.f32 %v2977_v37, %v2746_v40 }
 0x209   :  { %v203_v41 = vpop.f32.mrf.mxu0  ;;  %v287_v42 = vpop.f32.mrf.mxu1 }
 0x20a   :  { %v204_v44 = vadd.f32 %v2746_v40, %v203_v41  ;;  %v288_v45 = vadd.f32 %v2749_v36, %v287_v42  ;;  %2992 = vmatprep.subr.msk.mxu1 %vm380_vm2, %v293_v39  ;;  %v2801_v40 = vld [vmem:[%s3769_s7 + $0x28] sm:$0xff]  ;;  %v2800_v42 = vld [vmem:[%s3769_s7 + $0x20] sm:$0xff] }
 0x20b   :  { %v2991_v46 = vpop.f32.mrf.mxu0  ;;  %2993 = vmatpush3.xpose.msk.msra.mxu1 %vm380_vm2, %v293_v39 }
 0x20c   :  { %v377_v47 = vadd.f32 %v2991_v46, %v2752_v43  ;;  %2994 = vmatprep.subr.msk.mxu1 %vm380_vm2, %v288_v45  ;;  %2996 = vmatprep.mubr.msk.f32.mxu1 %vm380_vm2, %v204_v44 }
 0x20d   :  { %v371_v48 = vpop.f32.mrf.mxu0 }
 0x20e   :  { %v372_v50 = vadd.f32 %v2752_v43, %v371_v48  ;;  %2999 = vmatprep.subr.msk.mxu0 %vm502_vm3, %v377_v47 }
 0x20f   :  { %2995 = vmatpush3.xpose.msk.msra.mxu1 %vm380_vm2, %v288_v45  ;;  %3000 = vmatpush3.msk.msra.mxu0 %vm502_vm3, %v377_v47 }
 0x210   :  { %3001 = vmatprep.subr.mxu0 %v372_v50  ;;  %3013 = vmatprep.subr.mxu1 %v2769_v49 }
 0x211   :  { %3002 = vmatpush3.msra.mxu0 %v372_v50 }
 0x212   :  { %2997 = vmatmul.mubr.msk.f32.vlgmr.msra.gmra.mxu1 %vm380_vm2, %v209_v51  ;;  %3006 = vmatprep.subr.mxu0 %v2763_v16 }
 0x213   :  { %3014 = vmatpush3.msra.mxu1 %v2769_v49  ;;  %3017 = vmatprep.mubr.msk.f32.mxu1 %vm77_vm0, %v3365_v31 }
 0x214   :  { %3015 = vmatprep.subr.mxu1 %v2768_v52 }
 0x215   :  { %3016 = vmatpush3.msra.mxu1 %v2768_v52  ;;  %v2803_v52 = vld [vmem:[%s3773_s8 + $0x2] ss:$0 sm:$0xff] }
 0x216   :  { %3018 = vmatmul.mubr.msk.f32.vlgmr.msra.gmra.mxu1 %vm77_vm0, %v3371_v34 }
 0x2d2   :  { %v2998_v53 = vpop.f32.mrf.mxu1 }
 0x2d3   :  { %v469_v55 = vmul.f32 0.5, %v2998_v53 }
 0x2d4   :  { %v459_v56 = vpop.f32.mrf.mxu1 }
 0x2d5   :  { %v468_v59 = vmul.f32 0.5, %v459_v56  ;;  %v471_v60 = vadd.f32 %v469_v55, %v3414_v54 }
 0x2d6   :  { %v3019_v61 = vpop.f32.mrf.mxu1 }
 0x2d7   :  { %v751_v62 = vadd.f32 %v3019_v61, %v2771_v57  ;;  %v477_v63 = vsel %vm476_vm4, %v471_v60, -inf  ;;  %v470_v2 = vadd.f32 %v468_v59, %v3422_v58 }
 0x2d8   :  { %478 = vmax.xlane.f32.xlu1 %v477_v63  ;;  %v745_v3 = vpop.f32.mrf.mxu1 }
 0x2d9   :  { %v746_v4 = vadd.f32 %v2771_v57, %v745_v3  ;;  %3027 = vmatprep.subr.msk.mxu1 %vm380_vm2, %v751_v62  ;;  %v473_v5 = vsel %vm472_vm5, %v470_v2, -inf }
 0x2da   :  { %3028 = vmatpush3.xpose.msk.msra.mxu1 %vm380_vm2, %v751_v62  ;;  %474 = vmax.xlane.f32.xlu0 %v473_v5 }
 0x2db   :  { %3029 = vmatprep.subr.msk.mxu1 %vm380_vm2, %v746_v4 }
 0x2de   :  { %3030 = vmatpush3.xpose.msk.msra.mxu1 %vm380_vm2, %v746_v4 }
 0x2df   :  { %3046 = vmatprep.subr.msk.mxu1 %vm1045_vm6, %v581_v26 }
 0x361   :  { %v479_v6 = vpop.xlane.xlu1 %478 }
 0x362   :  { %v481_v7 = vsub.f32 %v471_v60, %v479_v6 }
 0x363   :  { %v475_v8 = vpop.xlane.xlu0 %474 }
 0x364   :  { %v484_v9 = vmul.f32 1.442695, %v481_v7  ;;  %v480_v10 = vsub.f32 %v470_v2, %v475_v8  ;;  %v2787_v8 = vld [vmem:[%s3742_s10 + $0x4] sm:$0xf] }
 0x366   :  { %3162 = vpow2.f32 %v484_v9  ;;  %v482_v11 = vmul.f32 1.442695, %v480_v10 }
 0x368   :  { %3164 = vpow2.f32 %v482_v11 }
 0x373   :  { %v3163_v12 = vpop.eup %3162 }
 0x374   :  { %v489_v13 = vsel %vm476_vm4, %v3163_v12, 0.0 }
 0x375   :  { %v3165_v14 = vpop.eup %3164  ;;  %490 = vadd.xlane.f32.xlu1 %v489_v13 }
 0x376   :  { %v486_v15 = vsel %vm472_vm5, %v3165_v14, 0.0 }
 0x377   :  { %487 = vadd.xlane.f32.xlu0 %v486_v15  ;;  %v2795_v15 = vld [vmem:[%s3768_s23 + $0x28] sm:$0xff] }
 0x3fe   :  { %v491_v17 = vpop.xlane.xlu1 %490 }
 0x3ff   :  { %3166 = vrcp.f32 %v491_v17 }
 0x400   :  { %v488_v18 = vpop.xlane.xlu0 %487 }
 0x401   :  { %3168 = vrcp.f32 %v488_v18  ;;  %v2794_v18 = vld [vmem:[%s3768_s23 + $0x20] sm:$0xff] }
 0x40c   :  { %v3167_v19 = vpop.eup %3166 }
 0x40d   :  { %v495_v22 = vmul.f32 %v3167_v19, %v3163_v12  ;;  %v2807_v19 = vld [vmem:[%s3770_s29 + $0x28] sm:$0xff] }
 0x40e   :  { %v3169_v20 = vpop.eup %3168 }
 0x40f   :  { %v494_v21 = vmul.f32 %v3169_v20, %v3165_v14  ;;  %v2806_v20 = vld [vmem:[%s3770_s29 + $0x20] sm:$0xff] }
 0x411   :  { %3003 = vmatprep.mubr.msk.f32.mxu0 %vm472_vm5, %v494_v21  ;;  %v2824_v21 = vld [vmem:[%s3768_s23 + $0x38] sm:$0xff] }
 0x412   :  { %3004 = vmatmul.mubr.msk.f32.vlgmr.msra.gmra.mxu0 %vm472_vm5, %v495_v22 }
 0x413   :  { %3007 = vmatpush3.msra.mxu0 %v2763_v16  ;;  %3010 = vmatprep.mubr.msk.f32.mxu0 %vm77_vm0, %v3365_v31 }
 0x414   :  { %3008 = vmatprep.subr.mxu0 %v2762_v23 }
 0x415   :  { %3009 = vmatpush3.msra.mxu0 %v2762_v23 }
 0x416   :  { %3011 = vmatmul.mubr.msk.f32.vlgmr.msra.gmra.mxu0 %vm77_vm0, %v3371_v34  ;;  %3020 = vmatprep.subr.mxu0 %v2775_v24 }
 0x417   :  { %3021 = vmatpush3.msra.mxu0 %v2775_v24  ;;  %3024 = vmatprep.mubr.msk.f32.mxu0 %vm77_vm0, %v3365_v31 }
 0x418   :  { %3022 = vmatprep.subr.mxu0 %v2774_v25 }
 0x419   :  { %3023 = vmatpush3.msra.mxu0 %v2774_v25  ;;  %v2797_v25 = vld [vmem:[%s3739_s5 + $0x2] ss:$0 sm:$0xff] }
 0x41a   :  { %3025 = vmatmul.mubr.msk.f32.vlgmr.msra.gmra.mxu0 %vm77_vm0, %v3371_v34 }
 0x4d2   :  { %v3005_v27 = vpop.f32.mrf.mxu0 }
 0x4d4   :  { %v572_v28 = vpop.f32.mrf.mxu0 }
 0x4d6   :  { %v3012_v29 = vpop.f32.mrf.mxu0 }
 0x4d7   :  { %v665_v36 = vadd.f32 %v3012_v29, %v2765_v30 }
 0x4d8   :  { %v659_v32 = vpop.f32.mrf.mxu0 }
 0x4d9   :  { %v660_v35 = vadd.f32 %v2765_v30, %v659_v32 }
 0x4da   :  { %v3026_v37 = vpop.f32.mrf.mxu0 }
 0x4db   :  { %v837_v38 = vadd.f32 %v3026_v37, %v2777_v33  ;;  %3031 = vmatprep.mubr.msk.f32.mxu1 %vm380_vm2, %v660_v35  ;;  %v2823_v35 = vld [vmem:[%s3768_s23 + $0x30] sm:$0xff]  ;;  %v2836_v37 = vld [vmem:[%s3770_s29 + $0x38] sm:$0xff] }
 0x4dc   :  { %v831_v39 = vpop.f32.mrf.mxu0  ;;  %3032 = vmatmul.mubr.msk.f32.vlgmr.msra.gmra.mxu1 %vm380_vm2, %v665_v36 }
 0x4dd   :  { %v832_v41 = vadd.f32 %v2777_v33, %v831_v39  ;;  %3034 = vmatprep.subr.msk.mxu0 %vm502_vm3, %v837_v38  ;;  %3048 = vmatprep.mubr.msk.f32.mxu1 %vm380_vm2, %v572_v28 }
 0x4de   :  { %3035 = vmatpush3.msk.msra.mxu0 %vm502_vm3, %v837_v38  ;;  %3047 = vmatpush3.msk.msra.mxu1 %vm1045_vm6, %v581_v26  ;;  %v2835_v38 = vld [vmem:[%s3770_s29 + $0x30] sm:$0xff] }
 0x4df   :  { %3036 = vmatprep.subr.mxu0 %v832_v41  ;;  %3058 = vmatprep.subr.mxu1 %v2801_v40 }
 0x4e0   :  { %3037 = vmatpush3.msra.mxu0 %v832_v41  ;;  %3049 = vmatmul.mubr.msk.f32.vlgmr.msra.gmra.mxu1 %vm380_vm2, %v3005_v27  ;;  %v2809_v27 = vld [vmem:[%s3740_s9 + $0x2] ss:$0 sm:$0xff] }
 0x4e1   :  { %3059 = vmatpush3.msra.mxu1 %v2801_v40  ;;  %3062 = vmatprep.mubr.msk.f32.mxu1 %vm77_vm0, %v3365_v31 }
 0x4e2   :  { %3060 = vmatprep.subr.mxu1 %v2800_v42  ;;  %3041 = vmatprep.subr.msk.mxu0 %vm1045_vm6, %v2787_v8 }
 0x4e3   :  { %3061 = vmatpush3.msra.mxu1 %v2800_v42 }
 0x4e4   :  { %3063 = vmatmul.mubr.msk.f32.vlgmr.msra.gmra.mxu1 %vm77_vm0, %v3371_v34 }
 0x59c   :  { %v3033_v43 = vpop.f32.mrf.mxu1 }
 0x59d   :  { %v928_v44 = vmul.f32 0.5, %v3033_v43  ;;  %v2826_v43 = vld [vmem:[%s3739_s5 + $0x3] ss:$0 sm:$0xff] }
 0x59e   :  { %v918_v45 = vpop.f32.mrf.mxu1 }
 0x59f   :  { %v927_v46 = vmul.f32 0.5, %v918_v45  ;;  %v930_v47 = vadd.f32 %v928_v44, %v3414_v54 }
 0x5a0   :  { %v3484_v48 = vpop.f32.mrf.mxu1 }
 0x5a1   :  { %v934_v49 = vsel %vm476_vm4, %v930_v47, -inf  ;;  %v929_v50 = vadd.f32 %v927_v46, %v3422_v58 }
 0x5a2   :  { %935 = vmax.xlane.f32.xlu1 %v934_v49  ;;  %v3488_v51 = vpop.f32.mrf.mxu1 }
 0x5a3   :  { %v931_v53 = vsel %vm472_vm5, %v929_v50, -inf }
 0x5a4   :  { %v3064_v55 = vpop.f32.mrf.mxu1  ;;  %932 = vmax.xlane.f32.xlu0 %v931_v53 }
 0x5a5   :  { %v1377_v56 = vadd.f32 %v3064_v55, %v2803_v52 }
 0x5a6   :  { %v1371_v57 = vpop.f32.mrf.mxu1 }
 0x5a7   :  { %v1372_v59 = vadd.f32 %v2803_v52, %v1371_v57  ;;  %3072 = vmatprep.subr.msk.mxu1 %vm380_vm2, %v1377_v56  ;;  %v2838_v52 = vld [vmem:[%s3740_s9 + $0x3] ss:$0 sm:$0xff] }
 0x5a8   :  { %3073 = vmatpush3.xpose.msk.msra.mxu1 %vm380_vm2, %v1377_v56 }
 0x5a9   :  { %3074 = vmatprep.subr.msk.mxu1 %vm380_vm2, %v1372_v59 }
 0x5ac   :  { %3075 = vmatpush3.xpose.msk.msra.mxu1 %vm380_vm2, %v1372_v59 }
 0x5ad   :  { %3091 = vmatprep.subr.mxu1 %v2824_v21 }
 0x62b   :  { %v936_v60 = vpop.xlane.xlu1 %935 }
 0x62c   :  { %v938_v61 = vsub.f32 %v930_v47, %v936_v60 }
 0x62d   :  { %v933_v62 = vpop.xlane.xlu0 %932 }
 0x62e   :  { %v941_v63 = vmul.f32 1.442695, %v938_v61  ;;  %v937_v2 = vsub.f32 %v929_v50, %v933_v62 }
 0x630   :  { %3170 = vpow2.f32 %v941_v63  ;;  %v939_v3 = vmul.f32 1.442695, %v937_v2 }
 0x632   :  { %3172 = vpow2.f32 %v939_v3 }
 0x63d   :  { %v3171_v4 = vpop.eup %3170 }
 0x63e   :  { %v946_v5 = vsel %vm476_vm4, %v3171_v4, 0.0 }
 0x63f   :  { %v3173_v6 = vpop.eup %3172  ;;  %947 = vadd.xlane.f32.xlu1 %v946_v5 }
 0x640   :  { %v943_v7 = vsel %vm472_vm5, %v3173_v6, 0.0 }
 0x641   :  { %944 = vadd.xlane.f32.xlu0 %v943_v7 }
 0x6c8   :  { %v948_v9 = vpop.xlane.xlu1 %947 }
 0x6c9   :  { %3174 = vrcp.f32 %v948_v9 }
 0x6ca   :  { %v945_v10 = vpop.xlane.xlu0 %944 }
 0x6cb   :  { %3176 = vrcp.f32 %v945_v10 }
 0x6d6   :  { %v3175_v11 = vpop.eup %3174 }
 0x6d7   :  { %v952_v14 = vmul.f32 %v3175_v11, %v3171_v4 }
 0x6d8   :  { %v3177_v12 = vpop.eup %3176 }
 0x6d9   :  { %v951_v13 = vmul.f32 %v3177_v12, %v3173_v6 }
 0x6db   :  { %3038 = vmatprep.mubr.msk.f32.mxu0 %vm472_vm5, %v951_v13 }
 0x6dc   :  { %3039 = vmatmul.mubr.msk.f32.vlgmr.msra.gmra.mxu0 %vm472_vm5, %v952_v14 }
 0x6dd   :  { %3042 = vmatpush3.msk.msra.mxu0 %vm1045_vm6, %v2787_v8  ;;  %v2819_v8 = vld [vmem:[%s3742_s10 + $0x8] sm:$0xf] }
 0x6de   :  { %3051 = vmatprep.subr.mxu0 %v2795_v15 }
 0x79c   :  { %v3040_v16 = vpop.f32.mrf.mxu0 }
 0x79e   :  { %v1028_v17 = vpop.f32.mrf.mxu0 }
 0x79f   :  { %3043 = vmatprep.mubr.msk.f32.mxu0 %vm380_vm2, %v1028_v17 }
 0x7a0   :  { %3044 = vmatmul.mubr.msk.f32.vlgmr.msra.gmra.mxu0 %vm380_vm2, %v3040_v16 }
 0x7a1   :  { %3052 = vmatpush3.msra.mxu0 %v2795_v15  ;;  %3055 = vmatprep.mubr.msk.f32.mxu0 %vm77_vm0, %v3365_v31  ;;  %v2830_v15 = vld [vmem:[%s3769_s7 + $0x38] sm:$0xff] }
 0x7a2   :  { %3053 = vmatprep.subr.mxu0 %v2794_v18 }
 0x7a3   :  { %3054 = vmatpush3.msra.mxu0 %v2794_v18  ;;  %v2829_v18 = vld [vmem:[%s3769_s7 + $0x30] sm:$0xff] }
 0x7a4   :  { %3056 = vmatmul.mubr.msk.f32.vlgmr.msra.gmra.mxu0 %vm77_vm0, %v3371_v34  ;;  %3065 = vmatprep.subr.mxu0 %v2807_v19 }
 0x7a5   :  { %3066 = vmatpush3.msra.mxu0 %v2807_v19  ;;  %3069 = vmatprep.mubr.msk.f32.mxu0 %vm77_vm0, %v3365_v31 }
 0x7a6   :  { %3067 = vmatprep.subr.mxu0 %v2806_v20 }
 0x7a7   :  { %3068 = vmatpush3.msra.mxu0 %v2806_v20 }
 0x7a8   :  { %3070 = vmatmul.mubr.msk.f32.vlgmr.msra.gmra.mxu0 %vm77_vm0, %v3371_v34 }
 0x860   :  { %v3532_v22 = vpop.f32.mrf.mxu0 }
 0x861   :  { %v1205_v20 = vadd.f32 %v3484_v48, %v3532_v22 }
 0x862   :  { %v3534_v23 = vpop.f32.mrf.mxu0 }
 0x864   :  { %v3057_v24 = vpop.f32.mrf.mxu0 }
 0x865   :  { %v1291_v29 = vadd.f32 %v3057_v24, %v2797_v25  ;;  %v1200_v24 = vadd.f32 %v3488_v51, %v3534_v23 }
 0x866   :  { %v1285_v26 = vpop.f32.mrf.mxu0 }
 0x867   :  { %v1286_v28 = vadd.f32 %v2797_v25, %v1285_v26 }
 0x868   :  { %v3071_v30 = vpop.f32.mrf.mxu0 }
 0x869   :  { %v1463_v32 = vadd.f32 %v3071_v30, %v2809_v27  ;;  %3076 = vmatprep.mubr.msk.f32.mxu1 %vm380_vm2, %v1286_v28 }
 0x86a   :  { %v1457_v33 = vpop.f32.mrf.mxu0  ;;  %3077 = vmatmul.mubr.msk.f32.vlgmr.msra.gmra.mxu1 %vm380_vm2, %v1291_v29 }
 0x86b   :  { %v1458_v36 = vadd.f32 %v2809_v27, %v1457_v33  ;;  %3079 = vmatprep.subr.msk.mxu0 %vm502_vm3, %v1463_v32  ;;  %3092 = vmatpush3.msra.mxu1 %v2824_v21 }
 0x86c   :  { %3095 = vmatprep.mubr.msk.f32.mxu1 %vm77_vm0, %v3365_v31  ;;  %3080 = vmatpush3.msk.msra.mxu0 %vm502_vm3, %v1463_v32 }
 0x86d   :  { %3093 = vmatprep.subr.mxu1 %v2823_v35  ;;  %3081 = vmatprep.subr.mxu0 %v1458_v36 }
 0x86e   :  { %3094 = vmatpush3.msra.mxu1 %v2823_v35  ;;  %3082 = vmatpush3.msra.mxu0 %v1458_v36 }
 0x86f   :  { %3096 = vmatmul.mubr.msk.f32.vlgmr.msra.gmra.mxu1 %vm77_vm0, %v3371_v34  ;;  %3105 = vmatprep.subr.mxu1 %v2836_v37 }
 0x870   :  { %3106 = vmatpush3.msra.mxu1 %v2836_v37  ;;  %3109 = vmatprep.mubr.msk.f32.mxu1 %vm77_vm0, %v3365_v31 }
 0x871   :  { %3107 = vmatprep.subr.mxu1 %v2835_v38  ;;  %3086 = vmatprep.subr.msk.mxu0 %vm1045_vm6, %v2819_v8 }
 0x872   :  { %3108 = vmatpush3.msra.mxu1 %v2835_v38 }
 0x873   :  { %3110 = vmatmul.mubr.msk.f32.vlgmr.msra.gmra.mxu1 %vm77_vm0, %v3371_v34 }
 0x92a   :  { %v3078_v39 = vpop.f32.mrf.mxu1 }
 0x92b   :  { %v1554_v40 = vmul.f32 0.5, %v3078_v39 }
 0x92c   :  { %v1544_v41 = vpop.f32.mrf.mxu1 }
 0x92d   :  { %v1553_v42 = vmul.f32 0.5, %v1544_v41  ;;  %v1556_v44 = vadd.f32 %v1554_v40, %v3414_v54 }
 0x92f   :  { %v3097_v45 = vpop.f32.mrf.mxu1  ;;  %v1560_v46 = vsel %vm476_vm4, %v1556_v44, -inf  ;;  %v1555_v47 = vadd.f32 %v1553_v42, %v3422_v58 }
 0x930   :  { %v3569_v49 = vadd.f32 %v3097_v45, %v2826_v43  ;;  %1561 = vmax.xlane.f32.xlu1 %v1560_v46 }
 0x931   :  { %v1828_v50 = vpop.f32.mrf.mxu1  ;;  %v1557_v53 = vsel %vm472_vm5, %v1555_v47, -inf }
 0x932   :  { %1558 = vmax.xlane.f32.xlu0 %v1557_v53  ;;  %v1829_v19 = vadd.f32 %v2826_v43, %v1828_v50 }
 0x933   :  { %v3111_v55 = vpop.f32.mrf.mxu1 }
 0x934   :  { %v2006_v56 = vadd.f32 %v3111_v55, %v2838_v52 }
 0x935   :  { %v2000_v57 = vpop.f32.mrf.mxu1 }
 0x936   :  { %v2001_v59 = vadd.f32 %v2838_v52, %v2000_v57  ;;  %3119 = vmatprep.subr.msk.mxu1 %vm502_vm3, %v2006_v56 }
 0x937   :  { %3120 = vmatpush3.msk.msra.mxu1 %vm502_vm3, %v2006_v56 }
 0x938   :  { %3121 = vmatprep.subr.mxu1 %v2001_v59 }
 0x939   :  { %3122 = vmatpush3.msra.mxu1 %v2001_v59 }
 0x9b9   :  { %v1562_v60 = vpop.xlane.xlu1 %1561 }
 0x9ba   :  { %v1564_v61 = vsub.f32 %v1556_v44, %v1562_v60  ;;  %v2852_v60 = vld [vmem:[%s3743_s11] ss:$0 sm:$0xff] }
 0x9bb   :  { %v1559_v62 = vpop.xlane.xlu0 %1558 }
 0x9bc   :  { %v1567_v63 = vmul.f32 1.442695, %v1564_v61  ;;  %v1563_v2 = vsub.f32 %v1555_v47, %v1559_v62 }
 0x9be   :  { %3178 = vpow2.f32 %v1567_v63  ;;  %v1565_v3 = vmul.f32 1.442695, %v1563_v2 }
 0x9c0   :  { %3180 = vpow2.f32 %v1565_v3 }
 0x9cb   :  { %v3179_v4 = vpop.eup %3178 }
 0x9cc   :  { %v1572_v5 = vsel %vm476_vm4, %v3179_v4, 0.0 }
 0x9cd   :  { %v3181_v6 = vpop.eup %3180  ;;  %1573 = vadd.xlane.f32.xlu1 %v1572_v5 }
 0x9ce   :  { %v1569_v7 = vsel %vm472_vm5, %v3181_v6, 0.0 }
 0x9cf   :  { %1570 = vadd.xlane.f32.xlu0 %v1569_v7 }
 0xa56   :  { %v1574_v9 = vpop.xlane.xlu1 %1573 }
 0xa57   :  { %3182 = vrcp.f32 %v1574_v9 }
 0xa58   :  { %v1571_v10 = vpop.xlane.xlu0 %1570 }
 0xa59   :  { %3184 = vrcp.f32 %v1571_v10 }
 0xa64   :  { %v3183_v11 = vpop.eup %3182 }
 0xa65   :  { %v1578_v14 = vmul.f32 %v3183_v11, %v3179_v4 }
 0xa66   :  { %v3185_v12 = vpop.eup %3184 }
 0xa67   :  { %v1577_v13 = vmul.f32 %v3185_v12, %v3181_v6 }
 0xa69   :  { %3083 = vmatprep.mubr.msk.f32.mxu0 %vm472_vm5, %v1577_v13 }
 0xa6a   :  { %3084 = vmatmul.mubr.msk.f32.vlgmr.msra.gmra.mxu0 %vm472_vm5, %v1578_v14 }
 0xa6b   :  { %3087 = vmatpush3.msk.msra.mxu0 %vm1045_vm6, %v2819_v8 }
 0xa6c   :  { %3098 = vmatprep.subr.mxu0 %v2830_v15 }
 0xb2a   :  { %v3085_v16 = vpop.f32.mrf.mxu0 }
 0xb2c   :  { %v1654_v17 = vpop.f32.mrf.mxu0 }
 0xb2d   :  { %3088 = vmatprep.mubr.msk.f32.mxu0 %vm380_vm2, %v1654_v17 }
 0xb2e   :  { %3089 = vmatmul.mubr.msk.f32.vlgmr.msra.gmra.mxu0 %vm380_vm2, %v3085_v16  ;;  %v2349_v16 = vld [vmem:[%s3744_s14] sm:$0xff] }
 0xb2f   :  { %3099 = vmatpush3.msra.mxu0 %v2830_v15  ;;  %3102 = vmatprep.mubr.msk.f32.mxu0 %vm77_vm0, %v3365_v31  ;;  %v2832_v31 = vld [vmem:[%s3773_s8 + $0x3] ss:$0 sm:$0xff]  ;;  %v2350_v15 = vld [vmem:[%s3744_s14 + $0x8] sm:$0xff] }
 0xb30   :  { %3100 = vmatprep.subr.mxu0 %v2829_v18 }
 0xb31   :  { %3101 = vmatpush3.msra.mxu0 %v2829_v18 }
 0xb32   :  { %3103 = vmatmul.mubr.msk.f32.vlgmr.msra.gmra.mxu0 %vm77_vm0, %v3371_v34 }
 0xb33   :  { %3116 = vmatprep.mubr.msk.f32.mxu0 %vm380_vm2, %v1829_v19 }
 0xbee   :  { %v3090_v21 = vpop.f32.mrf.mxu0 }
 0xbef   :  { %v1750_v25 = vadd.f32 %v3090_v21, %v1205_v20 }
 0xbf0   :  { %v1740_v26 = vpop.f32.mrf.mxu0 }
 0xbf1   :  { %v1749_v27 = vadd.f32 %v1740_v26, %v1200_v24  ;;  %v2853_v26 = vld [vmem:[%s3745_s12] ss:$0 sm:$0xff] }
 0xbf2   :  { %v3104_v28 = vpop.f32.mrf.mxu0 }
 0xbf3   :  { %v1920_v29 = vadd.f32 %v3104_v28, %v2832_v31 }
 0xbf4   :  { %v1914_v30 = vpop.f32.mrf.mxu0 }
 0xbf5   :  { %v1915_v34 = vadd.f32 %v2832_v31, %v1914_v30  ;;  %3112 = vmatprep.subr.msk.mxu0 %vm380_vm2, %v1920_v29  ;;  %v2854_v30 = vld [vmem:[%s3746_s13] ss:$0 sm:$0xff] }
 0xbf6   :  { %3113 = vmatpush3.xpose.msk.msra.mxu0 %vm380_vm2, %v1920_v29 }
 0xbf7   :  { %3114 = vmatprep.subr.msk.mxu0 %vm380_vm2, %v1915_v34 }
 0xbfa   :  { %3115 = vmatpush3.xpose.msk.msra.mxu0 %vm380_vm2, %v1915_v34 }
 0xbfb   :  { %3131 = vmatprep.subr.mxu0 %v2350_v15 }
 0xbfd   :  { %3117 = vmatmul.mubr.msk.f32.vlgmr.msra.gmra.mxu0 %vm380_vm2, %v3569_v49 }
 0xbfe   :  { %3132 = vmatpush3.msra.mxu0 %v2350_v15 }
 0xbff   :  { %3133 = vmatprep.subr.mxu0 %v2349_v16 }
 0xc00   :  { %3134 = vmatpush3.msra.mxu0 %v2349_v16 }
 0xcbd   :  { %v3118_v48 = vpop.f32.mrf.mxu0 }
 0xcbe   :  { %v2097_v51 = vmul.f32 0.5, %v3118_v48 }
 0xcbf   :  { %v2087_v22 = vpop.f32.mrf.mxu0 }
 0xcc0   :  { %v2096_v23 = vmul.f32 0.5, %v2087_v22  ;;  %v2099_v32 = vadd.f32 %v2097_v51, %v3414_v54  ;;  %v2500_v22 = vld [vmem:[%s3747_s16 + $0x38] sm:$0xff] }
 0xcc2   :  { %v2103_v33 = vsel %vm476_vm4, %v2099_v32, -inf  ;;  %v2098_v35 = vadd.f32 %v2096_v23, %v3422_v58  ;;  %v2848_v58 = vld [vmem:[%s3742_s10 + $0xc] sm:$0xf]  ;;  %v2499_v23 = vld [vmem:[%s3747_s16 + $0x30] sm:$0xff] }
 0xcc3   :  { %2104 = vmax.xlane.f32.xlu1 %v2103_v33  ;;  %3126 = vmatprep.subr.msk.mxu1 %vm1045_vm6, %v2848_v58  ;;  %v2497_v33 = vld [vmem:[%s3747_s16 + $0x20] sm:$0xff] }
 0xcc4   :  { %v2100_v36 = vsel %vm472_vm5, %v2098_v35, -inf }
 0xcc5   :  { %2101 = vmax.xlane.f32.xlu0 %v2100_v36  ;;  %v2495_v36 = vld [vmem:[%s3747_s16 + $0x10] sm:$0xff] }
 0xd4c   :  { %v2105_v37 = vpop.xlane.xlu1 %2104 }
 0xd4d   :  { %v2107_v38 = vsub.f32 %v2099_v32, %v2105_v37  ;;  %v2498_v32 = vld [vmem:[%s3747_s16 + $0x28] sm:$0xff] }
 0xd4e   :  { %v2102_v39 = vpop.xlane.xlu0 %2101  ;;  %v2494_v37 = vld [vmem:[%s3747_s16 + $0x8] sm:$0xff] }
 0xd4f   :  { %v2110_v40 = vmul.f32 1.442695, %v2107_v38  ;;  %v2106_v41 = vsub.f32 %v2098_v35, %v2102_v39  ;;  %v2496_v35 = vld [vmem:[%s3747_s16 + $0x18] sm:$0xff]  ;;  %v2493_v38 = vld [vmem:[%s3747_s16] sm:$0xff] }
 0xd50   :  { %v2855_v39 = vld [vmem:[%s3748_s15] ss:$0 sm:$0xff] }
 0xd51   :  { %3186 = vpow2.f32 %v2110_v40  ;;  %v2108_v42 = vmul.f32 1.442695, %v2106_v41 }
 0xd53   :  { %3188 = vpow2.f32 %v2108_v42 }
 0xd5e   :  { %v3187_v43 = vpop.eup %3186 }
 0xd5f   :  { %v2115_v44 = vsel %vm476_vm4, %v3187_v43, 0.0 }
 0xd60   :  { %v3189_v54 = vpop.eup %3188  ;;  %2116 = vadd.xlane.f32.xlu1 %v2115_v44 }
 0xd61   :  { %v2112_v45 = vsel %vm472_vm5, %v3189_v54, 0.0 }
 0xd62   :  { %2113 = vadd.xlane.f32.xlu0 %v2112_v45 }
 0xde9   :  { %v2117_v46 = vpop.xlane.xlu1 %2116 }
 0xdea   :  { %3190 = vrcp.f32 %v2117_v46 }
 0xdeb   :  { %v2114_v47 = vpop.xlane.xlu0 %2113 }
 0xdec   :  { %3192 = vrcp.f32 %v2114_v47 }
 0xdf7   :  { %v3191_v49 = vpop.eup %3190 }
 0xdf8   :  { %v2121_v53 = vmul.f32 %v3191_v49, %v3187_v43 }
 0xdf9   :  { %v3193_v50 = vpop.eup %3192 }
 0xdfa   :  { %v2120_v52 = vmul.f32 %v3193_v50, %v3189_v54 }
 0xdfc   :  { %3123 = vmatprep.mubr.msk.f32.mxu1 %vm472_vm5, %v2120_v52 }
 0xdfd   :  { %3124 = vmatmul.mubr.msk.f32.vlgmr.msra.gmra.mxu1 %vm472_vm5, %v2121_v53 }
 0xdfe   :  { %3127 = vmatpush3.msk.msra.mxu1 %vm1045_vm6, %v2848_v58 }
 0xdff   :  { %3138 = vmatprep.subr.mxu1 %v2500_v22 }
 0xebd   :  { %v3125_v55 = vpop.f32.mrf.mxu1 }
 0xebf   :  { %v2197_v56 = vpop.f32.mrf.mxu1 }
 0xec0   :  { %3128 = vmatprep.mubr.msk.f32.mxu1 %vm380_vm2, %v2197_v56 }
 0xec1   :  { %3129 = vmatmul.mubr.msk.f32.vlgmr.msra.gmra.mxu1 %vm380_vm2, %v3125_v55 }
 0xec2   :  { %3139 = vmatpush3.msra.mxu1 %v2500_v22 }
 0xec3   :  { %3140 = vmatprep.subr.mxu1 %v2499_v23 }
 0xec4   :  { %3141 = vmatpush3.msra.mxu1 %v2499_v23  ;;  %v2858_v23 = vld [vmem:[%s3749_s17] ss:$0 sm:$0xff] }
 0xec5   :  { %3142 = vmatprep.subr.mxu1 %v2498_v32 }
 0xec6   :  { %3143 = vmatpush3.msra.mxu1 %v2498_v32 }
 0xec7   :  { %3144 = vmatprep.subr.mxu1 %v2497_v33 }
 0xec8   :  { %3145 = vmatpush3.msra.mxu1 %v2497_v33 }
 0xec9   :  { %3146 = vmatprep.subr.mxu1 %v2496_v35 }
 0xeca   :  { %3147 = vmatpush3.msra.mxu1 %v2496_v35 }
 0xecb   :  { %3148 = vmatprep.subr.mxu1 %v2495_v36 }
 0xecc   :  { %3149 = vmatpush3.msra.mxu1 %v2495_v36 }
 0xecd   :  { %3150 = vmatprep.subr.mxu1 %v2494_v37 }
 0xece   :  { %3151 = vmatpush3.msra.mxu1 %v2494_v37 }
 0xecf   :  { %3152 = vmatprep.subr.mxu1 %v2493_v38 }
 0xed0   :  { %3153 = vmatpush3.msra.mxu1 %v2493_v38 }
 0xf81   :  { %v3130_v57 = vpop.f32.mrf.mxu1 }
 0xf82   :  { %v2293_v59 = vadd.f32 %v3130_v57, %v1750_v25 }
 0xf83   :  { %v2283_v61 = vpop.f32.mrf.mxu1 }
 0xf84   :  { %v2295_v62 = vadd.f32 %v2293_v59, %v3334_v1  ;;  %v2292_v63 = vadd.f32 %v2283_v61, %v1749_v27 }
 0xf86   :  { %v3631_v2 = vadd.f32 %v2852_v60, %v2295_v62  ;;  %v2294_v3 = vadd.f32 %v2292_v63, %v3329_v0 }
 0xf88   :  { %v3634_v4 = vadd.f32 %v2852_v60, %v2294_v3  ;;  %v2310_v5 = vsel %vm81_vm1, %v3631_v2, 0.0 }
 0xf89   :  { %2311 = vadd.xlane.f32.xlu1 %v2310_v5 }
 0xf8a   :  { %v2307_v6 = vsel %vm77_vm0, %v3634_v4, 0.0 }
 0xf8b   :  { %2308 = vadd.xlane.f32.xlu0 %v2307_v6 }
0x1012   :  { %v2312_v7 = vpop.xlane.xlu1 %2311 }
0x1013   :  { %v2314_v8 = vmul.f32 0.0625, %v2312_v7 }
0x1014   :  { %v2309_v9 = vpop.xlane.xlu0 %2308 }
0x1015   :  { %v2316_v1 = vsub.f32 %v3631_v2, %v2314_v8  ;;  %v2313_v10 = vmul.f32 0.0625, %v2309_v9 }
0x1017   :  { %v2315_v11 = vsub.f32 %v3634_v4, %v2313_v10  ;;  %v2318_v12 = vmul.f32 %v2316_v1, %v2316_v1 }
0x1019   :  { %v2322_v0 = vsel %vm81_vm1, %v2318_v12, 0.0  ;;  %v2317_v13 = vmul.f32 %v2315_v11, %v2315_v11 }
0x101a   :  { %2323 = vadd.xlane.f32.xlu1 %v2322_v0 }
0x101b   :  { %v2319_v14 = vsel %vm77_vm0, %v2317_v13, 0.0 }
0x101c   :  { %2320 = vadd.xlane.f32.xlu0 %v2319_v14 }
0x10a3   :  { %v2324_v17 = vpop.xlane.xlu1 %2323 }
0x10a4   :  { %v2326_v18 = vmul.f32 0.0625, %v2324_v17 }
0x10a5   :  { %v2321_v19 = vpop.xlane.xlu0 %2320 }
0x10a6   :  { %v2328_v20 = vadd.f32 1e-05, %v2326_v18  ;;  %v2325_v21 = vmul.f32 0.0625, %v2321_v19 }
0x10a8   :  { %3194 = vrsqrt.f32 %v2328_v20  ;;  %v2327_v24 = vadd.f32 1e-05, %v2325_v21 }
0x10aa   :  { %3196 = vrsqrt.f32 %v2327_v24 }
0x10b5   :  { %v3195_v25 = vpop.eup %3194 }
0x10b6   :  { %v2332_v31 = vmul.f32 %v3195_v25, %v2316_v1 }
0x10b7   :  { %v3197_v27 = vpop.eup %3196 }
0x10b8   :  { %v2331_v28 = vmul.f32 %v3197_v27, %v2315_v11  ;;  %v2340_v29 = vmul.f32 %v2853_v26, %v2332_v31 }
0x10ba   :  { %v2339_v34 = vmul.f32 %v2853_v26, %v2331_v28  ;;  %v2348_v51 = vadd.f32 %v2854_v30, %v2340_v29 }
0x10bc   :  { %v2347_v48 = vadd.f32 %v2854_v30, %v2339_v34 }
0x10be   :  { %3135 = vmatprep.mubr.msk.f32.mxu0 %vm77_vm0, %v2347_v48 }
0x10bf   :  { %3136 = vmatmul.mubr.msk.f32.vlgmr.msra.gmra.mxu0 %vm77_vm0, %v2348_v51 }
0x117f   :  { %v3137_v40 = vpop.f32.mrf.mxu0 }
0x1180   :  { %v2436_v41 = vadd.f32 %v3137_v40, %v2855_v39 }
0x1181   :  { %v2430_v42 = vpop.f32.mrf.mxu0 }
0x1182   :  { %v2442_v43 = vmul.f32 0.70710677, %v2436_v41  ;;  %v2431_v44 = vadd.f32 %v2855_v39, %v2430_v42  ;;  %v2440_v48 = vmul.f32 0.5, %v2436_v41 }
0x1184   :  { %v2444_v54 = vand.u32 2147483647, %v2442_v43  ;;  %v2441_v45 = vmul.f32 0.70710677, %v2431_v44  ;;  %vm2484_vm7 = vcmp.lt.f32.partialorder %v2442_v43, 0.0  ;;  %v2439_v30 = vmul.f32 0.5, %v2431_v44 }
0x1186   :  { %v2446_v58 = vmul.f32 0.3275911, %v2444_v54  ;;  %v2443_v46 = vand.u32 2147483647, %v2441_v45  ;;  %v2472_v52 = vsub.f32 0.0, %v2444_v54  ;;  %vm2483_vm8 = vcmp.lt.f32.partialorder %v2441_v45, 0.0 }
0x1188   :  { %v2448_v47 = vadd.f32 1.0, %v2446_v58  ;;  %v2445_v49 = vmul.f32 0.3275911, %v2443_v46  ;;  %v2471_v53 = vsub.f32 0.0, %v2443_v46  ;;  %v2474_v55 = vmul.f32 %v2472_v52, %v2444_v54 }
0x1189   :  { %v3210_v52 = vmov 0.0  }
0x118a   :  { %3198 = vrcp.f32 %v2448_v47  ;;  %v2447_v50 = vadd.f32 1.0, %v2445_v49  ;;  %v2473_v57 = vmul.f32 %v2471_v53, %v2443_v46  ;;  %v2477_v60 = vmul.f32 1.442695, %v2474_v55  ;;  %v2638_v49 = vld [vmem:[%s3750_s20 + $0x10] sm:$0xff]  ;;  %2722 = vmatprep.mubr.f32.mxu0 %v3210_v52  ;;  %v2636_v53 = vld [vmem:[%s3750_s20] sm:$0xff] }
0x118c   :  { %3200 = vrcp.f32 %v2447_v50  ;;  %v2475_v3 = vmul.f32 1.442695, %v2473_v57  ;;  %v2637_v50 = vld [vmem:[%s3750_s20 + $0x8] sm:$0xff] }
0x118d   :  { %3202 = vpow2.f32 %v2477_v60 }
0x118e   :  { %3204 = vpow2.f32 %v2475_v3 }
0x1197   :  { %v3199_v56 = vpop.eup %3198 }
0x1198   :  { %v2454_v59 = vmul.f32 1.0614054, %v3199_v56 }
0x1199   :  { %v3201_v61 = vpop.eup %3200 }
0x119a   :  { %v2456_v62 = vadd.f32 -1.4531521, %v2454_v59  ;;  %v2453_v63 = vmul.f32 1.0614054, %v3201_v61  ;;  %v3203_v16 = vpop.eup %3202 }
0x119b   :  { %v3205_v20 = vpop.eup %3204 }
0x119c   :  { %v2458_v5 = vmul.f32 %v3199_v56, %v2456_v62  ;;  %v2455_v6 = vadd.f32 -1.4531521, %v2453_v63 }
0x119e   :  { %v2460_v7 = vadd.f32 1.4214138, %v2458_v5  ;;  %v2457_v8 = vmul.f32 %v3201_v61, %v2455_v6  ;;  %v2861_v6 = vld [vmem:[%s3751_s18] ss:$0 sm:$0xff] }
0x11a0   :  { %v2462_v9 = vmul.f32 %v3199_v56, %v2460_v7  ;;  %v2459_v1 = vadd.f32 1.4214138, %v2457_v8  ;;  %v2862_v8 = vld [vmem:[%s3752_s19] ss:$0 sm:$0xff] }
0x11a2   :  { %v2464_v10 = vadd.f32 -0.28449672, %v2462_v9  ;;  %v2461_v11 = vmul.f32 %v3201_v61, %v2459_v1 }
0x11a4   :  { %v2466_v12 = vmul.f32 %v3199_v56, %v2464_v10  ;;  %v2463_v0 = vadd.f32 -0.28449672, %v2461_v11  ;;  %v2642_v11 = vlaneseq }
0x11a6   :  { %v2468_v13 = vadd.f32 0.2548296, %v2466_v12  ;;  %v2465_v14 = vmul.f32 %v3201_v61, %v2463_v0  ;;  %v2643_v12 = vshrl.u32 %v2642_v11, 7 }
0x11a8   :  { %v2470_v15 = vmul.f32 %v3199_v56, %v2468_v13  ;;  %v2467_v17 = vadd.f32 0.2548296, %v2465_v14  ;;  %v2644_v0 = vsub.s32 0, %v2643_v12  ;;  %v2640_v13 = vld [vmem:[%s3753_s21] sm:$0x3]  ;;  %v2648_v14 = vsub.s32 1, %v2643_v12 }
0x11aa   :  { %v2480_v18 = vmul.f32 %v3203_v16, %v2470_v15  ;;  %v2469_v19 = vmul.f32 %v3201_v61, %v2467_v17  ;;  %v2645_v15 = vrot.slane %v2640_v13, %v2644_v0  ;;  %v2649_v16 = vrot.slane %v2640_v13, %v2648_v14 }
0x11ac   :  { %v2482_v21 = vsub.f32 1.0, %v2480_v18  ;;  %v2479_v24 = vmul.f32 %v3205_v20, %v2469_v19 }
0x11ae   :  { %v2486_v25 = vsub.f32 0.0, %v2482_v21  ;;  %v2481_v26 = vsub.f32 1.0, %v2479_v24 }
0x11b0   :  { %v2488_v31 = vsel %vm2484_vm7, %v2486_v25, %v2482_v21  ;;  %v2485_v27 = vsub.f32 0.0, %v2481_v26 }
0x11b1   :  { %v2490_v28 = vadd.f32 1.0, %v2488_v31 }
0x11b2   :  { %v2487_v29 = vsel %vm2483_vm8, %v2485_v27, %v2481_v26 }
0x11b3   :  { %v2489_v34 = vadd.f32 1.0, %v2487_v29  ;;  %v2492_v22 = vmul.f32 %v2490_v28, %v2440_v48 }
0x11b5   :  { %v2491_v51 = vmul.f32 %v2489_v34, %v2439_v30 }
0x11b7   :  { %3154 = vmatprep.mubr.msk.f32.mxu1 %vm2508_vm9, %v2491_v51 }
0x11b8   :  { %3155 = vmatmul.mubr.msk.f32.vlgmr.msra.gmra.mxu1 %vm2508_vm9, %v2492_v22 }
0x1278   :  { %v3156_v32 = vpop.f32.mrf.mxu1 }
0x1279   :  { %v2587_v33 = vadd.f32 %v3156_v32, %v2858_v23 }
0x127a   :  { %v2581_v35 = vpop.f32.mrf.mxu1 }
0x127b   :  { %v2582_v36 = vadd.f32 %v2858_v23, %v2581_v35  ;;  %v2591_v37 = vadd.f32 %v2587_v33, %v3631_v2 }
0x127d   :  { %v2597_v38 = vsel %vm81_vm1, %v2591_v37, 0.0  ;;  %v2590_v39 = vadd.f32 %v2582_v36, %v3634_v4  ;;  %v2639_v4 = vld [vmem:[%s3750_s20 + $0x18] sm:$0xff] }
0x127e   :  { %2598 = vadd.xlane.f32.xlu1 %v2597_v38  ;;  %2686 = vmatprep.subr.mxu0 %v2639_v4 }
0x127f   :  { %v2594_v40 = vsel %vm77_vm0, %v2590_v39, 0.0  ;;  %2687 = vmatpush1.msra.mxu0 %v2638_v49 }
0x1280   :  { %2595 = vadd.xlane.f32.xlu0 %v2594_v40  ;;  %2688 = vmatprep.subr.mxu0 %v2637_v50 }
0x1281   :  { %2689 = vmatpush1.msra.mxu0 %v2636_v53 }
0x1307   :  { %v2599_v41 = vpop.xlane.xlu1 %2598 }
0x1308   :  { %v2601_v42 = vmul.f32 0.0625, %v2599_v41 }
0x1309   :  { %v2596_v43 = vpop.xlane.xlu0 %2595 }
0x130a   :  { %v2603_v44 = vsub.f32 %v2591_v37, %v2601_v42  ;;  %v2600_v54 = vmul.f32 0.0625, %v2596_v43 }
0x130c   :  { %v2602_v45 = vsub.f32 %v2590_v39, %v2600_v54  ;;  %v2605_v58 = vmul.f32 %v2603_v44, %v2603_v44 }
0x130e   :  { %v2609_v46 = vsel %vm81_vm1, %v2605_v58, 0.0  ;;  %v2604_v47 = vmul.f32 %v2602_v45, %v2602_v45 }
0x130f   :  { %2610 = vadd.xlane.f32.xlu1 %v2609_v46 }
0x1310   :  { %v2606_v2 = vsel %vm77_vm0, %v2604_v47, 0.0 }
0x1311   :  { %2607 = vadd.xlane.f32.xlu0 %v2606_v2 }
0x1398   :  { %v2611_v55 = vpop.xlane.xlu1 %2610 }
0x1399   :  { %v2613_v56 = vmul.f32 0.0625, %v2611_v55 }
0x139a   :  { %v2608_v57 = vpop.xlane.xlu0 %2607 }
0x139b   :  { %v2615_v59 = vadd.f32 1e-05, %v2613_v56  ;;  %v2612_v60 = vmul.f32 0.0625, %v2608_v57 }
0x139d   :  { %3206 = vrsqrt.f32 %v2615_v59  ;;  %v2614_v61 = vadd.f32 1e-05, %v2612_v60 }
0x139f   :  { %3208 = vrsqrt.f32 %v2614_v61 }
0x13aa   :  { %v3207_v62 = vpop.eup %3206 }
0x13ab   :  { %v2619_v5 = vmul.f32 %v3207_v62, %v2603_v44 }
0x13ac   :  { %v3209_v63 = vpop.eup %3208 }
0x13ad   :  { %v2618_v3 = vmul.f32 %v3209_v63, %v2602_v45  ;;  %v2627_v1 = vmul.f32 %v2861_v6, %v2619_v5 }
0x13af   :  { %v2626_v7 = vmul.f32 %v2861_v6, %v2618_v3  ;;  %v2635_v10 = vadd.f32 %v2862_v8, %v2627_v1 }
0x13b1   :  { %v2634_v9 = vadd.f32 %v2862_v8, %v2626_v7 }
0x13b3   :  { %2863 = vmatmul.mubr.msk.f32.vlgmr.msra.gmra.mxu0 %vm77_vm0, %v2634_v9 }
0x13b4   :  { %2728 = vmatprep.mubr.f32.mxu0 %v3210_v52 }
0x13b7   :  { %2864 = vmatmul.mubr.msk.f32.gmra.mxu0 %vm77_vm0, %v2635_v10 }
0x1473   :  { %v2724_v17 = vpop.f32.mrf.mxu0 }
0x1474   :  { %v2725_v18 = vadd.f32 %v2724_v17, %v2645_v15 }
0x1475   :  { %v2726_v19 = vpop.f32.mrf.mxu0 }
0x1476   :  { %2735 = vst [vmem:[%s3754_s22] sm:$0xff] %v2725_v18  ;;  %v2727_v20 = vadd.f32 %v2726_v19, %v2649_v16 }
0x1477   :  { %v2730_v21 = vpop.f32.mrf.mxu0 }
0x1478   :  { %2736 = vst.msk [vmem:[%s3754_s22 + $0x8] sm:$0xff] %vm2508_vm9, %v2727_v20  ;;  %v2731_v24 = vadd.f32 %v2730_v21, %v2645_v15 }
0x1479   :  { %v2732_v25 = vpop.f32.mrf.mxu0 }
0x147a   :  { %2737 = vst [vmem:[%s3754_s22 + $0x10] sm:$0x3] %v2731_v24  ;;  %v2733_v26 = vadd.f32 %v2732_v25, %v2649_v16 }
0x147c   :  { %2739 = vst.msk [vmem:[%s3754_s22 + $0x18] sm:$0x3] %vm2738_vm10, %v2733_v26 }

// kernel: forward.5
= control target key start
LH: loop header
LB: loop body
LE: loop exit
PB: predicated region body
PF: predicated region fallthrough
CT: control target
= control target key end

     0   :  { %s8304_s0 = inlined_call_operand.vmem [shape: f32[2,10,32], index: 0, kind: input, shape index: {}]   ;;  %s8305_s1 = inlined_call_operand.vmem [shape: f32[2,10,10], index: 1, kind: input, shape index: {}]   ;;  %s8306_s2 = inlined_call_operand.vmem [shape: f32[2,1,32], index: 2, kind: input, shape index: {}]   ;;  %s8307_s3 = inlined_call_operand.vmem [shape: f32[2,1,32], index: 3, kind: input, shape index: {}]   ;;  %s8308_s4 = inlined_call_operand.vmem [shape: f32[2,4,32,8], index: 4, kind: input, shape index: {}]   ;;  %s8309_s5 = inlined_call_operand.vmem [shape: f32[2,4,1,8], index: 5, kind: input, shape index: {}]   ;;  %s8310_s6 = inlined_call_operand.vmem [shape: f32[2,4,32,8], index: 6, kind: input, shape index: {}]   ;;  %s8311_s7 = inlined_call_operand.vmem [shape: f32[2,4,1,8], index: 7, kind: input, shape index: {}]   ;;  %s8312_s8 = inlined_call_operand.vmem [shape: f32[2,4,32,8], index: 8, kind: input, shape index: {}]   ;;  %s8313_s9 = inlined_call_operand.vmem [shape: f32[2,4,1,8], index: 9, kind: input, shape index: {}]   ;;  %s8314_s10 = inlined_call_operand.vmem [shape: f32[2,4,8,32], index: 10, kind: input, shape index: {}]   ;;  %s8315_s11 = inlined_call_operand.vmem [shape: f32[2,1,32], index: 11, kind: input, shape index: {}]   ;;  %s8316_s12 = inlined_call_operand.vmem [shape: f32[2,1,32], index: 12, kind: input, shape index: {}]   ;;  %s8317_s13 = inlined_call_operand.vmem [shape: f32[2,1,32], index: 13, kind: input, shape index: {}]   ;;  %s8318_s14 = inlined_call_operand.vmem [shape: f32[2,32,128], index: 14, kind: input, shape index: {}]   ;;  %s8319_s15 = inlined_call_operand.vmem [shape: f32[2,1,128], index: 15, kind: input, shape index: {}]   ;;  %s8320_s16 = inlined_call_operand.vmem [shape: f32[2,128,32], index: 16, kind: input, shape index: {}]   ;;  %s8321_s17 = inlined_call_operand.vmem [shape: f32[2,1,32], index: 17, kind: input, shape index: {}]   ;;  %s8322_s18 = inlined_call_operand.vmem [shape: f32[1,32], index: 18, kind: input, shape index: {}]   ;;  %s8323_s19 = inlined_call_operand.vmem [shape: f32[1,32], index: 19, kind: input, shape index: {}]   ;;  %s8324_s20 = inlined_call_operand.vmem [shape: f32[32,16], index: 20, kind: input, shape index: {}]   ;;  %s8325_s21 = inlined_call_operand.vmem [shape: f32[1,16], index: 21, kind: input, shape index: {}]   ;;  %s8326_s22 = inlined_call_operand.vmem [shape: f32[2,10,48], index: 22, kind: output, shape index: {}]  }
   0x1   :  { %8333 = sst [smem:[#allocation3_spill]] %s8304_s0 }
   0x2   :  { %8334 = sst [smem:[#allocation4_spill]] %s8305_s1 }
   0x3   :  { %8335 = sst [smem:[#allocation5_spill]] %s8306_s2 }
   0x4   :  { %8336 = sst [smem:[#allocation6_spill]] %s8307_s3  ;;  %s7358_s3 = smov 0  }
   0x5   :  { %8337 = sst [smem:[#allocation7_spill]] %s8308_s4 }
   0x6   :  { %8338 = sst [smem:[#allocation8_spill]] %s8309_s5 }
   0x7   :  { %8339 = sst [smem:[#allocation9_spill]] %s8310_s6 }
   0x8 LB: > { %8340 = sst [smem:[#allocation2_spill]] %s7240_s3  ;;  %s5996_s28 = sadd.s32 4294967295, %s7240_s3   ;;  %s7240_s3 = sphi %s7358_s3, %s32_s3  }
   0x9   : > { %p6000_p0 = scmp.ge.s32.totalorder %s7240_s3, 1  ;;  %p622_p1 = scmp.lt.s32.totalorder %s7240_s3, 3 }
   0xb   : > { %p623_p2 = pnand %p6000_p0, %p622_p1 }
   0xc   : > { %p689_p3 = scmp.lt.s32.totalorder (!%p623_p2), %s5996_s28, 1  ;;  %s8341_s0 = sld [smem:[#allocation3_spill]] (!%p623_p2) }
   0xd   : > { %626 = sbr.rel (%p623_p2) target bundleno = 10126 (0x278e), region = 108  ;;  %s8342_s24 = sld [smem:[#allocation7_spill]] (!%p623_p2) }
   0xe   : > { %s8344_s5 = sld [smem:[#allocation5_spill]] (!%p623_p2) }
   0xf   : > { %s8345_s26 = sld [smem:[#allocation6_spill]] (!%p623_p2) }
  0x10   : > { %s8346_s6 = sld [smem:[#allocation8_spill]] (!%p623_p2) }
  0x12   : > { %s8350_s28 = smov (!%p689_p3, %s5996_s28), 1  ;;  %vm710_vm0 = vcmask 261120   ;;  %vm714_vm1 = vcmask 254976   ;;  %v936_v38 = vld [vmem:[%s8312_s8 + $0x18] sm:$0xff]  ;;  %v935_v39 = vld [vmem:[%s8312_s8 + $0x10] sm:$0xff]  ;;  %v934_v40 = vld [vmem:[%s8312_s8 + $0x8] sm:$0xff] }
  0x13   : > { %s7366_s29 = sshll.u32 %s8350_s28, 4  ;;  %v758_v14 = vld [vmem:[%s8342_s24 + $0x18] sm:$0xff]  ;;  %v757_v15 = vld [vmem:[%s8342_s24 + $0x10] sm:$0xff]  ;;  %v756_v16 = vld [vmem:[%s8342_s24 + $0x8] sm:$0xff]  ;;  %vm1019_vm2 = vcmask 64512   ;;  %vm1141_vm3 = vcmask 1041408  }
  0x14   : > { %s693_s23 = scalar_lea.vmem %s8341_s0, %s7366_s29  ;;  %6604 = vmatprep.subr.mxu0 %v758_v14  ;;  %v755_v17 = vld [vmem:[%s8342_s24] sm:$0xff]  ;;  %s8343_s0 = sld [smem:[#allocation9_spill]]  ;;  %v6028_v52 = vld [vmem:[%s8342_s24 + $0x38] sm:$0xff]  ;;  %v6027_v58 = vld [vmem:[%s8342_s24 + $0x30] sm:$0xff]  ;;  %vm1115_vm4 = vcmask 74752   ;;  %vm1111_vm5 = vcmask 80896  }
  0x15   : > { %v7372_v0 = vld [vmem:[%s693_s23] sm:$0xff]  ;;  %v7376_v2 = vld [vmem:[%s693_s23 + $0x8] sm:$0x3]  ;;  %6605 = vmatpush3.msra.mxu0 %v758_v14  ;;  %v6044_v61 = vld [vmem:[%s8312_s8 + $0x38] sm:$0xff]  ;;  %s8347_s23 = sld [smem:[#allocation4_spill]]  ;;  %s703_s28 = scalar_lea.vmem %s8326_s22, %s7366_s29  ;;  %vm5927_vm10 = vcmask 386304  }
  0x16   : > { %v711_v1 = vsel %vm710_vm0, %v7372_v0, 0.0  ;;  %v715_v3 = vsel %vm714_vm1, %v7376_v2, 0.0  ;;  %6606 = vmatprep.subr.mxu0 %v757_v15  ;;  %v6007_v26 = vld [vmem:[%s8344_s5] ss:$0 sm:$0xff]  ;;  %v6026_v59 = vld [vmem:[%s8342_s24 + $0x28] sm:$0xff]  ;;  %v6043_v62 = vld [vmem:[%s8312_s8 + $0x30] sm:$0xff] }
  0x17   : > { %712 = vadd.xlane.f32.xlu0 %v711_v1  ;;  %6607 = vmatpush3.msra.mxu0 %v757_v15  ;;  %v6008_v28 = vld [vmem:[%s8345_s26] ss:$0 sm:$0xff]  ;;  %v6042_v63 = vld [vmem:[%s8312_s8 + $0x28] sm:$0xff]  ;;  %vm5925_vm11 = vcmask 392448  }
  0x18   : > { %6608 = vmatprep.subr.mxu0 %v756_v16  ;;  %v933_v41 = vld [vmem:[%s8312_s8] sm:$0xff] }
  0x19   : > { %6609 = vmatpush3.msra.mxu0 %v756_v16  ;;  %v6009_v43 = vld [vmem:[%s8346_s6] ss:$0 sm:$0xff] }
  0x1a   : > { %6610 = vmatprep.subr.mxu0 %v755_v17  ;;  %v850_v18 = vld [vmem:[%s8343_s0 + $0x18] sm:$0xff]  ;;  %v849_v35 = vld [vmem:[%s8343_s0 + $0x10] sm:$0xff]  ;;  %v848_v36 = vld [vmem:[%s8343_s0 + $0x8] sm:$0xff] }
  0x1b   : > { %716 = vadd.xlane.f32.xlu0 %v715_v3  ;;  %6611 = vmatpush3.msra.mxu0 %v755_v17  ;;  %v847_v37 = vld [vmem:[%s8343_s0] sm:$0xff]  ;;  %s7495_s1 = scalar_lea.vmem %s8347_s23, %s7366_s29  ;;  %s7242_s29 = smov 32  }
  0x1c   : > { %6615 = vmatprep.subr.mxu0 %v850_v18  ;;  %v6012_v46 = vld [vmem:[%s8311_s7] ss:$0 sm:$0xff]  ;;  %v7498_v3 = vld [vmem:[%s7495_s1 + $0x8] sm:$0x3]  ;;  %v6046_v17 = vld [vmem:[%s8313_s9 + $0x1] ss:$0 sm:$0xff] }
  0x1d   : > { %v6015_v51 = vld [vmem:[%s8313_s9] ss:$0 sm:$0xff] }
  0x1e   : > { %v6025_v60 = vld [vmem:[%s8342_s24 + $0x20] sm:$0xff] }
  0x1f   : > { %v6041_v1 = vld [vmem:[%s8312_s8 + $0x20] sm:$0xff] }
  0xa0   : > { %v713_v4 = vpop.xlane.xlu0 %712 }
  0xa1   : > { %v719_v5 = vmul.f32 0.03125, %v713_v4 }
  0xa3   : > { %v721_v6 = vsub.f32 %v7372_v0, %v719_v5 }
  0xa4   : > { %v717_v7 = vpop.xlane.xlu0 %716 }
  0xa5   : > { %v720_v8 = vmul.f32 0.03125, %v717_v7  ;;  %v723_v9 = vmul.f32 %v721_v6, %v721_v6 }
  0xa7   : > { %v722_v10 = vsub.f32 %v7376_v2, %v720_v8  ;;  %v725_v11 = vsel %vm710_vm0, %v723_v9, 0.0 }
  0xa8   : > { %726 = vadd.xlane.f32.xlu1 %v725_v11 }
  0xa9   : > { %v724_v12 = vmul.f32 %v722_v10, %v722_v10 }
  0xab   : > { %v728_v13 = vsel %vm714_vm1, %v724_v12, 0.0  ;;  %v6030_v12 = vld [vmem:[%s8346_s6 + $0x1] ss:$0 sm:$0xff] }
  0xac   : > { %729 = vadd.xlane.f32.xlu1 %v728_v13 }
 0x131   : > { %v727_v19 = vpop.xlane.xlu1 %726 }
 0x132   : > { %v731_v20 = vmul.f32 0.03125, %v727_v19 }
 0x134   : > { %v733_v21 = vadd.f32 1e-05, %v731_v20 }
 0x135   : > { %v730_v22 = vpop.xlane.xlu1 %729 }
 0x136   : > { %7132 = vrsqrt.f32 %v733_v21  ;;  %v732_v23 = vmul.f32 0.03125, %v730_v22 }
 0x138   : > { %v734_v24 = vadd.f32 1e-05, %v732_v23 }
 0x13a   : > { %7134 = vrsqrt.f32 %v734_v24 }
 0x143   : > { %v7133_v25 = vpop.eup %7132 }
 0x144   : > { %v737_v27 = vmul.f32 %v7133_v25, %v721_v6  ;;  %v7501_v6 = vld [vmem:[%s7495_s1] sm:$0xff] }
 0x146   : > { %v745_v29 = vmul.f32 %v6007_v26, %v737_v27 }
 0x147   : > { %v7135_v30 = vpop.eup %7134 }
 0x148   : > { %v7405_v31 = vadd.f32 %v6008_v28, %v745_v29  ;;  %v738_v32 = vmul.f32 %v7135_v30, %v722_v10 }
 0x14a   : > { %v746_v33 = vmul.f32 %v6007_v26, %v738_v32  ;;  %6612 = vmatprep.mubr.msk.f32.mxu0 %vm710_vm0, %v7405_v31 }
 0x14c   : > { %v7409_v34 = vadd.f32 %v6008_v28, %v746_v33  ;;  %v6036_v33 = vld [vmem:[%s8343_s0 + $0x38] sm:$0xff] }
 0x14e   : > { %6613 = vmatmul.mubr.msk.f32.vlgmr.msra.gmra.mxu0 %vm710_vm0, %v7409_v34 }
 0x14f   : > { %6616 = vmatpush3.msra.mxu0 %v850_v18  ;;  %6623 = vmatprep.mubr.msk.f32.mxu0 %vm710_vm0, %v7405_v31 }
 0x150   : > { %6617 = vmatprep.subr.mxu0 %v849_v35 }
 0x151   : > { %6618 = vmatpush3.msra.mxu0 %v849_v35 }
 0x152   : > { %6619 = vmatprep.subr.mxu0 %v848_v36 }
 0x153   : > { %6620 = vmatpush3.msra.mxu0 %v848_v36 }
 0x154   : > { %6621 = vmatprep.subr.mxu0 %v847_v37 }
 0x155   : > { %6622 = vmatpush3.msra.mxu0 %v847_v37 }
 0x156   : > { %6624 = vmatmul.mubr.msk.f32.vlgmr.msra.gmra.mxu0 %vm710_vm0, %v7409_v34  ;;  %6626 = vmatprep.subr.mxu0 %v936_v38 }
 0x157   : > { %6627 = vmatpush3.msra.mxu0 %v936_v38  ;;  %6634 = vmatprep.mubr.msk.f32.mxu0 %vm710_vm0, %v7405_v31 }
 0x158   : > { %6628 = vmatprep.subr.mxu0 %v935_v39 }
 0x159   : > { %6629 = vmatpush3.msra.mxu0 %v935_v39 }
 0x15a   : > { %6630 = vmatprep.subr.mxu0 %v934_v40 }
 0x15b   : > { %6631 = vmatpush3.msra.mxu0 %v934_v40 }
 0x15c   : > { %6632 = vmatprep.subr.mxu0 %v933_v41 }
 0x15d   : > { %6633 = vmatpush3.msra.mxu0 %v933_v41  ;;  %v6035_v41 = vld [vmem:[%s8343_s0 + $0x30] sm:$0xff] }
 0x15e   : > { %6635 = vmatmul.mubr.msk.f32.vlgmr.msra.gmra.mxu0 %vm710_vm0, %v7409_v34 }
 0x20e   : > { %v6614_v42 = vpop.f32.mrf.mxu0 }
 0x20f   : > { %v844_v54 = vadd.f32 %v6614_v42, %v6009_v43  ;;  %v6034_v42 = vld [vmem:[%s8343_s0 + $0x28] sm:$0xff] }
 0x210   : > { %v838_v44 = vpop.f32.mrf.mxu0 }
 0x211   : > { %v839_v45 = vadd.f32 %v6009_v43, %v838_v44  ;;  %v6033_v43 = vld [vmem:[%s8343_s0 + $0x20] sm:$0xff] }
 0x213   : > { %6641 = vmatprep.mubr.msk.f32.mxu1 %vm1019_vm2, %v839_v45 }
 0x216   : > { %v6625_v47 = vpop.f32.mrf.mxu0 }
 0x217   : > { %v930_v48 = vadd.f32 %v6625_v47, %v6012_v46  ;;  %v6038_v47 = vld [vmem:[%s8311_s7 + $0x1] ss:$0 sm:$0xff] }
 0x218   : > { %v924_v49 = vpop.f32.mrf.mxu0 }
 0x219   : > { %v925_v50 = vadd.f32 %v6012_v46, %v924_v49  ;;  %6637 = vmatprep.subr.msk.mxu1 %vm1019_vm2, %v930_v48 }
 0x21a   : > { %6638 = vmatpush3.xpose.msk.msra.mxu1 %vm1019_vm2, %v930_v48 }
 0x21b   : > { %6639 = vmatprep.subr.msk.mxu1 %vm1019_vm2, %v925_v50 }
 0x21e   : > { %v6636_v53 = vpop.f32.mrf.mxu0  ;;  %6640 = vmatpush3.xpose.msk.msra.mxu1 %vm1019_vm2, %v925_v50 }
 0x21f   : > { %v1016_v55 = vadd.f32 %v6636_v53, %v6015_v51  ;;  %6651 = vmatprep.subr.mxu1 %v6028_v52 }
 0x220   : > { %v1010_v56 = vpop.f32.mrf.mxu0 }
 0x221   : > { %v1011_v57 = vadd.f32 %v6015_v51, %v1010_v56  ;;  %6642 = vmatmul.mubr.msk.f32.vlgmr.msra.gmra.mxu1 %vm1019_vm2, %v844_v54  ;;  %6644 = vmatprep.subr.msk.mxu0 %vm1141_vm3, %v1016_v55 }
 0x222   : > { %6645 = vmatpush3.msk.msra.mxu0 %vm1141_vm3, %v1016_v55  ;;  %6652 = vmatpush3.msra.mxu1 %v6028_v52 }
 0x223   : > { %6659 = vmatprep.mubr.msk.f32.mxu1 %vm710_vm0, %v7405_v31  ;;  %6646 = vmatprep.subr.mxu0 %v1011_v57 }
 0x224   : > { %6653 = vmatprep.subr.mxu1 %v6027_v58  ;;  %6647 = vmatpush3.msra.mxu0 %v1011_v57 }
 0x225   : > { %6654 = vmatpush3.msra.mxu1 %v6027_v58  ;;  %6662 = vmatprep.subr.mxu0 %v6036_v33 }
 0x226   : > { %6655 = vmatprep.subr.mxu1 %v6026_v59 }
 0x227   : > { %6656 = vmatpush3.msra.mxu1 %v6026_v59 }
 0x228   : > { %6657 = vmatprep.subr.mxu1 %v6025_v60 }
 0x229   : > { %6658 = vmatpush3.msra.mxu1 %v6025_v60 }
 0x22a   : > { %6660 = vmatmul.mubr.msk.f32.vlgmr.msra.gmra.mxu1 %vm710_vm0, %v7409_v34  ;;  %6673 = vmatprep.subr.mxu1 %v6044_v61 }
 0x22b   : > { %6674 = vmatpush3.msra.mxu1 %v6044_v61  ;;  %6681 = vmatprep.mubr.msk.f32.mxu1 %vm710_vm0, %v7405_v31 }
 0x22c   : > { %6675 = vmatprep.subr.mxu1 %v6043_v62 }
 0x22d   : > { %6676 = vmatpush3.msra.mxu1 %v6043_v62 }
 0x22e   : > { %6677 = vmatprep.subr.mxu1 %v6042_v63 }
 0x22f   : > { %6678 = vmatpush3.msra.mxu1 %v6042_v63 }
 0x230   : > { %6679 = vmatprep.subr.mxu1 %v6041_v1 }
 0x231   : > { %6680 = vmatpush3.msra.mxu1 %v6041_v1 }
 0x232   : > { %6682 = vmatmul.mubr.msk.f32.vlgmr.msra.gmra.mxu1 %vm710_vm0, %v7409_v34 }
 0x2e1   : > { %v6643_v4 = vpop.f32.mrf.mxu1 }
 0x2e2   : > { %v1108_v5 = vmul.f32 0.35355338, %v6643_v4 }
 0x2e3   : > { %v1098_v7 = vpop.f32.mrf.mxu1 }
 0x2e4   : > { %v1107_v8 = vmul.f32 0.35355338, %v1098_v7  ;;  %v1110_v9 = vadd.f32 %v1108_v5, %v7498_v3 }
 0x2e6   : > { %v1116_v10 = vsel %vm1115_vm4, %v1110_v9, -inf  ;;  %v1109_v11 = vadd.f32 %v1107_v8, %v7501_v6 }
 0x2e7   : > { %1117 = vmax.xlane.f32.xlu1 %v1116_v10  ;;  %v1220_v10 = vld [vmem:[%s8314_s10] sm:$0xff] }
 0x2e8   : > { %v1112_v13 = vsel %vm1111_vm5, %v1109_v11, -inf }
 0x2e9   : > { %1113 = vmax.xlane.f32.xlu0 %v1112_v13 }
 0x2ea   : > { %v6661_v14 = vpop.f32.mrf.mxu1 }
 0x2eb   : > { %v1306_v15 = vadd.f32 %v6661_v14, %v6030_v12 }
 0x2ec   : > { %v1300_v16 = vpop.f32.mrf.mxu1 }
 0x2ed   : > { %v1301_v44 = vadd.f32 %v6030_v12, %v1300_v16 }
 0x2f2   : > { %v6683_v18 = vpop.f32.mrf.mxu1 }
 0x2f3   : > { %v1482_v19 = vadd.f32 %v6683_v18, %v6046_v17  ;;  %v6072_v18 = vld [vmem:[%s8343_s0 + $0x58] sm:$0xff] }
 0x2f4   : > { %v1476_v20 = vpop.f32.mrf.mxu1 }
 0x2f5   : > { %v1477_v21 = vadd.f32 %v6046_v17, %v1476_v20  ;;  %6691 = vmatprep.subr.msk.mxu1 %vm1141_vm3, %v1482_v19  ;;  %v6070_v20 = vld [vmem:[%s8343_s0 + $0x48] sm:$0xff] }
 0x2f6   : > { %6692 = vmatpush3.msk.msra.mxu1 %vm1141_vm3, %v1482_v19  ;;  %v6071_v19 = vld [vmem:[%s8343_s0 + $0x50] sm:$0xff] }
 0x2f7   : > { %6693 = vmatprep.subr.mxu1 %v1477_v21 }
 0x2f8   : > { %6694 = vmatpush3.msra.mxu1 %v1477_v21  ;;  %v6069_v21 = vld [vmem:[%s8343_s0 + $0x40] sm:$0xff] }
 0x2f9   : > { %6703 = vmatprep.subr.mxu1 %v1220_v10 }
 0x370   : > { %v1118_v22 = vpop.xlane.xlu1 %1117 }
 0x371   : > { %v1120_v23 = vsub.f32 %v1110_v9, %v1118_v22  ;;  %v6064_v22 = vld [vmem:[%s8342_s24 + $0x58] sm:$0xff] }
 0x372   : > { %v1114_v24 = vpop.xlane.xlu0 %1113 }
 0x373   : > { %v1123_v25 = vmul.f32 1.442695, %v1120_v23  ;;  %v1119_v26 = vsub.f32 %v1109_v11, %v1114_v24  ;;  %v6056_v11 = vld [vmem:[%s8314_s10 + $0x8] sm:$0xff] }
 0x375   : > { %7136 = vpow2.f32 %v1123_v25  ;;  %v1121_v27 = vmul.f32 1.442695, %v1119_v26  ;;  %v6063_v25 = vld [vmem:[%s8342_s24 + $0x50] sm:$0xff]  ;;  %v6062_v26 = vld [vmem:[%s8342_s24 + $0x48] sm:$0xff] }
 0x377   : > { %7138 = vpow2.f32 %v1121_v27 }
 0x382   : > { %v7137_v28 = vpop.eup %7136 }
 0x383   : > { %v1128_v29 = vsel %vm1115_vm4, %v7137_v28, 0.0 }
 0x384   : > { %v7139_v30 = vpop.eup %7138  ;;  %1129 = vadd.xlane.f32.xlu1 %v1128_v29  ;;  %v6080_v29 = vld [vmem:[%s8312_s8 + $0x58] sm:$0xff] }
 0x385   : > { %v1125_v32 = vsel %vm1111_vm5, %v7139_v30, 0.0 }
 0x386   : > { %1126 = vadd.xlane.f32.xlu0 %v1125_v32  ;;  %v6074_v32 = vld [vmem:[%s8311_s7 + $0x2] ss:$0 sm:$0xff] }
 0x40d   : > { %v1130_v35 = vpop.xlane.xlu1 %1129 }
 0x40e   : > { %7140 = vrcp.f32 %v1130_v35 }
 0x40f   : > { %v1127_v36 = vpop.xlane.xlu0 %1126 }
 0x410   : > { %7142 = vrcp.f32 %v1127_v36 }
 0x41b   : > { %v7141_v37 = vpop.eup %7140 }
 0x41c   : > { %v1134_v40 = vmul.f32 %v7141_v37, %v7137_v28  ;;  %v6061_v28 = vld [vmem:[%s8342_s24 + $0x40] sm:$0xff]  ;;  %v6078_v37 = vld [vmem:[%s8312_s8 + $0x48] sm:$0xff] }
 0x41d   : > { %v7143_v38 = vpop.eup %7142 }
 0x41e   : > { %v1133_v39 = vmul.f32 %v7143_v38, %v7139_v30 }
 0x420   : > { %6648 = vmatprep.mubr.msk.f32.mxu0 %vm1111_vm5, %v1133_v39 }
 0x421   : > { %6649 = vmatmul.mubr.msk.f32.vlgmr.msra.gmra.mxu0 %vm1111_vm5, %v1134_v40  ;;  %v6077_v40 = vld [vmem:[%s8312_s8 + $0x40] sm:$0xff] }
 0x422   : > { %6663 = vmatpush3.msra.mxu0 %v6036_v33  ;;  %6670 = vmatprep.mubr.msk.f32.mxu0 %vm710_vm0, %v7405_v31  ;;  %v6079_v33 = vld [vmem:[%s8312_s8 + $0x50] sm:$0xff] }
 0x423   : > { %6664 = vmatprep.subr.mxu0 %v6035_v41 }
 0x424   : > { %6665 = vmatpush3.msra.mxu0 %v6035_v41 }
 0x425   : > { %6666 = vmatprep.subr.mxu0 %v6034_v42 }
 0x426   : > { %6667 = vmatpush3.msra.mxu0 %v6034_v42 }
 0x427   : > { %6668 = vmatprep.subr.mxu0 %v6033_v43 }
 0x428   : > { %6669 = vmatpush3.msra.mxu0 %v6033_v43 }
 0x429   : > { %6671 = vmatmul.mubr.msk.f32.vlgmr.msra.gmra.mxu0 %vm710_vm0, %v7409_v34 }
 0x42a   : > { %6688 = vmatprep.mubr.msk.f32.mxu0 %vm1019_vm2, %v1301_v44  ;;  %v6066_v44 = vld [vmem:[%s8346_s6 + $0x2] ss:$0 sm:$0xff] }
 0x4e1   : > { %v6650_v45 = vpop.f32.mrf.mxu0 }
 0x4e3   : > { %v1211_v46 = vpop.f32.mrf.mxu0 }
 0x4e9   : > { %v6672_v48 = vpop.f32.mrf.mxu0 }
 0x4ea   : > { %v1394_v49 = vadd.f32 %v6672_v48, %v6038_v47  ;;  %v6082_v48 = vld [vmem:[%s8313_s9 + $0x2] ss:$0 sm:$0xff] }
 0x4eb   : > { %v1388_v50 = vpop.f32.mrf.mxu0 }
 0x4ec   : > { %v1389_v51 = vadd.f32 %v6038_v47, %v1388_v50  ;;  %6684 = vmatprep.subr.msk.mxu0 %vm1019_vm2, %v1394_v49 }
 0x4ed   : > { %6685 = vmatpush3.xpose.msk.msra.mxu0 %vm1019_vm2, %v1394_v49 }
 0x4ee   : > { %6686 = vmatprep.subr.msk.mxu0 %vm1019_vm2, %v1389_v51 }
 0x4f1   : > { %6687 = vmatpush3.xpose.msk.msra.mxu0 %vm1019_vm2, %v1389_v51 }
 0x4f2   : > { %6698 = vmatprep.subr.mxu0 %v6056_v11 }
 0x4f4   : > { %6689 = vmatmul.mubr.msk.f32.vlgmr.msra.gmra.mxu0 %vm1019_vm2, %v1306_v15 }
 0x4f5   : > { %6699 = vmatpush3.msra.mxu0 %v6056_v11  ;;  %v6098_v11 = vld [vmem:[%s8342_s24 + $0x78] sm:$0xff] }
 0x4f6   : > { %6708 = vmatprep.subr.mxu0 %v6064_v22 }
 0x5b4   : > { %v6690_v52 = vpop.f32.mrf.mxu0 }
 0x5b5   : > { %v1573_v53 = vmul.f32 0.35355338, %v6690_v52 }
 0x5b6   : > { %v1563_v54 = vpop.f32.mrf.mxu0 }
 0x5b7   : > { %v1572_v55 = vmul.f32 0.35355338, %v1563_v54  ;;  %v1575_v56 = vadd.f32 %v1573_v53, %v7498_v3 }
 0x5b9   : > { %v1579_v57 = vsel %vm1115_vm4, %v1575_v56, -inf  ;;  %v1574_v58 = vadd.f32 %v1572_v55, %v7501_v6 }
 0x5ba   : > { %1580 = vmax.xlane.f32.xlu1 %v1579_v57 }
 0x5bb   : > { %v1576_v59 = vsel %vm1111_vm5, %v1574_v58, -inf }
 0x5bc   : > { %1577 = vmax.xlane.f32.xlu0 %v1576_v59 }
 0x643   : > { %v1581_v60 = vpop.xlane.xlu1 %1580 }
 0x644   : > { %v1583_v61 = vsub.f32 %v1575_v56, %v1581_v60 }
 0x645   : > { %v1578_v62 = vpop.xlane.xlu0 %1577 }
 0x646   : > { %v1586_v63 = vmul.f32 1.442695, %v1583_v61  ;;  %v1582_v1 = vsub.f32 %v1574_v58, %v1578_v62 }
 0x648   : > { %7144 = vpow2.f32 %v1586_v63  ;;  %v1584_v4 = vmul.f32 1.442695, %v1582_v1 }
 0x64a   : > { %7146 = vpow2.f32 %v1584_v4 }
 0x655   : > { %v7145_v5 = vpop.eup %7144 }
 0x656   : > { %v1591_v7 = vsel %vm1115_vm4, %v7145_v5, 0.0 }
 0x657   : > { %v7147_v8 = vpop.eup %7146  ;;  %1592 = vadd.xlane.f32.xlu1 %v1591_v7 }
 0x658   : > { %v1588_v9 = vsel %vm1111_vm5, %v7147_v8, 0.0 }
 0x659   : > { %1589 = vadd.xlane.f32.xlu0 %v1588_v9 }
 0x6e0   : > { %v1593_v12 = vpop.xlane.xlu1 %1592 }
 0x6e1   : > { %7148 = vrcp.f32 %v1593_v12  ;;  %v6092_v12 = vld [vmem:[%s8314_s10 + $0x10] sm:$0xff] }
 0x6e2   : > { %v1590_v13 = vpop.xlane.xlu0 %1589 }
 0x6e3   : > { %7150 = vrcp.f32 %v1590_v13 }
 0x6ee   : > { %v7149_v14 = vpop.eup %7148 }
 0x6ef   : > { %v1597_v17 = vmul.f32 %v7149_v14, %v7145_v5 }
 0x6f0   : > { %v7151_v15 = vpop.eup %7150 }
 0x6f1   : > { %v1596_v16 = vmul.f32 %v7151_v15, %v7147_v8 }
 0x6f3   : > { %6695 = vmatprep.mubr.msk.f32.mxu1 %vm1111_vm5, %v1596_v16 }
 0x6f4   : > { %6696 = vmatmul.mubr.msk.f32.vlgmr.msra.gmra.mxu1 %vm1111_vm5, %v1597_v17 }
 0x6f5   : > { %6705 = vmatprep.mubr.msk.f32.mxu1 %vm1019_vm2, %v1211_v46  ;;  %6704 = vmatpush3.msra.mxu1 %v1220_v10 }
 0x6f6   : > { %6719 = vmatprep.subr.mxu1 %v6072_v18 }
 0x6f8   : > { %6706 = vmatmul.mubr.msk.f32.vlgmr.msra.gmra.mxu1 %vm1019_vm2, %v6650_v45 }
 0x6f9   : > { %6720 = vmatpush3.msra.mxu1 %v6072_v18  ;;  %6727 = vmatprep.mubr.msk.f32.mxu1 %vm710_vm0, %v7405_v31 }
 0x6fa   : > { %6721 = vmatprep.subr.mxu1 %v6071_v19 }
 0x6fb   : > { %6722 = vmatpush3.msra.mxu1 %v6071_v19  ;;  %v6097_v19 = vld [vmem:[%s8342_s24 + $0x70] sm:$0xff] }
 0x6fc   : > { %6723 = vmatprep.subr.mxu1 %v6070_v20 }
 0x6fd   : > { %6724 = vmatpush3.msra.mxu1 %v6070_v20  ;;  %v6096_v20 = vld [vmem:[%s8342_s24 + $0x68] sm:$0xff] }
 0x6fe   : > { %6725 = vmatprep.subr.mxu1 %v6069_v21 }
 0x6ff   : > { %6726 = vmatpush3.msra.mxu1 %v6069_v21  ;;  %v6095_v21 = vld [vmem:[%s8342_s24 + $0x60] sm:$0xff] }
 0x700   : > { %6728 = vmatmul.mubr.msk.f32.vlgmr.msra.gmra.mxu1 %vm710_vm0, %v7409_v34 }
 0x7b4   : > { %v6697_v23 = vpop.f32.mrf.mxu1 }
 0x7b6   : > { %v1673_v24 = vpop.f32.mrf.mxu1 }
 0x7b7   : > { %6700 = vmatprep.mubr.msk.f32.mxu0 %vm1019_vm2, %v1673_v24  ;;  %v6112_v24 = vld [vmem:[%s8312_s8 + $0x68] sm:$0xff] }
 0x7b8   : > { %6701 = vmatmul.mubr.msk.f32.vlgmr.msra.gmra.mxu0 %vm1019_vm2, %v6697_v23  ;;  %v7589_v27 = vpop.f32.mrf.mxu1  ;;  %v6113_v23 = vld [vmem:[%s8312_s8 + $0x70] sm:$0xff] }
 0x7b9   : > { %6709 = vmatpush3.msra.mxu0 %v6064_v22  ;;  %6716 = vmatprep.mubr.msk.f32.mxu0 %vm710_vm0, %v7405_v31  ;;  %v6114_v22 = vld [vmem:[%s8312_s8 + $0x78] sm:$0xff] }
 0x7ba   : > { %6710 = vmatprep.subr.mxu0 %v6063_v25  ;;  %v7597_v30 = vpop.f32.mrf.mxu1 }
 0x7bb   : > { %6711 = vmatpush3.msra.mxu0 %v6063_v25  ;;  %v6111_v25 = vld [vmem:[%s8312_s8 + $0x60] sm:$0xff] }
 0x7bc   : > { %6712 = vmatprep.subr.mxu0 %v6062_v26 }
 0x7bd   : > { %6713 = vmatpush3.msra.mxu0 %v6062_v26  ;;  %v6106_v26 = vld [vmem:[%s8343_s0 + $0x78] sm:$0xff] }
 0x7be   : > { %6714 = vmatprep.subr.mxu0 %v6061_v28 }
 0x7bf   : > { %6715 = vmatpush3.msra.mxu0 %v6061_v28 }
 0x7c0   : > { %6717 = vmatmul.mubr.msk.f32.vlgmr.msra.gmra.mxu0 %vm710_vm0, %v7409_v34  ;;  %v6729_v35 = vpop.f32.mrf.mxu1  ;;  %6730 = vmatprep.subr.mxu0 %v6080_v29 }
 0x7c1   : > { %v2019_v36 = vadd.f32 %v6729_v35, %v6074_v32  ;;  %6731 = vmatpush3.msra.mxu0 %v6080_v29  ;;  %6738 = vmatprep.mubr.msk.f32.mxu0 %vm710_vm0, %v7405_v31  ;;  %v6100_v35 = vld [vmem:[%s8346_s6 + $0x3] ss:$0 sm:$0xff] }
 0x7c2   : > { %v2013_v38 = vpop.f32.mrf.mxu1  ;;  %6732 = vmatprep.subr.mxu0 %v6079_v33 }
 0x7c3   : > { %v2014_v39 = vadd.f32 %v6074_v32, %v2013_v38  ;;  %6733 = vmatpush3.msra.mxu0 %v6079_v33  ;;  %6741 = vmatprep.subr.msk.mxu1 %vm1019_vm2, %v2019_v36  ;;  %v6105_v32 = vld [vmem:[%s8343_s0 + $0x70] sm:$0xff]  ;;  %v6104_v33 = vld [vmem:[%s8343_s0 + $0x68] sm:$0xff] }
 0x7c4   : > { %6734 = vmatprep.subr.mxu0 %v6078_v37  ;;  %6742 = vmatpush3.xpose.msk.msra.mxu1 %vm1019_vm2, %v2019_v36  ;;  %v6103_v36 = vld [vmem:[%s8343_s0 + $0x60] sm:$0xff] }
 0x7c5   : > { %6735 = vmatpush3.msra.mxu0 %v6078_v37  ;;  %6743 = vmatprep.subr.msk.mxu1 %vm1019_vm2, %v2014_v39 }
 0x7c6   : > { %6736 = vmatprep.subr.mxu0 %v6077_v40 }
 0x7c7   : > { %6737 = vmatpush3.msra.mxu0 %v6077_v40  ;;  %v6116_v40 = vld [vmem:[%s8313_s9 + $0x3] ss:$0 sm:$0xff] }
 0x7c8   : > { %6739 = vmatmul.mubr.msk.f32.vlgmr.msra.gmra.mxu0 %vm710_vm0, %v7409_v34  ;;  %6744 = vmatpush3.xpose.msk.msra.mxu1 %vm1019_vm2, %v2014_v39 }
 0x7c9   : > { %6755 = vmatprep.subr.mxu1 %v6092_v12 }
 0x878   : > { %v7621_v41 = vpop.f32.mrf.mxu0 }
 0x87a   : > { %v7623_v42 = vpop.f32.mrf.mxu0 }
 0x880   : > { %v6718_v43 = vpop.f32.mrf.mxu0 }
 0x881   : > { %v1931_v47 = vadd.f32 %v6718_v43, %v6066_v44 }
 0x882   : > { %v1925_v45 = vpop.f32.mrf.mxu0 }
 0x883   : > { %v1926_v46 = vadd.f32 %v6066_v44, %v1925_v45 }
 0x885   : > { %6745 = vmatprep.mubr.msk.f32.mxu1 %vm1019_vm2, %v1926_v46 }
 0x886   : > { %6746 = vmatmul.mubr.msk.f32.vlgmr.msra.gmra.mxu1 %vm1019_vm2, %v1931_v47  ;;  %v1843_v47 = vadd.f32 %v7589_v27, %v7621_v41 }
 0x887   : > { %6756 = vmatpush3.msra.mxu1 %v6092_v12 }
 0x888   : > { %v6740_v49 = vpop.f32.mrf.mxu0  ;;  %6771 = vmatprep.subr.mxu1 %v6106_v26 }
 0x889   : > { %v2107_v50 = vadd.f32 %v6740_v49, %v6082_v48 }
 0x88a   : > { %v2101_v51 = vpop.f32.mrf.mxu0 }
 0x88b   : > { %v2102_v52 = vadd.f32 %v6082_v48, %v2101_v51  ;;  %6748 = vmatprep.subr.msk.mxu0 %vm1141_vm3, %v2107_v50  ;;  %v1838_v48 = vadd.f32 %v7597_v30, %v7623_v42 }
 0x88c   : > { %6749 = vmatpush3.msk.msra.mxu0 %vm1141_vm3, %v2107_v50 }
 0x88d   : > { %6750 = vmatprep.subr.mxu0 %v2102_v52 }
 0x88e   : > { %6751 = vmatpush3.msra.mxu0 %v2102_v52  ;;  %v6108_v52 = vld [vmem:[%s8311_s7 + $0x3] ss:$0 sm:$0xff] }
 0x88f   : > { %6760 = vmatprep.subr.mxu0 %v6098_v11 }
 0x946   : > { %v6747_v53 = vpop.f32.mrf.mxu1 }
 0x947   : > { %v2198_v54 = vmul.f32 0.35355338, %v6747_v53 }
 0x948   : > { %v2188_v55 = vpop.f32.mrf.mxu1 }
 0x949   : > { %v2197_v56 = vmul.f32 0.35355338, %v2188_v55  ;;  %v2200_v57 = vadd.f32 %v2198_v54, %v7498_v3 }
 0x94b   : > { %v2204_v58 = vsel %vm1115_vm4, %v2200_v57, -inf  ;;  %v2199_v59 = vadd.f32 %v2197_v56, %v7501_v6 }
 0x94c   : > { %2205 = vmax.xlane.f32.xlu1 %v2204_v58 }
 0x94d   : > { %v2201_v60 = vsel %vm1111_vm5, %v2199_v59, -inf }
 0x94e   : > { %2202 = vmax.xlane.f32.xlu0 %v2201_v60 }
 0x9d5   : > { %v2206_v61 = vpop.xlane.xlu1 %2205 }
 0x9d6   : > { %v2208_v62 = vsub.f32 %v2200_v57, %v2206_v61 }
 0x9d7   : > { %v2203_v63 = vpop.xlane.xlu0 %2202 }
 0x9d8   : > { %v2211_v1 = vmul.f32 1.442695, %v2208_v62  ;;  %v2207_v4 = vsub.f32 %v2199_v59, %v2203_v63 }
 0x9da   : > { %7152 = vpow2.f32 %v2211_v1  ;;  %v2209_v5 = vmul.f32 1.442695, %v2207_v4 }
 0x9dc   : > { %7154 = vpow2.f32 %v2209_v5 }
 0x9e7   : > { %v7153_v7 = vpop.eup %7152 }
 0x9e8   : > { %v2216_v8 = vsel %vm1115_vm4, %v7153_v7, 0.0 }
 0x9e9   : > { %v7155_v9 = vpop.eup %7154  ;;  %2217 = vadd.xlane.f32.xlu1 %v2216_v8 }
 0x9ea   : > { %v2213_v10 = vsel %vm1111_vm5, %v7155_v9, 0.0 }
 0x9eb   : > { %2214 = vadd.xlane.f32.xlu0 %v2213_v10 }
 0xa72   : > { %v2218_v13 = vpop.xlane.xlu1 %2217 }
 0xa73   : > { %7156 = vrcp.f32 %v2218_v13 }
 0xa74   : > { %v2215_v14 = vpop.xlane.xlu0 %2214 }
 0xa75   : > { %7158 = vrcp.f32 %v2215_v14 }
 0xa80   : > { %v7157_v15 = vpop.eup %7156 }
 0xa81   : > { %v2222_v18 = vmul.f32 %v7157_v15, %v7153_v7 }
 0xa82   : > { %v7159_v16 = vpop.eup %7158 }
 0xa83   : > { %v2221_v17 = vmul.f32 %v7159_v16, %v7155_v9 }
 0xa85   : > { %6752 = vmatprep.mubr.msk.f32.mxu0 %vm1111_vm5, %v2221_v17 }
 0xa86   : > { %6753 = vmatmul.mubr.msk.f32.vlgmr.msra.gmra.mxu0 %vm1111_vm5, %v2222_v18 }
 0xa87   : > { %6761 = vmatpush3.msra.mxu0 %v6098_v11  ;;  %6768 = vmatprep.mubr.msk.f32.mxu0 %vm710_vm0, %v7405_v31 }
 0xa88   : > { %6762 = vmatprep.subr.mxu0 %v6097_v19 }
 0xa89   : > { %6763 = vmatpush3.msra.mxu0 %v6097_v19 }
 0xa8a   : > { %6764 = vmatprep.subr.mxu0 %v6096_v20 }
 0xa8b   : > { %6765 = vmatpush3.msra.mxu0 %v6096_v20  ;;  %v6129_v20 = vld [vmem:[%s8315_s11] ss:$0 sm:$0xff] }
 0xa8c   : > { %6766 = vmatprep.subr.mxu0 %v6095_v21 }
 0xa8d   : > { %6767 = vmatpush3.msra.mxu0 %v6095_v21 }
 0xa8e   : > { %6769 = vmatmul.mubr.msk.f32.vlgmr.msra.gmra.mxu0 %vm710_vm0, %v7409_v34  ;;  %6782 = vmatprep.subr.mxu0 %v6114_v22 }
 0xa8f   : > { %6783 = vmatpush3.msra.mxu0 %v6114_v22  ;;  %6790 = vmatprep.mubr.msk.f32.mxu0 %vm710_vm0, %v7405_v31 }
 0xa90   : > { %6784 = vmatprep.subr.mxu0 %v6113_v23 }
 0xa91   : > { %6785 = vmatpush3.msra.mxu0 %v6113_v23 }
 0xa92   : > { %6786 = vmatprep.subr.mxu0 %v6112_v24 }
 0xa93   : > { %6787 = vmatpush3.msra.mxu0 %v6112_v24 }
 0xa94   : > { %6788 = vmatprep.subr.mxu0 %v6111_v25 }
 0xa95   : > { %6789 = vmatpush3.msra.mxu0 %v6111_v25 }
 0xa96   : > { %6791 = vmatmul.mubr.msk.f32.vlgmr.msra.gmra.mxu0 %vm710_vm0, %v7409_v34 }
 0xb46   : > { %v6754_v28 = vpop.f32.mrf.mxu0 }
 0xb48   : > { %v2298_v29 = vpop.f32.mrf.mxu0 }
 0xb49   : > { %6757 = vmatprep.mubr.msk.f32.mxu1 %vm1019_vm2, %v2298_v29 }
 0xb4a   : > { %6758 = vmatmul.mubr.msk.f32.vlgmr.msra.gmra.mxu1 %vm1019_vm2, %v6754_v28 }
 0xb4b   : > { %6772 = vmatpush3.msra.mxu1 %v6106_v26  ;;  %6779 = vmatprep.mubr.msk.f32.mxu1 %vm710_vm0, %v7405_v31 }
 0xb4c   : > { %6773 = vmatprep.subr.mxu1 %v6105_v32 }
 0xb4d   : > { %6774 = vmatpush3.msra.mxu1 %v6105_v32 }
 0xb4e   : > { %v6770_v37 = vpop.f32.mrf.mxu0  ;;  %6775 = vmatprep.subr.mxu1 %v6104_v33 }
 0xb4f   : > { %v2477_v38 = vadd.f32 %v6770_v37, %v6100_v35  ;;  %6776 = vmatpush3.msra.mxu1 %v6104_v33 }
 0xb50   : > { %v2471_v39 = vpop.f32.mrf.mxu0  ;;  %6777 = vmatprep.subr.mxu1 %v6103_v36 }
 0xb51   : > { %v2472_v31 = vadd.f32 %v6100_v35, %v2471_v39  ;;  %6778 = vmatpush3.msra.mxu1 %v6103_v36 }
 0xb52   : > { %6780 = vmatmul.mubr.msk.f32.vlgmr.msra.gmra.mxu1 %vm710_vm0, %v7409_v34 }
 0xb53   : > { %6797 = vmatprep.mubr.msk.f32.mxu1 %vm1019_vm2, %v2472_v31 }
 0xb56   : > { %v6792_v43 = vpop.f32.mrf.mxu0 }
 0xb57   : > { %v2653_v44 = vadd.f32 %v6792_v43, %v6116_v40  ;;  %v2995_v43 = vld [vmem:[%s8318_s14 + $0x10] sm:$0xff] }
 0xb58   : > { %v2647_v45 = vpop.f32.mrf.mxu0 }
 0xb59   : > { %v2648_v46 = vadd.f32 %v6116_v40, %v2647_v45  ;;  %6800 = vmatprep.subr.msk.mxu0 %vm1141_vm3, %v2653_v44  ;;  %v2996_v40 = vld [vmem:[%s8318_s14 + $0x18] sm:$0xff]  ;;  %v2993_v45 = vld [vmem:[%s8318_s14] sm:$0xff] }
 0xb5a   : > { %6801 = vmatpush3.msk.msra.mxu0 %vm1141_vm3, %v2653_v44  ;;  %v2994_v44 = vld [vmem:[%s8318_s14 + $0x8] sm:$0xff] }
 0xb5b   : > { %6802 = vmatprep.subr.mxu0 %v2648_v46 }
 0xb5c   : > { %6803 = vmatpush3.msra.mxu0 %v2648_v46 }
 0xb5d   : > { %6812 = vmatprep.subr.mxu0 %v2996_v40 }
 0xc0a   : > { %v6759_v34 = vpop.f32.mrf.mxu1 }
 0xc0b   : > { %v2391_v49 = vadd.f32 %v6759_v34, %v1843_v47 }
 0xc0c   : > { %v2381_v50 = vpop.f32.mrf.mxu1 }
 0xc0d   : > { %v2390_v51 = vadd.f32 %v2381_v50, %v1838_v48 }
 0xc12   : > { %v6781_v53 = vpop.f32.mrf.mxu1 }
 0xc13   : > { %v2565_v54 = vadd.f32 %v6781_v53, %v6108_v52 }
 0xc14   : > { %v2559_v55 = vpop.f32.mrf.mxu1 }
 0xc15   : > { %v2560_v56 = vadd.f32 %v6108_v52, %v2559_v55  ;;  %6793 = vmatprep.subr.msk.mxu1 %vm1019_vm2, %v2565_v54  ;;  %v6130_v52 = vld [vmem:[%s8316_s12] ss:$0 sm:$0xff] }
 0xc16   : > { %6794 = vmatpush3.xpose.msk.msra.mxu1 %vm1019_vm2, %v2565_v54 }
 0xc17   : > { %6795 = vmatprep.subr.msk.mxu1 %vm1019_vm2, %v2560_v56 }
 0xc1a   : > { %6796 = vmatpush3.xpose.msk.msra.mxu1 %vm1019_vm2, %v2560_v56 }
 0xc1d   : > { %6798 = vmatmul.mubr.msk.f32.vlgmr.msra.gmra.mxu1 %vm1019_vm2, %v2477_v38 }
 0xcdd   : > { %v6799_v27 = vpop.f32.mrf.mxu1 }
 0xcde   : > { %v2744_v30 = vmul.f32 0.35355338, %v6799_v27  ;;  %v6131_v27 = vld [vmem:[%s8317_s13] ss:$0 sm:$0xff] }
 0xcdf   : > { %v2734_v41 = vpop.f32.mrf.mxu1 }
 0xce0   : > { %v2743_v42 = vmul.f32 0.35355338, %v2734_v41  ;;  %v2746_v57 = vadd.f32 %v2744_v30, %v7498_v3 }
 0xce2   : > { %v2750_v58 = vsel %vm1115_vm4, %v2746_v57, -inf  ;;  %v2745_v59 = vadd.f32 %v2743_v42, %v7501_v6  ;;  %v6126_v6 = vld [vmem:[%s8314_s10 + $0x18] sm:$0xff] }
 0xce3   : > { %2751 = vmax.xlane.f32.xlu1 %v2750_v58  ;;  %6807 = vmatprep.subr.mxu1 %v6126_v6  ;;  %v3153_v58 = vld [vmem:[%s8320_s16 + $0x70] sm:$0xff] }
 0xce4   : > { %v2747_v60 = vsel %vm1111_vm5, %v2745_v59, -inf  ;;  %6808 = vmatpush3.msra.mxu1 %v6126_v6  ;;  %v3140_v6 = vld [vmem:[%s8320_s16 + $0x8] sm:$0xff] }
 0xce5   : > { %2748 = vmax.xlane.f32.xlu0 %v2747_v60  ;;  %v3151_v60 = vld [vmem:[%s8320_s16 + $0x60] sm:$0xff] }
 0xd6c   : > { %v2752_v61 = vpop.xlane.xlu1 %2751 }
 0xd6d   : > { %v2754_v62 = vsub.f32 %v2746_v57, %v2752_v61  ;;  %v3154_v57 = vld [vmem:[%s8320_s16 + $0x78] sm:$0xff] }
 0xd6e   : > { %v2749_v63 = vpop.xlane.xlu0 %2748  ;;  %6823 = vmatprep.subr.mxu1 %v3154_v57  ;;  %v3150_v61 = vld [vmem:[%s8320_s16 + $0x58] sm:$0xff] }
 0xd6f   : > { %v2757_v1 = vmul.f32 1.442695, %v2754_v62  ;;  %v2753_v4 = vsub.f32 %v2745_v59, %v2749_v63  ;;  %v3152_v59 = vld [vmem:[%s8320_s16 + $0x68] sm:$0xff]  ;;  %v3149_v62 = vld [vmem:[%s8320_s16 + $0x50] sm:$0xff] }
 0xd70   : > { %v3148_v63 = vld [vmem:[%s8320_s16 + $0x48] sm:$0xff] }
 0xd71   : > { %7160 = vpow2.f32 %v2757_v1  ;;  %v2755_v5 = vmul.f32 1.442695, %v2753_v4  ;;  %v3147_v1 = vld [vmem:[%s8320_s16 + $0x40] sm:$0xff]  ;;  %v3146_v4 = vld [vmem:[%s8320_s16 + $0x38] sm:$0xff] }
 0xd73   : > { %7162 = vpow2.f32 %v2755_v5  ;;  %v3145_v5 = vld [vmem:[%s8320_s16 + $0x30] sm:$0xff] }
 0xd7e   : > { %v7161_v7 = vpop.eup %7160 }
 0xd7f   : > { %v2762_v8 = vsel %vm1115_vm4, %v7161_v7, 0.0 }
 0xd80   : > { %v7163_v3 = vpop.eup %7162  ;;  %2763 = vadd.xlane.f32.xlu1 %v2762_v8  ;;  %v3143_v8 = vld [vmem:[%s8320_s16 + $0x20] sm:$0xff] }
 0xd81   : > { %v2759_v9 = vsel %vm1111_vm5, %v7163_v3, 0.0 }
 0xd82   : > { %2760 = vadd.xlane.f32.xlu0 %v2759_v9  ;;  %v3141_v9 = vld [vmem:[%s8320_s16 + $0x10] sm:$0xff] }
 0xe09   : > { %v2764_v10 = vpop.xlane.xlu1 %2763 }
 0xe0a   : > { %7164 = vrcp.f32 %v2764_v10  ;;  %v3139_v10 = vld [vmem:[%s8320_s16] sm:$0xff] }
 0xe0b   : > { %v2761_v11 = vpop.xlane.xlu0 %2760 }
 0xe0c   : > { %7166 = vrcp.f32 %v2761_v11  ;;  %v6132_v11 = vld [vmem:[%s8319_s15] ss:$0 sm:$0xff] }
 0xe17   : > { %v7165_v12 = vpop.eup %7164 }
 0xe18   : > { %v2768_v15 = vmul.f32 %v7165_v12, %v7161_v7  ;;  %v3144_v7 = vld [vmem:[%s8320_s16 + $0x28] sm:$0xff] }
 0xe19   : > { %v7167_v13 = vpop.eup %7166 }
 0xe1a   : > { %v2767_v14 = vmul.f32 %v7167_v13, %v7163_v3  ;;  %v3142_v3 = vld [vmem:[%s8320_s16 + $0x18] sm:$0xff] }
 0xe1c   : > { %6804 = vmatprep.mubr.msk.f32.mxu0 %vm1111_vm5, %v2767_v14 }
 0xe1d   : > { %6805 = vmatmul.mubr.msk.f32.vlgmr.msra.gmra.mxu0 %vm1111_vm5, %v2768_v15 }
 0xe1e   : > { %6813 = vmatpush3.msra.mxu0 %v2996_v40 }
 0xe1f   : > { %6814 = vmatprep.subr.mxu0 %v2995_v43 }
 0xe20   : > { %6815 = vmatpush3.msra.mxu0 %v2995_v43 }
 0xe21   : > { %6816 = vmatprep.subr.mxu0 %v2994_v44 }
 0xe22   : > { %6817 = vmatpush3.msra.mxu0 %v2994_v44 }
 0xe23   : > { %6818 = vmatprep.subr.mxu0 %v2993_v45 }
 0xe24   : > { %6819 = vmatpush3.msra.mxu0 %v2993_v45 }
 0xedd   : > { %v6806_v16 = vpop.f32.mrf.mxu0 }
 0xedf   : > { %v2844_v17 = vpop.f32.mrf.mxu0 }
 0xee0   : > { %6809 = vmatprep.mubr.msk.f32.mxu1 %vm1019_vm2, %v2844_v17 }
 0xee1   : > { %6810 = vmatmul.mubr.msk.f32.vlgmr.msra.gmra.mxu1 %vm1019_vm2, %v6806_v16 }
 0xee2   : > { %6824 = vmatpush3.msra.mxu1 %v3154_v57 }
 0xee3   : > { %6825 = vmatprep.subr.mxu1 %v3153_v58 }
 0xee4   : > { %6826 = vmatpush3.msra.mxu1 %v3153_v58 }
 0xee5   : > { %6827 = vmatprep.subr.mxu1 %v3152_v59 }
 0xee6   : > { %6828 = vmatpush3.msra.mxu1 %v3152_v59 }
 0xee7   : > { %6829 = vmatprep.subr.mxu1 %v3151_v60 }
 0xee8   : > { %6830 = vmatpush3.msra.mxu1 %v3151_v60 }
 0xee9   : > { %6831 = vmatprep.subr.mxu1 %v3150_v61 }
 0xeea   : > { %6832 = vmatpush3.msra.mxu1 %v3150_v61 }
 0xeeb   : > { %6833 = vmatprep.subr.mxu1 %v3149_v62 }
 0xeec   : > { %6834 = vmatpush3.msra.mxu1 %v3149_v62 }
 0xeed   : > { %6835 = vmatprep.subr.mxu1 %v3148_v63 }
 0xeee   : > { %6836 = vmatpush3.msra.mxu1 %v3148_v63 }
 0xeef   : > { %6837 = vmatprep.subr.mxu1 %v3147_v1 }
 0xef0   : > { %6838 = vmatpush3.msra.mxu1 %v3147_v1 }
 0xef1   : > { %6839 = vmatprep.subr.mxu1 %v3146_v4 }
 0xef2   : > { %6840 = vmatpush3.msra.mxu1 %v3146_v4 }
 0xef3   : > { %6841 = vmatprep.subr.mxu1 %v3145_v5 }
 0xef4   : > { %6842 = vmatpush3.msra.mxu1 %v3145_v5  ;;  %v6135_v5 = vld [vmem:[%s8321_s17] ss:$0 sm:$0xff] }
 0xef5   : > { %6843 = vmatprep.subr.mxu1 %v3144_v7 }
 0xef6   : > { %6844 = vmatpush3.msra.mxu1 %v3144_v7 }
 0xef7   : > { %6845 = vmatprep.subr.mxu1 %v3143_v8 }
 0xef8   : > { %6846 = vmatpush3.msra.mxu1 %v3143_v8 }
 0xef9   : > { %6847 = vmatprep.subr.mxu1 %v3142_v3 }
 0xefa   : > { %6848 = vmatpush3.msra.mxu1 %v3142_v3 }
 0xefb   : > { %6849 = vmatprep.subr.mxu1 %v3141_v9 }
 0xefc   : > { %6850 = vmatpush3.msra.mxu1 %v3141_v9 }
 0xefd   : > { %6851 = vmatprep.subr.mxu1 %v3140_v6 }
 0xefe   : > { %6852 = vmatpush3.msra.mxu1 %v3140_v6 }
 0xeff   : > { %6853 = vmatprep.subr.mxu1 %v3139_v10 }
 0xf00   : > { %6854 = vmatpush3.msra.mxu1 %v3139_v10 }
 0xfa1   : > { %v6811_v18 = vpop.f32.mrf.mxu1 }
 0xfa2   : > { %v2937_v19 = vadd.f32 %v6811_v18, %v2391_v49 }
 0xfa3   : > { %v2927_v21 = vpop.f32.mrf.mxu1 }
 0xfa4   : > { %v2939_v22 = vadd.f32 %v2937_v19, %v7376_v2  ;;  %v2936_v23 = vadd.f32 %v2927_v21, %v2390_v51 }
 0xfa6   : > { %v7734_v24 = vadd.f32 %v6129_v20, %v2939_v22  ;;  %v2938_v25 = vadd.f32 %v2936_v23, %v7372_v0 }
 0xfa8   : > { %v7737_v26 = vadd.f32 %v6129_v20, %v2938_v25  ;;  %v2954_v28 = vsel %vm714_vm1, %v7734_v24, 0.0 }
 0xfa9   : > { %2955 = vadd.xlane.f32.xlu1 %v2954_v28 }
 0xfaa   : > { %v2951_v29 = vsel %vm710_vm0, %v7737_v26, 0.0 }
 0xfab   : > { %2952 = vadd.xlane.f32.xlu0 %v2951_v29 }
0x1032   : > { %v2956_v32 = vpop.xlane.xlu1 %2955 }
0x1033   : > { %v2958_v33 = vmul.f32 0.03125, %v2956_v32 }
0x1034   : > { %v2953_v35 = vpop.xlane.xlu0 %2952 }
0x1035   : > { %v2960_v2 = vsub.f32 %v7734_v24, %v2958_v33  ;;  %v2957_v36 = vmul.f32 0.03125, %v2953_v35 }
0x1037   : > { %v2959_v37 = vsub.f32 %v7737_v26, %v2957_v36  ;;  %v2962_v38 = vmul.f32 %v2960_v2, %v2960_v2 }
0x1039   : > { %v2966_v0 = vsel %vm714_vm1, %v2962_v38, 0.0  ;;  %v2961_v39 = vmul.f32 %v2959_v37, %v2959_v37 }
0x103a   : > { %2967 = vadd.xlane.f32.xlu1 %v2966_v0 }
0x103b   : > { %v2963_v31 = vsel %vm710_vm0, %v2961_v39, 0.0 }
0x103c   : > { %2964 = vadd.xlane.f32.xlu0 %v2963_v31 }
0x10c3   : > { %v2968_v46 = vpop.xlane.xlu1 %2967 }
0x10c4   : > { %v2970_v47 = vmul.f32 0.03125, %v2968_v46 }
0x10c5   : > { %v2965_v34 = vpop.xlane.xlu0 %2964 }
0x10c6   : > { %v2972_v48 = vadd.f32 1e-05, %v2970_v47  ;;  %v2969_v49 = vmul.f32 0.03125, %v2965_v34 }
0x10c8   : > { %7168 = vrsqrt.f32 %v2972_v48  ;;  %v2971_v50 = vadd.f32 1e-05, %v2969_v49 }
0x10ca   : > { %7170 = vrsqrt.f32 %v2971_v50 }
0x10d5   : > { %v7169_v51 = vpop.eup %7168 }
0x10d6   : > { %v2976_v53 = vmul.f32 %v7169_v51, %v2960_v2 }
0x10d7   : > { %v7171_v54 = vpop.eup %7170 }
0x10d8   : > { %v2975_v55 = vmul.f32 %v7171_v54, %v2959_v37  ;;  %v2984_v56 = vmul.f32 %v6130_v52, %v2976_v53 }
0x10da   : > { %v2983_v30 = vmul.f32 %v6130_v52, %v2975_v55  ;;  %v2992_v42 = vadd.f32 %v6131_v27, %v2984_v56 }
0x10dc   : > { %v2991_v41 = vadd.f32 %v6131_v27, %v2983_v30 }
0x10de   : > { %6820 = vmatprep.mubr.msk.f32.mxu0 %vm710_vm0, %v2991_v41 }
0x10df   : > { %6821 = vmatmul.mubr.msk.f32.vlgmr.msra.gmra.mxu0 %vm710_vm0, %v2992_v42 }
0x119f   : > { %v6822_v12 = vpop.f32.mrf.mxu0 }
0x11a0   : > { %v3082_v13 = vadd.f32 %v6822_v12, %v6132_v11 }
0x11a1   : > { %v3076_v14 = vpop.f32.mrf.mxu0 }
0x11a2   : > { %v3088_v15 = vmul.f32 0.70710677, %v3082_v13  ;;  %v3077_v16 = vadd.f32 %v6132_v11, %v3076_v14  ;;  %v3086_v63 = vmul.f32 0.5, %v3082_v13 }
0x11a4   : > { %v3090_v17 = vand.u32 2147483647, %v3088_v15  ;;  %v3087_v18 = vmul.f32 0.70710677, %v3077_v16  ;;  %vm3130_vm6 = vcmp.lt.f32.partialorder %v3088_v15, 0.0  ;;  %v3085_v61 = vmul.f32 0.5, %v3077_v16 }
0x11a6   : > { %v3092_v19 = vmul.f32 0.3275911, %v3090_v17  ;;  %v3089_v20 = vand.u32 2147483647, %v3087_v18  ;;  %v3118_v25 = vsub.f32 0.0, %v3090_v17  ;;  %vm3129_vm7 = vcmp.lt.f32.partialorder %v3087_v18, 0.0 }
0x11a8   : > { %v3094_v21 = vadd.f32 1.0, %v3092_v19  ;;  %v3091_v22 = vmul.f32 0.3275911, %v3089_v20  ;;  %v3117_v28 = vsub.f32 0.0, %v3089_v20  ;;  %v3120_v29 = vmul.f32 %v3118_v25, %v3090_v17  ;;  %v6140_v25 = vld [vmem:[%s8342_s24 + $0x80] sm:$0xff] }
0x11aa   : > { %7172 = vrcp.f32 %v3094_v21  ;;  %v3093_v23 = vadd.f32 1.0, %v3091_v22  ;;  %v3119_v33 = vmul.f32 %v3117_v28, %v3089_v20  ;;  %v3123_v2 = vmul.f32 1.442695, %v3120_v29  ;;  %v6143_v21 = vld [vmem:[%s8342_s24 + $0x98] sm:$0xff]  ;;  %v6142_v22 = vld [vmem:[%s8342_s24 + $0x90] sm:$0xff] }
0x11ab   : > { %6858 = vmatprep.subr.mxu0 %v6143_v21  ;;  %v6151_v28 = vld [vmem:[%s8343_s0 + $0x98] sm:$0xff] }
0x11ac   : > { %7174 = vrcp.f32 %v3093_v23  ;;  %v3121_v38 = vmul.f32 1.442695, %v3119_v33  ;;  %6859 = vmatpush3.msra.mxu0 %v6143_v21  ;;  %v6141_v23 = vld [vmem:[%s8342_s24 + $0x88] sm:$0xff] }
0x11ad   : > { %7176 = vpow2.f32 %v3123_v2  ;;  %6860 = vmatprep.subr.mxu0 %v6142_v22 }
0x11ae   : > { %7178 = vpow2.f32 %v3121_v38  ;;  %6861 = vmatpush3.msra.mxu0 %v6142_v22  ;;  %v6138_v38 = vld [vmem:[%s8344_s5 + $0x1] ss:$0 sm:$0xff] }
0x11af   : > { %6862 = vmatprep.subr.mxu0 %v6141_v23 }
0x11b0   : > { %6863 = vmatpush3.msra.mxu0 %v6141_v23 }
0x11b1   : > { %6864 = vmatprep.subr.mxu0 %v6140_v25 }
0x11b2   : > { %6865 = vmatpush3.msra.mxu0 %v6140_v25 }
0x11b3   : > { %6869 = vmatprep.subr.mxu0 %v6151_v28 }
0x11b7   : > { %v7173_v32 = vpop.eup %7172 }
0x11b8   : > { %v3100_v35 = vmul.f32 1.0614054, %v7173_v32 }
0x11b9   : > { %v7175_v36 = vpop.eup %7174 }
0x11ba   : > { %v3102_v37 = vadd.f32 -1.4531521, %v3100_v35  ;;  %v3099_v0 = vmul.f32 1.0614054, %v7175_v36  ;;  %v7177_v52 = vpop.eup %7176 }
0x11bb   : > { %v7179_v56 = vpop.eup %7178 }
0x11bc   : > { %v3104_v39 = vmul.f32 %v7173_v32, %v3102_v37  ;;  %v3101_v31 = vadd.f32 -1.4531521, %v3099_v0 }
0x11be   : > { %v3106_v40 = vadd.f32 1.4214138, %v3104_v39  ;;  %v3103_v43 = vmul.f32 %v7175_v36, %v3101_v31 }
0x11c0   : > { %v3108_v44 = vmul.f32 %v7173_v32, %v3106_v40  ;;  %v3105_v45 = vadd.f32 1.4214138, %v3103_v43  ;;  %v6139_v43 = vld [vmem:[%s8345_s26 + $0x1] ss:$0 sm:$0xff] }
0x11c2   : > { %v3110_v46 = vadd.f32 -0.28449672, %v3108_v44  ;;  %v3107_v47 = vmul.f32 %v7175_v36, %v3105_v45 }
0x11c4   : > { %v3112_v34 = vmul.f32 %v7173_v32, %v3110_v46  ;;  %v3109_v48 = vadd.f32 -0.28449672, %v3107_v47  ;;  %v6150_v47 = vld [vmem:[%s8343_s0 + $0x90] sm:$0xff] }
0x11c6   : > { %v3114_v49 = vadd.f32 0.2548296, %v3112_v34  ;;  %v3111_v50 = vmul.f32 %v7175_v36, %v3109_v48  ;;  %v6149_v34 = vld [vmem:[%s8343_s0 + $0x88] sm:$0xff]  ;;  %v6148_v48 = vld [vmem:[%s8343_s0 + $0x80] sm:$0xff] }
0x11c8   : > { %v3116_v51 = vmul.f32 %v7173_v32, %v3114_v49  ;;  %v3113_v53 = vadd.f32 0.2548296, %v3111_v50  ;;  %v6159_v49 = vld [vmem:[%s8312_s8 + $0x98] sm:$0xff]  ;;  %v6158_v50 = vld [vmem:[%s8312_s8 + $0x90] sm:$0xff] }
0x11ca   : > { %v3126_v54 = vmul.f32 %v7177_v52, %v3116_v51  ;;  %v3115_v55 = vmul.f32 %v7175_v36, %v3113_v53  ;;  %v6157_v51 = vld [vmem:[%s8312_s8 + $0x88] sm:$0xff]  ;;  %v6156_v52 = vld [vmem:[%s8312_s8 + $0x80] sm:$0xff] }
0x11cc   : > { %v3128_v27 = vsub.f32 1.0, %v3126_v54  ;;  %v3125_v30 = vmul.f32 %v7179_v56, %v3115_v55  ;;  %v6145_v54 = vld [vmem:[%s8346_s6 + $0x4] ss:$0 sm:$0xff] }
0x11ce   : > { %v3132_v41 = vsub.f32 0.0, %v3128_v27  ;;  %v3127_v42 = vsub.f32 1.0, %v3125_v30 }
0x11d0   : > { %v3134_v57 = vsel %vm3130_vm6, %v3132_v41, %v3128_v27  ;;  %v3131_v58 = vsub.f32 0.0, %v3127_v42  ;;  %v6153_v27 = vld [vmem:[%s8311_s7 + $0x4] ss:$0 sm:$0xff] }
0x11d1   : > { %v3136_v59 = vadd.f32 1.0, %v3134_v57 }
0x11d2   : > { %v3133_v60 = vsel %vm3129_vm7, %v3131_v58, %v3127_v42  ;;  %v6161_v58 = vld [vmem:[%s8313_s9 + $0x4] ss:$0 sm:$0xff] }
0x11d3   : > { %v3135_v62 = vadd.f32 1.0, %v3133_v60  ;;  %v3138_v4 = vmul.f32 %v3136_v59, %v3086_v63  ;;  %v6183_v59 = vld [vmem:[%s8343_s0 + $0xb8] sm:$0xff] }
0x11d5   : > { %v3137_v1 = vmul.f32 %v3135_v62, %v3085_v61 }
0x11d7   : > { %6855 = vmatprep.mubr.f32.mxu1 %v3137_v1 }
0x11d8   : > { %6856 = vmatmul.mubr.f32.vlgmr.msra.gmra.mxu1 %v3138_v4  ;;  %v6182_v4 = vld [vmem:[%s8343_s0 + $0xb0] sm:$0xff] }
0x1298   : > { %v6857_v7 = vpop.f32.mrf.mxu1 }
0x1299   : > { %v3234_v8 = vadd.f32 %v6857_v7, %v6135_v5  ;;  %v6180_v7 = vld [vmem:[%s8343_s0 + $0xa0] sm:$0xff] }
0x129a   : > { %v3228_v3 = vpop.f32.mrf.mxu1 }
0x129b   : > { %v7822_v9 = vadd.f32 %v3234_v8, %v7734_v24  ;;  %v3229_v6 = vadd.f32 %v6135_v5, %v3228_v3  ;;  %v6181_v5 = vld [vmem:[%s8343_s0 + $0xa8] sm:$0xff] }
0x129d   : > { %v7825_v10 = vadd.f32 %v3229_v6, %v7737_v26  ;;  %v3246_v11 = vsel %vm714_vm1, %v7822_v9, 0.0 }
0x129e   : > { %3247 = vadd.xlane.f32.xlu1 %v3246_v11 }
0x129f   : > { %v3243_v12 = vsel %vm710_vm0, %v7825_v10, 0.0 }
0x12a0   : > { %3244 = vadd.xlane.f32.xlu0 %v3243_v12  ;;  %v7927_v12 = vld [vmem:[%s7495_s1 + $0x8] sm:$0x3] }
0x1327   : > { %v3248_v13 = vpop.xlane.xlu1 %3247 }
0x1328   : > { %v3250_v14 = vmul.f32 0.03125, %v3248_v13 }
0x1329   : > { %v3245_v15 = vpop.xlane.xlu0 %3244 }
0x132a   : > { %v3252_v16 = vsub.f32 %v7822_v9, %v3250_v14  ;;  %v3249_v17 = vmul.f32 0.03125, %v3245_v15  ;;  %v7932_v15 = vld [vmem:[%s7495_s1] sm:$0xff] }
0x132c   : > { %v3251_v24 = vsub.f32 %v7825_v10, %v3249_v17  ;;  %v3254_v18 = vmul.f32 %v3252_v16, %v3252_v16  ;;  %v6185_v17 = vld [vmem:[%s8311_s7 + $0x5] ss:$0 sm:$0xff] }
0x132e   : > { %v3258_v26 = vsel %vm714_vm1, %v3254_v18, 0.0  ;;  %v3253_v19 = vmul.f32 %v3251_v24, %v3251_v24 }
0x132f   : > { %3259 = vadd.xlane.f32.xlu1 %v3258_v26 }
0x1330   : > { %v3255_v20 = vsel %vm710_vm0, %v3253_v19, 0.0 }
0x1331   : > { %3256 = vadd.xlane.f32.xlu0 %v3255_v20 }
0x13b8   : > { %v3260_v29 = vpop.xlane.xlu1 %3259 }
0x13b9   : > { %v3262_v32 = vmul.f32 0.03125, %v3260_v29 }
0x13ba   : > { %v3257_v33 = vpop.xlane.xlu0 %3256 }
0x13bb   : > { %v3264_v35 = vadd.f32 1e-05, %v3262_v32  ;;  %v3261_v2 = vmul.f32 0.03125, %v3257_v33 }
0x13bd   : > { %7180 = vrsqrt.f32 %v3264_v35  ;;  %v3263_v36 = vadd.f32 1e-05, %v3261_v2 }
0x13bf   : > { %7182 = vrsqrt.f32 %v3263_v36  ;;  %v6175_v36 = vld [vmem:[%s8342_s24 + $0xb8] sm:$0xff] }
0x13ca   : > { %v7181_v37 = vpop.eup %7180 }
0x13cb   : > { %v3268_v0 = vmul.f32 %v7181_v37, %v3252_v16 }
0x13cc   : > { %v7183_v39 = vpop.eup %7182 }
0x13cd   : > { %v3267_v31 = vmul.f32 %v7183_v39, %v3251_v24  ;;  %v3276_v40 = vmul.f32 %v6138_v38, %v3268_v0 }
0x13cf   : > { %v3275_v44 = vmul.f32 %v6138_v38, %v3267_v31  ;;  %v7858_v46 = vadd.f32 %v6139_v43, %v3276_v40 }
0x13d1   : > { %v7856_v45 = vadd.f32 %v6139_v43, %v3275_v44  ;;  %v6174_v43 = vld [vmem:[%s8342_s24 + $0xb0] sm:$0xff]  ;;  %v6173_v44 = vld [vmem:[%s8342_s24 + $0xa8] sm:$0xff] }
0x13d3   : > { %6866 = vmatprep.mubr.msk.f32.mxu0 %vm710_vm0, %v7856_v45 }
0x13d4   : > { %6867 = vmatmul.mubr.msk.f32.vlgmr.msra.gmra.mxu0 %vm710_vm0, %v7858_v46 }
0x13d5   : > { %6870 = vmatpush3.msra.mxu0 %v6151_v28  ;;  %6877 = vmatprep.mubr.msk.f32.mxu0 %vm710_vm0, %v7856_v45 }
0x13d6   : > { %6871 = vmatprep.subr.mxu0 %v6150_v47 }
0x13d7   : > { %6872 = vmatpush3.msra.mxu0 %v6150_v47  ;;  %v6172_v47 = vld [vmem:[%s8342_s24 + $0xa0] sm:$0xff] }
0x13d8   : > { %6873 = vmatprep.subr.mxu0 %v6149_v34 }
0x13d9   : > { %6874 = vmatpush3.msra.mxu0 %v6149_v34  ;;  %v6191_v34 = vld [vmem:[%s8312_s8 + $0xb8] sm:$0xff] }
0x13da   : > { %6875 = vmatprep.subr.mxu0 %v6148_v48 }
0x13db   : > { %6876 = vmatpush3.msra.mxu0 %v6148_v48  ;;  %v6190_v48 = vld [vmem:[%s8312_s8 + $0xb0] sm:$0xff] }
0x13dc   : > { %6878 = vmatmul.mubr.msk.f32.vlgmr.msra.gmra.mxu0 %vm710_vm0, %v7858_v46  ;;  %6880 = vmatprep.subr.mxu0 %v6159_v49 }
0x13dd   : > { %6881 = vmatpush3.msra.mxu0 %v6159_v49  ;;  %6888 = vmatprep.mubr.msk.f32.mxu0 %vm710_vm0, %v7856_v45  ;;  %v6189_v49 = vld [vmem:[%s8312_s8 + $0xa8] sm:$0xff] }
0x13de   : > { %6882 = vmatprep.subr.mxu0 %v6158_v50 }
0x13df   : > { %6883 = vmatpush3.msra.mxu0 %v6158_v50  ;;  %v6188_v50 = vld [vmem:[%s8312_s8 + $0xa0] sm:$0xff] }
0x13e0   : > { %6884 = vmatprep.subr.mxu0 %v6157_v51 }
0x13e1   : > { %6885 = vmatpush3.msra.mxu0 %v6157_v51 }
0x13e2   : > { %6886 = vmatprep.subr.mxu0 %v6156_v52 }
0x13e3   : > { %6887 = vmatpush3.msra.mxu0 %v6156_v52 }
0x13e4   : > { %6889 = vmatmul.mubr.msk.f32.vlgmr.msra.gmra.mxu0 %vm710_vm0, %v7858_v46 }
0x1494   : > { %v6868_v53 = vpop.f32.mrf.mxu0 }
0x1495   : > { %v3376_v61 = vadd.f32 %v6868_v53, %v6145_v54 }
0x1496   : > { %v3370_v55 = vpop.f32.mrf.mxu0 }
0x1497   : > { %v3371_v56 = vadd.f32 %v6145_v54, %v3370_v55  ;;  %v6177_v54 = vld [vmem:[%s8346_s6 + $0x5] ss:$0 sm:$0xff] }
0x1499   : > { %6895 = vmatprep.mubr.msk.f32.mxu0 %vm1019_vm2, %v3371_v56 }
0x149c   : > { %v6879_v30 = vpop.f32.mrf.mxu0 }
0x149d   : > { %v3464_v41 = vadd.f32 %v6879_v30, %v6153_v27  ;;  %v6193_v30 = vld [vmem:[%s8313_s9 + $0x5] ss:$0 sm:$0xff] }
0x149e   : > { %v3458_v42 = vpop.f32.mrf.mxu0 }
0x149f   : > { %v3459_v57 = vadd.f32 %v6153_v27, %v3458_v42  ;;  %6891 = vmatprep.subr.msk.mxu0 %vm1019_vm2, %v3464_v41 }
0x14a0   : > { %6892 = vmatpush3.xpose.msk.msra.mxu0 %vm1019_vm2, %v3464_v41 }
0x14a1   : > { %6893 = vmatprep.subr.msk.mxu0 %vm1019_vm2, %v3459_v57 }
0x14a4   : > { %v6890_v60 = vpop.f32.mrf.mxu0  ;;  %6894 = vmatpush3.xpose.msk.msra.mxu0 %vm1019_vm2, %v3459_v57 }
0x14a5   : > { %v3552_v62 = vadd.f32 %v6890_v60, %v6161_v58  ;;  %6916 = vmatprep.subr.mxu0 %v6183_v59 }
0x14a6   : > { %v3546_v63 = vpop.f32.mrf.mxu0 }
0x14a7   : > { %v3547_v1 = vadd.f32 %v6161_v58, %v3546_v63  ;;  %6896 = vmatmul.mubr.msk.f32.vlgmr.msra.gmra.mxu0 %vm1019_vm2, %v3376_v61  ;;  %6898 = vmatprep.subr.msk.mxu1 %vm1141_vm3, %v3552_v62 }
0x14a8   : > { %6899 = vmatpush3.msk.msra.mxu1 %vm1141_vm3, %v3552_v62  ;;  %6917 = vmatpush3.msra.mxu0 %v6183_v59 }
0x14a9   : > { %6924 = vmatprep.mubr.msk.f32.mxu0 %vm710_vm0, %v7856_v45  ;;  %6900 = vmatprep.subr.mxu1 %v3547_v1 }
0x14aa   : > { %6918 = vmatprep.subr.mxu0 %v6182_v4  ;;  %6901 = vmatpush3.msra.mxu1 %v3547_v1 }
0x14ab   : > { %6919 = vmatpush3.msra.mxu0 %v6182_v4  ;;  %6905 = vmatprep.subr.mxu1 %v6175_v36 }
0x14ac   : > { %6920 = vmatprep.subr.mxu0 %v6181_v5 }
0x14ad   : > { %6921 = vmatpush3.msra.mxu0 %v6181_v5 }
0x14ae   : > { %6922 = vmatprep.subr.mxu0 %v6180_v7 }
0x14af   : > { %6923 = vmatpush3.msra.mxu0 %v6180_v7 }
0x14b0   : > { %6925 = vmatmul.mubr.msk.f32.vlgmr.msra.gmra.mxu0 %vm710_vm0, %v7858_v46 }
0x1567   : > { %v6897_v8 = vpop.f32.mrf.mxu0 }
0x1568   : > { %v3643_v3 = vmul.f32 0.35355338, %v6897_v8 }
0x1569   : > { %v3633_v6 = vpop.f32.mrf.mxu0 }
0x156a   : > { %v3642_v11 = vmul.f32 0.35355338, %v3633_v6  ;;  %v3645_v13 = vadd.f32 %v7927_v12, %v3643_v3 }
0x156c   : > { %v3649_v14 = vsel %vm1115_vm4, %v3645_v13, -inf  ;;  %v3644_v16 = vadd.f32 %v7932_v15, %v3642_v11 }
0x156d   : > { %3650 = vmax.xlane.f32.xlu1 %v3649_v14 }
0x156e   : > { %v3646_v24 = vsel %vm1111_vm5, %v3644_v16, -inf }
0x156f   : > { %3647 = vmax.xlane.f32.xlu0 %v3646_v24 }
0x1570   : > { %v6926_v18 = vpop.f32.mrf.mxu0 }
0x1571   : > { %v3927_v26 = vadd.f32 %v6926_v18, %v6185_v17  ;;  %v6171_v18 = vld [vmem:[%s8314_s10 + $0x20] sm:$0xff] }
0x1572   : > { %v3921_v19 = vpop.f32.mrf.mxu0 }
0x1573   : > { %v3922_v20 = vadd.f32 %v6185_v17, %v3921_v19  ;;  %6938 = vmatprep.subr.msk.mxu0 %vm1019_vm2, %v3927_v26 }
0x1574   : > { %6939 = vmatpush3.xpose.msk.msra.mxu0 %vm1019_vm2, %v3927_v26  ;;  %v6203_v26 = vld [vmem:[%s8314_s10 + $0x28] sm:$0xff] }
0x1575   : > { %6940 = vmatprep.subr.msk.mxu0 %vm1019_vm2, %v3922_v20 }
0x1578   : > { %6941 = vmatpush3.xpose.msk.msra.mxu0 %vm1019_vm2, %v3922_v20 }
0x1579   : > { %6952 = vmatprep.subr.mxu0 %v6203_v26 }
0x15f6   : > { %v3651_v21 = vpop.xlane.xlu1 %3650 }
0x15f7   : > { %v3653_v22 = vsub.f32 %v3645_v13, %v3651_v21 }
0x15f8   : > { %v3648_v23 = vpop.xlane.xlu0 %3647 }
0x15f9   : > { %v3656_v25 = vmul.f32 1.442695, %v3653_v22  ;;  %v3652_v28 = vsub.f32 %v3644_v16, %v3648_v23 }
0x15fb   : > { %7184 = vpow2.f32 %v3656_v25  ;;  %v3654_v29 = vmul.f32 1.442695, %v3652_v28  ;;  %v6219_v28 = vld [vmem:[%s8343_s0 + $0xd8] sm:$0xff] }
0x15fd   : > { %7186 = vpow2.f32 %v3654_v29  ;;  %v6218_v29 = vld [vmem:[%s8343_s0 + $0xd0] sm:$0xff] }
0x1608   : > { %v7185_v32 = vpop.eup %7184 }
0x1609   : > { %v3661_v33 = vsel %vm1115_vm4, %v7185_v32, 0.0 }
0x160a   : > { %v7187_v35 = vpop.eup %7186  ;;  %3662 = vadd.xlane.f32.xlu1 %v3661_v33  ;;  %v6216_v33 = vld [vmem:[%s8343_s0 + $0xc0] sm:$0xff] }
0x160b   : > { %v3658_v2 = vsel %vm1111_vm5, %v7187_v35, 0.0 }
0x160c   : > { %3659 = vadd.xlane.f32.xlu0 %v3658_v2 }
0x1693   : > { %v3663_v37 = vpop.xlane.xlu1 %3662 }
0x1694   : > { %7188 = vrcp.f32 %v3663_v37  ;;  %v6210_v37 = vld [vmem:[%s8342_s24 + $0xd0] sm:$0xff] }
0x1695   : > { %v3660_v38 = vpop.xlane.xlu0 %3659 }
0x1696   : > { %7190 = vrcp.f32 %v3660_v38  ;;  %v6209_v38 = vld [vmem:[%s8342_s24 + $0xc8] sm:$0xff] }
0x16a1   : > { %v7189_v0 = vpop.eup %7188 }
0x16a2   : > { %v3667_v40 = vmul.f32 %v7189_v0, %v7185_v32  ;;  %v6217_v32 = vld [vmem:[%s8343_s0 + $0xc8] sm:$0xff] }
0x16a3   : > { %v7191_v39 = vpop.eup %7190 }
0x16a4   : > { %v3666_v31 = vmul.f32 %v7191_v39, %v7187_v35  ;;  %v6211_v35 = vld [vmem:[%s8342_s24 + $0xd8] sm:$0xff]  ;;  %v6208_v39 = vld [vmem:[%s8342_s24 + $0xc0] sm:$0xff] }
0x16a6   : > { %6902 = vmatprep.mubr.msk.f32.mxu1 %vm1111_vm5, %v3666_v31  ;;  %v6227_v31 = vld [vmem:[%s8312_s8 + $0xd8] sm:$0xff] }
0x16a7   : > { %6903 = vmatmul.mubr.msk.f32.vlgmr.msra.gmra.mxu1 %vm1111_vm5, %v3667_v40 }
0x16a8   : > { %6906 = vmatpush3.msra.mxu1 %v6175_v36  ;;  %6913 = vmatprep.mubr.msk.f32.mxu1 %vm710_vm0, %v7856_v45 }
0x16a9   : > { %6907 = vmatprep.subr.mxu1 %v6174_v43 }
0x16aa   : > { %6908 = vmatpush3.msra.mxu1 %v6174_v43  ;;  %v6221_v43 = vld [vmem:[%s8311_s7 + $0x6] ss:$0 sm:$0xff] }
0x16ab   : > { %6909 = vmatprep.subr.mxu1 %v6173_v44 }
0x16ac   : > { %6910 = vmatpush3.msra.mxu1 %v6173_v44  ;;  %v6226_v44 = vld [vmem:[%s8312_s8 + $0xd0] sm:$0xff] }
0x16ad   : > { %6911 = vmatprep.subr.mxu1 %v6172_v47 }
0x16ae   : > { %6912 = vmatpush3.msra.mxu1 %v6172_v47 }
0x16af   : > { %6914 = vmatmul.mubr.msk.f32.vlgmr.msra.gmra.mxu1 %vm710_vm0, %v7858_v46  ;;  %6927 = vmatprep.subr.mxu1 %v6191_v34 }
0x16b0   : > { %6928 = vmatpush3.msra.mxu1 %v6191_v34  ;;  %6935 = vmatprep.mubr.msk.f32.mxu1 %vm710_vm0, %v7856_v45 }
0x16b1   : > { %6929 = vmatprep.subr.mxu1 %v6190_v48 }
0x16b2   : > { %6930 = vmatpush3.msra.mxu1 %v6190_v48  ;;  %v6225_v48 = vld [vmem:[%s8312_s8 + $0xc8] sm:$0xff] }
0x16b3   : > { %6931 = vmatprep.subr.mxu1 %v6189_v49 }
0x16b4   : > { %6932 = vmatpush3.msra.mxu1 %v6189_v49 }
0x16b5   : > { %6933 = vmatprep.subr.mxu1 %v6188_v50 }
0x16b6   : > { %6934 = vmatpush3.msra.mxu1 %v6188_v50 }
0x16b7   : > { %6936 = vmatmul.mubr.msk.f32.vlgmr.msra.gmra.mxu1 %vm710_vm0, %v7858_v46 }
0x1767   : > { %v6904_v51 = vpop.f32.mrf.mxu1 }
0x1769   : > { %v3743_v52 = vpop.f32.mrf.mxu1 }
0x176f   : > { %v6915_v53 = vpop.f32.mrf.mxu1 }
0x1770   : > { %v3839_v27 = vadd.f32 %v6915_v53, %v6177_v54 }
0x1771   : > { %v3833_v55 = vpop.f32.mrf.mxu1 }
0x1772   : > { %v3834_v56 = vadd.f32 %v6177_v54, %v3833_v55  ;;  %v6213_v55 = vld [vmem:[%s8346_s6 + $0x6] ss:$0 sm:$0xff] }
0x1774   : > { %6942 = vmatprep.mubr.msk.f32.mxu0 %vm1019_vm2, %v3834_v56 }
0x1775   : > { %6943 = vmatmul.mubr.msk.f32.vlgmr.msra.gmra.mxu0 %vm1019_vm2, %v3839_v27 }
0x1776   : > { %6953 = vmatpush3.msra.mxu0 %v6203_v26  ;;  %v6245_v26 = vld [vmem:[%s8342_s24 + $0xf8] sm:$0xff] }
0x1777   : > { %v6937_v41 = vpop.f32.mrf.mxu1  ;;  %6962 = vmatprep.subr.mxu0 %v6211_v35 }
0x1778   : > { %v4015_v42 = vadd.f32 %v6937_v41, %v6193_v30  ;;  %v6229_v41 = vld [vmem:[%s8313_s9 + $0x6] ss:$0 sm:$0xff] }
0x1779   : > { %v4009_v57 = vpop.f32.mrf.mxu1 }
0x177a   : > { %v4010_v58 = vadd.f32 %v6193_v30, %v4009_v57  ;;  %6945 = vmatprep.subr.msk.mxu1 %vm1141_vm3, %v4015_v42 }
0x177b   : > { %6946 = vmatpush3.msk.msra.mxu1 %vm1141_vm3, %v4015_v42 }
0x177c   : > { %6947 = vmatprep.subr.mxu1 %v4010_v58 }
0x177d   : > { %6948 = vmatpush3.msra.mxu1 %v4010_v58 }
0x177e   : > { %6957 = vmatprep.subr.mxu1 %v6171_v18 }
0x1835   : > { %v6944_v59 = vpop.f32.mrf.mxu0 }
0x1836   : > { %v4106_v60 = vmul.f32 0.35355338, %v6944_v59 }
0x1837   : > { %v4096_v61 = vpop.f32.mrf.mxu0 }
0x1838   : > { %v4105_v62 = vmul.f32 0.35355338, %v4096_v61  ;;  %v4108_v63 = vadd.f32 %v7927_v12, %v4106_v60 }
0x183a   : > { %v4112_v1 = vsel %vm1115_vm4, %v4108_v63, -inf  ;;  %v4107_v4 = vadd.f32 %v7932_v15, %v4105_v62 }
0x183b   : > { %4113 = vmax.xlane.f32.xlu1 %v4112_v1 }
0x183c   : > { %v4109_v5 = vsel %vm1111_vm5, %v4107_v4, -inf }
0x183d   : > { %4110 = vmax.xlane.f32.xlu0 %v4109_v5 }
0x18c4   : > { %v4114_v7 = vpop.xlane.xlu1 %4113 }
0x18c5   : > { %v4116_v8 = vsub.f32 %v4108_v63, %v4114_v7 }
0x18c6   : > { %v4111_v3 = vpop.xlane.xlu0 %4110 }
0x18c7   : > { %v4119_v6 = vmul.f32 1.442695, %v4116_v8  ;;  %v4115_v11 = vsub.f32 %v4107_v4, %v4111_v3 }
0x18c9   : > { %7192 = vpow2.f32 %v4119_v6  ;;  %v4117_v13 = vmul.f32 1.442695, %v4115_v11 }
0x18cb   : > { %7194 = vpow2.f32 %v4117_v13 }
0x18d6   : > { %v7193_v14 = vpop.eup %7192 }
0x18d7   : > { %v4124_v16 = vsel %vm1115_vm4, %v7193_v14, 0.0 }
0x18d8   : > { %v7195_v17 = vpop.eup %7194  ;;  %4125 = vadd.xlane.f32.xlu1 %v4124_v16 }
0x18d9   : > { %v4121_v24 = vsel %vm1111_vm5, %v7195_v17, 0.0 }
0x18da   : > { %4122 = vadd.xlane.f32.xlu0 %v4121_v24 }
0x1961   : > { %v4126_v19 = vpop.xlane.xlu1 %4125 }
0x1962   : > { %7196 = vrcp.f32 %v4126_v19  ;;  %v6239_v19 = vld [vmem:[%s8314_s10 + $0x30] sm:$0xff] }
0x1963   : > { %v4123_v20 = vpop.xlane.xlu0 %4122 }
0x1964   : > { %7198 = vrcp.f32 %v4123_v20 }
0x196f   : > { %v7197_v21 = vpop.eup %7196 }
0x1970   : > { %v4130_v25 = vmul.f32 %v7197_v21, %v7193_v14 }
0x1971   : > { %v7199_v22 = vpop.eup %7198 }
0x1972   : > { %v4129_v23 = vmul.f32 %v7199_v22, %v7195_v17 }
0x1974   : > { %6949 = vmatprep.mubr.msk.f32.mxu1 %vm1111_vm5, %v4129_v23 }
0x1975   : > { %6950 = vmatmul.mubr.msk.f32.vlgmr.msra.gmra.mxu1 %vm1111_vm5, %v4130_v25 }
0x1976   : > { %6959 = vmatprep.mubr.msk.f32.mxu1 %vm1019_vm2, %v3743_v52  ;;  %6958 = vmatpush3.msra.mxu1 %v6171_v18 }
0x1977   : > { %6973 = vmatprep.subr.mxu1 %v6219_v28 }
0x1979   : > { %6960 = vmatmul.mubr.msk.f32.vlgmr.msra.gmra.mxu1 %vm1019_vm2, %v6904_v51  ;;  %v6224_v51 = vld [vmem:[%s8312_s8 + $0xc0] sm:$0xff] }
0x197a   : > { %6974 = vmatpush3.msra.mxu1 %v6219_v28  ;;  %6981 = vmatprep.mubr.msk.f32.mxu1 %vm710_vm0, %v7856_v45 }
0x197b   : > { %6975 = vmatprep.subr.mxu1 %v6218_v29 }
0x197c   : > { %6976 = vmatpush3.msra.mxu1 %v6218_v29  ;;  %v6244_v29 = vld [vmem:[%s8342_s24 + $0xf0] sm:$0xff] }
0x197d   : > { %6977 = vmatprep.subr.mxu1 %v6217_v32 }
0x197e   : > { %6978 = vmatpush3.msra.mxu1 %v6217_v32  ;;  %v6243_v32 = vld [vmem:[%s8342_s24 + $0xe8] sm:$0xff] }
0x197f   : > { %6979 = vmatprep.subr.mxu1 %v6216_v33 }
0x1980   : > { %6980 = vmatpush3.msra.mxu1 %v6216_v33  ;;  %v6242_v33 = vld [vmem:[%s8342_s24 + $0xe0] sm:$0xff] }
0x1981   : > { %6982 = vmatmul.mubr.msk.f32.vlgmr.msra.gmra.mxu1 %vm710_vm0, %v7858_v46 }
0x1a35   : > { %v6951_v2 = vpop.f32.mrf.mxu1 }
0x1a37   : > { %v4206_v36 = vpop.f32.mrf.mxu1 }
0x1a38   : > { %6954 = vmatprep.mubr.msk.f32.mxu0 %vm1019_vm2, %v4206_v36  ;;  %v6259_v36 = vld [vmem:[%s8312_s8 + $0xe8] sm:$0xff] }
0x1a39   : > { %6955 = vmatmul.mubr.msk.f32.vlgmr.msra.gmra.mxu0 %vm1019_vm2, %v6951_v2  ;;  %v8034_v0 = vpop.f32.mrf.mxu1  ;;  %v6260_v2 = vld [vmem:[%s8312_s8 + $0xf0] sm:$0xff] }
0x1a3a   : > { %6963 = vmatpush3.msra.mxu0 %v6211_v35  ;;  %6970 = vmatprep.mubr.msk.f32.mxu0 %vm710_vm0, %v7856_v45  ;;  %v6261_v35 = vld [vmem:[%s8312_s8 + $0xf8] sm:$0xff] }
0x1a3b   : > { %6964 = vmatprep.subr.mxu0 %v6210_v37  ;;  %v8042_v40 = vpop.f32.mrf.mxu1 }
0x1a3c   : > { %6965 = vmatpush3.msra.mxu0 %v6210_v37  ;;  %v6258_v37 = vld [vmem:[%s8312_s8 + $0xe0] sm:$0xff] }
0x1a3d   : > { %6966 = vmatprep.subr.mxu0 %v6209_v38 }
0x1a3e   : > { %6967 = vmatpush3.msra.mxu0 %v6209_v38  ;;  %v6253_v38 = vld [vmem:[%s8343_s0 + $0xf8] sm:$0xff] }
0x1a3f   : > { %6968 = vmatprep.subr.mxu0 %v6208_v39 }
0x1a40   : > { %6969 = vmatpush3.msra.mxu0 %v6208_v39 }
0x1a41   : > { %6971 = vmatmul.mubr.msk.f32.vlgmr.msra.gmra.mxu0 %vm710_vm0, %v7858_v46  ;;  %v6983_v47 = vpop.f32.mrf.mxu1  ;;  %6984 = vmatprep.subr.mxu0 %v6227_v31 }
0x1a42   : > { %v4552_v34 = vadd.f32 %v6983_v47, %v6221_v43  ;;  %6985 = vmatpush3.msra.mxu0 %v6227_v31  ;;  %6992 = vmatprep.mubr.msk.f32.mxu0 %vm710_vm0, %v7856_v45  ;;  %v6247_v47 = vld [vmem:[%s8346_s6 + $0x7] ss:$0 sm:$0xff] }
0x1a43   : > { %v4546_v49 = vpop.f32.mrf.mxu1  ;;  %6986 = vmatprep.subr.mxu0 %v6226_v44 }
0x1a44   : > { %v4547_v50 = vadd.f32 %v6221_v43, %v4546_v49  ;;  %6987 = vmatpush3.msra.mxu0 %v6226_v44  ;;  %6995 = vmatprep.subr.msk.mxu1 %vm1019_vm2, %v4552_v34  ;;  %v6252_v43 = vld [vmem:[%s8343_s0 + $0xf0] sm:$0xff]  ;;  %v6251_v44 = vld [vmem:[%s8343_s0 + $0xe8] sm:$0xff] }
0x1a45   : > { %6988 = vmatprep.subr.mxu0 %v6225_v48  ;;  %6996 = vmatpush3.xpose.msk.msra.mxu1 %vm1019_vm2, %v4552_v34  ;;  %v6250_v34 = vld [vmem:[%s8343_s0 + $0xe0] sm:$0xff] }
0x1a46   : > { %6989 = vmatpush3.msra.mxu0 %v6225_v48  ;;  %6997 = vmatprep.subr.msk.mxu1 %vm1019_vm2, %v4547_v50 }
0x1a47   : > { %6990 = vmatprep.subr.mxu0 %v6224_v51 }
0x1a48   : > { %6991 = vmatpush3.msra.mxu0 %v6224_v51  ;;  %v6263_v51 = vld [vmem:[%s8313_s9 + $0x7] ss:$0 sm:$0xff] }
0x1a49   : > { %6993 = vmatmul.mubr.msk.f32.vlgmr.msra.gmra.mxu0 %vm710_vm0, %v7858_v46  ;;  %6998 = vmatpush3.xpose.msk.msra.mxu1 %vm1019_vm2, %v4547_v50 }
0x1a4a   : > { %7009 = vmatprep.subr.mxu1 %v6239_v19 }
0x1af9   : > { %v8066_v52 = vpop.f32.mrf.mxu0 }
0x1afb   : > { %v8068_v53 = vpop.f32.mrf.mxu0 }
0x1b01   : > { %v6972_v54 = vpop.f32.mrf.mxu0 }
0x1b02   : > { %v4464_v30 = vadd.f32 %v6972_v54, %v6213_v55 }
0x1b03   : > { %v4458_v56 = vpop.f32.mrf.mxu0 }
0x1b04   : > { %v4459_v27 = vadd.f32 %v6213_v55, %v4458_v56 }
0x1b06   : > { %6999 = vmatprep.mubr.msk.f32.mxu1 %vm1019_vm2, %v4459_v27 }
0x1b07   : > { %7000 = vmatmul.mubr.msk.f32.vlgmr.msra.gmra.mxu1 %vm1019_vm2, %v4464_v30  ;;  %v4376_v30 = vadd.f32 %v8034_v0, %v8066_v52 }
0x1b08   : > { %7010 = vmatpush3.msra.mxu1 %v6239_v19 }
0x1b09   : > { %v6994_v42 = vpop.f32.mrf.mxu0  ;;  %7025 = vmatprep.subr.mxu1 %v6253_v38 }
0x1b0a   : > { %v4640_v57 = vadd.f32 %v6994_v42, %v6229_v41 }
0x1b0b   : > { %v4634_v58 = vpop.f32.mrf.mxu0 }
0x1b0c   : > { %v4635_v59 = vadd.f32 %v6229_v41, %v4634_v58  ;;  %7002 = vmatprep.subr.msk.mxu0 %vm1141_vm3, %v4640_v57  ;;  %v4371_v41 = vadd.f32 %v8042_v40, %v8068_v53 }
0x1b0d   : > { %7003 = vmatpush3.msk.msra.mxu0 %vm1141_vm3, %v4640_v57 }
0x1b0e   : > { %7004 = vmatprep.subr.mxu0 %v4635_v59 }
0x1b0f   : > { %7005 = vmatpush3.msra.mxu0 %v4635_v59  ;;  %v6255_v59 = vld [vmem:[%s8311_s7 + $0x7] ss:$0 sm:$0xff] }
0x1b10   : > { %7014 = vmatprep.subr.mxu0 %v6245_v26 }
0x1bc7   : > { %v7001_v60 = vpop.f32.mrf.mxu1 }
0x1bc8   : > { %v4731_v61 = vmul.f32 0.35355338, %v7001_v60 }
0x1bc9   : > { %v4721_v62 = vpop.f32.mrf.mxu1 }
0x1bca   : > { %v4730_v63 = vmul.f32 0.35355338, %v4721_v62  ;;  %v4733_v1 = vadd.f32 %v7927_v12, %v4731_v61 }
0x1bcc   : > { %v4737_v4 = vsel %vm1115_vm4, %v4733_v1, -inf  ;;  %v4732_v5 = vadd.f32 %v7932_v15, %v4730_v63 }
0x1bcd   : > { %4738 = vmax.xlane.f32.xlu1 %v4737_v4 }
0x1bce   : > { %v4734_v7 = vsel %vm1111_vm5, %v4732_v5, -inf }
0x1bcf   : > { %4735 = vmax.xlane.f32.xlu0 %v4734_v7 }
0x1c56   : > { %v4739_v8 = vpop.xlane.xlu1 %4738 }
0x1c57   : > { %v4741_v3 = vsub.f32 %v4733_v1, %v4739_v8 }
0x1c58   : > { %v4736_v6 = vpop.xlane.xlu0 %4735 }
0x1c59   : > { %v4744_v11 = vmul.f32 1.442695, %v4741_v3  ;;  %v4740_v13 = vsub.f32 %v4732_v5, %v4736_v6 }
0x1c5b   : > { %7200 = vpow2.f32 %v4744_v11  ;;  %v4742_v14 = vmul.f32 1.442695, %v4740_v13 }
0x1c5d   : > { %7202 = vpow2.f32 %v4742_v14 }
0x1c68   : > { %v7201_v16 = vpop.eup %7200 }
0x1c69   : > { %v4749_v17 = vsel %vm1115_vm4, %v7201_v16, 0.0 }
0x1c6a   : > { %v7203_v24 = vpop.eup %7202  ;;  %4750 = vadd.xlane.f32.xlu1 %v4749_v17 }
0x1c6b   : > { %v4746_v18 = vsel %vm1111_vm5, %v7203_v24, 0.0 }
0x1c6c   : > { %4747 = vadd.xlane.f32.xlu0 %v4746_v18 }
0x1cf3   : > { %v4751_v20 = vpop.xlane.xlu1 %4750 }
0x1cf4   : > { %7204 = vrcp.f32 %v4751_v20 }
0x1cf5   : > { %v4748_v21 = vpop.xlane.xlu0 %4747 }
0x1cf6   : > { %7206 = vrcp.f32 %v4748_v21 }
0x1d01   : > { %v7205_v22 = vpop.eup %7204 }
0x1d02   : > { %v4755_v28 = vmul.f32 %v7205_v22, %v7201_v16 }
0x1d03   : > { %v7207_v23 = vpop.eup %7206 }
0x1d04   : > { %v4754_v25 = vmul.f32 %v7207_v23, %v7203_v24 }
0x1d06   : > { %7006 = vmatprep.mubr.msk.f32.mxu0 %vm1111_vm5, %v4754_v25 }
0x1d07   : > { %7007 = vmatmul.mubr.msk.f32.vlgmr.msra.gmra.mxu0 %vm1111_vm5, %v4755_v28 }
0x1d08   : > { %7015 = vmatpush3.msra.mxu0 %v6245_v26  ;;  %7022 = vmatprep.mubr.msk.f32.mxu0 %vm710_vm0, %v7856_v45 }
0x1d09   : > { %7016 = vmatprep.subr.mxu0 %v6244_v29 }
0x1d0a   : > { %7017 = vmatpush3.msra.mxu0 %v6244_v29 }
0x1d0b   : > { %7018 = vmatprep.subr.mxu0 %v6243_v32 }
0x1d0c   : > { %7019 = vmatpush3.msra.mxu0 %v6243_v32  ;;  %v6277_v32 = vld [vmem:[%s8315_s11 + $0x1] ss:$0 sm:$0xff] }
0x1d0d   : > { %7020 = vmatprep.subr.mxu0 %v6242_v33 }
0x1d0e   : > { %7021 = vmatpush3.msra.mxu0 %v6242_v33 }
0x1d0f   : > { %7023 = vmatmul.mubr.msk.f32.vlgmr.msra.gmra.mxu0 %vm710_vm0, %v7858_v46  ;;  %7036 = vmatprep.subr.mxu0 %v6261_v35 }
0x1d10   : > { %7037 = vmatpush3.msra.mxu0 %v6261_v35  ;;  %7044 = vmatprep.mubr.msk.f32.mxu0 %vm710_vm0, %v7856_v45 }
0x1d11   : > { %7038 = vmatprep.subr.mxu0 %v6260_v2 }
0x1d12   : > { %7039 = vmatpush3.msra.mxu0 %v6260_v2 }
0x1d13   : > { %7040 = vmatprep.subr.mxu0 %v6259_v36 }
0x1d14   : > { %7041 = vmatpush3.msra.mxu0 %v6259_v36 }
0x1d15   : > { %7042 = vmatprep.subr.mxu0 %v6258_v37 }
0x1d16   : > { %7043 = vmatpush3.msra.mxu0 %v6258_v37 }
0x1d17   : > { %7045 = vmatmul.mubr.msk.f32.vlgmr.msra.gmra.mxu0 %vm710_vm0, %v7858_v46 }
0x1dc7   : > { %v7008_v39 = vpop.f32.mrf.mxu0 }
0x1dc9   : > { %v4831_v31 = vpop.f32.mrf.mxu0 }
0x1dca   : > { %7011 = vmatprep.mubr.msk.f32.mxu1 %vm1019_vm2, %v4831_v31 }
0x1dcb   : > { %7012 = vmatmul.mubr.msk.f32.vlgmr.msra.gmra.mxu1 %vm1019_vm2, %v7008_v39 }
0x1dcc   : > { %7026 = vmatpush3.msra.mxu1 %v6253_v38  ;;  %7033 = vmatprep.mubr.msk.f32.mxu1 %vm710_vm0, %v7856_v45 }
0x1dcd   : > { %7027 = vmatprep.subr.mxu1 %v6252_v43 }
0x1dce   : > { %7028 = vmatpush3.msra.mxu1 %v6252_v43 }
0x1dcf   : > { %v7024_v48 = vpop.f32.mrf.mxu0  ;;  %7029 = vmatprep.subr.mxu1 %v6251_v44 }
0x1dd0   : > { %v5010_v49 = vadd.f32 %v7024_v48, %v6247_v47  ;;  %7030 = vmatpush3.msra.mxu1 %v6251_v44 }
0x1dd1   : > { %v5004_v50 = vpop.f32.mrf.mxu0  ;;  %7031 = vmatprep.subr.mxu1 %v6250_v34 }
0x1dd2   : > { %v5005_v45 = vadd.f32 %v6247_v47, %v5004_v50  ;;  %7032 = vmatpush3.msra.mxu1 %v6250_v34 }
0x1dd3   : > { %7034 = vmatmul.mubr.msk.f32.vlgmr.msra.gmra.mxu1 %vm710_vm0, %v7858_v46 }
0x1dd4   : > { %7051 = vmatprep.mubr.msk.f32.mxu1 %vm1019_vm2, %v5005_v45 }
0x1dd7   : > { %v7046_v54 = vpop.f32.mrf.mxu0 }
0x1dd8   : > { %v5186_v55 = vadd.f32 %v7046_v54, %v6263_v51  ;;  %v6284_v54 = vld [vmem:[%s8318_s14 + $0x30] sm:$0xff] }
0x1dd9   : > { %v5180_v56 = vpop.f32.mrf.mxu0 }
0x1dda   : > { %v5181_v27 = vadd.f32 %v6263_v51, %v5180_v56  ;;  %7054 = vmatprep.subr.msk.mxu0 %vm1141_vm3, %v5186_v55  ;;  %v6285_v51 = vld [vmem:[%s8318_s14 + $0x38] sm:$0xff]  ;;  %v6282_v56 = vld [vmem:[%s8318_s14 + $0x20] sm:$0xff] }
0x1ddb   : > { %7055 = vmatpush3.msk.msra.mxu0 %vm1141_vm3, %v5186_v55  ;;  %v6283_v55 = vld [vmem:[%s8318_s14 + $0x28] sm:$0xff] }
0x1ddc   : > { %7056 = vmatprep.subr.mxu0 %v5181_v27 }
0x1ddd   : > { %7057 = vmatpush3.msra.mxu0 %v5181_v27 }
0x1dde   : > { %7066 = vmatprep.subr.mxu0 %v6285_v51 }
0x1e8b   : > { %v7013_v46 = vpop.f32.mrf.mxu1 }
0x1e8c   : > { %v4924_v42 = vadd.f32 %v7013_v46, %v4376_v30 }
0x1e8d   : > { %v4914_v57 = vpop.f32.mrf.mxu1 }
0x1e8e   : > { %v4923_v58 = vadd.f32 %v4914_v57, %v4371_v41 }
0x1e93   : > { %v7035_v60 = vpop.f32.mrf.mxu1 }
0x1e94   : > { %v5098_v61 = vadd.f32 %v7035_v60, %v6255_v59 }
0x1e95   : > { %v5092_v62 = vpop.f32.mrf.mxu1 }
0x1e96   : > { %v5093_v63 = vadd.f32 %v6255_v59, %v5092_v62  ;;  %7047 = vmatprep.subr.msk.mxu1 %vm1019_vm2, %v5098_v61  ;;  %v6280_v59 = vld [vmem:[%s8316_s12 + $0x1] ss:$0 sm:$0xff] }
0x1e97   : > { %7048 = vmatpush3.xpose.msk.msra.mxu1 %vm1019_vm2, %v5098_v61 }
0x1e98   : > { %7049 = vmatprep.subr.msk.mxu1 %vm1019_vm2, %v5093_v63 }
0x1e9b   : > { %7050 = vmatpush3.xpose.msk.msra.mxu1 %vm1019_vm2, %v5093_v63 }
0x1e9e   : > { %7052 = vmatmul.mubr.msk.f32.vlgmr.msra.gmra.mxu1 %vm1019_vm2, %v5010_v49 }
0x1f5e   : > { %v7053_v0 = vpop.f32.mrf.mxu1 }
0x1f5f   : > { %v5277_v40 = vmul.f32 0.35355338, %v7053_v0  ;;  %v6281_v0 = vld [vmem:[%s8317_s13 + $0x1] ss:$0 sm:$0xff] }
0x1f60   : > { %v5267_v52 = vpop.f32.mrf.mxu1 }
0x1f61   : > { %v5276_v53 = vmul.f32 0.35355338, %v5267_v52  ;;  %v5279_v1 = vadd.f32 %v7927_v12, %v5277_v40 }
0x1f63   : > { %v5283_v4 = vsel %vm1115_vm4, %v5279_v1, -inf  ;;  %v5278_v5 = vadd.f32 %v7932_v15, %v5276_v53  ;;  %v6273_v15 = vld [vmem:[%s8314_s10 + $0x38] sm:$0xff] }
0x1f64   : > { %5284 = vmax.xlane.f32.xlu1 %v5283_v4  ;;  %7061 = vmatprep.subr.mxu1 %v6273_v15  ;;  %v6304_v4 = vld [vmem:[%s8320_s16 + $0xf0] sm:$0xff] }
0x1f65   : > { %v5280_v7 = vsel %vm1111_vm5, %v5278_v5, -inf  ;;  %7062 = vmatpush3.msra.mxu1 %v6273_v15  ;;  %v6291_v15 = vld [vmem:[%s8320_s16 + $0x88] sm:$0xff] }
0x1f66   : > { %5281 = vmax.xlane.f32.xlu0 %v5280_v7  ;;  %v6302_v7 = vld [vmem:[%s8320_s16 + $0xe0] sm:$0xff] }
0x1fed   : > { %v5285_v8 = vpop.xlane.xlu1 %5284 }
0x1fee   : > { %v5287_v3 = vsub.f32 %v5279_v1, %v5285_v8  ;;  %v6305_v1 = vld [vmem:[%s8320_s16 + $0xf8] sm:$0xff] }
0x1fef   : > { %v5282_v6 = vpop.xlane.xlu0 %5281  ;;  %7077 = vmatprep.subr.mxu1 %v6305_v1  ;;  %v6301_v8 = vld [vmem:[%s8320_s16 + $0xd8] sm:$0xff] }
0x1ff0   : > { %v5290_v11 = vmul.f32 1.442695, %v5287_v3  ;;  %v5286_v13 = vsub.f32 %v5278_v5, %v5282_v6  ;;  %v6303_v5 = vld [vmem:[%s8320_s16 + $0xe8] sm:$0xff]  ;;  %v6300_v3 = vld [vmem:[%s8320_s16 + $0xd0] sm:$0xff] }
0x1ff1   : > { %v6299_v6 = vld [vmem:[%s8320_s16 + $0xc8] sm:$0xff] }
0x1ff2   : > { %7208 = vpow2.f32 %v5290_v11  ;;  %v5288_v14 = vmul.f32 1.442695, %v5286_v13  ;;  %v6298_v11 = vld [vmem:[%s8320_s16 + $0xc0] sm:$0xff]  ;;  %v6297_v13 = vld [vmem:[%s8320_s16 + $0xb8] sm:$0xff] }
0x1ff4   : > { %7210 = vpow2.f32 %v5288_v14  ;;  %v6296_v14 = vld [vmem:[%s8320_s16 + $0xb0] sm:$0xff] }
0x1fff   : > { %v7209_v16 = vpop.eup %7208 }
0x2000   : > { %v5295_v17 = vsel %vm1115_vm4, %v7209_v16, 0.0 }
0x2001   : > { %v7211_v12 = vpop.eup %7210  ;;  %5296 = vadd.xlane.f32.xlu1 %v5295_v17  ;;  %v6294_v17 = vld [vmem:[%s8320_s16 + $0xa0] sm:$0xff] }
0x2002   : > { %v5292_v24 = vsel %vm1111_vm5, %v7211_v12, 0.0 }
0x2003   : > { %5293 = vadd.xlane.f32.xlu0 %v5292_v24  ;;  %v6292_v24 = vld [vmem:[%s8320_s16 + $0x90] sm:$0xff] }
0x208a   : > { %v5297_v18 = vpop.xlane.xlu1 %5296 }
0x208b   : > { %7212 = vrcp.f32 %v5297_v18  ;;  %v6290_v18 = vld [vmem:[%s8320_s16 + $0x80] sm:$0xff] }
0x208c   : > { %v5294_v26 = vpop.xlane.xlu0 %5293 }
0x208d   : > { %7214 = vrcp.f32 %v5294_v26  ;;  %v6287_v26 = vld [vmem:[%s8319_s15 + $0x1] ss:$0 sm:$0xff] }
0x2098   : > { %v7213_v19 = vpop.eup %7212 }
0x2099   : > { %v5301_v22 = vmul.f32 %v7213_v19, %v7209_v16  ;;  %v6295_v16 = vld [vmem:[%s8320_s16 + $0xa8] sm:$0xff] }
0x209a   : > { %v7215_v20 = vpop.eup %7214 }
0x209b   : > { %v5300_v21 = vmul.f32 %v7215_v20, %v7211_v12  ;;  %v6293_v12 = vld [vmem:[%s8320_s16 + $0x98] sm:$0xff] }
0x209d   : > { %7058 = vmatprep.mubr.msk.f32.mxu0 %vm1111_vm5, %v5300_v21 }
0x209e   : > { %7059 = vmatmul.mubr.msk.f32.vlgmr.msra.gmra.mxu0 %vm1111_vm5, %v5301_v22 }
0x209f   : > { %7067 = vmatpush3.msra.mxu0 %v6285_v51 }
0x20a0   : > { %7068 = vmatprep.subr.mxu0 %v6284_v54 }
0x20a1   : > { %7069 = vmatpush3.msra.mxu0 %v6284_v54 }
0x20a2   : > { %7070 = vmatprep.subr.mxu0 %v6283_v55 }
0x20a3   : > { %7071 = vmatpush3.msra.mxu0 %v6283_v55 }
0x20a4   : > { %7072 = vmatprep.subr.mxu0 %v6282_v56 }
0x20a5   : > { %7073 = vmatpush3.msra.mxu0 %v6282_v56 }
0x215e   : > { %v7060_v23 = vpop.f32.mrf.mxu0 }
0x2160   : > { %v5377_v25 = vpop.f32.mrf.mxu0 }
0x2161   : > { %7063 = vmatprep.mubr.msk.f32.mxu1 %vm1019_vm2, %v5377_v25 }
0x2162   : > { %7064 = vmatmul.mubr.msk.f32.vlgmr.msra.gmra.mxu1 %vm1019_vm2, %v7060_v23 }
0x2163   : > { %7078 = vmatpush3.msra.mxu1 %v6305_v1 }
0x2164   : > { %7079 = vmatprep.subr.mxu1 %v6304_v4 }
0x2165   : > { %7080 = vmatpush3.msra.mxu1 %v6304_v4 }
0x2166   : > { %7081 = vmatprep.subr.mxu1 %v6303_v5 }
0x2167   : > { %7082 = vmatpush3.msra.mxu1 %v6303_v5 }
0x2168   : > { %7083 = vmatprep.subr.mxu1 %v6302_v7 }
0x2169   : > { %7084 = vmatpush3.msra.mxu1 %v6302_v7 }
0x216a   : > { %7085 = vmatprep.subr.mxu1 %v6301_v8 }
0x216b   : > { %7086 = vmatpush3.msra.mxu1 %v6301_v8 }
0x216c   : > { %7087 = vmatprep.subr.mxu1 %v6300_v3 }
0x216d   : > { %7088 = vmatpush3.msra.mxu1 %v6300_v3 }
0x216e   : > { %7089 = vmatprep.subr.mxu1 %v6299_v6 }
0x216f   : > { %7090 = vmatpush3.msra.mxu1 %v6299_v6 }
0x2170   : > { %7091 = vmatprep.subr.mxu1 %v6298_v11 }
0x2171   : > { %7092 = vmatpush3.msra.mxu1 %v6298_v11 }
0x2172   : > { %7093 = vmatprep.subr.mxu1 %v6297_v13 }
0x2173   : > { %7094 = vmatpush3.msra.mxu1 %v6297_v13 }
0x2174   : > { %7095 = vmatprep.subr.mxu1 %v6296_v14 }
0x2175   : > { %7096 = vmatpush3.msra.mxu1 %v6296_v14  ;;  %v6307_v14 = vld [vmem:[%s8321_s17 + $0x1] ss:$0 sm:$0xff] }
0x2176   : > { %7097 = vmatprep.subr.mxu1 %v6295_v16 }
0x2177   : > { %7098 = vmatpush3.msra.mxu1 %v6295_v16 }
0x2178   : > { %7099 = vmatprep.subr.mxu1 %v6294_v17 }
0x2179   : > { %7100 = vmatpush3.msra.mxu1 %v6294_v17 }
0x217a   : > { %7101 = vmatprep.subr.mxu1 %v6293_v12 }
0x217b   : > { %7102 = vmatpush3.msra.mxu1 %v6293_v12 }
0x217c   : > { %7103 = vmatprep.subr.mxu1 %v6292_v24 }
0x217d   : > { %7104 = vmatpush3.msra.mxu1 %v6292_v24 }
0x217e   : > { %7105 = vmatprep.subr.mxu1 %v6291_v15 }
0x217f   : > { %7106 = vmatpush3.msra.mxu1 %v6291_v15 }
0x2180   : > { %7107 = vmatprep.subr.mxu1 %v6290_v18 }
0x2181   : > { %7108 = vmatpush3.msra.mxu1 %v6290_v18 }
0x2222   : > { %v7065_v28 = vpop.f32.mrf.mxu1 }
0x2223   : > { %v5470_v29 = vadd.f32 %v7065_v28, %v4924_v42 }
0x2224   : > { %v5460_v33 = vpop.f32.mrf.mxu1 }
0x2225   : > { %v5472_v35 = vadd.f32 %v5470_v29, %v7822_v9  ;;  %v5469_v2 = vadd.f32 %v5460_v33, %v4923_v58 }
0x2227   : > { %v8179_v36 = vadd.f32 %v6277_v32, %v5472_v35  ;;  %v5471_v37 = vadd.f32 %v5469_v2, %v7825_v10 }
0x2229   : > { %v8182_v38 = vadd.f32 %v6277_v32, %v5471_v37  ;;  %v5490_v39 = vsel %vm714_vm1, %v8179_v36, 0.0 }
0x222a   : > { %5491 = vadd.xlane.f32.xlu1 %v5490_v39 }
0x222b   : > { %v5487_v31 = vsel %vm710_vm0, %v8182_v38, 0.0 }
0x222c   : > { %5488 = vadd.xlane.f32.xlu0 %v5487_v31 }
0x22b3   : > { %v5492_v43 = vpop.xlane.xlu1 %5491 }
0x22b4   : > { %v5494_v44 = vmul.f32 0.03125, %v5492_v43 }
0x22b5   : > { %v5489_v47 = vpop.xlane.xlu0 %5488 }
0x22b6   : > { %v5496_v9 = vsub.f32 %v8179_v36, %v5494_v44  ;;  %v5493_v34 = vmul.f32 0.03125, %v5489_v47 }
0x22b8   : > { %v5495_v48 = vsub.f32 %v8182_v38, %v5493_v34  ;;  %v5498_v49 = vmul.f32 %v5496_v9, %v5496_v9 }
0x22ba   : > { %v5502_v10 = vsel %vm714_vm1, %v5498_v49, 0.0  ;;  %v5497_v50 = vmul.f32 %v5495_v48, %v5495_v48 }
0x22bb   : > { %5503 = vadd.xlane.f32.xlu1 %v5502_v10 }
0x22bc   : > { %v5499_v45 = vsel %vm710_vm0, %v5497_v50, 0.0 }
0x22bd   : > { %5500 = vadd.xlane.f32.xlu0 %v5499_v45 }
0x2344   : > { %v5504_v27 = vpop.xlane.xlu1 %5503 }
0x2345   : > { %v5506_v30 = vmul.f32 0.03125, %v5504_v27 }
0x2346   : > { %v5501_v46 = vpop.xlane.xlu0 %5500 }
0x2347   : > { %v5508_v41 = vadd.f32 1e-05, %v5506_v30  ;;  %v5505_v42 = vmul.f32 0.03125, %v5501_v46 }
0x2349   : > { %7216 = vrsqrt.f32 %v5508_v41  ;;  %v5507_v57 = vadd.f32 1e-05, %v5505_v42 }
0x234b   : > { %7218 = vrsqrt.f32 %v5507_v57 }
0x2356   : > { %v7217_v58 = vpop.eup %7216 }
0x2357   : > { %v5512_v60 = vmul.f32 %v7217_v58, %v5496_v9 }
0x2358   : > { %v7219_v61 = vpop.eup %7218 }
0x2359   : > { %v5511_v62 = vmul.f32 %v7219_v61, %v5495_v48  ;;  %v5520_v63 = vmul.f32 %v6280_v59, %v5512_v60 }
0x235b   : > { %v5519_v40 = vmul.f32 %v6280_v59, %v5511_v62  ;;  %v5528_v53 = vadd.f32 %v6281_v0, %v5520_v63 }
0x235d   : > { %v5527_v52 = vadd.f32 %v6281_v0, %v5519_v40 }
0x235f   : > { %7074 = vmatprep.mubr.msk.f32.mxu0 %vm710_vm0, %v5527_v52 }
0x2360   : > { %7075 = vmatmul.mubr.msk.f32.vlgmr.msra.gmra.mxu0 %vm710_vm0, %v5528_v53 }
0x2420   : > { %v7076_v19 = vpop.f32.mrf.mxu0 }
0x2421   : > { %v5620_v20 = vadd.f32 %v7076_v19, %v6287_v26 }
0x2422   : > { %v5614_v21 = vpop.f32.mrf.mxu0 }
0x2423   : > { %v5626_v22 = vmul.f32 0.70710677, %v5620_v20  ;;  %v5615_v23 = vadd.f32 %v6287_v26, %v5614_v21  ;;  %v5624_v6 = vmul.f32 0.5, %v5620_v20 }
0x2425   : > { %v5628_v25 = vand.u32 2147483647, %v5626_v22  ;;  %v5625_v28 = vmul.f32 0.70710677, %v5615_v23  ;;  %vm5668_vm8 = vcmp.lt.f32.partialorder %v5626_v22, 0.0  ;;  %v5623_v8 = vmul.f32 0.5, %v5615_v23 }
0x2427   : > { %v5630_v29 = vmul.f32 0.3275911, %v5628_v25  ;;  %v5627_v32 = vand.u32 2147483647, %v5625_v28  ;;  %v5656_v37 = vsub.f32 0.0, %v5628_v25  ;;  %vm5667_vm9 = vcmp.lt.f32.partialorder %v5625_v28, 0.0 }
0x2429   : > { %v5632_v33 = vadd.f32 1.0, %v5630_v29  ;;  %v5629_v35 = vmul.f32 0.3275911, %v5627_v32  ;;  %v5655_v39 = vsub.f32 0.0, %v5627_v32  ;;  %v5658_v31 = vmul.f32 %v5656_v37, %v5628_v25  ;;  %v5823_v37 = vld [vmem:[%s8324_s20] sm:$0xff] }
0x242b   : > { %7220 = vrcp.f32 %v5632_v33  ;;  %v5631_v2 = vadd.f32 1.0, %v5629_v35  ;;  %v5657_v44 = vmul.f32 %v5655_v39, %v5627_v32  ;;  %v5661_v9 = vmul.f32 1.442695, %v5658_v31  ;;  %v5825_v35 = vld [vmem:[%s8324_s20 + $0x10] sm:$0xff] }
0x242d   : > { %7222 = vrcp.f32 %v5631_v2  ;;  %v5659_v49 = vmul.f32 1.442695, %v5657_v44  ;;  %v5824_v2 = vld [vmem:[%s8324_s20 + $0x8] sm:$0xff] }
0x242e   : > { %7224 = vpow2.f32 %v5661_v9 }
0x242f   : > { %7226 = vpow2.f32 %v5659_v49 }
0x2438   : > { %v7221_v43 = vpop.eup %7220 }
0x2439   : > { %v5638_v47 = vmul.f32 1.0614054, %v7221_v43 }
0x243a   : > { %v7223_v34 = vpop.eup %7222 }
0x243b   : > { %v5640_v48 = vadd.f32 -1.4531521, %v5638_v47  ;;  %v5637_v10 = vmul.f32 1.0614054, %v7223_v34  ;;  %v7225_v59 = vpop.eup %7224 }
0x243c   : > { %v7227_v63 = vpop.eup %7226 }
0x243d   : > { %v5642_v50 = vmul.f32 %v7221_v43, %v5640_v48  ;;  %v5639_v45 = vadd.f32 -1.4531521, %v5637_v10  ;;  %v6308_v48 = vld [vmem:[%s8322_s18] ss:$0 sm:$0xff] }
0x243f   : > { %v5644_v51 = vadd.f32 1.4214138, %v5642_v50  ;;  %v5641_v54 = vmul.f32 %v7223_v34, %v5639_v45  ;;  %v6309_v50 = vld [vmem:[%s8323_s19] ss:$0 sm:$0xff] }
0x2441   : > { %v5646_v55 = vmul.f32 %v7221_v43, %v5644_v51  ;;  %v5643_v56 = vadd.f32 1.4214138, %v5641_v54 }
0x2443   : > { %v5648_v27 = vadd.f32 -0.28449672, %v5646_v55  ;;  %v5645_v30 = vmul.f32 %v7223_v34, %v5643_v56 }
0x2445   : > { %v5650_v46 = vmul.f32 %v7221_v43, %v5648_v27  ;;  %v5647_v41 = vadd.f32 -0.28449672, %v5645_v30  ;;  %v6310_v27 = vld [vmem:[%s8325_s21] ss:$0 sm:$0xff] }
0x2447   : > { %v5652_v42 = vadd.f32 0.2548296, %v5650_v46  ;;  %v5649_v57 = vmul.f32 %v7223_v34, %v5647_v41 }
0x2449   : > { %v5654_v58 = vmul.f32 %v7221_v43, %v5652_v42  ;;  %v5651_v60 = vadd.f32 0.2548296, %v5649_v57 }
0x244b   : > { %v5664_v61 = vmul.f32 %v7225_v59, %v5654_v58  ;;  %v5653_v62 = vmul.f32 %v7223_v34, %v5651_v60 }
0x244d   : > { %v5666_v0 = vsub.f32 1.0, %v5664_v61  ;;  %v5663_v40 = vmul.f32 %v7227_v63, %v5653_v62 }
0x244f   : > { %v5670_v52 = vsub.f32 0.0, %v5666_v0  ;;  %v5665_v53 = vsub.f32 1.0, %v5663_v40 }
0x2451   : > { %v5672_v1 = vsel %vm5668_vm8, %v5670_v52, %v5666_v0  ;;  %v5669_v4 = vsub.f32 0.0, %v5665_v53 }
0x2452   : > { %v5674_v5 = vadd.f32 1.0, %v5672_v1 }
0x2453   : > { %v5671_v7 = vsel %vm5667_vm9, %v5669_v4, %v5665_v53 }
0x2454   : > { %v5673_v3 = vadd.f32 1.0, %v5671_v7  ;;  %v5676_v13 = vmul.f32 %v5674_v5, %v5624_v6 }
0x2456   : > { %v5675_v11 = vmul.f32 %v5673_v3, %v5623_v8 }
0x2458   : > { %7109 = vmatprep.mubr.f32.mxu1 %v5675_v11 }
0x2459   : > { %7110 = vmatmul.mubr.f32.vlgmr.msra.gmra.mxu1 %v5676_v13 }
0x2519   : > { %v7111_v16 = vpop.f32.mrf.mxu1 }
0x251a   : > { %v5774_v17 = vadd.f32 %v7111_v16, %v6307_v14 }
0x251b   : > { %v5768_v12 = vpop.f32.mrf.mxu1 }
0x251c   : > { %v5769_v24 = vadd.f32 %v6307_v14, %v5768_v12  ;;  %v5778_v15 = vadd.f32 %v5774_v17, %v8179_v36 }
0x251e   : > { %v5784_v18 = vsel %vm714_vm1, %v5778_v15, 0.0  ;;  %v5777_v26 = vadd.f32 %v5769_v24, %v8182_v38  ;;  %v5826_v38 = vld [vmem:[%s8324_s20 + $0x18] sm:$0xff] }
0x251f   : > { %5785 = vadd.xlane.f32.xlu1 %v5784_v18  ;;  %7112 = vmatprep.subr.mxu0 %v5826_v38 }
0x2520   : > { %v5781_v19 = vsel %vm710_vm0, %v5777_v26, 0.0  ;;  %7113 = vmatpush3.msra.mxu0 %v5826_v38 }
0x2521   : > { %5782 = vadd.xlane.f32.xlu0 %v5781_v19  ;;  %7114 = vmatprep.subr.mxu0 %v5825_v35 }
0x2522   : > { %7115 = vmatpush3.msra.mxu0 %v5825_v35 }
0x2523   : > { %7116 = vmatprep.subr.mxu0 %v5824_v2 }
0x2524   : > { %7117 = vmatpush3.msra.mxu0 %v5824_v2 }
0x2525   : > { %7118 = vmatprep.subr.mxu0 %v5823_v37 }
0x2526   : > { %7119 = vmatpush3.msra.mxu0 %v5823_v37 }
0x25a8   : > { %v5786_v20 = vpop.xlane.xlu1 %5785 }
0x25a9   : > { %v5788_v21 = vmul.f32 0.03125, %v5786_v20 }
0x25aa   : > { %v5783_v22 = vpop.xlane.xlu0 %5782 }
0x25ab   : > { %v5790_v23 = vsub.f32 %v5778_v15, %v5788_v21  ;;  %v5787_v25 = vmul.f32 0.03125, %v5783_v22 }
0x25ad   : > { %v5789_v28 = vsub.f32 %v5777_v26, %v5787_v25  ;;  %v5792_v29 = vmul.f32 %v5790_v23, %v5790_v23 }
0x25af   : > { %v5796_v32 = vsel %vm714_vm1, %v5792_v29, 0.0  ;;  %v5791_v33 = vmul.f32 %v5789_v28, %v5789_v28 }
0x25b0   : > { %5797 = vadd.xlane.f32.xlu1 %v5796_v32 }
0x25b1   : > { %v5793_v36 = vsel %vm710_vm0, %v5791_v33, 0.0 }
0x25b2   : > { %5794 = vadd.xlane.f32.xlu0 %v5793_v36 }
0x2639   : > { %v5798_v39 = vpop.xlane.xlu1 %5797 }
0x263a   : > { %v5800_v31 = vmul.f32 0.03125, %v5798_v39 }
0x263b   : > { %v5795_v43 = vpop.xlane.xlu0 %5794 }
0x263c   : > { %v5802_v44 = vadd.f32 1e-05, %v5800_v31  ;;  %v5799_v47 = vmul.f32 0.03125, %v5795_v43 }
0x263e   : > { %7228 = vrsqrt.f32 %v5802_v44  ;;  %v5801_v9 = vadd.f32 1e-05, %v5799_v47 }
0x2640   : > { %7230 = vrsqrt.f32 %v5801_v9 }
0x264b   : > { %v7229_v34 = vpop.eup %7228 }
0x264c   : > { %v5806_v49 = vmul.f32 %v7229_v34, %v5790_v23 }
0x264d   : > { %v7231_v10 = vpop.eup %7230 }
0x264e   : > { %v5805_v45 = vmul.f32 %v7231_v10, %v5789_v28  ;;  %v5814_v51 = vmul.f32 %v6308_v48, %v5806_v49 }
0x2650   : > { %v5813_v54 = vmul.f32 %v6308_v48, %v5805_v45  ;;  %v5822_v55 = vadd.f32 %v6309_v50, %v5814_v51 }
0x2652   : > { %v5821_v56 = vadd.f32 %v6309_v50, %v5813_v54  ;;  %5916 = vst.msk [vmem:[%s703_s28 + $0x8] sm:$0x3] %vm714_vm1, %v5822_v55 }
0x2654   : > { %7120 = vmatprep.mubr.msk.f32.mxu0 %vm710_vm0, %v5821_v56  ;;  %5915 = vst.msk [vmem:[%s703_s28] sm:$0xff] %vm710_vm0, %v5821_v56 }
0x2655   : > { %7121 = vmatmul.mubr.msk.f32.vlgmr.msra.gmra.mxu0 %vm710_vm0, %v5822_v55 }
0x2715   : > { %v7122_v30 = vpop.f32.mrf.mxu0 }
0x2716   : > { %v5912_v46 = vadd.f32 %v7122_v30, %v6310_v27 }
0x2717   : > { %v5906_v41 = vpop.f32.mrf.mxu0 }
0x2718   : > { %v5907_v42 = vadd.f32 %v6310_v27, %v5906_v41  ;;  %5921 = vrot.lane.b32.xlu1 %v5912_v46, %s7242_s29 }
0x271a   : > { %5919 = vrot.lane.b32.xlu0 %v5907_v42, %s7242_s29 }
0x278a   : > { %v5922_v57 = vpop.permute.xlu1 %5921 }
0x278b   : > { %5928 = vst.msk [vmem:[%s703_s28 + $0x8] sm:$0x3] %vm5927_vm10, %v5922_v57 }
0x278c   : > { %v5920_v58 = vpop.permute.xlu0 %5919 }
0x278d   : > { %5926 = vst.msk [vmem:[%s703_s28] sm:$0xff] %vm5925_vm11, %v5920_v58 }
0x278e PF: > { %s8348_s4 = sld [smem:[#allocation2_spill]] }
0x2794   : > { %s32_s3 = sadd.s32 1, %s8348_s4  }
0x2795   : > { %p29_p4 = scmp.ge.s32.totalorder %s32_s3, 4  }
0x2797   :  { %31 = sbr.rel (!%p29_p4) target bundleno = 8 (0x8), region = 199 }

</bundles_post_ra>
